<compile_context>
chip_gen: v7x
topology: tpu7x:2x2x1
jax: 0.10.0
libtpu: 0.0.40
codegen_flags: <defaults>
</compile_context>

<pallas_src>
import functools

import numpy as np
import jax
import jax.numpy as jnp
from jax.experimental import pallas as pl
from jax.experimental.pallas import tpu as pltpu


_CPARAMS = pltpu.CompilerParams(
    dimension_semantics=("parallel",),
    vmem_limit_bytes=32 * 1024 * 1024,
)


# ----------------------------------------------------------------------------
# small helpers usable inside kernels
# ----------------------------------------------------------------------------
def _shift_lanes(v, off):
    """s[:, p] = v[:, p + off]; zeros shifted in at the boundary (static off)."""
    if off == 0:
        return v
    n = v.shape[-1]
    z = jnp.zeros(v.shape[:-1] + (abs(off),), v.dtype)
    if off > 0:
        return jnp.concatenate([v[..., off:], z], axis=-1)
    return jnp.concatenate([z, v[..., :n + off]], axis=-1)


# ----------------------------------------------------------------------------
# Pallas kernels
# ----------------------------------------------------------------------------
def _up_attn_kernel(*refs, n_in, hw, cout):
    # fused: [folded 1x1 frame-fusion +] deconv(2x2,s2)-as-matmul (skip via
    # weight split) + BN bias + ReLU + channel attention.  Output stays in
    # "group" layout: lane index = (kh*2+kw)*cout + co.
    xs = refs[:n_in]
    ws = refs[n_in:2 * n_in]
    b_ref, w1t_ref, w2t_ref, o_ref = refs[2 * n_in:]

    acc = jnp.dot(xs[0][0], ws[0][...], preferred_element_type=jnp.float32)
    for i in range(1, n_in):
        acc = acc + jnp.dot(xs[i][0], ws[i][...],
                            preferred_element_type=jnp.float32)
    y = jnp.maximum(acc + b_ref[...], 0.0)              # (HW, 4*Cout) f32

    # channel attention: per-channel mean / max over all 4*HW output pixels
    # (spatial permutation invariant, so computed pre pixel-shuffle).
    col_sum = jnp.sum(y, axis=0, keepdims=True)         # (1, 4*Cout)
    col_max = jnp.max(y, axis=0, keepdims=True)         # (1, 4*Cout)
    s = col_sum[:, 0:cout]
    m = col_max[:, 0:cout]
    for k in range(1, 4):
        s = s + col_sum[:, k * cout:(k + 1) * cout]
        m = jnp.maximum(m, col_max[:, k * cout:(k + 1) * cout])
    avg = s * (1.0 / (4.0 * hw))

    pooled = jnp.concatenate([avg, m], axis=0).astype(jnp.bfloat16)   # (2, C)
    h = jnp.maximum(jnp.dot(pooled, w1t_ref[...],
                            preferred_element_type=jnp.float32), 0.0)
    o = jnp.dot(h.astype(jnp.bfloat16), w2t_ref[...],
                preferred_element_type=jnp.float32)                    # (2, C)
    attn = jax.nn.sigmoid(o[0:1, :] + o[1:2, :])                       # (1, C)
    attn4 = jnp.concatenate([attn, attn, attn, attn], axis=1)          # (1, 4C)
    o_ref[0] = (y * attn4).astype(o_ref.dtype)


def up_attn_stage(xs, ws, bias4, w1t, w2t, *, hw, cout):
    """Fused (folded 1x1) + ConvTranspose(2x2,s2) + BN + ReLU + ChannelAttn."""
    B = xs[0].shape[0]
    n_in = len(xs)
    in_specs = []
    for x in xs:
        in_specs.append(pl.BlockSpec((1,) + tuple(x.shape[1:]),
                                     lambda b: (b, 0, 0)))
    for w in ws:
        in_specs.append(pl.BlockSpec(tuple(w.shape), lambda b: (0, 0)))
    in_specs += [
        pl.BlockSpec(tuple(bias4.shape), lambda b: (0, 0)),
        pl.BlockSpec(tuple(w1t.shape), lambda b: (0, 0)),
        pl.BlockSpec(tuple(w2t.shape), lambda b: (0, 0)),
    ]
    kernel = functools.partial(_up_attn_kernel, n_in=n_in, hw=hw, cout=cout)
    return pl.pallas_call(
        kernel,
        out_shape=jax.ShapeDtypeStruct((B, hw, 4 * cout), jnp.bfloat16),
        grid=(B,),
        in_specs=in_specs,
        out_specs=pl.BlockSpec((1, hw, 4 * cout), lambda b: (b, 0, 0)),
        compiler_params=_CPARAMS,
    )(*xs, *ws, bias4, w1t, w2t)


def _final_head_kernel(x_ref, mask_ref, w1_ref, b1_ref, w2_ref, b2_ref, w3_ref,
                       o_ref, *, shifts):
    # x: (1, C0, NPAD) bf16 — channels on sublanes, zero-padded flattened
    # (H+2)x(W+2) spatial (lane-padded to NPAD) on lanes.
    x = x_ref[0]
    mask = mask_ref[...]                                   # (1, NPAD) f32

    # final[0]: 1x1 ConvBnRelu (scale folded into w1); re-zero pad ring/tail;
    # single f32->bf16 cast (review: not one cast per tap).
    h1 = jnp.dot(w1_ref[...], x, preferred_element_type=jnp.float32)
    h1 = (jnp.maximum(h1 + b1_ref[...], 0.0) * mask).astype(jnp.bfloat16)

    # final[1]: 3x3 ConvBnRelu — 9 lane-shifted bf16 views stacked along K,
    # one MXU matmul with the pre-merged (C, 9*C) weight.
    h1s = jnp.concatenate([_shift_lanes(h1, off) for off in shifts], axis=0)
    h2 = jnp.dot(w2_ref[...], h1s, preferred_element_type=jnp.float32)
    h2 = (jnp.maximum(h2 + b2_ref[...], 0.0) * mask).astype(jnp.bfloat16)

    # final[2]: 3x3 Conv -> 3 channels (no BN / bias), same merged-tap matmul.
    h2s = jnp.concatenate([_shift_lanes(h2, off) for off in shifts], axis=0)
    o_ref[0] = jnp.dot(w3_ref[...], h2s, preferred_element_type=jnp.float32)


def final_head(xpad, mask, w1, b1, w2m, b2, w3m, shifts):
    B, C0, NPAD = xpad.shape
    kernel = functools.partial(_final_head_kernel, shifts=tuple(shifts))
    return pl.pallas_call(
        kernel,
        out_shape=jax.ShapeDtypeStruct((B, 3, NPAD), jnp.float32),
        grid=(B,),
        in_specs=[
            pl.BlockSpec((1, C0, NPAD), lambda b: (b, 0, 0)),
            pl.BlockSpec(tuple(mask.shape), lambda b: (0, 0)),
            pl.BlockSpec(tuple(w1.shape), lambda b: (0, 0)),
            pl.BlockSpec(tuple(b1.shape), lambda b: (0, 0)),
            pl.BlockSpec(tuple(w2m.shape), lambda b: (0, 0)),
            pl.BlockSpec(tuple(b2.shape), lambda b: (0, 0)),
            pl.BlockSpec(tuple(w3m.shape), lambda b: (0, 0)),
        ],
        out_specs=pl.BlockSpec((1, 3, NPAD), lambda b: (b, 0, 0)),
        compiler_params=_CPARAMS,
    )(xpad, mask, w1, b1, w2m, b2, w3m)


# ----------------------------------------------------------------------------
# precision-matched pure-JAX mirrors of the kernels (tight correctness check)
# ----------------------------------------------------------------------------
def _up_attn_ref(xs, ws, bias4, w1t, w2t, *, hw, cout):
    acc = sum(jnp.einsum("bsc,cd->bsd", x, w, preferred_element_type=jnp.float32)
              for x, w in zip(xs, ws))
    y = jnp.maximum(acc + bias4[None], 0.0)
    B = y.shape[0]
    y4 = y.reshape(B, hw, 4, cout)
    avg = jnp.mean(y4, axis=(1, 2))
    mx = jnp.max(y4, axis=(1, 2))
    pooled = jnp.stack([avg, mx], axis=1).astype(jnp.bfloat16)
    h = jnp.maximum(jnp.einsum("bpc,cr->bpr", pooled, w1t,
                               preferred_element_type=jnp.float32), 0.0)
    o = jnp.einsum("bpr,rc->bpc", h.astype(jnp.bfloat16), w2t,
                   preferred_element_type=jnp.float32)
    attn = jax.nn.sigmoid(o[:, 0] + o[:, 1])
    out = y * jnp.tile(attn, (1, 4))[:, None, :]
    return out.astype(jnp.bfloat16)


def _final_head_ref(xpad, mask, w1, b1, w2m, b2, w3m, shifts):
    def shift(v, off):
        if off == 0:
            return v
        n = v.shape[-1]
        z = jnp.zeros(v.shape[:-1] + (abs(off),), v.dtype)
        if off > 0:
            return jnp.concatenate([v[..., off:], z], axis=-1)
        return jnp.concatenate([z, v[..., :n + off]], axis=-1)

    h1 = jnp.einsum("oc,bcn->bon", w1, xpad, preferred_element_type=jnp.float32)
    h1 = (jnp.maximum(h1 + b1[None], 0.0) * mask[None]).astype(jnp.bfloat16)
    h1s = jnp.concatenate([shift(h1, off) for off in shifts], axis=1)
    h2 = jnp.einsum("ok,bkn->bon", w2m, h1s, preferred_element_type=jnp.float32)
    h2 = (jnp.maximum(h2 + b2[None], 0.0) * mask[None]).astype(jnp.bfloat16)
    h2s = jnp.concatenate([shift(h2, off) for off in shifts], axis=1)
    return jnp.einsum("ok,bkn->bon", w3m, h2s, preferred_element_type=jnp.float32)


# ----------------------------------------------------------------------------
# parameter init (PyTorch-style raw params) and one-time inference prep
# ----------------------------------------------------------------------------
def init_raw_params(key, frames, ch, ratio):
    keys = iter(jax.random.split(key, 64))
    nk = lambda: next(keys)

    def conv_w(cout, cin, k=1):
        fan_in = cin * k * k
        std = (2.0 / fan_in) ** 0.5
        shape = (cout, cin) if k == 1 else (cout, cin, k, k)
        return std * jax.random.normal(nk(), shape, dtype=jnp.float32)

    def deconv_w(cin, cout):
        std = (2.0 / (cin * 4)) ** 0.5
        return std * jax.random.normal(nk(), (cin, cout, 2, 2), dtype=jnp.float32)

    def bn(c):
        return dict(
            gamma=1.0 + 0.1 * jax.random.normal(nk(), (c,), dtype=jnp.float32),
            beta=0.1 * jax.random.normal(nk(), (c,), dtype=jnp.float32),
            mean=0.1 * jax.random.normal(nk(), (c,), dtype=jnp.float32),
            var=jax.random.uniform(nk(), (c,), dtype=jnp.float32,
                                   minval=0.5, maxval=1.5),
        )

    p = {}
    p["conv_x8"] = conv_w(ch[1], ch[0] * frames)
    p["conv_x2"] = conv_w(ch[4], ch[4] * frames)
    p["conv_x1"] = conv_w(ch[5], ch[5] * frames)
    p["up8"] = dict(w=deconv_w(ch[1], ch[2]), bn=bn(ch[2]))
    p["up4"] = dict(w=deconv_w(ch[2] + ch[4], ch[3]), bn=bn(ch[3]))
    p["up2"] = dict(w=deconv_w(ch[3] + ch[5], ch[4]), bn=bn(ch[4]))
    for name, c in (("attn8", ch[2]), ("attn4", ch[3]), ("attn2", ch[4])):
        p[name] = dict(w1=conv_w(c // ratio, c), w2=conv_w(c, c // ratio))
    p["final1"] = dict(w=conv_w(ch[5], ch[4]), bn=bn(ch[5]))
    p["final2"] = dict(w=conv_w(ch[5], ch[5], 3), bn=bn(ch[5]))
    p["final3"] = conv_w(3, ch[5], 3)
    return p


def prepare_params(raw, ch, n_segment, n_div, s_final, eps=1e-5):
    """Fold BN / TSM / 1x1 frame-fusion convs into weights (once, in f32)."""
    f32 = jnp.float32

    def bn_fold(bnp):
        scale = bnp["gamma"] / jnp.sqrt(bnp["var"] + eps)
        bias = bnp["beta"] - bnp["mean"] * scale
        return scale, bias

    prep = {}

    # conv_x8 with TSM(left) + residual add folded into the weight columns (f32).
    wt = raw["conv_x8"].T                                  # (F*ch0, ch1)
    C = wt.shape[1]
    cs = C // n_segment
    fold = cs // n_div
    w_shift = jnp.concatenate(
        [wt[:, cs:], jnp.zeros((wt.shape[0], cs), f32)], axis=1)
    pos = jnp.arange(C) % cs
    w_left = jnp.where((pos < fold)[None, :], w_shift, wt)
    w_x8 = wt + w_left                                     # f32
    w_x2 = raw["conv_x2"].T                                # (F*ch4, ch4)
    w_x1 = raw["conv_x1"].T                                # (F*ch5, ch5)

    # deconv stages: (Cin, Cout, 2, 2) -> (Cin, 4*Cout) with BN scale folded,
    # rows split per concat input ([skip, previous]); segments that are the
    # output of a 1x1 frame-fusion conv get that conv pre-multiplied in f32.
    def prep_up(p, attn_p, segments):
        wd = p["w"]
        cin, cout = wd.shape[0], wd.shape[1]
        scale, bias = bn_fold(p["bn"])
        wmat = jnp.transpose(wd, (0, 2, 3, 1)).reshape(cin, 4 * cout)
        wmat = wmat * jnp.tile(scale, (4,))[None, :]
        bias4 = jnp.tile(bias, (4,))[None, :].astype(f32)
        parts, start = [], 0
        for cseg, w_pre in segments:
            seg = wmat[start:start + cseg]                 # (cseg, 4*cout) f32
            if w_pre is not None:
                seg = w_pre @ seg                          # fold 1x1 conv (f32)
            parts.append(seg.astype(jnp.bfloat16))
            start += cseg
        return dict(ws=parts, bias4=bias4,
                    w1t=attn_p["w1"].T.astype(jnp.bfloat16),
                    w2t=attn_p["w2"].T.astype(jnp.bfloat16))

    # TODO(synk): at full wresnet1024 scale the up8 fold becomes 16384x4096 bf16
    #             (>VMEM) — keep conv_x8 as a separate K-tiled matmul there; at
    #             demo scale folding all three is a pure launch/DMA win.
    prep["up8"] = prep_up(raw["up8"], raw["attn8"], [(ch[1], w_x8)])
    prep["up4"] = prep_up(raw["up4"], raw["attn4"], [(ch[4], w_x2), (ch[2], None)])
    prep["up2"] = prep_up(raw["up2"], raw["attn2"], [(ch[5], w_x1), (ch[3], None)])

    # final head: fold BN scales; merge the 9 taps of each 3x3 conv into one
    # K-stacked weight (Cout, 9*Cin) so each layer is a single MXU matmul.
    s1_, b1_ = bn_fold(raw["final1"]["bn"])
    prep["f1_w"] = (raw["final1"]["w"] * s1_[:, None]).astype(jnp.bfloat16)
    prep["f1_b"] = b1_[:, None].astype(f32)
    s2_, b2_ = bn_fold(raw["final2"]["bn"])
    w2 = raw["final2"]["w"] * s2_[:, None, None, None]
    w2taps = jnp.transpose(w2, (2, 3, 0, 1)).reshape(9, ch[5], ch[5])
    prep["f2_w"] = jnp.transpose(w2taps, (1, 0, 2)).reshape(
        ch[5], 9 * ch[5]).astype(jnp.bfloat16)
    prep["f2_b"] = b2_[:, None].astype(f32)
    w3taps = jnp.transpose(raw["final3"], (2, 3, 0, 1)).reshape(9, 3, ch[5])
    prep["f3_w"] = jnp.transpose(w3taps, (1, 0, 2)).reshape(
        3, 9 * ch[5]).astype(jnp.bfloat16)

    # padded-coordinate geometry for the fused in-kernel 3x3 convolutions.
    hp = s_final + 2
    npad_raw = hp * hp
    npad = ((npad_raw + 127) // 128) * 128
    shifts = [(dh - 1) * hp + (dw - 1) for dh in range(3) for dw in range(3)]
    m = np.zeros((hp, hp), np.float32)
    m[1:s_final + 1, 1:s_final + 1] = 1.0
    mask = np.zeros((1, npad), np.float32)
    mask[0, :npad_raw] = m.reshape(-1)
    prep["head_mask"] = jnp.asarray(mask)

    cfg = dict(head_shifts=shifts, head_npad=npad, head_hp=hp)
    return prep, cfg


# ----------------------------------------------------------------------------
# forward pass (glue in JAX, compute in the kernels supplied via `ops`)
# ----------------------------------------------------------------------------
def cat_frames(xs):
    """(F, B, C, H, W) -> (B, H*W, F*C) bf16 (frame-major channel order)."""
    F, B, C, H, W = xs.shape
    x = jnp.transpose(xs, (1, 3, 4, 0, 2)).reshape(B, H * W, F * C)
    return x.astype(jnp.bfloat16)


def pixel_shuffle(y, h, w, cout):
    """(B, h*w, 4*cout) group layout -> (B, (2h)*(2w), cout)."""
    B = y.shape[0]
    y = y.reshape(B, h, w, 2, 2, cout)
    y = jnp.transpose(y, (0, 1, 3, 2, 4, 5))
    return y.reshape(B, 4 * h * w, cout)


def to_padded_rows(x, h, w, npad):
    """(B, h*w, C) -> (B, C, npad): NCHW zero-pad(1) flattened, lane-padded."""
    B, _, C = x.shape
    img = jnp.transpose(x.reshape(B, h, w, C), (0, 3, 1, 2))
    img = jnp.pad(img, ((0, 0), (0, 0), (1, 1), (1, 1)))
    flat = img.reshape(B, C, (h + 2) * (w + 2))
    return jnp.pad(flat, ((0, 0), (0, 0), (0, npad - flat.shape[-1])))


def astnet_decoder(prep, x1s, x2s, x8s, *, cfg, ops):
    up_fn, head_fn = ops
    s8, s2, s1 = x8s.shape[-1], x2s.shape[-1], x1s.shape[-1]
    sf = 2 * s1

    # frame-fusion 1x1 convs (+ TSM/residual on x8) are folded into the up
    # weights — no standalone conv1x1 pallas_calls / HBM intermediates.
    x8 = cat_frames(x8s)
    x2 = cat_frames(x2s)
    x1 = cat_frames(x1s)

    def run_up(p, xs, h, w):
        cout = p["w1t"].shape[0]
        y = up_fn(xs, p["ws"], p["bias4"], p["w1t"], p["w2t"],
                  hw=h * w, cout=cout)
        # TODO(synk): 2x2 pixel shuffle stays as tiny XLA glue between stages;
        # at full scale fold it into the consumer kernel's index arithmetic.
        return pixel_shuffle(y, h, w, cout)

    x = run_up(prep["up8"], [x8], s8, s8)          # (B, (2*s8)^2, ch[2])
    x = run_up(prep["up4"], [x2, x], s2, s2)       # (B, (2*s2)^2, ch[3])
    x = run_up(prep["up2"], [x1, x], s1, s1)       # (B, (2*s1)^2, ch[4])

    xpad = to_padded_rows(x, sf, sf, cfg["head_npad"])
    ypad = head_fn(xpad, prep["head_mask"], prep["f1_w"], prep["f1_b"],
                   prep["f2_w"], prep["f2_b"], prep["f3_w"],
                   cfg["head_shifts"])
    hp = cfg["head_hp"]
    y = ypad[:, :, :hp * hp].reshape(ypad.shape[0], 3, hp, hp)
    return y[:, :, 1:sf + 1, 1:sf + 1]


# ----------------------------------------------------------------------------
# structurally independent f32 NCHW reference (validates folding / glue)
# ----------------------------------------------------------------------------
def faithful_forward(raw, x1s, x2s, x8s, *, n_segment, n_div, eps=1e-5):
    f32 = jnp.float32

    def r(v):  # mirror the bf16 rounding of params / inputs used by kernels
        return v.astype(jnp.bfloat16).astype(f32)

    def cat(xs):                       # (F, B, C, H, W) -> (B, F*C, H, W)
        F, B, C, H, W = xs.shape
        return jnp.transpose(xs, (1, 0, 2, 3, 4)).reshape(B, F * C, H, W)

    def c1x1(x, w):
        return jnp.einsum("bchw,oc->bohw", x, w)

    def bn(x, p):
        scale = p["gamma"] / jnp.sqrt(p["var"] + eps)
        shift = p["beta"] - p["mean"] * scale
        return x * scale[None, :, None, None] + shift[None, :, None, None]

    def deconv2x2(x, w):               # w: (Cin, Cout, 2, 2), stride 2
        B, C, H, W = x.shape
        y = jnp.einsum("bchw,cokl->bohkwl", x, w)
        return y.reshape(B, w.shape[1], 2 * H, 2 * W)

    def conv3x3(x, w):                 # w: (O, I, 3, 3), pad 1
        B, C, H, W = x.shape
        xp = jnp.pad(x, ((0, 0), (0, 0), (1, 1), (1, 1)))
        out = 0.0
        for dh in range(3):
            for dw in range(3):
                out = out + jnp.einsum("bchw,oc->bohw",
                                       xp[:, :, dh:dh + H, dw:dw + W],
                                       w[:, :, dh, dw])
        return out

    def tsm_left(x):
        B, C, H, W = x.shape
        cs = C // n_segment
        fold = cs // n_div
        xs = x.reshape(B, n_segment, cs, H, W)
        nxt = jnp.concatenate([xs[:, 1:], jnp.zeros_like(xs[:, :1])], axis=1)
        keep = (jnp.arange(cs) < fold)[None, None, :, None, None]
        return jnp.where(keep, nxt, xs).reshape(B, C, H, W)

    def cattn(x, p):
        avg = x.mean(axis=(2, 3))
        mx = x.max(axis=(2, 3))

        def mlp(v):
            h = jnp.maximum(jnp.einsum("rc,bc->br", r(p["w1"]), v), 0.0)
            return jnp.einsum("cr,br->bc", r(p["w2"]), h)

        g = jax.nn.sigmoid(mlp(avg) + mlp(mx))
        return x * g[:, :, None, None]

    x8s, x2s, x1s = r(x8s), r(x2s), r(x1s)
    x8 = c1x1(cat(x8s), r(raw["conv_x8"]))
    x2 = c1x1(cat(x2s), r(raw["conv_x2"]))
    x1 = c1x1(cat(x1s), r(raw["conv_x1"]))
    x8 = x8 + tsm_left(x8)

    x = jnp.maximum(bn(deconv2x2(x8, r(raw["up8"]["w"])), raw["up8"]["bn"]), 0.0)
    x = cattn(x, raw["attn8"])
    x = jnp.maximum(bn(deconv2x2(jnp.concatenate([x2, x], axis=1),
                                 r(raw["up4"]["w"])), raw["up4"]["bn"]), 0.0)
    x = cattn(x, raw["attn4"])
    x = jnp.maximum(bn(deconv2x2(jnp.concatenate([x1, x], axis=1),
                                 r(raw["up2"]["w"])), raw["up2"]["bn"]), 0.0)
    x = cattn(x, raw["attn2"])

    x = jnp.maximum(bn(c1x1(x, r(raw["final1"]["w"])), raw["final1"]["bn"]), 0.0)
    x = jnp.maximum(bn(conv3x3(x, r(raw["final2"]["w"])), raw["final2"]["bn"]), 0.0)
    return conv3x3(x, r(raw["final3"]))


# ----------------------------------------------------------------------------
if __name__ == "__main__":
    B, FRAMES = 2, 4
    CH = [512, 256, 128, 64, 32, 16]   # channels scaled 1/8 of the real model
    RATIO, N_SEG, N_DIV = 16, 4, 16
    S8, S2, S1 = 4, 8, 16              # x8 / x2 / x1 spatial sizes
    SF = 2 * S1

    key = jax.random.PRNGKey(0)
    kp, k8, k2, k1 = jax.random.split(key, 4)
    raw = init_raw_params(kp, FRAMES, CH, RATIO)
    prep, cfg = prepare_params(raw, CH, N_SEG, N_DIV, SF)

    # per-frame backbone features, NCHW (frames stacked on the leading axis)
    x8s = jax.random.normal(k8, (FRAMES, B, CH[0], S8, S8), dtype=jnp.float32)
    x2s = jax.random.normal(k2, (FRAMES, B, CH[4], S2, S2), dtype=jnp.float32)
    x1s = jax.random.normal(k1, (FRAMES, B, CH[5], S1, S1), dtype=jnp.float32)

    pallas_ops = (up_attn_stage, final_head)
    ref_ops = (_up_attn_ref, _final_head_ref)

    fwd = jax.jit(functools.partial(astnet_decoder, cfg=cfg, ops=pallas_ops))
    out = jax.block_until_ready(fwd(prep, x1s, x2s, x8s))

    assert out.shape == (B, 3, SF, SF), out.shape
    assert bool(jnp.all(jnp.isfinite(out)))

    # (1) tight check against a precision-matched pure-JAX mirror of the kernels
    ref_m = astnet_decoder(prep, x1s, x2s, x8s, cfg=cfg, ops=ref_ops)
    err_m = float(jnp.max(jnp.abs(out - ref_m)))
    assert bool(jnp.allclose(out, ref_m, rtol=2e-2, atol=2e-2)), err_m

    # (2) loose structural check against an independent f32 NCHW reference
    #     (validates BN/TSM/frame-fusion weight folding, deconv->matmul layout,
    #      pixel shuffle and the padded-coordinate merged-tap 3x3 formulation;
    #      differences are bf16 rounding only).
    ref_f = faithful_forward(raw, x1s, x2s, x8s, n_segment=N_SEG, n_div=N_DIV)
    err_f = float(jnp.max(jnp.abs(out - ref_f)))
    assert bool(jnp.allclose(out, ref_f, rtol=3e-1, atol=3e-1)), err_f

    print("KERNEL_OK")
</pallas_src>

<mosaic_0001>
module attributes {stable_mosaic.version = 11 : i64} {
  func.func @_up_attn_kernel(%arg0: i32, %arg1: memref<1x16x2048xbf16, #tpu.memory_space<vmem>>, %arg2: memref<2048x512xbf16, #tpu.memory_space<vmem>>, %arg3: memref<1x512xf32, #tpu.memory_space<vmem>>, %arg4: memref<128x8xbf16, #tpu.memory_space<vmem>>, %arg5: memref<8x128xbf16, #tpu.memory_space<vmem>>, %arg6: memref<1x16x512xbf16, #tpu.memory_space<vmem>>) attributes {dimension_semantics = [#tpu.dimension_semantics<parallel>], iteration_bounds = array<i64: 2>, scalar_prefetch = 0 : i64, scratch_operands = 0 : i64, tpu.core_type = #tpu.core_type<tc>, window_params = [{transform_indices = @transform_0, window_bounds = array<i64: 1, 16, 2048>}, {pipeline_mode = #tpu.pipeline_mode<synchronous>, transform_indices = @transform_1, window_bounds = array<i64: 2048, 512>}, {pipeline_mode = #tpu.pipeline_mode<synchronous>, transform_indices = @transform_2, window_bounds = array<i64: 1, 512>}, {pipeline_mode = #tpu.pipeline_mode<synchronous>, transform_indices = @transform_3, window_bounds = array<i64: 128, 8>}, {pipeline_mode = #tpu.pipeline_mode<synchronous>, transform_indices = @transform_4, window_bounds = array<i64: 8, 128>}, {transform_indices = @transform_5, window_bounds = array<i64: 1, 16, 512>}]} {
    %c0 = arith.constant 0 : index
    %c0_0 = arith.constant 0 : index
    %c0_1 = arith.constant 0 : index
    %0 = vector.load %arg1[%c0, %c0_0, %c0_1] : memref<1x16x2048xbf16, #tpu.memory_space<vmem>>, vector<1x16x2048xbf16>
    %1 = vector.shape_cast %0 : vector<1x16x2048xbf16> to vector<16x2048xbf16>
    %c0_2 = arith.constant 0 : index
    %c0_3 = arith.constant 0 : index
    %2 = vector.load %arg2[%c0_2, %c0_3] : memref<2048x512xbf16, #tpu.memory_space<vmem>>, vector<2048x512xbf16>
    %cst = arith.constant dense<0.000000e+00> : vector<16x512xf32>
    %3 = tpu.matmul %1, %2, %cst {dimension_numbers = #tpu.dot_dimension_numbers<[1], [0], [0], [1], [0, 0, 1, 1], [], []>} : vector<16x2048xbf16>, vector<2048x512xbf16>, vector<16x512xf32> -> vector<16x512xf32>
    %c0_4 = arith.constant 0 : index
    %c0_5 = arith.constant 0 : index
    %4 = vector.load %arg3[%c0_4, %c0_5] : memref<1x512xf32, #tpu.memory_space<vmem>>, vector<1x512xf32>
    %5 = vector.broadcast %4 : vector<1x512xf32> to vector<16x512xf32>
    %6 = arith.addf %3, %5 : vector<16x512xf32>
    %cst_6 = arith.constant 0.000000e+00 : f32
    %7 = vector.broadcast %cst_6 : f32 to vector<16x512xf32>
    %8 = arith.maximumf %6, %7 : vector<16x512xf32>
    %cst_7 = arith.constant dense<0.000000e+00> : vector<512xf32>
    %9 = vector.multi_reduction <add>, %8, %cst_7 [0] : vector<16x512xf32> to vector<512xf32>
    %10 = vector.shape_cast %9 : vector<512xf32> to vector<1x512xf32>
    %cst_8 = arith.constant dense<0xFF800000> : vector<512xf32>
    %11 = vector.multi_reduction <maximumf>, %8, %cst_8 [0] : vector<16x512xf32> to vector<512xf32>
    %12 = vector.shape_cast %11 : vector<512xf32> to vector<1x512xf32>
    %13 = vector.extract_strided_slice %10 {offsets = [0, 0], sizes = [1, 128], strides = [1, 1]} : vector<1x512xf32> to vector<1x128xf32>
    %14 = vector.extract_strided_slice %12 {offsets = [0, 0], sizes = [1, 128], strides = [1, 1]} : vector<1x512xf32> to vector<1x128xf32>
    %15 = vector.extract_strided_slice %10 {offsets = [0, 128], sizes = [1, 128], strides = [1, 1]} : vector<1x512xf32> to vector<1x128xf32>
    %16 = arith.addf %13, %15 : vector<1x128xf32>
    %17 = vector.extract_strided_slice %12 {offsets = [0, 128], sizes = [1, 128], strides = [1, 1]} : vector<1x512xf32> to vector<1x128xf32>
    %18 = arith.maximumf %14, %17 : vector<1x128xf32>
    %19 = vector.extract_strided_slice %10 {offsets = [0, 256], sizes = [1, 128], strides = [1, 1]} : vector<1x512xf32> to vector<1x128xf32>
    %20 = arith.addf %16, %19 : vector<1x128xf32>
    %21 = vector.extract_strided_slice %12 {offsets = [0, 256], sizes = [1, 128], strides = [1, 1]} : vector<1x512xf32> to vector<1x128xf32>
    %22 = arith.maximumf %18, %21 : vector<1x128xf32>
    %23 = vector.extract_strided_slice %10 {offsets = [0, 384], sizes = [1, 128], strides = [1, 1]} : vector<1x512xf32> to vector<1x128xf32>
    %24 = arith.addf %20, %23 : vector<1x128xf32>
    %25 = vector.extract_strided_slice %12 {offsets = [0, 384], sizes = [1, 128], strides = [1, 1]} : vector<1x512xf32> to vector<1x128xf32>
    %26 = arith.maximumf %22, %25 : vector<1x128xf32>
    %cst_9 = arith.constant 1.562500e-02 : f32
    %27 = vector.broadcast %cst_9 : f32 to vector<1x128xf32>
    %28 = arith.mulf %24, %27 : vector<1x128xf32>
    %29 = tpu.concatenate %28, %26 in 0 : vector<1x128xf32>, vector<1x128xf32> -> vector<2x128xf32>
    %30 = arith.truncf %29 : vector<2x128xf32> to vector<2x128xbf16>
    %c0_10 = arith.constant 0 : index
    %c0_11 = arith.constant 0 : index
    %31 = vector.load %arg4[%c0_10, %c0_11] : memref<128x8xbf16, #tpu.memory_space<vmem>>, vector<128x8xbf16>
    %cst_12 = arith.constant dense<0.000000e+00> : vector<2x8xf32>
    %32 = tpu.matmul %30, %31, %cst_12 {dimension_numbers = #tpu.dot_dimension_numbers<[1], [0], [0], [1], [0, 0, 1, 1], [], []>} : vector<2x128xbf16>, vector<128x8xbf16>, vector<2x8xf32> -> vector<2x8xf32>
    %cst_13 = arith.constant 0.000000e+00 : f32
    %33 = vector.broadcast %cst_13 : f32 to vector<2x8xf32>
    %34 = arith.maximumf %32, %33 : vector<2x8xf32>
    %35 = arith.truncf %34 : vector<2x8xf32> to vector<2x8xbf16>
    %c0_14 = arith.constant 0 : index
    %c0_15 = arith.constant 0 : index
    %36 = vector.load %arg5[%c0_14, %c0_15] : memref<8x128xbf16, #tpu.memory_space<vmem>>, vector<8x128xbf16>
    %cst_16 = arith.constant dense<0.000000e+00> : vector<2x128xf32>
    %37 = tpu.matmul %35, %36, %cst_16 {dimension_numbers = #tpu.dot_dimension_numbers<[1], [0], [0], [1], [0, 0, 1, 1], [], []>} : vector<2x8xbf16>, vector<8x128xbf16>, vector<2x128xf32> -> vector<2x128xf32>
    %38 = vector.extract_strided_slice %37 {offsets = [0, 0], sizes = [1, 128], strides = [1, 1]} : vector<2x128xf32> to vector<1x128xf32>
    %39 = vector.extract_strided_slice %37 {offsets = [1, 0], sizes = [1, 128], strides = [1, 1]} : vector<2x128xf32> to vector<1x128xf32>
    %40 = arith.addf %38, %39 : vector<1x128xf32>
    %41 = arith.negf %40 : vector<1x128xf32>
    %42 = math.exp %41 : vector<1x128xf32>
    %cst_17 = arith.constant 1.000000e+00 : f32
    %43 = vector.broadcast %cst_17 : f32 to vector<1x128xf32>
    %44 = arith.addf %43, %42 : vector<1x128xf32>
    %45 = arith.divf %43, %44 : vector<1x128xf32>
    %46 = tpu.concatenate %45, %45, %45, %45 in 1 : vector<1x128xf32>, vector<1x128xf32>, vector<1x128xf32>, vector<1x128xf32> -> vector<1x512xf32>
    %47 = vector.broadcast %46 : vector<1x512xf32> to vector<16x512xf32>
    %48 = arith.mulf %8, %47 : vector<16x512xf32>
    %49 = arith.truncf %48 : vector<16x512xf32> to vector<16x512xbf16>
    %c0_18 = arith.constant 0 : index
    %c0_19 = arith.constant 0 : index
    %c0_20 = arith.constant 0 : index
    %50 = vector.load %arg6[%c0_18, %c0_19, %c0_20] : memref<1x16x512xbf16, #tpu.memory_space<vmem>>, vector<1x16x512xbf16>
    %51 = vector.shape_cast %50 : vector<1x16x512xbf16> to vector<16x512xbf16>
    %52 = vector.shape_cast %49 : vector<16x512xbf16> to vector<1x16x512xbf16>
    tpu.vector_store %arg6[%c0_18, %c0_19, %c0_20], %52 {strides = array<i32>} : memref<1x16x512xbf16, #tpu.memory_space<vmem>>, vector<1x16x512xbf16>,
    return
  }
  func.func @transform_0(%arg0: i32) -> (i32, i32, i32) {
    %c0_i32 = arith.constant 0 : i32
    %c0_i32_0 = arith.constant 0 : i32
    %c0_i32_1 = arith.constant 0 : i32
    return %arg0, %c0_i32, %c0_i32_0 : i32, i32, i32
  }
  func.func @transform_1(%arg0: i32) -> (i32, i32) {
    %c0_i32 = arith.constant 0 : i32
    %c0_i32_0 = arith.constant 0 : i32
    %c0_i32_1 = arith.constant 0 : i32
    return %c0_i32, %c0_i32_0 : i32, i32
  }
  func.func @transform_2(%arg0: i32) -> (i32, i32) {
    %c0_i32 = arith.constant 0 : i32
    %c0_i32_0 = arith.constant 0 : i32
    %c0_i32_1 = arith.constant 0 : i32
    return %c0_i32, %c0_i32_0 : i32, i32
  }
  func.func @transform_3(%arg0: i32) -> (i32, i32) {
    %c0_i32 = arith.constant 0 : i32
    %c0_i32_0 = arith.constant 0 : i32
    %c0_i32_1 = arith.constant 0 : i32
    return %c0_i32, %c0_i32_0 : i32, i32
  }
  func.func @transform_4(%arg0: i32) -> (i32, i32) {
    %c0_i32 = arith.constant 0 : i32
    %c0_i32_0 = arith.constant 0 : i32
    %c0_i32_1 = arith.constant 0 : i32
    return %c0_i32, %c0_i32_0 : i32, i32
  }
  func.func @transform_5(%arg0: i32) -> (i32, i32, i32) {
    %c0_i32 = arith.constant 0 : i32
    %c0_i32_0 = arith.constant 0 : i32
    %c0_i32_1 = arith.constant 0 : i32
    return %arg0, %c0_i32, %c0_i32_0 : i32, i32, i32
  }
}

module attributes {stable_mosaic.version = 11 : i64} {
  func.func @_up_attn_kernel(%arg0: i32, %arg1: memref<1x64x128xbf16, #tpu.memory_space<vmem>>, %arg2: memref<1x64x128xbf16, #tpu.memory_space<vmem>>, %arg3: memref<128x256xbf16, #tpu.memory_space<vmem>>, %arg4: memref<128x256xbf16, #tpu.memory_space<vmem>>, %arg5: memref<1x256xf32, #tpu.memory_space<vmem>>, %arg6: memref<64x4xbf16, #tpu.memory_space<vmem>>, %arg7: memref<4x64xbf16, #tpu.memory_space<vmem>>, %arg8: memref<1x64x256xbf16, #tpu.memory_space<vmem>>) attributes {dimension_semantics = [#tpu.dimension_semantics<parallel>], iteration_bounds = array<i64: 2>, scalar_prefetch = 0 : i64, scratch_operands = 0 : i64, tpu.core_type = #tpu.core_type<tc>, window_params = [{transform_indices = @transform_0, window_bounds = array<i64: 1, 64, 128>}, {transform_indices = @transform_1, window_bounds = array<i64: 1, 64, 128>}, {pipeline_mode = #tpu.pipeline_mode<synchronous>, transform_indices = @transform_2, window_bounds = array<i64: 128, 256>}, {pipeline_mode = #tpu.pipeline_mode<synchronous>, transform_indices = @transform_3, window_bounds = array<i64: 128, 256>}, {pipeline_mode = #tpu.pipeline_mode<synchronous>, transform_indices = @transform_4, window_bounds = array<i64: 1, 256>}, {pipeline_mode = #tpu.pipeline_mode<synchronous>, transform_indices = @transform_5, window_bounds = array<i64: 64, 4>}, {pipeline_mode = #tpu.pipeline_mode<synchronous>, transform_indices = @transform_6, window_bounds = array<i64: 4, 64>}, {transform_indices = @transform_7, window_bounds = array<i64: 1, 64, 256>}]} {
    %c0 = arith.constant 0 : index
    %c0_0 = arith.constant 0 : index
    %c0_1 = arith.constant 0 : index
    %0 = vector.load %arg1[%c0, %c0_0, %c0_1] : memref<1x64x128xbf16, #tpu.memory_space<vmem>>, vector<1x64x128xbf16>
    %1 = vector.shape_cast %0 : vector<1x64x128xbf16> to vector<64x128xbf16>
    %c0_2 = arith.constant 0 : index
    %c0_3 = arith.constant 0 : index
    %2 = vector.load %arg3[%c0_2, %c0_3] : memref<128x256xbf16, #tpu.memory_space<vmem>>, vector<128x256xbf16>
    %cst = arith.constant dense<0.000000e+00> : vector<64x256xf32>
    %3 = tpu.matmul %1, %2, %cst {dimension_numbers = #tpu.dot_dimension_numbers<[1], [0], [0], [1], [0, 0, 1, 1], [], []>} : vector<64x128xbf16>, vector<128x256xbf16>, vector<64x256xf32> -> vector<64x256xf32>
    %c0_4 = arith.constant 0 : index
    %c0_5 = arith.constant 0 : index
    %c0_6 = arith.constant 0 : index
    %4 = vector.load %arg2[%c0_4, %c0_5, %c0_6] : memref<1x64x128xbf16, #tpu.memory_space<vmem>>, vector<1x64x128xbf16>
    %5 = vector.shape_cast %4 : vector<1x64x128xbf16> to vector<64x128xbf16>
    %c0_7 = arith.constant 0 : index
    %c0_8 = arith.constant 0 : index
    %6 = vector.load %arg4[%c0_7, %c0_8] : memref<128x256xbf16, #tpu.memory_space<vmem>>, vector<128x256xbf16>
    %cst_9 = arith.constant dense<0.000000e+00> : vector<64x256xf32>
    %7 = tpu.matmul %5, %6, %cst_9 {dimension_numbers = #tpu.dot_dimension_numbers<[1], [0], [0], [1], [0, 0, 1, 1], [], []>} : vector<64x128xbf16>, vector<128x256xbf16>, vector<64x256xf32> -> vector<64x256xf32>
    %8 = arith.addf %3, %7 : vector<64x256xf32>
    %c0_10 = arith.constant 0 : index
    %c0_11 = arith.constant 0 : index
    %9 = vector.load %arg5[%c0_10, %c0_11] : memref<1x256xf32, #tpu.memory_space<vmem>>, vector<1x256xf32>
    %10 = vector.broadcast %9 : vector<1x256xf32> to vector<64x256xf32>
    %11 = arith.addf %8, %10 : vector<64x256xf32>
    %cst_12 = arith.constant 0.000000e+00 : f32
    %12 = vector.broadcast %cst_12 : f32 to vector<64x256xf32>
    %13 = arith.maximumf %11, %12 : vector<64x256xf32>
    %cst_13 = arith.constant dense<0.000000e+00> : vector<256xf32>
    %14 = vector.multi_reduction <add>, %13, %cst_13 [0] : vector<64x256xf32> to vector<256xf32>
    %15 = vector.shape_cast %14 : vector<256xf32> to vector<1x256xf32>
    %cst_14 = arith.constant dense<0xFF800000> : vector<256xf32>
    %16 = vector.multi_reduction <maximumf>, %13, %cst_14 [0] : vector<64x256xf32> to vector<256xf32>
    %17 = vector.shape_cast %16 : vector<256xf32> to vector<1x256xf32>
    %18 = vector.extract_strided_slice %15 {offsets = [0, 0], sizes = [1, 64], strides = [1, 1]} : vector<1x256xf32> to vector<1x64xf32>
    %19 = vector.extract_strided_slice %17 {offsets = [0, 0], sizes = [1, 64], strides = [1, 1]} : vector<1x256xf32> to vector<1x64xf32>
    %20 = vector.extract_strided_slice %15 {offsets = [0, 64], sizes = [1, 64], strides = [1, 1]} : vector<1x256xf32> to vector<1x64xf32>
    %21 = arith.addf %18, %20 : vector<1x64xf32>
    %22 = vector.extract_strided_slice %17 {offsets = [0, 64], sizes = [1, 64], strides = [1, 1]} : vector<1x256xf32> to vector<1x64xf32>
    %23 = arith.maximumf %19, %22 : vector<1x64xf32>
    %24 = vector.extract_strided_slice %15 {offsets = [0, 128], sizes = [1, 64], strides = [1, 1]} : vector<1x256xf32> to vector<1x64xf32>
    %25 = arith.addf %21, %24 : vector<1x64xf32>
    %26 = vector.extract_strided_slice %17 {offsets = [0, 128], sizes = [1, 64], strides = [1, 1]} : vector<1x256xf32> to vector<1x64xf32>
    %27 = arith.maximumf %23, %26 : vector<1x64xf32>
    %28 = vector.extract_strided_slice %15 {offsets = [0, 192], sizes = [1, 64], strides = [1, 1]} : vector<1x256xf32> to vector<1x64xf32>
    %29 = arith.addf %25, %28 : vector<1x64xf32>
    %30 = vector.extract_strided_slice %17 {offsets = [0, 192], sizes = [1, 64], strides = [1, 1]} : vector<1x256xf32> to vector<1x64xf32>
    %31 = arith.maximumf %27, %30 : vector<1x64xf32>
    %cst_15 = arith.constant 3.906250e-03 : f32
    %32 = vector.broadcast %cst_15 : f32 to vector<1x64xf32>
    %33 = arith.mulf %29, %32 : vector<1x64xf32>
    %34 = tpu.concatenate %33, %31 in 0 : vector<1x64xf32>, vector<1x64xf32> -> vector<2x64xf32>
    %35 = arith.truncf %34 : vector<2x64xf32> to vector<2x64xbf16>
    %c0_16 = arith.constant 0 : index
    %c0_17 = arith.constant 0 : index
    %36 = vector.load %arg6[%c0_16, %c0_17] : memref<64x4xbf16, #tpu.memory_space<vmem>>, vector<64x4xbf16>
    %cst_18 = arith.constant dense<0.000000e+00> : vector<2x4xf32>
    %37 = tpu.matmul %35, %36, %cst_18 {dimension_numbers = #tpu.dot_dimension_numbers<[1], [0], [0], [1], [0, 0, 1, 1], [], []>} : vector<2x64xbf16>, vector<64x4xbf16>, vector<2x4xf32> -> vector<2x4xf32>
    %cst_19 = arith.constant 0.000000e+00 : f32
    %38 = vector.broadcast %cst_19 : f32 to vector<2x4xf32>
    %39 = arith.maximumf %37, %38 : vector<2x4xf32>
    %40 = arith.truncf %39 : vector<2x4xf32> to vector<2x4xbf16>
    %c0_20 = arith.constant 0 : index
    %c0_21 = arith.constant 0 : index
    %41 = vector.load %arg7[%c0_20, %c0_21] : memref<4x64xbf16, #tpu.memory_space<vmem>>, vector<4x64xbf16>
    %cst_22 = arith.constant dense<0.000000e+00> : vector<2x64xf32>
    %42 = tpu.matmul %40, %41, %cst_22 {dimension_numbers = #tpu.dot_dimension_numbers<[1], [0], [0], [1], [0, 0, 1, 1], [], []>} : vector<2x4xbf16>, vector<4x64xbf16>, vector<2x64xf32> -> vector<2x64xf32>
    %43 = vector.extract_strided_slice %42 {offsets = [0, 0], sizes = [1, 64], strides = [1, 1]} : vector<2x64xf32> to vector<1x64xf32>
    %44 = vector.extract_strided_slice %42 {offsets = [1, 0], sizes = [1, 64], strides = [1, 1]} : vector<2x64xf32> to vector<1x64xf32>
    %45 = arith.addf %43, %44 : vector<1x64xf32>
    %46 = arith.negf %45 : vector<1x64xf32>
    %47 = math.exp %46 : vector<1x64xf32>
    %cst_23 = arith.constant 1.000000e+00 : f32
    %48 = vector.broadcast %cst_23 : f32 to vector<1x64xf32>
    %49 = arith.addf %48, %47 : vector<1x64xf32>
    %50 = arith.divf %48, %49 : vector<1x64xf32>
    %51 = tpu.concatenate %50, %50, %50, %50 in 1 : vector<1x64xf32>, vector<1x64xf32>, vector<1x64xf32>, vector<1x64xf32> -> vector<1x256xf32>
    %52 = vector.broadcast %51 : vector<1x256xf32> to vector<64x256xf32>
    %53 = arith.mulf %13, %52 : vector<64x256xf32>
    %54 = arith.truncf %53 : vector<64x256xf32> to vector<64x256xbf16>
    %c0_24 = arith.constant 0 : index
    %c0_25 = arith.constant 0 : index
    %c0_26 = arith.constant 0 : index
    %55 = vector.load %arg8[%c0_24, %c0_25, %c0_26] : memref<1x64x256xbf16, #tpu.memory_space<vmem>>, vector<1x64x256xbf16>
    %56 = vector.shape_cast %55 : vector<1x64x256xbf16> to vector<64x256xbf16>
    %57 = vector.shape_cast %54 : vector<64x256xbf16> to vector<1x64x256xbf16>
    tpu.vector_store %arg8[%c0_24, %c0_25, %c0_26], %57 {strides = array<i32>} : memref<1x64x256xbf16, #tpu.memory_space<vmem>>, vector<1x64x256xbf16>,
    return
  }
  func.func @transform_0(%arg0: i32) -> (i32, i32, i32) {
    %c0_i32 = arith.constant 0 : i32
    %c0_i32_0 = arith.constant 0 : i32
    %c0_i32_1 = arith.constant 0 : i32
    return %arg0, %c0_i32, %c0_i32_0 : i32, i32, i32
  }
  func.func @transform_1(%arg0: i32) -> (i32, i32, i32) {
    %c0_i32 = arith.constant 0 : i32
    %c0_i32_0 = arith.constant 0 : i32
    %c0_i32_1 = arith.constant 0 : i32
    return %arg0, %c0_i32, %c0_i32_0 : i32, i32, i32
  }
  func.func @transform_2(%arg0: i32) -> (i32, i32) {
    %c0_i32 = arith.constant 0 : i32
    %c0_i32_0 = arith.constant 0 : i32
    %c0_i32_1 = arith.constant 0 : i32
    return %c0_i32, %c0_i32_0 : i32, i32
  }
  func.func @transform_3(%arg0: i32) -> (i32, i32) {
    %c0_i32 = arith.constant 0 : i32
    %c0_i32_0 = arith.constant 0 : i32
    %c0_i32_1 = arith.constant 0 : i32
    return %c0_i32, %c0_i32_0 : i32, i32
  }
  func.func @transform_4(%arg0: i32) -> (i32, i32) {
    %c0_i32 = arith.constant 0 : i32
    %c0_i32_0 = arith.constant 0 : i32
    %c0_i32_1 = arith.constant 0 : i32
    return %c0_i32, %c0_i32_0 : i32, i32
  }
  func.func @transform_5(%arg0: i32) -> (i32, i32) {
    %c0_i32 = arith.constant 0 : i32
    %c0_i32_0 = arith.constant 0 : i32
    %c0_i32_1 = arith.constant 0 : i32
    return %c0_i32, %c0_i32_0 : i32, i32
  }
  func.func @transform_6(%arg0: i32) -> (i32, i32) {
    %c0_i32 = arith.constant 0 : i32
    %c0_i32_0 = arith.constant 0 : i32
    %c0_i32_1 = arith.constant 0 : i32
    return %c0_i32, %c0_i32_0 : i32, i32
  }
  func.func @transform_7(%arg0: i32) -> (i32, i32, i32) {
    %c0_i32 = arith.constant 0 : i32
    %c0_i32_0 = arith.constant 0 : i32
    %c0_i32_1 = arith.constant 0 : i32
    return %arg0, %c0_i32, %c0_i32_0 : i32, i32, i32
  }
}

module attributes {stable_mosaic.version = 11 : i64} {
  func.func @_up_attn_kernel(%arg0: i32, %arg1: memref<1x256x64xbf16, #tpu.memory_space<vmem>>, %arg2: memref<1x256x64xbf16, #tpu.memory_space<vmem>>, %arg3: memref<64x128xbf16, #tpu.memory_space<vmem>>, %arg4: memref<64x128xbf16, #tpu.memory_space<vmem>>, %arg5: memref<1x128xf32, #tpu.memory_space<vmem>>, %arg6: memref<32x2xbf16, #tpu.memory_space<vmem>>, %arg7: memref<2x32xbf16, #tpu.memory_space<vmem>>, %arg8: memref<1x256x128xbf16, #tpu.memory_space<vmem>>) attributes {dimension_semantics = [#tpu.dimension_semantics<parallel>], iteration_bounds = array<i64: 2>, scalar_prefetch = 0 : i64, scratch_operands = 0 : i64, tpu.core_type = #tpu.core_type<tc>, window_params = [{transform_indices = @transform_0, window_bounds = array<i64: 1, 256, 64>}, {transform_indices = @transform_1, window_bounds = array<i64: 1, 256, 64>}, {pipeline_mode = #tpu.pipeline_mode<synchronous>, transform_indices = @transform_2, window_bounds = array<i64: 64, 128>}, {pipeline_mode = #tpu.pipeline_mode<synchronous>, transform_indices = @transform_3, window_bounds = array<i64: 64, 128>}, {pipeline_mode = #tpu.pipeline_mode<synchronous>, transform_indices = @transform_4, window_bounds = array<i64: 1, 128>}, {pipeline_mode = #tpu.pipeline_mode<synchronous>, transform_indices = @transform_5, window_bounds = array<i64: 32, 2>}, {pipeline_mode = #tpu.pipeline_mode<synchronous>, transform_indices = @transform_6, window_bounds = array<i64: 2, 32>}, {transform_indices = @transform_7, window_bounds = array<i64: 1, 256, 128>}]} {
    %c0 = arith.constant 0 : index
    %c0_0 = arith.constant 0 : index
    %c0_1 = arith.constant 0 : index
    %0 = vector.load %arg1[%c0, %c0_0, %c0_1] : memref<1x256x64xbf16, #tpu.memory_space<vmem>>, vector<1x256x64xbf16>
    %1 = vector.shape_cast %0 : vector<1x256x64xbf16> to vector<256x64xbf16>
    %c0_2 = arith.constant 0 : index
    %c0_3 = arith.constant 0 : index
    %2 = vector.load %arg3[%c0_2, %c0_3] : memref<64x128xbf16, #tpu.memory_space<vmem>>, vector<64x128xbf16>
    %cst = arith.constant dense<0.000000e+00> : vector<256x128xf32>
    %3 = tpu.matmul %1, %2, %cst {dimension_numbers = #tpu.dot_dimension_numbers<[1], [0], [0], [1], [0, 0, 1, 1], [], []>} : vector<256x64xbf16>, vector<64x128xbf16>, vector<256x128xf32> -> vector<256x128xf32>
    %c0_4 = arith.constant 0 : index
    %c0_5 = arith.constant 0 : index
    %c0_6 = arith.constant 0 : index
    %4 = vector.load %arg2[%c0_4, %c0_5, %c0_6] : memref<1x256x64xbf16, #tpu.memory_space<vmem>>, vector<1x256x64xbf16>
    %5 = vector.shape_cast %4 : vector<1x256x64xbf16> to vector<256x64xbf16>
    %c0_7 = arith.constant 0 : index
    %c0_8 = arith.constant 0 : index
    %6 = vector.load %arg4[%c0_7, %c0_8] : memref<64x128xbf16, #tpu.memory_space<vmem>>, vector<64x128xbf16>
    %cst_9 = arith.constant dense<0.000000e+00> : vector<256x128xf32>
    %7 = tpu.matmul %5, %6, %cst_9 {dimension_numbers = #tpu.dot_dimension_numbers<[1], [0], [0], [1], [0, 0, 1, 1], [], []>} : vector<256x64xbf16>, vector<64x128xbf16>, vector<256x128xf32> -> vector<256x128xf32>
    %8 = arith.addf %3, %7 : vector<256x128xf32>
    %c0_10 = arith.constant 0 : index
    %c0_11 = arith.constant 0 : index
    %9 = vector.load %arg5[%c0_10, %c0_11] : memref<1x128xf32, #tpu.memory_space<vmem>>, vector<1x128xf32>
    %10 = vector.broadcast %9 : vector<1x128xf32> to vector<256x128xf32>
    %11 = arith.addf %8, %10 : vector<256x128xf32>
    %cst_12 = arith.constant 0.000000e+00 : f32
    %12 = vector.broadcast %cst_12 : f32 to vector<256x128xf32>
    %13 = arith.maximumf %11, %12 : vector<256x128xf32>
    %cst_13 = arith.constant dense<0.000000e+00> : vector<128xf32>
    %14 = vector.multi_reduction <add>, %13, %cst_13 [0] : vector<256x128xf32> to vector<128xf32>
    %15 = vector.shape_cast %14 : vector<128xf32> to vector<1x128xf32>
    %cst_14 = arith.constant dense<0xFF800000> : vector<128xf32>
    %16 = vector.multi_reduction <maximumf>, %13, %cst_14 [0] : vector<256x128xf32> to vector<128xf32>
    %17 = vector.shape_cast %16 : vector<128xf32> to vector<1x128xf32>
    %18 = vector.extract_strided_slice %15 {offsets = [0, 0], sizes = [1, 32], strides = [1, 1]} : vector<1x128xf32> to vector<1x32xf32>
    %19 = vector.extract_strided_slice %17 {offsets = [0, 0], sizes = [1, 32], strides = [1, 1]} : vector<1x128xf32> to vector<1x32xf32>
    %20 = vector.extract_strided_slice %15 {offsets = [0, 32], sizes = [1, 32], strides = [1, 1]} : vector<1x128xf32> to vector<1x32xf32>
    %21 = arith.addf %18, %20 : vector<1x32xf32>
    %22 = vector.extract_strided_slice %17 {offsets = [0, 32], sizes = [1, 32], strides = [1, 1]} : vector<1x128xf32> to vector<1x32xf32>
    %23 = arith.maximumf %19, %22 : vector<1x32xf32>
    %24 = vector.extract_strided_slice %15 {offsets = [0, 64], sizes = [1, 32], strides = [1, 1]} : vector<1x128xf32> to vector<1x32xf32>
    %25 = arith.addf %21, %24 : vector<1x32xf32>
    %26 = vector.extract_strided_slice %17 {offsets = [0, 64], sizes = [1, 32], strides = [1, 1]} : vector<1x128xf32> to vector<1x32xf32>
    %27 = arith.maximumf %23, %26 : vector<1x32xf32>
    %28 = vector.extract_strided_slice %15 {offsets = [0, 96], sizes = [1, 32], strides = [1, 1]} : vector<1x128xf32> to vector<1x32xf32>
    %29 = arith.addf %25, %28 : vector<1x32xf32>
    %30 = vector.extract_strided_slice %17 {offsets = [0, 96], sizes = [1, 32], strides = [1, 1]} : vector<1x128xf32> to vector<1x32xf32>
    %31 = arith.maximumf %27, %30 : vector<1x32xf32>
    %cst_15 = arith.constant 9.765625E-4 : f32
    %32 = vector.broadcast %cst_15 : f32 to vector<1x32xf32>
    %33 = arith.mulf %29, %32 : vector<1x32xf32>
    %34 = tpu.concatenate %33, %31 in 0 : vector<1x32xf32>, vector<1x32xf32> -> vector<2x32xf32>
    %35 = arith.truncf %34 : vector<2x32xf32> to vector<2x32xbf16>
    %c0_16 = arith.constant 0 : index
    %c0_17 = arith.constant 0 : index
    %36 = vector.load %arg6[%c0_16, %c0_17] : memref<32x2xbf16, #tpu.memory_space<vmem>>, vector<32x2xbf16>
    %cst_18 = arith.constant dense<0.000000e+00> : vector<2x2xf32>
    %37 = tpu.matmul %35, %36, %cst_18 {dimension_numbers = #tpu.dot_dimension_numbers<[1], [0], [0], [1], [0, 0, 1, 1], [], []>} : vector<2x32xbf16>, vector<32x2xbf16>, vector<2x2xf32> -> vector<2x2xf32>
    %cst_19 = arith.constant 0.000000e+00 : f32
    %38 = vector.broadcast %cst_19 : f32 to vector<2x2xf32>
    %39 = arith.maximumf %37, %38 : vector<2x2xf32>
    %40 = arith.truncf %39 : vector<2x2xf32> to vector<2x2xbf16>
    %c0_20 = arith.constant 0 : index
    %c0_21 = arith.constant 0 : index
    %41 = vector.load %arg7[%c0_20, %c0_21] : memref<2x32xbf16, #tpu.memory_space<vmem>>, vector<2x32xbf16>
    %cst_22 = arith.constant dense<0.000000e+00> : vector<2x32xf32>
    %42 = tpu.matmul %40, %41, %cst_22 {dimension_numbers = #tpu.dot_dimension_numbers<[1], [0], [0], [1], [0, 0, 1, 1], [], []>} : vector<2x2xbf16>, vector<2x32xbf16>, vector<2x32xf32> -> vector<2x32xf32>
    %43 = vector.extract_strided_slice %42 {offsets = [0, 0], sizes = [1, 32], strides = [1, 1]} : vector<2x32xf32> to vector<1x32xf32>
    %44 = vector.extract_strided_slice %42 {offsets = [1, 0], sizes = [1, 32], strides = [1, 1]} : vector<2x32xf32> to vector<1x32xf32>
    %45 = arith.addf %43, %44 : vector<1x32xf32>
    %46 = arith.negf %45 : vector<1x32xf32>
    %47 = math.exp %46 : vector<1x32xf32>
    %cst_23 = arith.constant 1.000000e+00 : f32
    %48 = vector.broadcast %cst_23 : f32 to vector<1x32xf32>
    %49 = arith.addf %48, %47 : vector<1x32xf32>
    %50 = arith.divf %48, %49 : vector<1x32xf32>
    %51 = tpu.concatenate %50, %50, %50, %50 in 1 : vector<1x32xf32>, vector<1x32xf32>, vector<1x32xf32>, vector<1x32xf32> -> vector<1x128xf32>
    %52 = vector.broadcast %51 : vector<1x128xf32> to vector<256x128xf32>
    %53 = arith.mulf %13, %52 : vector<256x128xf32>
    %54 = arith.truncf %53 : vector<256x128xf32> to vector<256x128xbf16>
    %c0_24 = arith.constant 0 : index
    %c0_25 = arith.constant 0 : index
    %c0_26 = arith.constant 0 : index
    %55 = vector.load %arg8[%c0_24, %c0_25, %c0_26] : memref<1x256x128xbf16, #tpu.memory_space<vmem>>, vector<1x256x128xbf16>
    %56 = vector.shape_cast %55 : vector<1x256x128xbf16> to vector<256x128xbf16>
    %57 = vector.shape_cast %54 : vector<256x128xbf16> to vector<1x256x128xbf16>
    tpu.vector_store %arg8[%c0_24, %c0_25, %c0_26], %57 {strides = array<i32>} : memref<1x256x128xbf16, #tpu.memory_space<vmem>>, vector<1x256x128xbf16>,
    return
  }
  func.func @transform_0(%arg0: i32) -> (i32, i32, i32) {
    %c0_i32 = arith.constant 0 : i32
    %c0_i32_0 = arith.constant 0 : i32
    %c0_i32_1 = arith.constant 0 : i32
    return %arg0, %c0_i32, %c0_i32_0 : i32, i32, i32
  }
  func.func @transform_1(%arg0: i32) -> (i32, i32, i32) {
    %c0_i32 = arith.constant 0 : i32
    %c0_i32_0 = arith.constant 0 : i32
    %c0_i32_1 = arith.constant 0 : i32
    return %arg0, %c0_i32, %c0_i32_0 : i32, i32, i32
  }
  func.func @transform_2(%arg0: i32) -> (i32, i32) {
    %c0_i32 = arith.constant 0 : i32
    %c0_i32_0 = arith.constant 0 : i32
    %c0_i32_1 = arith.constant 0 : i32
    return %c0_i32, %c0_i32_0 : i32, i32
  }
  func.func @transform_3(%arg0: i32) -> (i32, i32) {
    %c0_i32 = arith.constant 0 : i32
    %c0_i32_0 = arith.constant 0 : i32
    %c0_i32_1 = arith.constant 0 : i32
    return %c0_i32, %c0_i32_0 : i32, i32
  }
  func.func @transform_4(%arg0: i32) -> (i32, i32) {
    %c0_i32 = arith.constant 0 : i32
    %c0_i32_0 = arith.constant 0 : i32
    %c0_i32_1 = arith.constant 0 : i32
    return %c0_i32, %c0_i32_0 : i32, i32
  }
  func.func @transform_5(%arg0: i32) -> (i32, i32) {
    %c0_i32 = arith.constant 0 : i32
    %c0_i32_0 = arith.constant 0 : i32
    %c0_i32_1 = arith.constant 0 : i32
    return %c0_i32, %c0_i32_0 : i32, i32
  }
  func.func @transform_6(%arg0: i32) -> (i32, i32) {
    %c0_i32 = arith.constant 0 : i32
    %c0_i32_0 = arith.constant 0 : i32
    %c0_i32_1 = arith.constant 0 : i32
    return %c0_i32, %c0_i32_0 : i32, i32
  }
  func.func @transform_7(%arg0: i32) -> (i32, i32, i32) {
    %c0_i32 = arith.constant 0 : i32
    %c0_i32_0 = arith.constant 0 : i32
    %c0_i32_1 = arith.constant 0 : i32
    return %arg0, %c0_i32, %c0_i32_0 : i32, i32, i32
  }
}

module attributes {stable_mosaic.version = 11 : i64} {
  func.func @_final_head_kernel(%arg0: i32, %arg1: memref<1x32x1280xbf16, #tpu.memory_space<vmem>>, %arg2: memref<1x1280xf32, #tpu.memory_space<vmem>>, %arg3: memref<16x32xbf16, #tpu.memory_space<vmem>>, %arg4: memref<16x1xf32, #tpu.memory_space<vmem>>, %arg5: memref<16x144xbf16, #tpu.memory_space<vmem>>, %arg6: memref<16x1xf32, #tpu.memory_space<vmem>>, %arg7: memref<3x144xbf16, #tpu.memory_space<vmem>>, %arg8: memref<1x3x1280xf32, #tpu.memory_space<vmem>>) attributes {dimension_semantics = [#tpu.dimension_semantics<parallel>], iteration_bounds = array<i64: 2>, scalar_prefetch = 0 : i64, scratch_operands = 0 : i64, tpu.core_type = #tpu.core_type<tc>, window_params = [{transform_indices = @transform_0, window_bounds = array<i64: 1, 32, 1280>}, {pipeline_mode = #tpu.pipeline_mode<synchronous>, transform_indices = @transform_1, window_bounds = array<i64: 1, 1280>}, {pipeline_mode = #tpu.pipeline_mode<synchronous>, transform_indices = @transform_2, window_bounds = array<i64: 16, 32>}, {pipeline_mode = #tpu.pipeline_mode<synchronous>, transform_indices = @transform_3, window_bounds = array<i64: 16, 1>}, {pipeline_mode = #tpu.pipeline_mode<synchronous>, transform_indices = @transform_4, window_bounds = array<i64: 16, 144>}, {pipeline_mode = #tpu.pipeline_mode<synchronous>, transform_indices = @transform_5, window_bounds = array<i64: 16, 1>}, {pipeline_mode = #tpu.pipeline_mode<synchronous>, transform_indices = @transform_6, window_bounds = array<i64: 3, 144>}, {transform_indices = @transform_7, window_bounds = array<i64: 1, 3, 1280>}]} {
    %c0 = arith.constant 0 : index
    %c0_0 = arith.constant 0 : index
    %c0_1 = arith.constant 0 : index
    %0 = vector.load %arg1[%c0, %c0_0, %c0_1] : memref<1x32x1280xbf16, #tpu.memory_space<vmem>>, vector<1x32x1280xbf16>
    %1 = vector.shape_cast %0 : vector<1x32x1280xbf16> to vector<32x1280xbf16>
    %c0_2 = arith.constant 0 : index
    %c0_3 = arith.constant 0 : index
    %2 = vector.load %arg2[%c0_2, %c0_3] : memref<1x1280xf32, #tpu.memory_space<vmem>>, vector<1x1280xf32>
    %c0_4 = arith.constant 0 : index
    %c0_5 = arith.constant 0 : index
    %3 = vector.load %arg3[%c0_4, %c0_5] : memref<16x32xbf16, #tpu.memory_space<vmem>>, vector<16x32xbf16>
    %cst = arith.constant dense<0.000000e+00> : vector<16x1280xf32>
    %4 = tpu.matmul %3, %1, %cst {dimension_numbers = #tpu.dot_dimension_numbers<[1], [0], [0], [1], [0, 0, 1, 1], [], []>} : vector<16x32xbf16>, vector<32x1280xbf16>, vector<16x1280xf32> -> vector<16x1280xf32>
    %c0_6 = arith.constant 0 : index
    %c0_7 = arith.constant 0 : index
    %5 = vector.load %arg4[%c0_6, %c0_7] : memref<16x1xf32, #tpu.memory_space<vmem>>, vector<16x1xf32>
    %6 = vector.broadcast %5 : vector<16x1xf32> to vector<16x1280xf32>
    %7 = arith.addf %4, %6 : vector<16x1280xf32>
    %cst_8 = arith.constant 0.000000e+00 : f32
    %8 = vector.broadcast %cst_8 : f32 to vector<16x1280xf32>
    %9 = arith.maximumf %7, %8 : vector<16x1280xf32>
    %10 = vector.broadcast %2 : vector<1x1280xf32> to vector<16x1280xf32>
    %11 = arith.mulf %9, %10 : vector<16x1280xf32>
    %12 = arith.truncf %11 : vector<16x1280xf32> to vector<16x1280xbf16>
    %cst_9 = arith.constant 0.000000e+00 : bf16
    %13 = vector.broadcast %cst_9 : bf16 to vector<16x35xbf16>
    %14 = vector.extract_strided_slice %12 {offsets = [0, 0], sizes = [16, 1245], strides = [1, 1]} : vector<16x1280xbf16> to vector<16x1245xbf16>
    %15 = tpu.concatenate %13, %14 in 1 : vector<16x35xbf16>, vector<16x1245xbf16> -> vector<16x1280xbf16>
    %cst_10 = arith.constant 0.000000e+00 : bf16
    %16 = vector.broadcast %cst_10 : bf16 to vector<16x34xbf16>
    %17 = vector.extract_strided_slice %12 {offsets = [0, 0], sizes = [16, 1246], strides = [1, 1]} : vector<16x1280xbf16> to vector<16x1246xbf16>
    %18 = tpu.concatenate %16, %17 in 1 : vector<16x34xbf16>, vector<16x1246xbf16> -> vector<16x1280xbf16>
    %cst_11 = arith.constant 0.000000e+00 : bf16
    %19 = vector.broadcast %cst_11 : bf16 to vector<16x33xbf16>
    %20 = vector.extract_strided_slice %12 {offsets = [0, 0], sizes = [16, 1247], strides = [1, 1]} : vector<16x1280xbf16> to vector<16x1247xbf16>
    %21 = tpu.concatenate %19, %20 in 1 : vector<16x33xbf16>, vector<16x1247xbf16> -> vector<16x1280xbf16>
    %cst_12 = arith.constant 0.000000e+00 : bf16
    %22 = vector.broadcast %cst_12 : bf16 to vector<16x1xbf16>
    %23 = vector.extract_strided_slice %12 {offsets = [0, 0], sizes = [16, 1279], strides = [1, 1]} : vector<16x1280xbf16> to vector<16x1279xbf16>
    %24 = tpu.concatenate %22, %23 in 1 : vector<16x1xbf16>, vector<16x1279xbf16> -> vector<16x1280xbf16>
    %cst_13 = arith.constant 0.000000e+00 : bf16
    %25 = vector.broadcast %cst_13 : bf16 to vector<16x1xbf16>
    %26 = vector.extract_strided_slice %12 {offsets = [0, 1], sizes = [16, 1279], strides = [1, 1]} : vector<16x1280xbf16> to vector<16x1279xbf16>
    %27 = tpu.concatenate %26, %25 in 1 : vector<16x1279xbf16>, vector<16x1xbf16> -> vector<16x1280xbf16>
    %cst_14 = arith.constant 0.000000e+00 : bf16
    %28 = vector.broadcast %cst_14 : bf16 to vector<16x33xbf16>
    %29 = vector.extract_strided_slice %12 {offsets = [0, 33], sizes = [16, 1247], strides = [1, 1]} : vector<16x1280xbf16> to vector<16x1247xbf16>
    %30 = tpu.concatenate %29, %28 in 1 : vector<16x1247xbf16>, vector<16x33xbf16> -> vector<16x1280xbf16>
    %cst_15 = arith.constant 0.000000e+00 : bf16
    %31 = vector.broadcast %cst_15 : bf16 to vector<16x34xbf16>
    %32 = vector.extract_strided_slice %12 {offsets = [0, 34], sizes = [16, 1246], strides = [1, 1]} : vector<16x1280xbf16> to vector<16x1246xbf16>
    %33 = tpu.concatenate %32, %31 in 1 : vector<16x1246xbf16>, vector<16x34xbf16> -> vector<16x1280xbf16>
    %cst_16 = arith.constant 0.000000e+00 : bf16
    %34 = vector.broadcast %cst_16 : bf16 to vector<16x35xbf16>
    %35 = vector.extract_strided_slice %12 {offsets = [0, 35], sizes = [16, 1245], strides = [1, 1]} : vector<16x1280xbf16> to vector<16x1245xbf16>
    %36 = tpu.concatenate %35, %34 in 1 : vector<16x1245xbf16>, vector<16x35xbf16> -> vector<16x1280xbf16>
    %37 = tpu.concatenate %15, %18, %21, %24, %12, %27, %30, %33, %36 in 0 : vector<16x1280xbf16>, vector<16x1280xbf16>, vector<16x1280xbf16>, vector<16x1280xbf16>, vector<16x1280xbf16>, vector<16x1280xbf16>, vector<16x1280xbf16>, vector<16x1280xbf16>, vector<16x1280xbf16> -> vector<144x1280xbf16>
    %c0_17 = arith.constant 0 : index
    %c0_18 = arith.constant 0 : index
    %38 = vector.load %arg5[%c0_17, %c0_18] : memref<16x144xbf16, #tpu.memory_space<vmem>>, vector<16x144xbf16>
    %cst_19 = arith.constant dense<0.000000e+00> : vector<16x1280xf32>
    %39 = tpu.matmul %38, %37, %cst_19 {dimension_numbers = #tpu.dot_dimension_numbers<[1], [0], [0], [1], [0, 0, 1, 1], [], []>} : vector<16x144xbf16>, vector<144x1280xbf16>, vector<16x1280xf32> -> vector<16x1280xf32>
    %c0_20 = arith.constant 0 : index
    %c0_21 = arith.constant 0 : index
    %40 = vector.load %arg6[%c0_20, %c0_21] : memref<16x1xf32, #tpu.memory_space<vmem>>, vector<16x1xf32>
    %41 = vector.broadcast %40 : vector<16x1xf32> to vector<16x1280xf32>
    %42 = arith.addf %39, %41 : vector<16x1280xf32>
    %cst_22 = arith.constant 0.000000e+00 : f32
    %43 = vector.broadcast %cst_22 : f32 to vector<16x1280xf32>
    %44 = arith.maximumf %42, %43 : vector<16x1280xf32>
    %45 = vector.broadcast %2 : vector<1x1280xf32> to vector<16x1280xf32>
    %46 = arith.mulf %44, %45 : vector<16x1280xf32>
    %47 = arith.truncf %46 : vector<16x1280xf32> to vector<16x1280xbf16>
    %cst_23 = arith.constant 0.000000e+00 : bf16
    %48 = vector.broadcast %cst_23 : bf16 to vector<16x35xbf16>
    %49 = vector.extract_strided_slice %47 {offsets = [0, 0], sizes = [16, 1245], strides = [1, 1]} : vector<16x1280xbf16> to vector<16x1245xbf16>
    %50 = tpu.concatenate %48, %49 in 1 : vector<16x35xbf16>, vector<16x1245xbf16> -> vector<16x1280xbf16>
    %cst_24 = arith.constant 0.000000e+00 : bf16
    %51 = vector.broadcast %cst_24 : bf16 to vector<16x34xbf16>
    %52 = vector.extract_strided_slice %47 {offsets = [0, 0], sizes = [16, 1246], strides = [1, 1]} : vector<16x1280xbf16> to vector<16x1246xbf16>
    %53 = tpu.concatenate %51, %52 in 1 : vector<16x34xbf16>, vector<16x1246xbf16> -> vector<16x1280xbf16>
    %cst_25 = arith.constant 0.000000e+00 : bf16
    %54 = vector.broadcast %cst_25 : bf16 to vector<16x33xbf16>
    %55 = vector.extract_strided_slice %47 {offsets = [0, 0], sizes = [16, 1247], strides = [1, 1]} : vector<16x1280xbf16> to vector<16x1247xbf16>
    %56 = tpu.concatenate %54, %55 in 1 : vector<16x33xbf16>, vector<16x1247xbf16> -> vector<16x1280xbf16>
    %cst_26 = arith.constant 0.000000e+00 : bf16
    %57 = vector.broadcast %cst_26 : bf16 to vector<16x1xbf16>
    %58 = vector.extract_strided_slice %47 {offsets = [0, 0], sizes = [16, 1279], strides = [1, 1]} : vector<16x1280xbf16> to vector<16x1279xbf16>
    %59 = tpu.concatenate %57, %58 in 1 : vector<16x1xbf16>, vector<16x1279xbf16> -> vector<16x1280xbf16>
    %cst_27 = arith.constant 0.000000e+00 : bf16
    %60 = vector.broadcast %cst_27 : bf16 to vector<16x1xbf16>
    %61 = vector.extract_strided_slice %47 {offsets = [0, 1], sizes = [16, 1279], strides = [1, 1]} : vector<16x1280xbf16> to vector<16x1279xbf16>
    %62 = tpu.concatenate %61, %60 in 1 : vector<16x1279xbf16>, vector<16x1xbf16> -> vector<16x1280xbf16>
    %cst_28 = arith.constant 0.000000e+00 : bf16
    %63 = vector.broadcast %cst_28 : bf16 to vector<16x33xbf16>
    %64 = vector.extract_strided_slice %47 {offsets = [0, 33], sizes = [16, 1247], strides = [1, 1]} : vector<16x1280xbf16> to vector<16x1247xbf16>
    %65 = tpu.concatenate %64, %63 in 1 : vector<16x1247xbf16>, vector<16x33xbf16> -> vector<16x1280xbf16>
    %cst_29 = arith.constant 0.000000e+00 : bf16
    %66 = vector.broadcast %cst_29 : bf16 to vector<16x34xbf16>
    %67 = vector.extract_strided_slice %47 {offsets = [0, 34], sizes = [16, 1246], strides = [1, 1]} : vector<16x1280xbf16> to vector<16x1246xbf16>
    %68 = tpu.concatenate %67, %66 in 1 : vector<16x1246xbf16>, vector<16x34xbf16> -> vector<16x1280xbf16>
    %cst_30 = arith.constant 0.000000e+00 : bf16
    %69 = vector.broadcast %cst_30 : bf16 to vector<16x35xbf16>
    %70 = vector.extract_strided_slice %47 {offsets = [0, 35], sizes = [16, 1245], strides = [1, 1]} : vector<16x1280xbf16> to vector<16x1245xbf16>
    %71 = tpu.concatenate %70, %69 in 1 : vector<16x1245xbf16>, vector<16x35xbf16> -> vector<16x1280xbf16>
    %72 = tpu.concatenate %50, %53, %56, %59, %47, %62, %65, %68, %71 in 0 : vector<16x1280xbf16>, vector<16x1280xbf16>, vector<16x1280xbf16>, vector<16x1280xbf16>, vector<16x1280xbf16>, vector<16x1280xbf16>, vector<16x1280xbf16>, vector<16x1280xbf16>, vector<16x1280xbf16> -> vector<144x1280xbf16>
    %c0_31 = arith.constant 0 : index
    %c0_32 = arith.constant 0 : index
    %73 = vector.load %arg7[%c0_31, %c0_32] : memref<3x144xbf16, #tpu.memory_space<vmem>>, vector<3x144xbf16>
    %cst_33 = arith.constant dense<0.000000e+00> : vector<3x1280xf32>
    %74 = tpu.matmul %73, %72, %cst_33 {dimension_numbers = #tpu.dot_dimension_numbers<[1], [0], [0], [1], [0, 0, 1, 1], [], []>} : vector<3x144xbf16>, vector<144x1280xbf16>, vector<3x1280xf32> -> vector<3x1280xf32>
    %c0_34 = arith.constant 0 : index
    %c0_35 = arith.constant 0 : index
    %c0_36 = arith.constant 0 : index
    %75 = vector.load %arg8[%c0_34, %c0_35, %c0_36] : memref<1x3x1280xf32, #tpu.memory_space<vmem>>, vector<1x3x1280xf32>
    %76 = vector.shape_cast %75 : vector<1x3x1280xf32> to vector<3x1280xf32>
    %77 = vector.shape_cast %74 : vector<3x1280xf32> to vector<1x3x1280xf32>
    tpu.vector_store %arg8[%c0_34, %c0_35, %c0_36], %77 {strides = array<i32>} : memref<1x3x1280xf32, #tpu.memory_space<vmem>>, vector<1x3x1280xf32>,
    return
  }
  func.func @transform_0(%arg0: i32) -> (i32, i32, i32) {
    %c0_i32 = arith.constant 0 : i32
    %c0_i32_0 = arith.constant 0 : i32
    %c0_i32_1 = arith.constant 0 : i32
    return %arg0, %c0_i32, %c0_i32_0 : i32, i32, i32
  }
  func.func @transform_1(%arg0: i32) -> (i32, i32) {
    %c0_i32 = arith.constant 0 : i32
    %c0_i32_0 = arith.constant 0 : i32
    %c0_i32_1 = arith.constant 0 : i32
    return %c0_i32, %c0_i32_0 : i32, i32
  }
  func.func @transform_2(%arg0: i32) -> (i32, i32) {
    %c0_i32 = arith.constant 0 : i32
    %c0_i32_0 = arith.constant 0 : i32
    %c0_i32_1 = arith.constant 0 : i32
    return %c0_i32, %c0_i32_0 : i32, i32
  }
  func.func @transform_3(%arg0: i32) -> (i32, i32) {
    %c0_i32 = arith.constant 0 : i32
    %c0_i32_0 = arith.constant 0 : i32
    %c0_i32_1 = arith.constant 0 : i32
    return %c0_i32, %c0_i32_0 : i32, i32
  }
  func.func @transform_4(%arg0: i32) -> (i32, i32) {
    %c0_i32 = arith.constant 0 : i32
    %c0_i32_0 = arith.constant 0 : i32
    %c0_i32_1 = arith.constant 0 : i32
    return %c0_i32, %c0_i32_0 : i32, i32
  }
  func.func @transform_5(%arg0: i32) -> (i32, i32) {
    %c0_i32 = arith.constant 0 : i32
    %c0_i32_0 = arith.constant 0 : i32
    %c0_i32_1 = arith.constant 0 : i32
    return %c0_i32, %c0_i32_0 : i32, i32
  }
  func.func @transform_6(%arg0: i32) -> (i32, i32) {
    %c0_i32 = arith.constant 0 : i32
    %c0_i32_0 = arith.constant 0 : i32
    %c0_i32_1 = arith.constant 0 : i32
    return %c0_i32, %c0_i32_0 : i32, i32
  }
  func.func @transform_7(%arg0: i32) -> (i32, i32, i32) {
    %c0_i32 = arith.constant 0 : i32
    %c0_i32_0 = arith.constant 0 : i32
    %c0_i32_1 = arith.constant 0 : i32
    return %arg0, %c0_i32, %c0_i32_0 : i32, i32, i32
  }
}

</mosaic_0001>

<bundles_post_ra>
// kernel: astnet_decoder.5
= control target key start
LH: loop header
LB: loop body
LE: loop exit
PB: predicated region body
PF: predicated region fallthrough
CT: control target
= control target key end

     0   :  { %s1376_s24 = smov 0   ;;  %s1642_s0 = inlined_call_operand.vmem [shape: bf16[2,64,128], index: 0, kind: input, shape index: {}]   ;;  %s1643_s1 = inlined_call_operand.vmem [shape: bf16[2,64,128], index: 1, kind: input, shape index: {}]   ;;  %s1644_s2 = inlined_call_operand.vmem [shape: bf16[128,256], index: 2, kind: input, shape index: {}]   ;;  %s1645_s3 = inlined_call_operand.vmem [shape: bf16[128,256], index: 3, kind: input, shape index: {}]   ;;  %s1646_s4 = inlined_call_operand.vmem [shape: f32[1,256], index: 4, kind: input, shape index: {}]   ;;  %s1647_s5 = inlined_call_operand.vmem [shape: bf16[64,4], index: 5, kind: input, shape index: {}]   ;;  %s1648_s6 = inlined_call_operand.vmem [shape: bf16[4,64], index: 6, kind: input, shape index: {}]   ;;  %s1649_s7 = inlined_call_operand.vmem [shape: bf16[2,64,256], index: 7, kind: output, shape index: {}]  }
   0x1 LB: > { %s1112_s25 = sadd.s32 4294967295, %s1330_s24   ;;  %p1116_p0 = scmp.ge.s32.totalorder %s1330_s24, 1  ;;  %s1330_s24 = sphi %s1376_s24, %s17_s24  }
   0x2   : > { %p247_p1 = scmp.lt.s32.totalorder %s1330_s24, 3 }
   0x4   : > { %p248_p2 = pnand %p1116_p0, %p247_p1 }
   0x5   : > { %v1260_v0 = vld [vmem:[%s1645_s3 + $0x4] ss:$8 sps:$4 sm:$0xff] (!%p248_p2)   ;;  %v1262_v1 = vld [vmem:[%s1645_s3] ss:$8 sps:$4 sm:$0xff] (!%p248_p2)   ;;  %v1332_v2 = vmov (!%p248_p2), 0   ;;  %p284_p3 = scmp.lt.s32.totalorder (!%p248_p2), %s1112_s25, 1  ;;  %v704_v57 = vlaneseq (!%p248_p2) }
   0x6   : > { %251 = sbr.rel (%p248_p2) target bundleno = 1031 (0x407), region = 48  ;;  %484 = vmatprep.mubr.bf16.mxu0 (!%p248_p2), %v1332_v2  ;;  %671 = vmatprep.mubr.bf16.mxu1 (!%p248_p2), %v1332_v2  ;;  %v1263_v3 = vld [vmem:[%s1645_s3 + $0x14] ss:$8 sps:$4 sm:$0xff] (!%p248_p2)   ;;  %v1265_v4 = vld [vmem:[%s1645_s3 + $0x10] ss:$8 sps:$4 sm:$0xff] (!%p248_p2)   ;;  %v1316_v41 = vld [vmem:[%s1647_s5] sm:$0xff] (!%p248_p2)  }
   0x7   : > { %452 = vmatprep.subr.bf16.mxu0 (!%p248_p2), %v1260_v0  ;;  %v1266_v5 = vld [vmem:[%s1645_s3 + $0x24] ss:$8 sps:$4 sm:$0xff] (!%p248_p2)   ;;  %v1271_v7 = vld [vmem:[%s1644_s2] ss:$8 sps:$4 sm:$0xff] (!%p248_p2)   ;;  %v1274_v9 = vld [vmem:[%s1644_s2 + $0x14] ss:$8 sps:$4 sm:$0xff] (!%p248_p2)  }
   0x8   : > { %453 = vmatpush1.bf16.msra.mxu0 (!%p248_p2), %v1262_v1  ;;  %v1268_v6 = vld [vmem:[%s1644_s2 + $0x4] ss:$8 sps:$4 sm:$0xff] (!%p248_p2)   ;;  %v1270_v8 = vld [vmem:[%s1645_s3 + $0x20] ss:$8 sps:$4 sm:$0xff] (!%p248_p2)   ;;  %v1277_v10 = vld [vmem:[%s1644_s2 + $0x10] ss:$8 sps:$4 sm:$0xff] (!%p248_p2)  }
   0x9   : > { %454 = vmatprep.subr.bf16.mxu0 (!%p248_p2), %v1263_v3  ;;  %1216 = vmatprep.subr.bf16.mxu1 (!%p248_p2), %v1268_v6  ;;  %v1272_v11 = vld [vmem:[%s1645_s3 + $0x34] ss:$8 sps:$4 sm:$0xff] (!%p248_p2)   ;;  %v1280_v12 = vld [vmem:[%s1644_s2 + $0x24] ss:$8 sps:$4 sm:$0xff] (!%p248_p2)   ;;  %v1276_v13 = vld [vmem:[%s1645_s3 + $0x30] ss:$8 sps:$4 sm:$0xff] (!%p248_p2)  }
   0xa   : > { %1224 = vmatpush1.bf16.msra.mxu1 (!%p248_p2), %v1271_v7  ;;  %v1283_v14 = vld [vmem:[%s1644_s2 + $0x20] ss:$8 sps:$4 sm:$0xff] (!%p248_p2)   ;;  %v1278_v15 = vld [vmem:[%s1645_s3 + $0x44] ss:$8 sps:$4 sm:$0xff] (!%p248_p2)   ;;  %v1286_v16 = vld [vmem:[%s1644_s2 + $0x34] ss:$8 sps:$4 sm:$0xff] (!%p248_p2)  }
   0xb   : > { %1217 = vmatprep.subr.bf16.mxu1 (!%p248_p2), %v1274_v9  ;;  %v1282_v17 = vld [vmem:[%s1645_s3 + $0x40] ss:$8 sps:$4 sm:$0xff] (!%p248_p2)   ;;  %v1284_v18 = vld [vmem:[%s1645_s3 + $0x54] ss:$8 sps:$4 sm:$0xff] (!%p248_p2)   ;;  %v1289_v19 = vld [vmem:[%s1644_s2 + $0x30] ss:$8 sps:$4 sm:$0xff] (!%p248_p2)  }
   0xc   : > { %455 = vmatpush1.bf16.msra.mxu0 (!%p248_p2), %v1265_v4  ;;  %v1292_v20 = vld [vmem:[%s1644_s2 + $0x44] ss:$8 sps:$4 sm:$0xff] (!%p248_p2)   ;;  %v1288_v21 = vld [vmem:[%s1645_s3 + $0x50] ss:$8 sps:$4 sm:$0xff] (!%p248_p2)   ;;  %v1295_v22 = vld [vmem:[%s1644_s2 + $0x40] ss:$8 sps:$4 sm:$0xff] (!%p248_p2)  }
   0xd   : > { %456 = vmatprep.subr.bf16.mxu0 %v1266_v5  ;;  %s1651_s25 = smov (!%p284_p3, %s1112_s25), 1  ;;  %v1290_v23 = vld [vmem:[%s1645_s3 + $0x64] ss:$8 sps:$4 sm:$0xff]   ;;  %v1298_v24 = vld [vmem:[%s1644_s2 + $0x54] ss:$8 sps:$4 sm:$0xff]   ;;  %v1333_v42 = vmov 0.0  }
   0xe   : > { %1225 = vmatpush1.bf16.msra.mxu1 %v1277_v10  ;;  %s1180_s14 = sshll.u32 %s1651_s25, 5  ;;  %v1294_v25 = vld [vmem:[%s1645_s3 + $0x60] ss:$8 sps:$4 sm:$0xff]   ;;  %v1296_v26 = vld [vmem:[%s1645_s3 + $0x74] ss:$8 sps:$4 sm:$0xff]   ;;  %v1522_v62 = vshrl.u32 %v704_v57, 7 }
   0xf   : > { %1218 = vmatprep.subr.bf16.mxu1 %v1280_v12  ;;  %s1456_s27 = scalar_lea.vmem %s1643_s1, %s1180_s14  ;;  %s1479_s20 = scalar_lea.vmem %s1642_s0, %s1180_s14  ;;  %v1301_v27 = vld [vmem:[%s1644_s2 + $0x50] ss:$8 sps:$4 sm:$0xff]   ;;  %v1303_v28 = vld [vmem:[%s1644_s2 + $0x64] ss:$8 sps:$4 sm:$0xff]   ;;  %v1305_v30 = vld [vmem:[%s1644_s2 + $0x60] ss:$8 sps:$4 sm:$0xff]  }
  0x10   : > { %457 = vmatpush1.bf16.msra.mxu0 %v1270_v8  ;;  %v1300_v29 = vld [vmem:[%s1645_s3 + $0x70] ss:$8 sps:$4 sm:$0xff]   ;;  %v1302_v31 = vld [vmem:[%s1456_s27] sm:$0xff]   ;;  %v1306_v32 = vld [vmem:[%s1644_s2 + $0x74] ss:$8 sps:$4 sm:$0xff]   ;;  %s1334_s22 = smov 64  }
  0x11   : > { %458 = vmatprep.subr.bf16.mxu0 %v1272_v11  ;;  %v1308_v33 = vld [vmem:[%s1644_s2 + $0x70] ss:$8 sps:$4 sm:$0xff]   ;;  %v1310_v34 = vld [vmem:[%s1479_s20 + $0x8] sm:$0xff]   ;;  %v1315_v40 = vld [vmem:[%s1479_s20] sm:$0xff]   ;;  %vm1335_vm0 = vmmov 0   ;;  %vm824_vm1 = vcmask 1040384  }
  0x12   : > { %1226 = vmatpush1.bf16.msra.mxu1 %v1283_v14  ;;  %v1309_v35 = vld [vmem:[%s1456_s27 + $0x8] sm:$0xff]   ;;  %v1312_v36 = vld [vmem:[%s1479_s20 + $0x10] sm:$0xff]   ;;  %v1314_v38 = vld [vmem:[%s1479_s20 + $0x18] sm:$0xff]   ;;  %vm910_vm2 = vcmask 1041408   ;;  %vm859_vm3 = vcmask 523264   ;;  %vm906_vm4 = vcmask 31744  }
  0x13   : > { %1219 = vmatprep.subr.bf16.mxu1 %v1286_v16  ;;  %v1311_v37 = vld [vmem:[%s1456_s27 + $0x10] sm:$0xff]   ;;  %v1313_v39 = vld [vmem:[%s1456_s27 + $0x18] sm:$0xff]   ;;  %v1317_v43 = vld [vmem:[%s1647_s5 + $0x8] sm:$0xff]   ;;  %s1182_s28 = sshll.u32 %s1651_s25, 6 }
  0x14   : > { %459 = vmatpush1.bf16.msra.mxu0 %v1276_v13  ;;  %s298_s14 = scalar_lea.vmem %s1649_s7, %s1182_s28 }
  0x15   : > { %460 = vmatprep.subr.bf16.mxu0 %v1278_v15 }
  0x16   : > { %1227 = vmatpush1.bf16.msra.mxu1 %v1289_v19 }
  0x17   : > { %1220 = vmatprep.subr.bf16.mxu1 %v1292_v20 }
  0x18   : > { %461 = vmatpush1.bf16.msra.mxu0 %v1282_v17 }
  0x19   : > { %462 = vmatprep.subr.bf16.mxu0 %v1284_v18 }
  0x1a   : > { %1228 = vmatpush1.bf16.msra.mxu1 %v1295_v22 }
  0x1b   : > { %1221 = vmatprep.subr.bf16.mxu1 %v1298_v24 }
  0x1c   : > { %463 = vmatpush1.bf16.msra.mxu0 %v1288_v21 }
  0x1d   : > { %464 = vmatprep.subr.bf16.mxu0 %v1290_v23 }
  0x1e   : > { %1229 = vmatpush1.bf16.msra.mxu1 %v1301_v27 }
  0x1f   : > { %1222 = vmatprep.subr.bf16.mxu1 %v1303_v28 }
  0x20   : > { %465 = vmatpush1.bf16.msra.mxu0 %v1294_v25 }
  0x21   : > { %466 = vmatprep.subr.bf16.mxu0 %v1296_v26 }
  0x22   : > { %1230 = vmatpush1.bf16.msra.mxu1 %v1305_v30 }
  0x23   : > { %1223 = vmatprep.subr.bf16.mxu1 %v1306_v32 }
  0x24   : > { %467 = vmatpush1.bf16.msra.mxu0 %v1300_v29 }
  0x25   : > { %629 = vmatprep.subr.bf16.mxu0 %v1268_v6 }
  0x26   : > { %1231 = vmatpush1.bf16.msra.mxu1 %v1308_v33 }
  0x27   : > { %485 = vmatmul.mubr.bf16.vlgmr.msra.gmra.mrb[0].mxu0 %v1302_v31  ;;  %1198 = vmatprep.subr.bf16.mxu1 %v1333_v42 }
  0x28   : > { %630 = vmatpush1.bf16.msra.mxu0 %v1271_v7  ;;  %494 = vmatprep.mubr.bf16.mxu0 %v1332_v2  ;;  %v706_v7 = vsub.s32 0, %v1522_v62 }
  0x29   : > { %631 = vmatprep.subr.bf16.mxu0 %v1274_v9  ;;  %672 = vmatmul.mubr.bf16.vlgmr.msra.gmra.mrb[0].mxu1 %v1310_v34  ;;  %v702_v9 = vld [vmem:[%s1646_s4] sm:$0x3] }
  0x2a   : > { %681 = vmatprep.mubr.bf16.mxu1 %v1332_v2  ;;  %1199 = vmatpush3.bf16.msra.mxu1 %v1316_v41 }
  0x2b   : > { %1200 = vmatprep.subr.bf16.mxu1 %v1333_v42 }
  0x2c   : > { %632 = vmatpush1.bf16.msra.mxu0 %v1277_v10  ;;  %v710_v10 = vsub.s32 1, %v1522_v62 }
  0x2d   : > { %633 = vmatprep.subr.bf16.mxu0 %v1280_v12 }
  0x2e   : > { %1201 = vmatpush3.bf16.msra.mxu1 %v1317_v43  ;;  %v711_v17 = vrot.slane %v702_v9, %v710_v10 }
  0x2f   : > { %495 = vmatmul.mubr.bf16.gmra.mrb[4].mxu0 %v1309_v35  ;;  %1202 = vmatprep.subr.bf16.mxu1 %v1333_v42 }
  0x30   : > { %634 = vmatpush1.bf16.msra.mxu0 %v1283_v14  ;;  %504 = vmatprep.mubr.bf16.mxu0 %v1332_v2  ;;  %v707_v14 = vrot.slane %v702_v9, %v706_v7 }
  0x31   : > { %635 = vmatprep.subr.bf16.mxu0 %v1286_v16  ;;  %682 = vmatmul.mubr.bf16.gmra.mrb[4].mxu1 %v1312_v36 }
  0x32   : > { %691 = vmatprep.mubr.bf16.mxu1 %v1332_v2 }
  0x34   : > { %636 = vmatpush1.bf16.msra.mxu0 %v1289_v19 }
  0x35   : > { %637 = vmatprep.subr.bf16.mxu0 %v1292_v20 }
  0x37   : > { %505 = vmatmul.mubr.bf16.gmra.mrb[8].mxu0 %v1311_v37 }
  0x38   : > { %638 = vmatpush1.bf16.msra.mxu0 %v1295_v22  ;;  %514 = vmatprep.mubr.bf16.mxu0 %v1332_v2 }
  0x39   : > { %639 = vmatprep.subr.bf16.mxu0 %v1298_v24  ;;  %692 = vmatmul.mubr.bf16.gmra.mrb[8].mxu1 %v1314_v38 }
  0x3a   : > { %1206 = vmatprep.mubr.msk.bf16.mxu1 %vm1335_vm0, %v1333_v42 }
  0x3c   : > { %640 = vmatpush1.bf16.msra.mxu0 %v1301_v27 }
  0x3d   : > { %641 = vmatprep.subr.bf16.mxu0 %v1303_v28 }
  0x3f   : > { %515 = vmatmul.mubr.bf16.gmra.mrb[12].mxu0 %v1313_v39 }
  0x40   : > { %642 = vmatpush1.bf16.msra.mxu0 %v1305_v30  ;;  %661 = vmatprep.mubr.bf16.mxu0 %v1332_v2 }
  0x41   : > { %643 = vmatprep.subr.bf16.mxu0 %v1306_v32 }
  0x44   : > { %644 = vmatpush1.bf16.msra.mxu0 %v1308_v33 }
  0x47   : > { %662 = vmatmul.mubr.bf16.vlgmr.msra.gmra.mrb[0].mxu0 %v1315_v40 }
  0xfc   : > { %v673_v44 = vpop.f32.mrb[0].mxu1 }
  0xfd   : > { %v675_v45 = vpop.f32.mrb[1].mxu1 }
  0xfe   : > { %v677_v46 = vpop.f32.mrb[2].mxu1 }
  0xff   : > { %v679_v47 = vpop.f32.mrb[3].mxu1 }
 0x102   : > { %v496_v48 = vpop.f32.mrb[4].mxu0 }
 0x103   : > { %v674_v49 = vadd.f32 %v673_v44, %v496_v48  ;;  %v498_v50 = vpop.f32.mrb[5].mxu0 }
 0x104   : > { %v676_v51 = vadd.f32 %v675_v45, %v498_v50  ;;  %v500_v52 = vpop.f32.mrb[6].mxu0  ;;  %v683_v56 = vpop.f32.mrb[4].mxu1 }
 0x105   : > { %v678_v53 = vadd.f32 %v677_v46, %v500_v52  ;;  %v502_v54 = vpop.f32.mrb[7].mxu0  ;;  %v685_v58 = vpop.f32.mrb[5].mxu1  ;;  %v718_v23 = vadd.f32 %v707_v14, %v674_v49 }
 0x106   : > { %v680_v55 = vadd.f32 %v679_v47, %v502_v54  ;;  %v687_v59 = vpop.f32.mrb[6].mxu1  ;;  %v719_v24 = vadd.f32 %v711_v17, %v676_v51 }
 0x107   : > { %v689_v60 = vpop.f32.mrb[7].mxu1  ;;  %v720_v25 = vadd.f32 %v707_v14, %v678_v53  ;;  %v1531_v30 = vmax.f32 %v718_v23, 0.0 }
 0x108   : > { %v721_v26 = vadd.f32 %v711_v17, %v680_v55  ;;  %v1533_v33 = vmax.f32 %v719_v24, 0.0 }
 0x109   : > { %v1535_v34 = vmax.f32 %v720_v25, 0.0 }
 0x10a   : > { %v506_v61 = vpop.f32.mrb[8].mxu0  ;;  %v1537_v35 = vmax.f32 %v721_v26, 0.0 }
 0x10b   : > { %v684_v63 = vadd.f32 %v683_v56, %v506_v61  ;;  %v508_v0 = vpop.f32.mrb[9].mxu0 }
 0x10c   : > { %v686_v1 = vadd.f32 %v685_v58, %v508_v0  ;;  %v510_v2 = vpop.f32.mrb[10].mxu0  ;;  %v693_v6 = vpop.f32.mrb[8].mxu1 }
 0x10d   : > { %v688_v3 = vadd.f32 %v687_v59, %v510_v2  ;;  %v512_v4 = vpop.f32.mrb[11].mxu0  ;;  %v695_v8 = vpop.f32.mrb[9].mxu1  ;;  %v722_v27 = vadd.f32 %v707_v14, %v684_v63 }
 0x10e   : > { %v690_v5 = vadd.f32 %v689_v60, %v512_v4  ;;  %v697_v11 = vpop.f32.mrb[10].mxu1  ;;  %v723_v28 = vadd.f32 %v711_v17, %v686_v1 }
 0x10f   : > { %v699_v12 = vpop.f32.mrb[11].mxu1  ;;  %v1539_v38 = vmax.f32 %v722_v27, 0.0  ;;  %v724_v39 = vadd.f32 %v707_v14, %v688_v3 }
 0x110   : > { %v1543_v44 = vmax.f32 %v723_v28, 0.0  ;;  %v725_v45 = vadd.f32 %v711_v17, %v690_v5 }
 0x111   : > { %v1555_v56 = vmax.f32 %v724_v39, 0.0 }
 0x112   : > { %v516_v13 = vpop.f32.mrb[12].mxu0  ;;  %v1562_v60 = vmax.f32 %v725_v45, 0.0 }
 0x113   : > { %v694_v15 = vadd.f32 %v693_v6, %v516_v13  ;;  %v518_v16 = vpop.f32.mrb[13].mxu0 }
 0x114   : > { %v696_v18 = vadd.f32 %v695_v8, %v518_v16  ;;  %v520_v19 = vpop.f32.mrb[14].mxu0 }
 0x115   : > { %v698_v20 = vadd.f32 %v697_v11, %v520_v19  ;;  %v522_v21 = vpop.f32.mrb[15].mxu0  ;;  %v726_v48 = vadd.f32 %v707_v14, %v694_v15 }
 0x116   : > { %v700_v22 = vadd.f32 %v699_v12, %v522_v21  ;;  %v727_v52 = vadd.f32 %v711_v17, %v696_v18 }
 0x117   : > { %v728_v49 = vadd.f32 %v707_v14, %v698_v20  ;;  %v1569_v1 = vmax.f32 %v726_v48, 0.0 }
 0x118   : > { %v729_v53 = vadd.f32 %v711_v17, %v700_v22  ;;  %v1575_v5 = vmax.f32 %v727_v52, 0.0 }
 0x119   : > { %v1571_v2 = vmax.f32 %v728_v49, 0.0 }
 0x11a   : > { %v663_v29 = vpop.f32.mrb[0].mxu0  ;;  %v1577_v6 = vmax.f32 %v729_v53, 0.0 }
 0x11b   : > { %v714_v31 = vadd.f32 %v707_v14, %v663_v29  ;;  %v665_v32 = vpop.f32.mrb[1].mxu0 }
 0x11c   : > { %v715_v36 = vadd.f32 %v711_v17, %v665_v32  ;;  %v667_v37 = vpop.f32.mrb[2].mxu0 }
 0x11d   : > { %v1541_v40 = vmax.f32 %v714_v31, 0.0  ;;  %v716_v41 = vadd.f32 %v707_v14, %v667_v37  ;;  %v669_v43 = vpop.f32.mrb[3].mxu0 }
 0x11e   : > { %v1545_v46 = vmax.f32 %v715_v36, 0.0  ;;  %v717_v47 = vadd.f32 %v711_v17, %v669_v43 }
 0x11f   : > { %v772_v50 = vmax.f32 %v1541_v40, %v1531_v30  ;;  %v1549_v51 = vmax.f32 %v716_v41, 0.0 }
 0x120   : > { %v785_v54 = vmax.f32 %v1545_v46, %v1533_v33  ;;  %v1553_v55 = vmax.f32 %v717_v47, 0.0  ;;  %v1318_v47 = vld [vmem:[%s1647_s5 + $0x10] sm:$0xff]  }
 0x121   : > { %v774_v57 = vmax.f32 %v772_v50, %v1539_v38  ;;  %v746_v58 = vadd.f32 %v1549_v51, %v1541_v40  ;;  %v773_v59 = vmax.f32 %v1549_v51, %v1535_v34  ;;  %1203 = vmatpush3.bf16.msra.mxu1 %v1318_v47 }
 0x122   : > { %v787_v61 = vmax.f32 %v785_v54, %v1543_v44  ;;  %v759_v63 = vadd.f32 %v1553_v55, %v1545_v46  ;;  %v786_v0 = vmax.f32 %v1553_v55, %v1537_v35  ;;  %1204 = vmatprep.subr.bf16.mxu1 %v1333_v42 }
 0x123   : > { %v747_v3 = vadd.f32 %v746_v58, %v1531_v30  ;;  %v775_v4 = vmax.f32 %v773_v59, %v1555_v56  ;;  %v776_v10 = vmax.f32 %v774_v57, %v1569_v1  ;;  %v1319_v57 = vld [vmem:[%s1647_s5 + $0x18] sm:$0xff]  }
 0x124   : > { %v760_v8 = vadd.f32 %v759_v63, %v1533_v33  ;;  %v788_v9 = vmax.f32 %v786_v0, %v1562_v60  ;;  %v789_v13 = vmax.f32 %v787_v61, %v1575_v5 }
 0x125   : > { %v748_v11 = vadd.f32 %v747_v3, %v1535_v34  ;;  %v777_v12 = vmax.f32 %v775_v4, %v1571_v2  ;;  %1205 = vmatpush3.bf16.msra.mxu1 %v1319_v57 }
 0x126   : > { %v761_v14 = vadd.f32 %v760_v8, %v1537_v35  ;;  %v790_v15 = vmax.f32 %v788_v9, %v1577_v6  ;;  %1210 = vmatprep.subr.bf16.mxu1 %v1333_v42 }
 0x127   : > { %v749_v16 = vadd.f32 %v748_v11, %v1539_v38  ;;  %v778_v17 = vmax.f32 %v776_v10, %v777_v12 }
 0x128   : > { %v762_v18 = vadd.f32 %v761_v14, %v1543_v44  ;;  %v791_v19 = vmax.f32 %v789_v13, %v790_v15 }
 0x129   : > { %v750_v20 = vadd.f32 %v749_v16, %v1555_v56  ;;  %v779_v21 = vrot.slane %v778_v17, 4 }
 0x12a   : > { %v763_v22 = vadd.f32 %v762_v18, %v1562_v60  ;;  %v792_v23 = vrot.slane %v791_v19, 4 }
 0x12b   : > { %v751_v24 = vadd.f32 %v750_v20, %v1569_v1  ;;  %v780_v27 = vmax.f32 %v778_v17, %v779_v21 }
 0x12c   : > { %v764_v25 = vadd.f32 %v763_v22, %v1575_v5  ;;  %v793_v29 = vmax.f32 %v791_v19, %v792_v23  ;;  %v905_v19 = vld [vmem:[%s1648_s6] sm:$0x3] }
 0x12d   : > { %v752_v26 = vadd.f32 %v751_v24, %v1571_v2  ;;  %v781_v37 = vrot.slane %v780_v27, 2  ;;  %v912_v22 = vsel %vm910_vm2, %v905_v19, 0 }
 0x12e   : > { %v765_v28 = vadd.f32 %v764_v25, %v1577_v6  ;;  %v794_v41 = vrot.slane %v793_v29, 2 }
 0x12f   : > { %v753_v31 = vrot.slane %v752_v26, 4  ;;  %v782_v49 = vmax.f32 %v780_v27, %v781_v37 }
 0x130   : > { %v766_v32 = vrot.slane %v765_v28, 4  ;;  %v795_v52 = vmax.f32 %v793_v29, %v794_v41 }
 0x131   : > { %v754_v36 = vadd.f32 %v753_v31, %v752_v26  ;;  %v783_v59 = vrot.slane %v782_v49, 1 }
 0x132   : > { %v767_v39 = vadd.f32 %v766_v32, %v765_v28  ;;  %v796_v63 = vrot.slane %v795_v52, 1 }
 0x133   : > { %v755_v43 = vrot.slane %v754_v36, 2  ;;  %v784_v0 = vmax.f32 %v782_v49, %v783_v59 }
 0x134   : > { %v768_v45 = vrot.slane %v767_v39, 2  ;;  %v797_v3 = vmax.f32 %v795_v52, %v796_v63 }
 0x135   : > { %v756_v48 = vadd.f32 %v755_v43, %v754_v36 }
 0x136   : > { %v769_v50 = vadd.f32 %v768_v45, %v767_v39 }
 0x137   : > { %v757_v53 = vrot.slane %v756_v48, 1 }
 0x138   : > { %v770_v54 = vrot.slane %v769_v50, 1 }
 0x139   : > { %v758_v58 = vadd.f32 %v757_v53, %v756_v48 }
 0x13a   : > { %v771_v61 = vadd.f32 %v770_v54, %v769_v50 }
 0x13b   : > { %799 = vrot.lane.b32.xlu0 %v758_v58, %s1334_s22 }
 0x13c   : > { %811 = vrot.lane.b32.xlu1 %v771_v61, %s1334_s22 }
 0x13f   : > { %804 = vrot.lane.b32.xlu0 %v784_v0, %s1334_s22 }
 0x140   : > { %816 = vrot.lane.b32.xlu1 %v797_v3, %s1334_s22 }
 0x1ad   : > { %v800_v4 = vpop.permute.xlu0 %799 }
 0x1ae   : > { %v802_v8 = vadd.f32 %v800_v4, %v758_v58  ;;  %v812_v9 = vpop.permute.xlu1 %811 }
 0x1b0   : > { %v808_v10 = vadd.f32 %v802_v8, %v771_v61 }
 0x1b1   : > { %v805_v11 = vpop.permute.xlu0 %804 }
 0x1b2   : > { %v807_v12 = vmax.f32 %v784_v0, %v805_v11  ;;  %v814_v13 = vadd.f32 %v812_v9, %v808_v10  ;;  %v817_v15 = vpop.permute.xlu1 %816 }
 0x1b4   : > { %v809_v14 = vmax.f32 %v807_v12, %v797_v3  ;;  %v820_v17 = vmul.f32 0.00390625, %v814_v13 }
 0x1b6   : > { %v819_v16 = vmax.f32 %v809_v14, %v817_v15 }
 0x1b8   : > { %v822_v18 = vrot.slane %v819_v16, 7 }
 0x1ba   : > { %v825_v20 = vsel %vm824_vm1, %v820_v17, %v822_v18 }
 0x1bb   : > { %v826_v21 = vpack.c.bf16 %v825_v20, %v825_v20 }
 0x1bd   : > { %1207 = vmatmul.mubr.msk.bf16.vlgmr.msra.gmra.mrb[12].mxu1 %vm859_vm3, %v826_v21 }
 0x1be   : > { %1211 = vmatpush3.bf16.msra.mxu1 %v912_v22  ;;  %1212 = vmatprep.mubr.msk.bf16.mxu1 %vm1335_vm0, %v1333_v42 }
 0x290   : > { %v897_v23 = vpop.f32.mrb[12].mxu1 }
 0x291   : > { %v903_v24 = vmax.f32 %v897_v23, 0.0  ;;  %v1208_v25 = vpop.f32.mrb[13].mxu1 }
 0x292   : > { %v900_v26 = vpop.f32.mrb[14].mxu1 }
 0x293   : > { %v904_v27 = vpack.c.bf16 %v903_v24, %v903_v24  ;;  %v1209_v28 = vpop.f32.mrb[15].mxu1 }
 0x295   : > { %1213 = vmatmul.mubr.msk.bf16.vlgmr.msra.gmra.mrb[16].mxu1 %vm906_vm4, %v904_v27 }
 0x368   : > { %v948_v29 = vpop.f32.mrb[16].mxu1 }
 0x369   : > { %v955_v31 = vrot.slane %v948_v29, 1  ;;  %v1214_v32 = vpop.f32.mrb[17].mxu1 }
 0x36a   : > { %v951_v36 = vpop.f32.mrb[18].mxu1 }
 0x36b   : > { %v957_v37 = vadd.f32 %v955_v31, %v948_v29  ;;  %v1215_v39 = vpop.f32.mrb[19].mxu1 }
 0x36d   : > { %v1169_v41 = vmul.f32 -1.442695, %v957_v37 }
 0x36f   : > { %1320 = vpow2.f32 %v1169_v41 }
 0x379   : > { %v1321_v43 = vpop.eup %1320 }
 0x37a   : > { %v961_v45 = vadd.f32 1.0, %v1321_v43 }
 0x37c   : > { %1322 = vrcp.f32 %v961_v45 }
 0x386   : > { %v1323_v42 = vpop.eup %1322 }
 0x387   : > { %965 = vrot.lane.b32.xlu0 %v1323_v42, %s1334_s22 }
 0x3f9   : > { %v966_v47 = vpop.permute.xlu0 %965 }
 0x3fa   : > { %v968_v48 = vsel %vm859_vm3, %v1323_v42, %v966_v47 }
 0x3fb   : > { %v972_v49 = vrot.slane %v968_v48, %v706_v7 }
 0x3fd   : > { %v973_v50 = vmul.f32 %v972_v49, %v1541_v40  ;;  %v974_v52 = vmul.f32 %v972_v49, %v1545_v46  ;;  %v975_v53 = vmul.f32 %v972_v49, %v1549_v51  ;;  %v976_v54 = vmul.f32 %v972_v49, %v1553_v55 }
 0x3fe   : > { %v977_v57 = vmul.f32 %v972_v49, %v1531_v30  ;;  %v978_v58 = vmul.f32 %v972_v49, %v1533_v33  ;;  %v979_v59 = vmul.f32 %v972_v49, %v1535_v34  ;;  %v980_v61 = vmul.f32 %v972_v49, %v1537_v35 }
 0x3ff   : > { %v981_v62 = vmul.f32 %v972_v49, %v1539_v38  ;;  %v982_v7 = vmul.f32 %v972_v49, %v1543_v44  ;;  %v983_v40 = vmul.f32 %v972_v49, %v1555_v56  ;;  %v984_v46 = vmul.f32 %v972_v49, %v1562_v60 }
 0x400   : > { %v985_v30 = vmul.f32 %v972_v49, %v1569_v1  ;;  %v986_v33 = vmul.f32 %v972_v49, %v1575_v5  ;;  %v987_v34 = vmul.f32 %v972_v49, %v1571_v2  ;;  %v988_v35 = vmul.f32 %v972_v49, %v1577_v6 }
 0x401   : > { %v1183_v51 = vpack.c.bf16 %v974_v52, %v973_v50  ;;  %v1184_v38 = vpack.c.bf16 %v976_v54, %v975_v53  ;;  %v1185_v55 = vpack.c.bf16 %v978_v58, %v977_v57  ;;  %v1186_v44 = vpack.c.bf16 %v980_v61, %v979_v59 }
 0x402   : > { %v1187_v63 = vpack.c.bf16 %v982_v7, %v981_v62  ;;  %v1188_v56 = vpack.c.bf16 %v984_v46, %v983_v40  ;;  %v1189_v0 = vpack.c.bf16 %v986_v33, %v985_v30  ;;  %v1190_v60 = vpack.c.bf16 %v988_v35, %v987_v34 }
 0x403   : > { %1037 = vst [vmem:[%s298_s14] sm:$0xff] %v1183_v51  ;;  %1038 = vst [vmem:[%s298_s14 + $0x8] sm:$0xff] %v1184_v38 }
 0x404   : > { %1039 = vst [vmem:[%s298_s14 + $0x10] sm:$0xff] %v1185_v55  ;;  %1040 = vst [vmem:[%s298_s14 + $0x18] sm:$0xff] %v1186_v44 }
 0x405   : > { %1041 = vst [vmem:[%s298_s14 + $0x20] sm:$0xff] %v1187_v63  ;;  %1042 = vst [vmem:[%s298_s14 + $0x28] sm:$0xff] %v1188_v56 }
 0x406   : > { %1043 = vst [vmem:[%s298_s14 + $0x30] sm:$0xff] %v1189_v0  ;;  %1044 = vst [vmem:[%s298_s14 + $0x38] sm:$0xff] %v1190_v60 }
 0x407 PF: > { %s17_s24 = sadd.s32 1, %s1330_s24  }
 0x408   : > { %p14_p4 = scmp.ge.s32.totalorder %s17_s24, 4  }
 0x40a   :  { %16 = sbr.rel (!%p14_p4) target bundleno = 1 (0x1), region = 81 }

// kernel: astnet_decoder.4
= control target key start
LH: loop header
LB: loop body
LE: loop exit
PB: predicated region body
PF: predicated region fallthrough
CT: control target
= control target key end

     0   :  { %s5928_s18 = smov 0   ;;  %s7643_s0 = inlined_call_operand.vmem [shape: bf16[2,16,2048], index: 0, kind: input, shape index: {}]   ;;  %s7644_s1 = inlined_call_operand.vmem [shape: bf16[2048,512], index: 1, kind: input, shape index: {}]   ;;  %s7645_s2 = inlined_call_operand.vmem [shape: f32[1,512], index: 2, kind: input, shape index: {}]   ;;  %s7646_s3 = inlined_call_operand.vmem [shape: bf16[128,8], index: 3, kind: input, shape index: {}]   ;;  %s7647_s4 = inlined_call_operand.vmem [shape: bf16[8,128], index: 4, kind: input, shape index: {}]   ;;  %s7648_s5 = inlined_call_operand.vmem [shape: bf16[2,16,512], index: 5, kind: output, shape index: {}]  }
   0x1 LB: > { %s4438_s19 = sadd.s32 4294967295, %s5894_s18   ;;  %p4442_p0 = scmp.ge.s32.totalorder %s5894_s18, 1  ;;  %s5894_s18 = sphi %s5928_s18, %s15_s18  }
   0x2   : > { %p187_p1 = scmp.lt.s32.totalorder %s5894_s18, 3 }
   0x4   : > { %p188_p2 = pnand %p4442_p0, %p187_p1 }
   0x5   : > { %v5108_v0 = vld [vmem:[%s7644_s1 + $0x4] ss:$16 sps:$4 sm:$0xff] (!%p188_p2)   ;;  %v5110_v1 = vld [vmem:[%s7644_s1 + $0xc] ss:$16 sps:$4 sm:$0xff] (!%p188_p2)   ;;  %v5112_v2 = vld [vmem:[%s7644_s1] ss:$16 sps:$4 sm:$0xff] (!%p188_p2)  }
   0x6   : > { %191 = sbr.rel (%p188_p2) target bundleno = 1228 (0x4cc), region = 40  ;;  %3416 = vmatprep.subr.bf16.mxu0 (!%p188_p2), %v5108_v0  ;;  %v5113_v3 = vld [vmem:[%s7644_s1 + $0x8] ss:$16 sps:$4 sm:$0xff] (!%p188_p2)   ;;  %3760 = vmatprep.subr.bf16.mxu1 (!%p188_p2), %v5110_v1  ;;  %v5114_v4 = vld [vmem:[%s7644_s1 + $0x24] ss:$16 sps:$4 sm:$0xff] (!%p188_p2)   ;;  %p215_p3 = scmp.lt.s32.totalorder (!%p188_p2), %s4438_s19, 1 }
   0x7   : > { %3417 = vmatpush1.bf16.msra.mxu0 (!%p188_p2), %v5112_v2  ;;  %3761 = vmatpush1.bf16.msra.mxu1 (!%p188_p2), %v5113_v3  ;;  %v5116_v5 = vld [vmem:[%s7644_s1 + $0x2c] ss:$16 sps:$4 sm:$0xff] (!%p188_p2)   ;;  %v5118_v6 = vld [vmem:[%s7644_s1 + $0x20] ss:$16 sps:$4 sm:$0xff] (!%p188_p2)   ;;  %v5119_v7 = vld [vmem:[%s7644_s1 + $0x28] ss:$16 sps:$4 sm:$0xff] (!%p188_p2)  }
   0x8   : > { %3418 = vmatprep.subr.bf16.mxu0 (!%p188_p2), %v5114_v4  ;;  %3762 = vmatprep.subr.bf16.mxu1 (!%p188_p2), %v5116_v5  ;;  %v5120_v8 = vld [vmem:[%s7644_s1 + $0x44] ss:$16 sps:$4 sm:$0xff] (!%p188_p2)   ;;  %v5122_v9 = vld [vmem:[%s7644_s1 + $0x4c] ss:$16 sps:$4 sm:$0xff] (!%p188_p2)   ;;  %v5124_v10 = vld [vmem:[%s7644_s1 + $0x40] ss:$16 sps:$4 sm:$0xff] (!%p188_p2)  }
   0x9   : > { %v5125_v11 = vld [vmem:[%s7644_s1 + $0x48] ss:$16 sps:$4 sm:$0xff] (!%p188_p2)   ;;  %v5126_v12 = vld [vmem:[%s7644_s1 + $0x64] ss:$16 sps:$4 sm:$0xff] (!%p188_p2)   ;;  %v5128_v13 = vld [vmem:[%s7644_s1 + $0x6c] ss:$16 sps:$4 sm:$0xff] (!%p188_p2)  }
   0xa   : > { %v5130_v14 = vld [vmem:[%s7644_s1 + $0x60] ss:$16 sps:$4 sm:$0xff] (!%p188_p2)   ;;  %v5131_v15 = vld [vmem:[%s7644_s1 + $0x68] ss:$16 sps:$4 sm:$0xff] (!%p188_p2)   ;;  %v5132_v16 = vld [vmem:[%s7644_s1 + $0x84] ss:$16 sps:$4 sm:$0xff] (!%p188_p2)  }
   0xb   : > { %3419 = vmatpush1.bf16.msra.mxu0 (!%p188_p2), %v5118_v6  ;;  %3763 = vmatpush1.bf16.msra.mxu1 (!%p188_p2), %v5119_v7  ;;  %v5134_v17 = vld [vmem:[%s7644_s1 + $0x8c] ss:$16 sps:$4 sm:$0xff] (!%p188_p2)   ;;  %v5136_v18 = vld [vmem:[%s7644_s1 + $0x80] ss:$16 sps:$4 sm:$0xff] (!%p188_p2)   ;;  %v5137_v19 = vld [vmem:[%s7644_s1 + $0x88] ss:$16 sps:$4 sm:$0xff] (!%p188_p2)  }
   0xc   : > { %3420 = vmatprep.subr.bf16.mxu0 (!%p188_p2), %v5120_v8  ;;  %3764 = vmatprep.subr.bf16.mxu1 (!%p188_p2), %v5122_v9  ;;  %v5138_v20 = vld [vmem:[%s7644_s1 + $0xa4] ss:$16 sps:$4 sm:$0xff] (!%p188_p2)   ;;  %v5140_v21 = vld [vmem:[%s7644_s1 + $0xac] ss:$16 sps:$4 sm:$0xff] (!%p188_p2)   ;;  %v5142_v22 = vld [vmem:[%s7644_s1 + $0xa0] ss:$16 sps:$4 sm:$0xff] (!%p188_p2)  }
   0xd   : > { %v5143_v23 = vld [vmem:[%s7644_s1 + $0xa8] ss:$16 sps:$4 sm:$0xff]   ;;  %v5144_v24 = vld [vmem:[%s7644_s1 + $0xc4] ss:$16 sps:$4 sm:$0xff]   ;;  %v5146_v25 = vld [vmem:[%s7644_s1 + $0xcc] ss:$16 sps:$4 sm:$0xff]  }
   0xe   : > { %v5148_v26 = vld [vmem:[%s7644_s1 + $0xc0] ss:$16 sps:$4 sm:$0xff]   ;;  %v5149_v27 = vld [vmem:[%s7644_s1 + $0xc8] ss:$16 sps:$4 sm:$0xff]   ;;  %v5150_v28 = vld [vmem:[%s7644_s1 + $0xe4] ss:$16 sps:$4 sm:$0xff]  }
   0xf   : > { %3421 = vmatpush1.bf16.msra.mxu0 %v5124_v10  ;;  %3765 = vmatpush1.bf16.msra.mxu1 %v5125_v11  ;;  %v5152_v29 = vld [vmem:[%s7644_s1 + $0xec] ss:$16 sps:$4 sm:$0xff]   ;;  %v5154_v30 = vld [vmem:[%s7644_s1 + $0xe0] ss:$16 sps:$4 sm:$0xff]   ;;  %v5155_v31 = vld [vmem:[%s7644_s1 + $0xe8] ss:$16 sps:$4 sm:$0xff]  }
  0x10   : > { %3422 = vmatprep.subr.bf16.mxu0 %v5126_v12  ;;  %3766 = vmatprep.subr.bf16.mxu1 %v5128_v13  ;;  %v5156_v32 = vld [vmem:[%s7644_s1 + $0x104] ss:$16 sps:$4 sm:$0xff]   ;;  %v5158_v33 = vld [vmem:[%s7644_s1 + $0x10c] ss:$16 sps:$4 sm:$0xff]   ;;  %v5160_v34 = vld [vmem:[%s7644_s1 + $0x100] ss:$16 sps:$4 sm:$0xff]  }
  0x11   : > { %v5161_v35 = vld [vmem:[%s7644_s1 + $0x108] ss:$16 sps:$4 sm:$0xff]   ;;  %v5162_v36 = vld [vmem:[%s7644_s1 + $0x124] ss:$16 sps:$4 sm:$0xff]   ;;  %s7650_s19 = smov (!%p215_p3, %s4438_s19), 1  ;;  %vm5897_vm0 = vmmov 0  }
  0x12   : > { %v5164_v37 = vld [vmem:[%s7644_s1 + $0x12c] ss:$16 sps:$4 sm:$0xff]   ;;  %v5166_v38 = vld [vmem:[%s7644_s1 + $0x120] ss:$16 sps:$4 sm:$0xff]   ;;  %v5167_v39 = vld [vmem:[%s7644_s1 + $0x128] ss:$16 sps:$4 sm:$0xff]  }
  0x13   : > { %3423 = vmatpush1.bf16.msra.mxu0 %v5130_v14  ;;  %3767 = vmatpush1.bf16.msra.mxu1 %v5131_v15  ;;  %v5168_v40 = vld [vmem:[%s7644_s1 + $0x144] ss:$16 sps:$4 sm:$0xff]   ;;  %s4991_s8 = sshll.u32 %s7650_s19, 7  ;;  %v5170_v41 = vld [vmem:[%s7644_s1 + $0x14c] ss:$16 sps:$4 sm:$0xff]   ;;  %vm4289_vm1 = vcmask 1043456  }
  0x14   : > { %3424 = vmatprep.subr.bf16.mxu0 %v5132_v16  ;;  %3768 = vmatprep.subr.bf16.mxu1 %v5134_v17  ;;  %v5172_v42 = vld [vmem:[%s7644_s1 + $0x140] ss:$16 sps:$4 sm:$0xff]   ;;  %v5173_v43 = vld [vmem:[%s7644_s1 + $0x148] ss:$16 sps:$4 sm:$0xff]   ;;  %s6078_s17 = scalar_lea.vmem %s7643_s0, %s4991_s8  ;;  %v5174_v44 = vld [vmem:[%s7644_s1 + $0x164] ss:$16 sps:$4 sm:$0xff]  }
  0x15   : > { %v5176_v45 = vld [vmem:[%s7644_s1 + $0x16c] ss:$16 sps:$4 sm:$0xff]   ;;  %v226_v46 = vld [vmem:[%s6078_s17] sm:$0xff]  ;;  %v5179_v49 = vld [vmem:[%s7644_s1 + $0x168] ss:$16 sps:$4 sm:$0xff]   ;;  %vm4175_vm2 = vcmask 1040384  }
  0x16   : > { %v234_v47 = vld [vmem:[%s6078_s17 + $0x40] sm:$0xff]  ;;  %v5182_v52 = vld [vmem:[%s7644_s1 + $0x18c] ss:$16 sps:$4 sm:$0xff]   ;;  %v5185_v54 = vld [vmem:[%s7644_s1 + $0x188] ss:$16 sps:$4 sm:$0xff]   ;;  %vm4285_vm3 = vcmask 64512  }
  0x17   : > { %3425 = vmatpush1.bf16.msra.mxu0 %v5136_v18  ;;  %3769 = vmatpush1.bf16.msra.mxu1 %v5137_v19  ;;  %v5178_v48 = vld [vmem:[%s7644_s1 + $0x160] ss:$16 sps:$4 sm:$0xff]   ;;  %v4448_v50 = vcombine.high %v226_v46, %v234_v47  ;;  %v5180_v51 = vld [vmem:[%s7644_s1 + $0x184] ss:$16 sps:$4 sm:$0xff]   ;;  %v5188_v56 = vld [vmem:[%s7644_s1 + $0x1ac] ss:$16 sps:$4 sm:$0xff]   ;;  %v4447_v5 = vcombine.low %v226_v46, %v234_v47 }
  0x18   : > { %3426 = vmatprep.subr.bf16.mxu0 %v5138_v20  ;;  %3770 = vmatprep.subr.bf16.mxu1 %v5140_v21  ;;  %v5184_v53 = vld [vmem:[%s7644_s1 + $0x180] ss:$16 sps:$4 sm:$0xff]   ;;  %v5186_v55 = vld [vmem:[%s7644_s1 + $0x1a4] ss:$16 sps:$4 sm:$0xff]   ;;  %v5191_v58 = vld [vmem:[%s7644_s1 + $0x1a8] ss:$16 sps:$4 sm:$0xff]  }
  0x19   : > { %3448 = vmatprep.mubr.bf16.mxu0 %v4448_v50  ;;  %3792 = vmatprep.mubr.bf16.mxu1 %v4448_v50  ;;  %v5190_v57 = vld [vmem:[%s7644_s1 + $0x1a0] ss:$16 sps:$4 sm:$0xff]   ;;  %v5192_v59 = vld [vmem:[%s7644_s1 + $0x1c4] ss:$16 sps:$4 sm:$0xff]   ;;  %v5194_v60 = vld [vmem:[%s7644_s1 + $0x1cc] ss:$16 sps:$4 sm:$0xff]  }
  0x1a   : > { %v5196_v61 = vld [vmem:[%s7644_s1 + $0x1c0] ss:$16 sps:$4 sm:$0xff]   ;;  %v5197_v62 = vld [vmem:[%s7644_s1 + $0x1c8] ss:$16 sps:$4 sm:$0xff]   ;;  %v5198_v63 = vld [vmem:[%s7644_s1 + $0x1e4] ss:$16 sps:$4 sm:$0xff]  }
  0x1b   : > { %3427 = vmatpush1.bf16.msra.mxu0 %v5142_v22  ;;  %3771 = vmatpush1.bf16.msra.mxu1 %v5143_v23  ;;  %v5200_v0 = vld [vmem:[%s7644_s1 + $0x1ec] ss:$16 sps:$4 sm:$0xff]   ;;  %v5202_v1 = vld [vmem:[%s7644_s1 + $0x1e0] ss:$16 sps:$4 sm:$0xff]   ;;  %v5203_v2 = vld [vmem:[%s7644_s1 + $0x1e8] ss:$16 sps:$4 sm:$0xff]  }
  0x1c   : > { %3428 = vmatprep.subr.bf16.mxu0 %v5144_v24  ;;  %3772 = vmatprep.subr.bf16.mxu1 %v5146_v25  ;;  %v5206_v3 = vld [vmem:[%s7644_s1 + $0x204] ss:$16 sps:$4 sm:$0xff]   ;;  %v5209_v4 = vld [vmem:[%s7644_s1 + $0x20c] ss:$16 sps:$4 sm:$0xff]   ;;  %v5204_v6 = vld [vmem:[%s7644_s1 + $0x200] ss:$16 sps:$4 sm:$0xff]  }
  0x1d   : > { %v5207_v7 = vld [vmem:[%s7644_s1 + $0x208] ss:$16 sps:$4 sm:$0xff]   ;;  %v5212_v8 = vld [vmem:[%s7644_s1 + $0x224] ss:$16 sps:$4 sm:$0xff]   ;;  %v5215_v9 = vld [vmem:[%s7644_s1 + $0x22c] ss:$16 sps:$4 sm:$0xff]  }
  0x1e   : > { %v5210_v10 = vld [vmem:[%s7644_s1 + $0x220] ss:$16 sps:$4 sm:$0xff]   ;;  %v5213_v11 = vld [vmem:[%s7644_s1 + $0x228] ss:$16 sps:$4 sm:$0xff]   ;;  %v5218_v12 = vld [vmem:[%s7644_s1 + $0x244] ss:$16 sps:$4 sm:$0xff]  }
  0x1f   : > { %3429 = vmatpush1.bf16.msra.mxu0 %v5148_v26  ;;  %3773 = vmatpush1.bf16.msra.mxu1 %v5149_v27  ;;  %v5221_v13 = vld [vmem:[%s7644_s1 + $0x24c] ss:$16 sps:$4 sm:$0xff]   ;;  %v5216_v14 = vld [vmem:[%s7644_s1 + $0x240] ss:$16 sps:$4 sm:$0xff]   ;;  %v5219_v15 = vld [vmem:[%s7644_s1 + $0x248] ss:$16 sps:$4 sm:$0xff]  }
  0x20   : > { %3430 = vmatprep.subr.bf16.mxu0 %v5150_v28  ;;  %3774 = vmatprep.subr.bf16.mxu1 %v5152_v29  ;;  %v5224_v16 = vld [vmem:[%s7644_s1 + $0x264] ss:$16 sps:$4 sm:$0xff]   ;;  %v5227_v17 = vld [vmem:[%s7644_s1 + $0x26c] ss:$16 sps:$4 sm:$0xff]   ;;  %v5222_v18 = vld [vmem:[%s7644_s1 + $0x260] ss:$16 sps:$4 sm:$0xff]  }
  0x21   : > { %v5225_v19 = vld [vmem:[%s7644_s1 + $0x268] ss:$16 sps:$4 sm:$0xff]   ;;  %v5230_v20 = vld [vmem:[%s7644_s1 + $0x284] ss:$16 sps:$4 sm:$0xff]   ;;  %v5233_v21 = vld [vmem:[%s7644_s1 + $0x28c] ss:$16 sps:$4 sm:$0xff]  }
  0x22   : > { %v5228_v22 = vld [vmem:[%s7644_s1 + $0x280] ss:$16 sps:$4 sm:$0xff]   ;;  %v5231_v23 = vld [vmem:[%s7644_s1 + $0x288] ss:$16 sps:$4 sm:$0xff]   ;;  %v5236_v24 = vld [vmem:[%s7644_s1 + $0x2a4] ss:$16 sps:$4 sm:$0xff]  }
  0x23   : > { %3431 = vmatpush1.bf16.msra.mxu0 %v5154_v30  ;;  %3775 = vmatpush1.bf16.msra.mxu1 %v5155_v31  ;;  %v5239_v25 = vld [vmem:[%s7644_s1 + $0x2ac] ss:$16 sps:$4 sm:$0xff]   ;;  %v5234_v26 = vld [vmem:[%s7644_s1 + $0x2a0] ss:$16 sps:$4 sm:$0xff]   ;;  %v5237_v27 = vld [vmem:[%s7644_s1 + $0x2a8] ss:$16 sps:$4 sm:$0xff]  }
  0x24   : > { %3432 = vmatprep.subr.bf16.mxu0 %v5156_v32  ;;  %3776 = vmatprep.subr.bf16.mxu1 %v5158_v33  ;;  %v5242_v28 = vld [vmem:[%s7644_s1 + $0x2c4] ss:$16 sps:$4 sm:$0xff]   ;;  %v5245_v29 = vld [vmem:[%s7644_s1 + $0x2cc] ss:$16 sps:$4 sm:$0xff]   ;;  %v5240_v32 = vld [vmem:[%s7644_s1 + $0x2c0] ss:$16 sps:$4 sm:$0xff]  }
  0x25   : > { %v6221_v30 = vld [vmem:[%s6078_s17 + $0x8] sm:$0xff]  ;;  %v5266_v47 = vld [vmem:[%s7644_s1 + $0x344] ss:$16 sps:$4 sm:$0xff]   ;;  %s4992_s24 = sshll.u32 %s7650_s19, 5 }
  0x26   : > { %v6224_v31 = vld [vmem:[%s6078_s17 + $0x48] sm:$0xff]  ;;  %s224_s26 = scalar_lea.vmem %s7648_s5, %s4992_s24 }
  0x27   : > { %3433 = vmatpush1.bf16.msra.mxu0 %v5160_v34  ;;  %3777 = vmatpush1.bf16.msra.mxu1 %v5161_v35  ;;  %v5243_v33 = vld [vmem:[%s7644_s1 + $0x2c8] ss:$16 sps:$4 sm:$0xff]   ;;  %v4450_v34 = vcombine.high %v6221_v30, %v6224_v31  ;;  %v5248_v35 = vld [vmem:[%s7644_s1 + $0x2e4] ss:$16 sps:$4 sm:$0xff]  }
  0x28   : > { %3434 = vmatprep.subr.bf16.mxu0 %v5162_v36  ;;  %3778 = vmatprep.subr.bf16.mxu1 %v5164_v37  ;;  %v5251_v36 = vld [vmem:[%s7644_s1 + $0x2ec] ss:$16 sps:$4 sm:$0xff]   ;;  %v5246_v37 = vld [vmem:[%s7644_s1 + $0x2e0] ss:$16 sps:$4 sm:$0xff]   ;;  %v5261_v46 = vld [vmem:[%s7644_s1 + $0x328] ss:$16 sps:$4 sm:$0xff]  }
  0x29   : > { %v5267_v50 = vld [vmem:[%s7644_s1 + $0x348] ss:$16 sps:$4 sm:$0xff]  }
  0x2b   : > { %3435 = vmatpush1.bf16.msra.mxu0 %v5166_v38  ;;  %3779 = vmatpush1.bf16.msra.mxu1 %v5167_v39  ;;  %v5249_v38 = vld [vmem:[%s7644_s1 + $0x2e8] ss:$16 sps:$4 sm:$0xff]   ;;  %v5254_v39 = vld [vmem:[%s7644_s1 + $0x304] ss:$16 sps:$4 sm:$0xff]  }
  0x2c   : > { %3436 = vmatprep.subr.bf16.mxu0 %v5168_v40  ;;  %3780 = vmatprep.subr.bf16.mxu1 %v5170_v41  ;;  %v5257_v40 = vld [vmem:[%s7644_s1 + $0x30c] ss:$16 sps:$4 sm:$0xff]   ;;  %v5252_v41 = vld [vmem:[%s7644_s1 + $0x300] ss:$16 sps:$4 sm:$0xff]  }
  0x2f   : > { %3437 = vmatpush1.bf16.msra.mxu0 %v5172_v42  ;;  %3781 = vmatpush1.bf16.msra.mxu1 %v5173_v43  ;;  %v5255_v42 = vld [vmem:[%s7644_s1 + $0x308] ss:$16 sps:$4 sm:$0xff]   ;;  %v5260_v43 = vld [vmem:[%s7644_s1 + $0x324] ss:$16 sps:$4 sm:$0xff]  }
  0x30   : > { %3438 = vmatprep.subr.bf16.mxu0 %v5174_v44  ;;  %3782 = vmatprep.subr.bf16.mxu1 %v5176_v45  ;;  %v5263_v44 = vld [vmem:[%s7644_s1 + $0x32c] ss:$16 sps:$4 sm:$0xff]   ;;  %v5258_v45 = vld [vmem:[%s7644_s1 + $0x320] ss:$16 sps:$4 sm:$0xff]  }
  0x33   : > { %3439 = vmatpush1.bf16.msra.mxu0 %v5178_v48  ;;  %3783 = vmatpush1.bf16.msra.mxu1 %v5179_v49  ;;  %v5269_v48 = vld [vmem:[%s7644_s1 + $0x34c] ss:$16 sps:$4 sm:$0xff]   ;;  %v5264_v49 = vld [vmem:[%s7644_s1 + $0x340] ss:$16 sps:$4 sm:$0xff]  }
  0x34   : > { %3440 = vmatprep.subr.bf16.mxu0 %v5180_v51  ;;  %3784 = vmatprep.subr.bf16.mxu1 %v5182_v52  ;;  %v5272_v51 = vld [vmem:[%s7644_s1 + $0x364] ss:$16 sps:$4 sm:$0xff]   ;;  %v5275_v52 = vld [vmem:[%s7644_s1 + $0x36c] ss:$16 sps:$4 sm:$0xff]  }
  0x37   : > { %3441 = vmatpush1.bf16.msra.mxu0 %v5184_v53  ;;  %3785 = vmatpush1.bf16.msra.mxu1 %v5185_v54  ;;  %v5270_v53 = vld [vmem:[%s7644_s1 + $0x360] ss:$16 sps:$4 sm:$0xff]   ;;  %v5273_v54 = vld [vmem:[%s7644_s1 + $0x368] ss:$16 sps:$4 sm:$0xff]  }
  0x38   : > { %3442 = vmatprep.subr.bf16.mxu0 %v5186_v55  ;;  %3786 = vmatprep.subr.bf16.mxu1 %v5188_v56  ;;  %v5278_v55 = vld [vmem:[%s7644_s1 + $0x384] ss:$16 sps:$4 sm:$0xff]   ;;  %v5281_v56 = vld [vmem:[%s7644_s1 + $0x38c] ss:$16 sps:$4 sm:$0xff]  }
  0x3b   : > { %3443 = vmatpush1.bf16.msra.mxu0 %v5190_v57  ;;  %3787 = vmatpush1.bf16.msra.mxu1 %v5191_v58  ;;  %v5276_v57 = vld [vmem:[%s7644_s1 + $0x380] ss:$16 sps:$4 sm:$0xff]   ;;  %v5279_v58 = vld [vmem:[%s7644_s1 + $0x388] ss:$16 sps:$4 sm:$0xff]  }
  0x3c   : > { %3444 = vmatprep.subr.bf16.mxu0 %v5192_v59  ;;  %3788 = vmatprep.subr.bf16.mxu1 %v5194_v60  ;;  %v5284_v59 = vld [vmem:[%s7644_s1 + $0x3a4] ss:$16 sps:$4 sm:$0xff]   ;;  %v5287_v60 = vld [vmem:[%s7644_s1 + $0x3ac] ss:$16 sps:$4 sm:$0xff]  }
  0x3f   : > { %3445 = vmatpush1.bf16.msra.mxu0 %v5196_v61  ;;  %3789 = vmatpush1.bf16.msra.mxu1 %v5197_v62  ;;  %v5282_v61 = vld [vmem:[%s7644_s1 + $0x3a0] ss:$16 sps:$4 sm:$0xff]   ;;  %v5285_v62 = vld [vmem:[%s7644_s1 + $0x3a8] ss:$16 sps:$4 sm:$0xff]  }
  0x40   : > { %3446 = vmatprep.subr.bf16.mxu0 %v5198_v63  ;;  %3790 = vmatprep.subr.bf16.mxu1 %v5200_v0  ;;  %v5290_v63 = vld [vmem:[%s7644_s1 + $0x3c4] ss:$16 sps:$4 sm:$0xff]   ;;  %v5293_v0 = vld [vmem:[%s7644_s1 + $0x3cc] ss:$16 sps:$4 sm:$0xff]  }
  0x43   : > { %3447 = vmatpush1.bf16.msra.mxu0 %v5202_v1  ;;  %3791 = vmatpush1.bf16.msra.mxu1 %v5203_v2  ;;  %v5288_v1 = vld [vmem:[%s7644_s1 + $0x3c0] ss:$16 sps:$4 sm:$0xff]   ;;  %v5291_v2 = vld [vmem:[%s7644_s1 + $0x3c8] ss:$16 sps:$4 sm:$0xff]  }
  0x44   : > { %3459 = vmatprep.subr.bf16.mxu0 %v5206_v3  ;;  %3803 = vmatprep.subr.bf16.mxu1 %v5209_v4  ;;  %v5296_v3 = vld [vmem:[%s7644_s1 + $0x3e4] ss:$16 sps:$4 sm:$0xff]   ;;  %v5299_v4 = vld [vmem:[%s7644_s1 + $0x3ec] ss:$16 sps:$4 sm:$0xff]  }
  0x46   : > { %3449 = vmatmul.mubr.bf16.vlgmr.msra.gmra.mrb[0].mxu0 %v4447_v5  ;;  %3793 = vmatmul.mubr.bf16.vlgmr.msra.gmra.mrb[0].mxu1 %v4447_v5  ;;  %v5294_v5 = vld [vmem:[%s7644_s1 + $0x3e0] ss:$16 sps:$4 sm:$0xff]  }
  0x47   : > { %3460 = vmatpush1.bf16.msra.mxu0 %v5204_v6  ;;  %3804 = vmatpush1.bf16.msra.mxu1 %v5207_v7  ;;  %v5297_v6 = vld [vmem:[%s7644_s1 + $0x3e8] ss:$16 sps:$4 sm:$0xff]   ;;  %v5302_v7 = vld [vmem:[%s7644_s1 + $0x404] ss:$16 sps:$4 sm:$0xff]  }
  0x48   : > { %3461 = vmatprep.subr.bf16.mxu0 %v5212_v8  ;;  %3805 = vmatprep.subr.bf16.mxu1 %v5215_v9  ;;  %v5305_v8 = vld [vmem:[%s7644_s1 + $0x40c] ss:$16 sps:$4 sm:$0xff]   ;;  %v4449_v9 = vcombine.low %v6221_v30, %v6224_v31  ;;  %v5327_v30 = vld [vmem:[%s7644_s1 + $0x488] ss:$16 sps:$4 sm:$0xff]   ;;  %v5332_v31 = vld [vmem:[%s7644_s1 + $0x4a4] ss:$16 sps:$4 sm:$0xff]  }
  0x49   : > { %3491 = vmatprep.mubr.bf16.mxu0 %v4450_v34  ;;  %3835 = vmatprep.mubr.bf16.mxu1 %v4450_v34  ;;  %v5333_v34 = vld [vmem:[%s7644_s1 + $0x4a8] ss:$16 sps:$4 sm:$0xff]  }
  0x4b   : > { %3462 = vmatpush1.bf16.msra.mxu0 %v5210_v10  ;;  %3806 = vmatpush1.bf16.msra.mxu1 %v5213_v11  ;;  %v5300_v10 = vld [vmem:[%s7644_s1 + $0x400] ss:$16 sps:$4 sm:$0xff]   ;;  %v5303_v11 = vld [vmem:[%s7644_s1 + $0x408] ss:$16 sps:$4 sm:$0xff]  }
  0x4c   : > { %3463 = vmatprep.subr.bf16.mxu0 %v5218_v12  ;;  %3807 = vmatprep.subr.bf16.mxu1 %v5221_v13  ;;  %v5308_v12 = vld [vmem:[%s7644_s1 + $0x424] ss:$16 sps:$4 sm:$0xff]   ;;  %v5311_v13 = vld [vmem:[%s7644_s1 + $0x42c] ss:$16 sps:$4 sm:$0xff]  }
  0x4f   : > { %3464 = vmatpush1.bf16.msra.mxu0 %v5216_v14  ;;  %3808 = vmatpush1.bf16.msra.mxu1 %v5219_v15  ;;  %v6363_v14 = vld [vmem:[%s6078_s17 + $0x10] sm:$0xff] }
  0x50   : > { %3465 = vmatprep.subr.bf16.mxu0 %v5224_v16  ;;  %3809 = vmatprep.subr.bf16.mxu1 %v5227_v17  ;;  %v6366_v15 = vld [vmem:[%s6078_s17 + $0x50] sm:$0xff] }
  0x51   : > { %v4452_v16 = vcombine.high %v6363_v14, %v6366_v15  ;;  %v5306_v17 = vld [vmem:[%s7644_s1 + $0x420] ss:$16 sps:$4 sm:$0xff]  }
  0x53   : > { %3466 = vmatpush1.bf16.msra.mxu0 %v5222_v18  ;;  %3810 = vmatpush1.bf16.msra.mxu1 %v5225_v19  ;;  %v5309_v18 = vld [vmem:[%s7644_s1 + $0x428] ss:$16 sps:$4 sm:$0xff]   ;;  %v5314_v19 = vld [vmem:[%s7644_s1 + $0x444] ss:$16 sps:$4 sm:$0xff]  }
  0x54   : > { %3467 = vmatprep.subr.bf16.mxu0 %v5230_v20  ;;  %3811 = vmatprep.subr.bf16.mxu1 %v5233_v21  ;;  %v5317_v20 = vld [vmem:[%s7644_s1 + $0x44c] ss:$16 sps:$4 sm:$0xff]   ;;  %v5312_v21 = vld [vmem:[%s7644_s1 + $0x440] ss:$16 sps:$4 sm:$0xff]  }
  0x57   : > { %3468 = vmatpush1.bf16.msra.mxu0 %v5228_v22  ;;  %3812 = vmatpush1.bf16.msra.mxu1 %v5231_v23  ;;  %v5315_v22 = vld [vmem:[%s7644_s1 + $0x448] ss:$16 sps:$4 sm:$0xff]   ;;  %v5320_v23 = vld [vmem:[%s7644_s1 + $0x464] ss:$16 sps:$4 sm:$0xff]  }
  0x58   : > { %3469 = vmatprep.subr.bf16.mxu0 %v5236_v24  ;;  %3813 = vmatprep.subr.bf16.mxu1 %v5239_v25  ;;  %v5323_v24 = vld [vmem:[%s7644_s1 + $0x46c] ss:$16 sps:$4 sm:$0xff]   ;;  %v5318_v25 = vld [vmem:[%s7644_s1 + $0x460] ss:$16 sps:$4 sm:$0xff]  }
  0x5b   : > { %3470 = vmatpush1.bf16.msra.mxu0 %v5234_v26  ;;  %3814 = vmatpush1.bf16.msra.mxu1 %v5237_v27  ;;  %v5321_v26 = vld [vmem:[%s7644_s1 + $0x468] ss:$16 sps:$4 sm:$0xff]   ;;  %v5326_v27 = vld [vmem:[%s7644_s1 + $0x484] ss:$16 sps:$4 sm:$0xff]  }
  0x5c   : > { %3471 = vmatprep.subr.bf16.mxu0 %v5242_v28  ;;  %3815 = vmatprep.subr.bf16.mxu1 %v5245_v29  ;;  %v5329_v28 = vld [vmem:[%s7644_s1 + $0x48c] ss:$16 sps:$4 sm:$0xff]   ;;  %v5324_v29 = vld [vmem:[%s7644_s1 + $0x480] ss:$16 sps:$4 sm:$0xff]  }
  0x5f   : > { %3472 = vmatpush1.bf16.msra.mxu0 %v5240_v32  ;;  %3816 = vmatpush1.bf16.msra.mxu1 %v5243_v33  ;;  %v5335_v32 = vld [vmem:[%s7644_s1 + $0x4ac] ss:$16 sps:$4 sm:$0xff]   ;;  %v5330_v33 = vld [vmem:[%s7644_s1 + $0x4a0] ss:$16 sps:$4 sm:$0xff]  }
  0x60   : > { %3473 = vmatprep.subr.bf16.mxu0 %v5248_v35  ;;  %3817 = vmatprep.subr.bf16.mxu1 %v5251_v36  ;;  %v5338_v35 = vld [vmem:[%s7644_s1 + $0x4c4] ss:$16 sps:$4 sm:$0xff]   ;;  %v5341_v36 = vld [vmem:[%s7644_s1 + $0x4cc] ss:$16 sps:$4 sm:$0xff]  }
  0x63   : > { %3474 = vmatpush1.bf16.msra.mxu0 %v5246_v37  ;;  %3818 = vmatpush1.bf16.msra.mxu1 %v5249_v38  ;;  %v5336_v37 = vld [vmem:[%s7644_s1 + $0x4c0] ss:$16 sps:$4 sm:$0xff]   ;;  %v5339_v38 = vld [vmem:[%s7644_s1 + $0x4c8] ss:$16 sps:$4 sm:$0xff]  }
  0x64   : > { %3475 = vmatprep.subr.bf16.mxu0 %v5254_v39  ;;  %3819 = vmatprep.subr.bf16.mxu1 %v5257_v40  ;;  %v5344_v39 = vld [vmem:[%s7644_s1 + $0x4e4] ss:$16 sps:$4 sm:$0xff]   ;;  %v5347_v40 = vld [vmem:[%s7644_s1 + $0x4ec] ss:$16 sps:$4 sm:$0xff]  }
  0x67   : > { %3476 = vmatpush1.bf16.msra.mxu0 %v5252_v41  ;;  %3820 = vmatpush1.bf16.msra.mxu1 %v5255_v42  ;;  %v5342_v41 = vld [vmem:[%s7644_s1 + $0x4e0] ss:$16 sps:$4 sm:$0xff]   ;;  %v5345_v42 = vld [vmem:[%s7644_s1 + $0x4e8] ss:$16 sps:$4 sm:$0xff]  }
  0x68   : > { %3477 = vmatprep.subr.bf16.mxu0 %v5260_v43  ;;  %3821 = vmatprep.subr.bf16.mxu1 %v5263_v44  ;;  %v5350_v43 = vld [vmem:[%s7644_s1 + $0x504] ss:$16 sps:$4 sm:$0xff]   ;;  %v5353_v44 = vld [vmem:[%s7644_s1 + $0x50c] ss:$16 sps:$4 sm:$0xff]  }
  0x6b   : > { %3478 = vmatpush1.bf16.msra.mxu0 %v5258_v45  ;;  %3822 = vmatpush1.bf16.msra.mxu1 %v5261_v46  ;;  %v5348_v45 = vld [vmem:[%s7644_s1 + $0x500] ss:$16 sps:$4 sm:$0xff]   ;;  %v5351_v46 = vld [vmem:[%s7644_s1 + $0x508] ss:$16 sps:$4 sm:$0xff]  }
  0x6c   : > { %3479 = vmatprep.subr.bf16.mxu0 %v5266_v47  ;;  %3823 = vmatprep.subr.bf16.mxu1 %v5269_v48  ;;  %v5356_v47 = vld [vmem:[%s7644_s1 + $0x524] ss:$16 sps:$4 sm:$0xff]   ;;  %v5359_v48 = vld [vmem:[%s7644_s1 + $0x52c] ss:$16 sps:$4 sm:$0xff]  }
  0x6f   : > { %3480 = vmatpush1.bf16.msra.mxu0 %v5264_v49  ;;  %3824 = vmatpush1.bf16.msra.mxu1 %v5267_v50  ;;  %v5354_v49 = vld [vmem:[%s7644_s1 + $0x520] ss:$16 sps:$4 sm:$0xff]   ;;  %v5357_v50 = vld [vmem:[%s7644_s1 + $0x528] ss:$16 sps:$4 sm:$0xff]  }
  0x70   : > { %3481 = vmatprep.subr.bf16.mxu0 %v5272_v51  ;;  %3825 = vmatprep.subr.bf16.mxu1 %v5275_v52  ;;  %v5362_v51 = vld [vmem:[%s7644_s1 + $0x544] ss:$16 sps:$4 sm:$0xff]   ;;  %v5365_v52 = vld [vmem:[%s7644_s1 + $0x54c] ss:$16 sps:$4 sm:$0xff]  }
  0x73   : > { %3482 = vmatpush1.bf16.msra.mxu0 %v5270_v53  ;;  %3826 = vmatpush1.bf16.msra.mxu1 %v5273_v54  ;;  %v5360_v53 = vld [vmem:[%s7644_s1 + $0x540] ss:$16 sps:$4 sm:$0xff]   ;;  %v5363_v54 = vld [vmem:[%s7644_s1 + $0x548] ss:$16 sps:$4 sm:$0xff]  }
  0x74   : > { %3483 = vmatprep.subr.bf16.mxu0 %v5278_v55  ;;  %3827 = vmatprep.subr.bf16.mxu1 %v5281_v56  ;;  %v5368_v55 = vld [vmem:[%s7644_s1 + $0x564] ss:$16 sps:$4 sm:$0xff]   ;;  %v5371_v56 = vld [vmem:[%s7644_s1 + $0x56c] ss:$16 sps:$4 sm:$0xff]  }
  0x77   : > { %3484 = vmatpush1.bf16.msra.mxu0 %v5276_v57  ;;  %3828 = vmatpush1.bf16.msra.mxu1 %v5279_v58  ;;  %v5366_v57 = vld [vmem:[%s7644_s1 + $0x560] ss:$16 sps:$4 sm:$0xff]   ;;  %v5369_v58 = vld [vmem:[%s7644_s1 + $0x568] ss:$16 sps:$4 sm:$0xff]  }
  0x78   : > { %3485 = vmatprep.subr.bf16.mxu0 %v5284_v59  ;;  %3829 = vmatprep.subr.bf16.mxu1 %v5287_v60  ;;  %v5374_v59 = vld [vmem:[%s7644_s1 + $0x584] ss:$16 sps:$4 sm:$0xff]   ;;  %v5377_v60 = vld [vmem:[%s7644_s1 + $0x58c] ss:$16 sps:$4 sm:$0xff]  }
  0x7b   : > { %3486 = vmatpush1.bf16.msra.mxu0 %v5282_v61  ;;  %3830 = vmatpush1.bf16.msra.mxu1 %v5285_v62  ;;  %v5372_v61 = vld [vmem:[%s7644_s1 + $0x580] ss:$16 sps:$4 sm:$0xff]   ;;  %v5375_v62 = vld [vmem:[%s7644_s1 + $0x588] ss:$16 sps:$4 sm:$0xff]  }
  0x7c   : > { %3487 = vmatprep.subr.bf16.mxu0 %v5290_v63  ;;  %3831 = vmatprep.subr.bf16.mxu1 %v5293_v0  ;;  %v5380_v63 = vld [vmem:[%s7644_s1 + $0x5a4] ss:$16 sps:$4 sm:$0xff]   ;;  %v5383_v0 = vld [vmem:[%s7644_s1 + $0x5ac] ss:$16 sps:$4 sm:$0xff]  }
  0x7f   : > { %3488 = vmatpush1.bf16.msra.mxu0 %v5288_v1  ;;  %3832 = vmatpush1.bf16.msra.mxu1 %v5291_v2  ;;  %v5378_v1 = vld [vmem:[%s7644_s1 + $0x5a0] ss:$16 sps:$4 sm:$0xff]   ;;  %v5381_v2 = vld [vmem:[%s7644_s1 + $0x5a8] ss:$16 sps:$4 sm:$0xff]  }
  0x80   : > { %3489 = vmatprep.subr.bf16.mxu0 %v5296_v3  ;;  %3833 = vmatprep.subr.bf16.mxu1 %v5299_v4  ;;  %v5386_v3 = vld [vmem:[%s7644_s1 + $0x5c4] ss:$16 sps:$4 sm:$0xff]   ;;  %v5389_v4 = vld [vmem:[%s7644_s1 + $0x5cc] ss:$16 sps:$4 sm:$0xff]  }
  0x83   : > { %3490 = vmatpush1.bf16.msra.mxu0 %v5294_v5  ;;  %3834 = vmatpush1.bf16.msra.mxu1 %v5297_v6  ;;  %v5384_v5 = vld [vmem:[%s7644_s1 + $0x5c0] ss:$16 sps:$4 sm:$0xff]   ;;  %v5387_v6 = vld [vmem:[%s7644_s1 + $0x5c8] ss:$16 sps:$4 sm:$0xff]  }
  0x84   : > { %3502 = vmatprep.subr.bf16.mxu0 %v5302_v7  ;;  %3846 = vmatprep.subr.bf16.mxu1 %v5305_v8  ;;  %v5392_v7 = vld [vmem:[%s7644_s1 + $0x5e4] ss:$16 sps:$4 sm:$0xff]   ;;  %v5395_v8 = vld [vmem:[%s7644_s1 + $0x5ec] ss:$16 sps:$4 sm:$0xff]  }
  0x86   : > { %3492 = vmatmul.mubr.bf16.vlgmr.msra.gmra.mrb[0].mxu0 %v4449_v9  ;;  %3836 = vmatmul.mubr.bf16.vlgmr.msra.gmra.mrb[0].mxu1 %v4449_v9  ;;  %v5390_v9 = vld [vmem:[%s7644_s1 + $0x5e0] ss:$16 sps:$4 sm:$0xff]  }
  0x87   : > { %3503 = vmatpush1.bf16.msra.mxu0 %v5300_v10  ;;  %3847 = vmatpush1.bf16.msra.mxu1 %v5303_v11  ;;  %v5393_v10 = vld [vmem:[%s7644_s1 + $0x5e8] ss:$16 sps:$4 sm:$0xff]   ;;  %v5398_v11 = vld [vmem:[%s7644_s1 + $0x604] ss:$16 sps:$4 sm:$0xff]  }
  0x88   : > { %3504 = vmatprep.subr.bf16.mxu0 %v5308_v12  ;;  %3848 = vmatprep.subr.bf16.mxu1 %v5311_v13  ;;  %v5401_v12 = vld [vmem:[%s7644_s1 + $0x60c] ss:$16 sps:$4 sm:$0xff]   ;;  %v5396_v13 = vld [vmem:[%s7644_s1 + $0x600] ss:$16 sps:$4 sm:$0xff]  }
  0x89   : > { %3534 = vmatprep.mubr.bf16.mxu0 %v4452_v16  ;;  %3878 = vmatprep.mubr.bf16.mxu1 %v4452_v16  ;;  %v5399_v16 = vld [vmem:[%s7644_s1 + $0x608] ss:$16 sps:$4 sm:$0xff]  }
  0x8b   : > { %3505 = vmatpush1.bf16.msra.mxu0 %v5306_v17  ;;  %3849 = vmatpush1.bf16.msra.mxu1 %v5309_v18  ;;  %v4451_v17 = vcombine.low %v6363_v14, %v6366_v15  ;;  %v6559_v18 = vld [vmem:[%s6078_s17 + $0x18] sm:$0xff]  ;;  %v5402_v14 = vld [vmem:[%s7644_s1 + $0x620] ss:$16 sps:$4 sm:$0xff]  }
  0x8c   : > { %3506 = vmatprep.subr.bf16.mxu0 %v5314_v19  ;;  %3850 = vmatprep.subr.bf16.mxu1 %v5317_v20  ;;  %v6562_v19 = vld [vmem:[%s6078_s17 + $0x58] sm:$0xff]  ;;  %v5404_v20 = vld [vmem:[%s7644_s1 + $0x624] ss:$16 sps:$4 sm:$0xff]  }
  0x8d   : > { %v5405_v15 = vld [vmem:[%s7644_s1 + $0x628] ss:$16 sps:$4 sm:$0xff]  }
  0x8f   : > { %3507 = vmatpush1.bf16.msra.mxu0 %v5312_v21  ;;  %3851 = vmatpush1.bf16.msra.mxu1 %v5315_v22  ;;  %v5407_v21 = vld [vmem:[%s7644_s1 + $0x62c] ss:$16 sps:$4 sm:$0xff]   ;;  %v4454_v22 = vcombine.high %v6559_v18, %v6562_v19 }
  0x90   : > { %3508 = vmatprep.subr.bf16.mxu0 %v5320_v23  ;;  %3852 = vmatprep.subr.bf16.mxu1 %v5323_v24  ;;  %v5410_v23 = vld [vmem:[%s7644_s1 + $0x644] ss:$16 sps:$4 sm:$0xff]   ;;  %v5413_v24 = vld [vmem:[%s7644_s1 + $0x64c] ss:$16 sps:$4 sm:$0xff]  }
  0x93   : > { %3509 = vmatpush1.bf16.msra.mxu0 %v5318_v25  ;;  %3853 = vmatpush1.bf16.msra.mxu1 %v5321_v26  ;;  %v5408_v25 = vld [vmem:[%s7644_s1 + $0x640] ss:$16 sps:$4 sm:$0xff]   ;;  %v5411_v26 = vld [vmem:[%s7644_s1 + $0x648] ss:$16 sps:$4 sm:$0xff]  }
  0x94   : > { %3510 = vmatprep.subr.bf16.mxu0 %v5326_v27  ;;  %3854 = vmatprep.subr.bf16.mxu1 %v5329_v28  ;;  %v5416_v27 = vld [vmem:[%s7644_s1 + $0x664] ss:$16 sps:$4 sm:$0xff]   ;;  %v5419_v28 = vld [vmem:[%s7644_s1 + $0x66c] ss:$16 sps:$4 sm:$0xff]  }
  0x97   : > { %3511 = vmatpush1.bf16.msra.mxu0 %v5324_v29  ;;  %3855 = vmatpush1.bf16.msra.mxu1 %v5327_v30  ;;  %v5414_v29 = vld [vmem:[%s7644_s1 + $0x660] ss:$16 sps:$4 sm:$0xff]   ;;  %v5417_v30 = vld [vmem:[%s7644_s1 + $0x668] ss:$16 sps:$4 sm:$0xff]  }
  0x98   : > { %3512 = vmatprep.subr.bf16.mxu0 %v5332_v31  ;;  %3856 = vmatprep.subr.bf16.mxu1 %v5335_v32  ;;  %v5422_v31 = vld [vmem:[%s7644_s1 + $0x684] ss:$16 sps:$4 sm:$0xff]   ;;  %v5425_v32 = vld [vmem:[%s7644_s1 + $0x68c] ss:$16 sps:$4 sm:$0xff]  }
  0x9b   : > { %3513 = vmatpush1.bf16.msra.mxu0 %v5330_v33  ;;  %3857 = vmatpush1.bf16.msra.mxu1 %v5333_v34  ;;  %v5420_v33 = vld [vmem:[%s7644_s1 + $0x680] ss:$16 sps:$4 sm:$0xff]   ;;  %v5423_v34 = vld [vmem:[%s7644_s1 + $0x688] ss:$16 sps:$4 sm:$0xff]  }
  0x9c   : > { %3514 = vmatprep.subr.bf16.mxu0 %v5338_v35  ;;  %3858 = vmatprep.subr.bf16.mxu1 %v5341_v36  ;;  %v5428_v35 = vld [vmem:[%s7644_s1 + $0x6a4] ss:$16 sps:$4 sm:$0xff]   ;;  %v5431_v36 = vld [vmem:[%s7644_s1 + $0x6ac] ss:$16 sps:$4 sm:$0xff]  }
  0x9f   : > { %3515 = vmatpush1.bf16.msra.mxu0 %v5336_v37  ;;  %3859 = vmatpush1.bf16.msra.mxu1 %v5339_v38  ;;  %v5426_v37 = vld [vmem:[%s7644_s1 + $0x6a0] ss:$16 sps:$4 sm:$0xff]   ;;  %v5429_v38 = vld [vmem:[%s7644_s1 + $0x6a8] ss:$16 sps:$4 sm:$0xff]  }
  0xa0   : > { %3516 = vmatprep.subr.bf16.mxu0 %v5344_v39  ;;  %3860 = vmatprep.subr.bf16.mxu1 %v5347_v40  ;;  %v5434_v39 = vld [vmem:[%s7644_s1 + $0x6c4] ss:$16 sps:$4 sm:$0xff]   ;;  %v5437_v40 = vld [vmem:[%s7644_s1 + $0x6cc] ss:$16 sps:$4 sm:$0xff]  }
  0xa3   : > { %3517 = vmatpush1.bf16.msra.mxu0 %v5342_v41  ;;  %3861 = vmatpush1.bf16.msra.mxu1 %v5345_v42  ;;  %v5432_v41 = vld [vmem:[%s7644_s1 + $0x6c0] ss:$16 sps:$4 sm:$0xff]   ;;  %v5435_v42 = vld [vmem:[%s7644_s1 + $0x6c8] ss:$16 sps:$4 sm:$0xff]  }
  0xa4   : > { %3518 = vmatprep.subr.bf16.mxu0 %v5350_v43  ;;  %3862 = vmatprep.subr.bf16.mxu1 %v5353_v44  ;;  %v5440_v43 = vld [vmem:[%s7644_s1 + $0x6e4] ss:$16 sps:$4 sm:$0xff]   ;;  %v5443_v44 = vld [vmem:[%s7644_s1 + $0x6ec] ss:$16 sps:$4 sm:$0xff]  }
  0xa7   : > { %3519 = vmatpush1.bf16.msra.mxu0 %v5348_v45  ;;  %3863 = vmatpush1.bf16.msra.mxu1 %v5351_v46  ;;  %v5438_v45 = vld [vmem:[%s7644_s1 + $0x6e0] ss:$16 sps:$4 sm:$0xff]   ;;  %v5441_v46 = vld [vmem:[%s7644_s1 + $0x6e8] ss:$16 sps:$4 sm:$0xff]  }
  0xa8   : > { %3520 = vmatprep.subr.bf16.mxu0 %v5356_v47  ;;  %3864 = vmatprep.subr.bf16.mxu1 %v5359_v48  ;;  %v5446_v47 = vld [vmem:[%s7644_s1 + $0x704] ss:$16 sps:$4 sm:$0xff]   ;;  %v5449_v48 = vld [vmem:[%s7644_s1 + $0x70c] ss:$16 sps:$4 sm:$0xff]  }
  0xab   : > { %3521 = vmatpush1.bf16.msra.mxu0 %v5354_v49  ;;  %3865 = vmatpush1.bf16.msra.mxu1 %v5357_v50  ;;  %v5444_v49 = vld [vmem:[%s7644_s1 + $0x700] ss:$16 sps:$4 sm:$0xff]   ;;  %v5447_v50 = vld [vmem:[%s7644_s1 + $0x708] ss:$16 sps:$4 sm:$0xff]  }
  0xac   : > { %3522 = vmatprep.subr.bf16.mxu0 %v5362_v51  ;;  %3866 = vmatprep.subr.bf16.mxu1 %v5365_v52  ;;  %v5452_v51 = vld [vmem:[%s7644_s1 + $0x724] ss:$16 sps:$4 sm:$0xff]   ;;  %v5455_v52 = vld [vmem:[%s7644_s1 + $0x72c] ss:$16 sps:$4 sm:$0xff]  }
  0xaf   : > { %3523 = vmatpush1.bf16.msra.mxu0 %v5360_v53  ;;  %3867 = vmatpush1.bf16.msra.mxu1 %v5363_v54  ;;  %v5450_v53 = vld [vmem:[%s7644_s1 + $0x720] ss:$16 sps:$4 sm:$0xff]   ;;  %v5453_v54 = vld [vmem:[%s7644_s1 + $0x728] ss:$16 sps:$4 sm:$0xff]  }
  0xb0   : > { %3524 = vmatprep.subr.bf16.mxu0 %v5368_v55  ;;  %3868 = vmatprep.subr.bf16.mxu1 %v5371_v56  ;;  %v5458_v55 = vld [vmem:[%s7644_s1 + $0x744] ss:$16 sps:$4 sm:$0xff]   ;;  %v5461_v56 = vld [vmem:[%s7644_s1 + $0x74c] ss:$16 sps:$4 sm:$0xff]  }
  0xb3   : > { %3525 = vmatpush1.bf16.msra.mxu0 %v5366_v57  ;;  %3869 = vmatpush1.bf16.msra.mxu1 %v5369_v58  ;;  %v5456_v57 = vld [vmem:[%s7644_s1 + $0x740] ss:$16 sps:$4 sm:$0xff]   ;;  %v5459_v58 = vld [vmem:[%s7644_s1 + $0x748] ss:$16 sps:$4 sm:$0xff]  }
  0xb4   : > { %3526 = vmatprep.subr.bf16.mxu0 %v5374_v59  ;;  %3870 = vmatprep.subr.bf16.mxu1 %v5377_v60  ;;  %v5464_v59 = vld [vmem:[%s7644_s1 + $0x764] ss:$16 sps:$4 sm:$0xff]   ;;  %v5467_v60 = vld [vmem:[%s7644_s1 + $0x76c] ss:$16 sps:$4 sm:$0xff]  }
  0xb7   : > { %3527 = vmatpush1.bf16.msra.mxu0 %v5372_v61  ;;  %3871 = vmatpush1.bf16.msra.mxu1 %v5375_v62  ;;  %v5462_v61 = vld [vmem:[%s7644_s1 + $0x760] ss:$16 sps:$4 sm:$0xff]   ;;  %v5465_v62 = vld [vmem:[%s7644_s1 + $0x768] ss:$16 sps:$4 sm:$0xff]  }
  0xb8   : > { %3528 = vmatprep.subr.bf16.mxu0 %v5380_v63  ;;  %3872 = vmatprep.subr.bf16.mxu1 %v5383_v0  ;;  %v5470_v63 = vld [vmem:[%s7644_s1 + $0x784] ss:$16 sps:$4 sm:$0xff]   ;;  %v5473_v0 = vld [vmem:[%s7644_s1 + $0x78c] ss:$16 sps:$4 sm:$0xff]  }
  0xbb   : > { %3529 = vmatpush1.bf16.msra.mxu0 %v5378_v1  ;;  %3873 = vmatpush1.bf16.msra.mxu1 %v5381_v2  ;;  %v5468_v1 = vld [vmem:[%s7644_s1 + $0x780] ss:$16 sps:$4 sm:$0xff]   ;;  %v5471_v2 = vld [vmem:[%s7644_s1 + $0x788] ss:$16 sps:$4 sm:$0xff]  }
  0xbc   : > { %3530 = vmatprep.subr.bf16.mxu0 %v5386_v3  ;;  %3874 = vmatprep.subr.bf16.mxu1 %v5389_v4  ;;  %v5476_v3 = vld [vmem:[%s7644_s1 + $0x7a4] ss:$16 sps:$4 sm:$0xff]   ;;  %v5479_v4 = vld [vmem:[%s7644_s1 + $0x7ac] ss:$16 sps:$4 sm:$0xff]  }
  0xbf   : > { %3531 = vmatpush1.bf16.msra.mxu0 %v5384_v5  ;;  %3875 = vmatpush1.bf16.msra.mxu1 %v5387_v6  ;;  %v5474_v5 = vld [vmem:[%s7644_s1 + $0x7a0] ss:$16 sps:$4 sm:$0xff]   ;;  %v5477_v6 = vld [vmem:[%s7644_s1 + $0x7a8] ss:$16 sps:$4 sm:$0xff]  }
  0xc0   : > { %3532 = vmatprep.subr.bf16.mxu0 %v5392_v7  ;;  %3876 = vmatprep.subr.bf16.mxu1 %v5395_v8  ;;  %v5482_v7 = vld [vmem:[%s7644_s1 + $0x7c4] ss:$16 sps:$4 sm:$0xff]   ;;  %v5485_v8 = vld [vmem:[%s7644_s1 + $0x7cc] ss:$16 sps:$4 sm:$0xff]  }
  0xc3   : > { %3533 = vmatpush1.bf16.msra.mxu0 %v5390_v9  ;;  %3877 = vmatpush1.bf16.msra.mxu1 %v5393_v10  ;;  %v5480_v9 = vld [vmem:[%s7644_s1 + $0x7c0] ss:$16 sps:$4 sm:$0xff]   ;;  %v5483_v10 = vld [vmem:[%s7644_s1 + $0x7c8] ss:$16 sps:$4 sm:$0xff]  }
  0xc4   : > { %3545 = vmatprep.subr.bf16.mxu0 %v5398_v11  ;;  %3889 = vmatprep.subr.bf16.mxu1 %v5401_v12  ;;  %v5488_v11 = vld [vmem:[%s7644_s1 + $0x7e4] ss:$16 sps:$4 sm:$0xff]   ;;  %v5491_v12 = vld [vmem:[%s7644_s1 + $0x7ec] ss:$16 sps:$4 sm:$0xff]  }
  0xc6   : > { %3535 = vmatmul.mubr.bf16.vlgmr.msra.gmra.mrb[0].mxu0 %v4451_v17  ;;  %3879 = vmatmul.mubr.bf16.vlgmr.msra.gmra.mrb[0].mxu1 %v4451_v17  ;;  %v5494_v17 = vld [vmem:[%s7644_s1 + $0x804] ss:$16 sps:$4 sm:$0xff]  }
  0xc7   : > { %3546 = vmatpush1.bf16.msra.mxu0 %v5396_v13  ;;  %3890 = vmatpush1.bf16.msra.mxu1 %v5399_v16  ;;  %v5486_v13 = vld [vmem:[%s7644_s1 + $0x7e0] ss:$16 sps:$4 sm:$0xff]   ;;  %v5489_v16 = vld [vmem:[%s7644_s1 + $0x7e8] ss:$16 sps:$4 sm:$0xff]  }
  0xc8   : > { %3547 = vmatprep.subr.bf16.mxu0 %v5404_v20  ;;  %3891 = vmatprep.subr.bf16.mxu1 %v5407_v21  ;;  %v5497_v20 = vld [vmem:[%s7644_s1 + $0x80c] ss:$16 sps:$4 sm:$0xff]   ;;  %v6753_v21 = vld [vmem:[%s6078_s17 + $0x20] sm:$0xff] }
  0xc9   : > { %3577 = vmatprep.mubr.bf16.mxu0 %v4454_v22  ;;  %3921 = vmatprep.mubr.bf16.mxu1 %v4454_v22  ;;  %v4453_v22 = vcombine.low %v6559_v18, %v6562_v19  ;;  %v5503_v18 = vld [vmem:[%s7644_s1 + $0x82c] ss:$16 sps:$4 sm:$0xff]  }
  0xcb   : > { %3548 = vmatpush1.bf16.msra.mxu0 %v5402_v14  ;;  %3892 = vmatpush1.bf16.msra.mxu1 %v5405_v15  ;;  %v6758_v14 = vld [vmem:[%s6078_s17 + $0x60] sm:$0xff] }
  0xcc   : > { %3549 = vmatprep.subr.bf16.mxu0 %v5410_v23  ;;  %3893 = vmatprep.subr.bf16.mxu1 %v5413_v24  ;;  %v5492_v15 = vld [vmem:[%s7644_s1 + $0x800] ss:$16 sps:$4 sm:$0xff]   ;;  %v5495_v23 = vld [vmem:[%s7644_s1 + $0x808] ss:$16 sps:$4 sm:$0xff]   ;;  %v5500_v24 = vld [vmem:[%s7644_s1 + $0x824] ss:$16 sps:$4 sm:$0xff]   ;;  %v4456_v19 = vcombine.high %v6753_v21, %v6758_v14 }
  0xcf   : > { %3550 = vmatpush1.bf16.msra.mxu0 %v5408_v25  ;;  %3894 = vmatpush1.bf16.msra.mxu1 %v5411_v26  ;;  %v5498_v25 = vld [vmem:[%s7644_s1 + $0x820] ss:$16 sps:$4 sm:$0xff]   ;;  %v5501_v26 = vld [vmem:[%s7644_s1 + $0x828] ss:$16 sps:$4 sm:$0xff]  }
  0xd0   : > { %3551 = vmatprep.subr.bf16.mxu0 %v5416_v27  ;;  %3895 = vmatprep.subr.bf16.mxu1 %v5419_v28  ;;  %v5506_v27 = vld [vmem:[%s7644_s1 + $0x844] ss:$16 sps:$4 sm:$0xff]   ;;  %v5509_v28 = vld [vmem:[%s7644_s1 + $0x84c] ss:$16 sps:$4 sm:$0xff]  }
  0xd3   : > { %3552 = vmatpush1.bf16.msra.mxu0 %v5414_v29  ;;  %3896 = vmatpush1.bf16.msra.mxu1 %v5417_v30  ;;  %v5504_v29 = vld [vmem:[%s7644_s1 + $0x840] ss:$16 sps:$4 sm:$0xff]   ;;  %v5507_v30 = vld [vmem:[%s7644_s1 + $0x848] ss:$16 sps:$4 sm:$0xff]  }
  0xd4   : > { %3553 = vmatprep.subr.bf16.mxu0 %v5422_v31  ;;  %3897 = vmatprep.subr.bf16.mxu1 %v5425_v32  ;;  %v5512_v31 = vld [vmem:[%s7644_s1 + $0x864] ss:$16 sps:$4 sm:$0xff]   ;;  %v5515_v32 = vld [vmem:[%s7644_s1 + $0x86c] ss:$16 sps:$4 sm:$0xff]  }
  0xd7   : > { %3554 = vmatpush1.bf16.msra.mxu0 %v5420_v33  ;;  %3898 = vmatpush1.bf16.msra.mxu1 %v5423_v34  ;;  %v5510_v33 = vld [vmem:[%s7644_s1 + $0x860] ss:$16 sps:$4 sm:$0xff]   ;;  %v5513_v34 = vld [vmem:[%s7644_s1 + $0x868] ss:$16 sps:$4 sm:$0xff]  }
  0xd8   : > { %3555 = vmatprep.subr.bf16.mxu0 %v5428_v35  ;;  %3899 = vmatprep.subr.bf16.mxu1 %v5431_v36  ;;  %v5518_v35 = vld [vmem:[%s7644_s1 + $0x884] ss:$16 sps:$4 sm:$0xff]   ;;  %v5521_v36 = vld [vmem:[%s7644_s1 + $0x88c] ss:$16 sps:$4 sm:$0xff]  }
  0xdb   : > { %3556 = vmatpush1.bf16.msra.mxu0 %v5426_v37  ;;  %3900 = vmatpush1.bf16.msra.mxu1 %v5429_v38  ;;  %v5516_v37 = vld [vmem:[%s7644_s1 + $0x880] ss:$16 sps:$4 sm:$0xff]   ;;  %v5519_v38 = vld [vmem:[%s7644_s1 + $0x888] ss:$16 sps:$4 sm:$0xff]  }
  0xdc   : > { %3557 = vmatprep.subr.bf16.mxu0 %v5434_v39  ;;  %3901 = vmatprep.subr.bf16.mxu1 %v5437_v40  ;;  %v5524_v39 = vld [vmem:[%s7644_s1 + $0x8a4] ss:$16 sps:$4 sm:$0xff]   ;;  %v5527_v40 = vld [vmem:[%s7644_s1 + $0x8ac] ss:$16 sps:$4 sm:$0xff]  }
  0xdf   : > { %3558 = vmatpush1.bf16.msra.mxu0 %v5432_v41  ;;  %3902 = vmatpush1.bf16.msra.mxu1 %v5435_v42  ;;  %v5522_v41 = vld [vmem:[%s7644_s1 + $0x8a0] ss:$16 sps:$4 sm:$0xff]   ;;  %v5525_v42 = vld [vmem:[%s7644_s1 + $0x8a8] ss:$16 sps:$4 sm:$0xff]  }
  0xe0   : > { %3559 = vmatprep.subr.bf16.mxu0 %v5440_v43  ;;  %3903 = vmatprep.subr.bf16.mxu1 %v5443_v44  ;;  %v5530_v43 = vld [vmem:[%s7644_s1 + $0x8c4] ss:$16 sps:$4 sm:$0xff]   ;;  %v5533_v44 = vld [vmem:[%s7644_s1 + $0x8cc] ss:$16 sps:$4 sm:$0xff]  }
  0xe3   : > { %3560 = vmatpush1.bf16.msra.mxu0 %v5438_v45  ;;  %3904 = vmatpush1.bf16.msra.mxu1 %v5441_v46  ;;  %v5528_v45 = vld [vmem:[%s7644_s1 + $0x8c0] ss:$16 sps:$4 sm:$0xff]   ;;  %v5531_v46 = vld [vmem:[%s7644_s1 + $0x8c8] ss:$16 sps:$4 sm:$0xff]  }
  0xe4   : > { %3561 = vmatprep.subr.bf16.mxu0 %v5446_v47  ;;  %3905 = vmatprep.subr.bf16.mxu1 %v5449_v48  ;;  %v5536_v47 = vld [vmem:[%s7644_s1 + $0x8e4] ss:$16 sps:$4 sm:$0xff]   ;;  %v5539_v48 = vld [vmem:[%s7644_s1 + $0x8ec] ss:$16 sps:$4 sm:$0xff]  }
  0xe7   : > { %3562 = vmatpush1.bf16.msra.mxu0 %v5444_v49  ;;  %3906 = vmatpush1.bf16.msra.mxu1 %v5447_v50  ;;  %v5534_v49 = vld [vmem:[%s7644_s1 + $0x8e0] ss:$16 sps:$4 sm:$0xff]   ;;  %v5537_v50 = vld [vmem:[%s7644_s1 + $0x8e8] ss:$16 sps:$4 sm:$0xff]  }
  0xe8   : > { %3563 = vmatprep.subr.bf16.mxu0 %v5452_v51  ;;  %3907 = vmatprep.subr.bf16.mxu1 %v5455_v52  ;;  %v5542_v51 = vld [vmem:[%s7644_s1 + $0x904] ss:$16 sps:$4 sm:$0xff]   ;;  %v5545_v52 = vld [vmem:[%s7644_s1 + $0x90c] ss:$16 sps:$4 sm:$0xff]  }
  0xeb   : > { %3564 = vmatpush1.bf16.msra.mxu0 %v5450_v53  ;;  %3908 = vmatpush1.bf16.msra.mxu1 %v5453_v54  ;;  %v5540_v53 = vld [vmem:[%s7644_s1 + $0x900] ss:$16 sps:$4 sm:$0xff]   ;;  %v5543_v54 = vld [vmem:[%s7644_s1 + $0x908] ss:$16 sps:$4 sm:$0xff]  }
  0xec   : > { %3565 = vmatprep.subr.bf16.mxu0 %v5458_v55  ;;  %3909 = vmatprep.subr.bf16.mxu1 %v5461_v56  ;;  %v5548_v55 = vld [vmem:[%s7644_s1 + $0x924] ss:$16 sps:$4 sm:$0xff]   ;;  %v5551_v56 = vld [vmem:[%s7644_s1 + $0x92c] ss:$16 sps:$4 sm:$0xff]  }
  0xef   : > { %3566 = vmatpush1.bf16.msra.mxu0 %v5456_v57  ;;  %3910 = vmatpush1.bf16.msra.mxu1 %v5459_v58  ;;  %v5546_v57 = vld [vmem:[%s7644_s1 + $0x920] ss:$16 sps:$4 sm:$0xff]   ;;  %v5549_v58 = vld [vmem:[%s7644_s1 + $0x928] ss:$16 sps:$4 sm:$0xff]  }
  0xf0   : > { %3567 = vmatprep.subr.bf16.mxu0 %v5464_v59  ;;  %3911 = vmatprep.subr.bf16.mxu1 %v5467_v60  ;;  %v5554_v59 = vld [vmem:[%s7644_s1 + $0x944] ss:$16 sps:$4 sm:$0xff]   ;;  %v5557_v60 = vld [vmem:[%s7644_s1 + $0x94c] ss:$16 sps:$4 sm:$0xff]  }
  0xf3   : > { %3568 = vmatpush1.bf16.msra.mxu0 %v5462_v61  ;;  %3912 = vmatpush1.bf16.msra.mxu1 %v5465_v62  ;;  %v5552_v61 = vld [vmem:[%s7644_s1 + $0x940] ss:$16 sps:$4 sm:$0xff]   ;;  %v5555_v62 = vld [vmem:[%s7644_s1 + $0x948] ss:$16 sps:$4 sm:$0xff]  }
  0xf4   : > { %3569 = vmatprep.subr.bf16.mxu0 %v5470_v63  ;;  %3913 = vmatprep.subr.bf16.mxu1 %v5473_v0  ;;  %v5560_v63 = vld [vmem:[%s7644_s1 + $0x964] ss:$16 sps:$4 sm:$0xff]   ;;  %v5563_v0 = vld [vmem:[%s7644_s1 + $0x96c] ss:$16 sps:$4 sm:$0xff]  }
  0xf7   : > { %3570 = vmatpush1.bf16.msra.mxu0 %v5468_v1  ;;  %3914 = vmatpush1.bf16.msra.mxu1 %v5471_v2  ;;  %v5558_v1 = vld [vmem:[%s7644_s1 + $0x960] ss:$16 sps:$4 sm:$0xff]   ;;  %v5561_v2 = vld [vmem:[%s7644_s1 + $0x968] ss:$16 sps:$4 sm:$0xff]  }
  0xf8   : > { %3571 = vmatprep.subr.bf16.mxu0 %v5476_v3  ;;  %3915 = vmatprep.subr.bf16.mxu1 %v5479_v4  ;;  %v5566_v3 = vld [vmem:[%s7644_s1 + $0x984] ss:$16 sps:$4 sm:$0xff]   ;;  %v5569_v4 = vld [vmem:[%s7644_s1 + $0x98c] ss:$16 sps:$4 sm:$0xff]  }
  0xfb   : > { %3572 = vmatpush1.bf16.msra.mxu0 %v5474_v5  ;;  %3916 = vmatpush1.bf16.msra.mxu1 %v5477_v6  ;;  %v5564_v5 = vld [vmem:[%s7644_s1 + $0x980] ss:$16 sps:$4 sm:$0xff]   ;;  %v5567_v6 = vld [vmem:[%s7644_s1 + $0x988] ss:$16 sps:$4 sm:$0xff]  }
  0xfc   : > { %3573 = vmatprep.subr.bf16.mxu0 %v5482_v7  ;;  %3917 = vmatprep.subr.bf16.mxu1 %v5485_v8  ;;  %v5572_v7 = vld [vmem:[%s7644_s1 + $0x9a4] ss:$16 sps:$4 sm:$0xff]   ;;  %v5575_v8 = vld [vmem:[%s7644_s1 + $0x9ac] ss:$16 sps:$4 sm:$0xff]  }
  0xff   : > { %3574 = vmatpush1.bf16.msra.mxu0 %v5480_v9  ;;  %3918 = vmatpush1.bf16.msra.mxu1 %v5483_v10  ;;  %v5570_v9 = vld [vmem:[%s7644_s1 + $0x9a0] ss:$16 sps:$4 sm:$0xff]   ;;  %v5573_v10 = vld [vmem:[%s7644_s1 + $0x9a8] ss:$16 sps:$4 sm:$0xff]  }
 0x100   : > { %3575 = vmatprep.subr.bf16.mxu0 %v5488_v11  ;;  %3919 = vmatprep.subr.bf16.mxu1 %v5491_v12  ;;  %v5578_v11 = vld [vmem:[%s7644_s1 + $0x9c4] ss:$16 sps:$4 sm:$0xff]   ;;  %v5581_v12 = vld [vmem:[%s7644_s1 + $0x9cc] ss:$16 sps:$4 sm:$0xff]  }
 0x103   : > { %3576 = vmatpush1.bf16.msra.mxu0 %v5486_v13  ;;  %3920 = vmatpush1.bf16.msra.mxu1 %v5489_v16  ;;  %v5576_v13 = vld [vmem:[%s7644_s1 + $0x9c0] ss:$16 sps:$4 sm:$0xff]   ;;  %v5579_v16 = vld [vmem:[%s7644_s1 + $0x9c8] ss:$16 sps:$4 sm:$0xff]  }
 0x104   : > { %3588 = vmatprep.subr.bf16.mxu0 %v5494_v17  ;;  %3932 = vmatprep.subr.bf16.mxu1 %v5497_v20  ;;  %v5584_v17 = vld [vmem:[%s7644_s1 + $0x9e4] ss:$16 sps:$4 sm:$0xff]   ;;  %v5587_v20 = vld [vmem:[%s7644_s1 + $0x9ec] ss:$16 sps:$4 sm:$0xff]  }
 0x106   : > { %3578 = vmatmul.mubr.bf16.vlgmr.msra.gmra.mrb[0].mxu0 %v4453_v22  ;;  %3922 = vmatmul.mubr.bf16.vlgmr.msra.gmra.mrb[0].mxu1 %v4453_v22  ;;  %v5582_v22 = vld [vmem:[%s7644_s1 + $0x9e0] ss:$16 sps:$4 sm:$0xff]  }
 0x107   : > { %3589 = vmatpush1.bf16.msra.mxu0 %v5492_v15  ;;  %3933 = vmatpush1.bf16.msra.mxu1 %v5495_v23  ;;  %v5585_v15 = vld [vmem:[%s7644_s1 + $0x9e8] ss:$16 sps:$4 sm:$0xff]   ;;  %v5590_v23 = vld [vmem:[%s7644_s1 + $0xa04] ss:$16 sps:$4 sm:$0xff]  }
 0x108   : > { %3590 = vmatprep.subr.bf16.mxu0 %v5500_v24  ;;  %3934 = vmatprep.subr.bf16.mxu1 %v5503_v18  ;;  %v5593_v24 = vld [vmem:[%s7644_s1 + $0xa0c] ss:$16 sps:$4 sm:$0xff]  }
 0x109   : > { %3620 = vmatprep.mubr.bf16.mxu0 %v4456_v19  ;;  %3964 = vmatprep.mubr.bf16.mxu1 %v4456_v19  ;;  %v6955_v18 = vld [vmem:[%s6078_s17 + $0x28] sm:$0xff] }
 0x10a   : > { %v6958_v19 = vld [vmem:[%s6078_s17 + $0x68] sm:$0xff] }
 0x10b   : > { %3591 = vmatpush1.bf16.msra.mxu0 %v5498_v25  ;;  %3935 = vmatpush1.bf16.msra.mxu1 %v5501_v26  ;;  %v4455_v25 = vcombine.low %v6753_v21, %v6758_v14  ;;  %v5588_v26 = vld [vmem:[%s7644_s1 + $0xa00] ss:$16 sps:$4 sm:$0xff]   ;;  %v5599_v21 = vld [vmem:[%s7644_s1 + $0xa2c] ss:$16 sps:$4 sm:$0xff]   ;;  %v4458_v14 = vcombine.high %v6955_v18, %v6958_v19 }
 0x10c   : > { %3592 = vmatprep.subr.bf16.mxu0 %v5506_v27  ;;  %3936 = vmatprep.subr.bf16.mxu1 %v5509_v28  ;;  %v5591_v27 = vld [vmem:[%s7644_s1 + $0xa08] ss:$16 sps:$4 sm:$0xff]   ;;  %v5596_v28 = vld [vmem:[%s7644_s1 + $0xa24] ss:$16 sps:$4 sm:$0xff]  }
 0x10f   : > { %3593 = vmatpush1.bf16.msra.mxu0 %v5504_v29  ;;  %3937 = vmatpush1.bf16.msra.mxu1 %v5507_v30  ;;  %v5594_v29 = vld [vmem:[%s7644_s1 + $0xa20] ss:$16 sps:$4 sm:$0xff]   ;;  %v5597_v30 = vld [vmem:[%s7644_s1 + $0xa28] ss:$16 sps:$4 sm:$0xff]  }
 0x110   : > { %3594 = vmatprep.subr.bf16.mxu0 %v5512_v31  ;;  %3938 = vmatprep.subr.bf16.mxu1 %v5515_v32  ;;  %v5602_v31 = vld [vmem:[%s7644_s1 + $0xa44] ss:$16 sps:$4 sm:$0xff]   ;;  %v5605_v32 = vld [vmem:[%s7644_s1 + $0xa4c] ss:$16 sps:$4 sm:$0xff]  }
 0x113   : > { %3595 = vmatpush1.bf16.msra.mxu0 %v5510_v33  ;;  %3939 = vmatpush1.bf16.msra.mxu1 %v5513_v34  ;;  %v5600_v33 = vld [vmem:[%s7644_s1 + $0xa40] ss:$16 sps:$4 sm:$0xff]   ;;  %v5603_v34 = vld [vmem:[%s7644_s1 + $0xa48] ss:$16 sps:$4 sm:$0xff]  }
 0x114   : > { %3596 = vmatprep.subr.bf16.mxu0 %v5518_v35  ;;  %3940 = vmatprep.subr.bf16.mxu1 %v5521_v36  ;;  %v5608_v35 = vld [vmem:[%s7644_s1 + $0xa64] ss:$16 sps:$4 sm:$0xff]   ;;  %v5611_v36 = vld [vmem:[%s7644_s1 + $0xa6c] ss:$16 sps:$4 sm:$0xff]  }
 0x117   : > { %3597 = vmatpush1.bf16.msra.mxu0 %v5516_v37  ;;  %3941 = vmatpush1.bf16.msra.mxu1 %v5519_v38  ;;  %v5606_v37 = vld [vmem:[%s7644_s1 + $0xa60] ss:$16 sps:$4 sm:$0xff]   ;;  %v5609_v38 = vld [vmem:[%s7644_s1 + $0xa68] ss:$16 sps:$4 sm:$0xff]  }
 0x118   : > { %3598 = vmatprep.subr.bf16.mxu0 %v5524_v39  ;;  %3942 = vmatprep.subr.bf16.mxu1 %v5527_v40  ;;  %v5614_v39 = vld [vmem:[%s7644_s1 + $0xa84] ss:$16 sps:$4 sm:$0xff]   ;;  %v5617_v40 = vld [vmem:[%s7644_s1 + $0xa8c] ss:$16 sps:$4 sm:$0xff]  }
 0x11b   : > { %3599 = vmatpush1.bf16.msra.mxu0 %v5522_v41  ;;  %3943 = vmatpush1.bf16.msra.mxu1 %v5525_v42  ;;  %v5612_v41 = vld [vmem:[%s7644_s1 + $0xa80] ss:$16 sps:$4 sm:$0xff]   ;;  %v5615_v42 = vld [vmem:[%s7644_s1 + $0xa88] ss:$16 sps:$4 sm:$0xff]  }
 0x11c   : > { %3600 = vmatprep.subr.bf16.mxu0 %v5530_v43  ;;  %3944 = vmatprep.subr.bf16.mxu1 %v5533_v44  ;;  %v5620_v43 = vld [vmem:[%s7644_s1 + $0xaa4] ss:$16 sps:$4 sm:$0xff]   ;;  %v5623_v44 = vld [vmem:[%s7644_s1 + $0xaac] ss:$16 sps:$4 sm:$0xff]  }
 0x11f   : > { %3601 = vmatpush1.bf16.msra.mxu0 %v5528_v45  ;;  %3945 = vmatpush1.bf16.msra.mxu1 %v5531_v46  ;;  %v5618_v45 = vld [vmem:[%s7644_s1 + $0xaa0] ss:$16 sps:$4 sm:$0xff]   ;;  %v5621_v46 = vld [vmem:[%s7644_s1 + $0xaa8] ss:$16 sps:$4 sm:$0xff]  }
 0x120   : > { %3602 = vmatprep.subr.bf16.mxu0 %v5536_v47  ;;  %3946 = vmatprep.subr.bf16.mxu1 %v5539_v48  ;;  %v5626_v47 = vld [vmem:[%s7644_s1 + $0xac4] ss:$16 sps:$4 sm:$0xff]   ;;  %v5629_v48 = vld [vmem:[%s7644_s1 + $0xacc] ss:$16 sps:$4 sm:$0xff]  }
 0x123   : > { %3603 = vmatpush1.bf16.msra.mxu0 %v5534_v49  ;;  %3947 = vmatpush1.bf16.msra.mxu1 %v5537_v50  ;;  %v5624_v49 = vld [vmem:[%s7644_s1 + $0xac0] ss:$16 sps:$4 sm:$0xff]   ;;  %v5627_v50 = vld [vmem:[%s7644_s1 + $0xac8] ss:$16 sps:$4 sm:$0xff]  }
 0x124   : > { %3604 = vmatprep.subr.bf16.mxu0 %v5542_v51  ;;  %3948 = vmatprep.subr.bf16.mxu1 %v5545_v52  ;;  %v5632_v51 = vld [vmem:[%s7644_s1 + $0xae4] ss:$16 sps:$4 sm:$0xff]   ;;  %v5635_v52 = vld [vmem:[%s7644_s1 + $0xaec] ss:$16 sps:$4 sm:$0xff]  }
 0x127   : > { %3605 = vmatpush1.bf16.msra.mxu0 %v5540_v53  ;;  %3949 = vmatpush1.bf16.msra.mxu1 %v5543_v54  ;;  %v5630_v53 = vld [vmem:[%s7644_s1 + $0xae0] ss:$16 sps:$4 sm:$0xff]   ;;  %v5633_v54 = vld [vmem:[%s7644_s1 + $0xae8] ss:$16 sps:$4 sm:$0xff]  }
 0x128   : > { %3606 = vmatprep.subr.bf16.mxu0 %v5548_v55  ;;  %3950 = vmatprep.subr.bf16.mxu1 %v5551_v56  ;;  %v5638_v55 = vld [vmem:[%s7644_s1 + $0xb04] ss:$16 sps:$4 sm:$0xff]   ;;  %v5641_v56 = vld [vmem:[%s7644_s1 + $0xb0c] ss:$16 sps:$4 sm:$0xff]  }
 0x12b   : > { %3607 = vmatpush1.bf16.msra.mxu0 %v5546_v57  ;;  %3951 = vmatpush1.bf16.msra.mxu1 %v5549_v58  ;;  %v5636_v57 = vld [vmem:[%s7644_s1 + $0xb00] ss:$16 sps:$4 sm:$0xff]   ;;  %v5639_v58 = vld [vmem:[%s7644_s1 + $0xb08] ss:$16 sps:$4 sm:$0xff]  }
 0x12c   : > { %3608 = vmatprep.subr.bf16.mxu0 %v5554_v59  ;;  %3952 = vmatprep.subr.bf16.mxu1 %v5557_v60  ;;  %v5644_v59 = vld [vmem:[%s7644_s1 + $0xb24] ss:$16 sps:$4 sm:$0xff]   ;;  %v5647_v60 = vld [vmem:[%s7644_s1 + $0xb2c] ss:$16 sps:$4 sm:$0xff]  }
 0x12f   : > { %3609 = vmatpush1.bf16.msra.mxu0 %v5552_v61  ;;  %3953 = vmatpush1.bf16.msra.mxu1 %v5555_v62  ;;  %v5642_v61 = vld [vmem:[%s7644_s1 + $0xb20] ss:$16 sps:$4 sm:$0xff]   ;;  %v5645_v62 = vld [vmem:[%s7644_s1 + $0xb28] ss:$16 sps:$4 sm:$0xff]  }
 0x130   : > { %3610 = vmatprep.subr.bf16.mxu0 %v5560_v63  ;;  %3954 = vmatprep.subr.bf16.mxu1 %v5563_v0  ;;  %v5650_v63 = vld [vmem:[%s7644_s1 + $0xb44] ss:$16 sps:$4 sm:$0xff]   ;;  %v5653_v0 = vld [vmem:[%s7644_s1 + $0xb4c] ss:$16 sps:$4 sm:$0xff]  }
 0x133   : > { %3611 = vmatpush1.bf16.msra.mxu0 %v5558_v1  ;;  %3955 = vmatpush1.bf16.msra.mxu1 %v5561_v2  ;;  %v5648_v1 = vld [vmem:[%s7644_s1 + $0xb40] ss:$16 sps:$4 sm:$0xff]   ;;  %v5651_v2 = vld [vmem:[%s7644_s1 + $0xb48] ss:$16 sps:$4 sm:$0xff]  }
 0x134   : > { %3612 = vmatprep.subr.bf16.mxu0 %v5566_v3  ;;  %3956 = vmatprep.subr.bf16.mxu1 %v5569_v4  ;;  %v5656_v3 = vld [vmem:[%s7644_s1 + $0xb64] ss:$16 sps:$4 sm:$0xff]   ;;  %v5659_v4 = vld [vmem:[%s7644_s1 + $0xb6c] ss:$16 sps:$4 sm:$0xff]  }
 0x137   : > { %3613 = vmatpush1.bf16.msra.mxu0 %v5564_v5  ;;  %3957 = vmatpush1.bf16.msra.mxu1 %v5567_v6  ;;  %v5654_v5 = vld [vmem:[%s7644_s1 + $0xb60] ss:$16 sps:$4 sm:$0xff]   ;;  %v5657_v6 = vld [vmem:[%s7644_s1 + $0xb68] ss:$16 sps:$4 sm:$0xff]  }
 0x138   : > { %3614 = vmatprep.subr.bf16.mxu0 %v5572_v7  ;;  %3958 = vmatprep.subr.bf16.mxu1 %v5575_v8  ;;  %v5662_v7 = vld [vmem:[%s7644_s1 + $0xb84] ss:$16 sps:$4 sm:$0xff]   ;;  %v5665_v8 = vld [vmem:[%s7644_s1 + $0xb8c] ss:$16 sps:$4 sm:$0xff]  }
 0x13b   : > { %3615 = vmatpush1.bf16.msra.mxu0 %v5570_v9  ;;  %3959 = vmatpush1.bf16.msra.mxu1 %v5573_v10  ;;  %v5660_v9 = vld [vmem:[%s7644_s1 + $0xb80] ss:$16 sps:$4 sm:$0xff]   ;;  %v5663_v10 = vld [vmem:[%s7644_s1 + $0xb88] ss:$16 sps:$4 sm:$0xff]  }
 0x13c   : > { %3616 = vmatprep.subr.bf16.mxu0 %v5578_v11  ;;  %3960 = vmatprep.subr.bf16.mxu1 %v5581_v12  ;;  %v5668_v11 = vld [vmem:[%s7644_s1 + $0xba4] ss:$16 sps:$4 sm:$0xff]   ;;  %v5671_v12 = vld [vmem:[%s7644_s1 + $0xbac] ss:$16 sps:$4 sm:$0xff]  }
 0x13f   : > { %3617 = vmatpush1.bf16.msra.mxu0 %v5576_v13  ;;  %3961 = vmatpush1.bf16.msra.mxu1 %v5579_v16  ;;  %v5666_v13 = vld [vmem:[%s7644_s1 + $0xba0] ss:$16 sps:$4 sm:$0xff]   ;;  %v5669_v16 = vld [vmem:[%s7644_s1 + $0xba8] ss:$16 sps:$4 sm:$0xff]  }
 0x140   : > { %3618 = vmatprep.subr.bf16.mxu0 %v5584_v17  ;;  %3962 = vmatprep.subr.bf16.mxu1 %v5587_v20  ;;  %v5674_v17 = vld [vmem:[%s7644_s1 + $0xbc4] ss:$16 sps:$4 sm:$0xff]   ;;  %v5677_v20 = vld [vmem:[%s7644_s1 + $0xbcc] ss:$16 sps:$4 sm:$0xff]  }
 0x143   : > { %3619 = vmatpush1.bf16.msra.mxu0 %v5582_v22  ;;  %3963 = vmatpush1.bf16.msra.mxu1 %v5585_v15  ;;  %v5672_v22 = vld [vmem:[%s7644_s1 + $0xbc0] ss:$16 sps:$4 sm:$0xff]   ;;  %v5675_v15 = vld [vmem:[%s7644_s1 + $0xbc8] ss:$16 sps:$4 sm:$0xff]  }
 0x144   : > { %3631 = vmatprep.subr.bf16.mxu0 %v5590_v23  ;;  %3975 = vmatprep.subr.bf16.mxu1 %v5593_v24  ;;  %v5680_v23 = vld [vmem:[%s7644_s1 + $0xbe4] ss:$16 sps:$4 sm:$0xff]   ;;  %v5683_v24 = vld [vmem:[%s7644_s1 + $0xbec] ss:$16 sps:$4 sm:$0xff]  }
 0x146   : > { %3621 = vmatmul.mubr.bf16.vlgmr.msra.gmra.mrb[0].mxu0 %v4455_v25  ;;  %3965 = vmatmul.mubr.bf16.vlgmr.msra.gmra.mrb[0].mxu1 %v4455_v25  ;;  %v5678_v25 = vld [vmem:[%s7644_s1 + $0xbe0] ss:$16 sps:$4 sm:$0xff]  }
 0x147   : > { %3632 = vmatpush1.bf16.msra.mxu0 %v5588_v26  ;;  %3976 = vmatpush1.bf16.msra.mxu1 %v5591_v27  ;;  %v5681_v26 = vld [vmem:[%s7644_s1 + $0xbe8] ss:$16 sps:$4 sm:$0xff]   ;;  %v5686_v27 = vld [vmem:[%s7644_s1 + $0xc04] ss:$16 sps:$4 sm:$0xff]  }
 0x148   : > { %3633 = vmatprep.subr.bf16.mxu0 %v5596_v28  ;;  %3977 = vmatprep.subr.bf16.mxu1 %v5599_v21  ;;  %v5689_v28 = vld [vmem:[%s7644_s1 + $0xc0c] ss:$16 sps:$4 sm:$0xff]   ;;  %v4457_v21 = vcombine.low %v6955_v18, %v6958_v19  ;;  %v5692_v18 = vld [vmem:[%s7644_s1 + $0xc24] ss:$16 sps:$4 sm:$0xff]  }
 0x149   : > { %3663 = vmatprep.mubr.bf16.mxu0 %v4458_v14  ;;  %4007 = vmatprep.mubr.bf16.mxu1 %v4458_v14  ;;  %v7159_v14 = vld [vmem:[%s6078_s17 + $0x30] sm:$0xff]  ;;  %v5695_v19 = vld [vmem:[%s7644_s1 + $0xc2c] ss:$16 sps:$4 sm:$0xff]  }
 0x14b   : > { %3634 = vmatpush1.bf16.msra.mxu0 %v5594_v29  ;;  %3978 = vmatpush1.bf16.msra.mxu1 %v5597_v30  ;;  %v7162_v29 = vld [vmem:[%s6078_s17 + $0x70] sm:$0xff] }
 0x14c   : > { %3635 = vmatprep.subr.bf16.mxu0 %v5602_v31  ;;  %3979 = vmatprep.subr.bf16.mxu1 %v5605_v32  ;;  %v5684_v30 = vld [vmem:[%s7644_s1 + $0xc00] ss:$16 sps:$4 sm:$0xff]   ;;  %v5687_v31 = vld [vmem:[%s7644_s1 + $0xc08] ss:$16 sps:$4 sm:$0xff]   ;;  %v4460_v32 = vcombine.high %v7159_v14, %v7162_v29 }
 0x14f   : > { %3636 = vmatpush1.bf16.msra.mxu0 %v5600_v33  ;;  %3980 = vmatpush1.bf16.msra.mxu1 %v5603_v34  ;;  %v5690_v33 = vld [vmem:[%s7644_s1 + $0xc20] ss:$16 sps:$4 sm:$0xff]   ;;  %v5693_v34 = vld [vmem:[%s7644_s1 + $0xc28] ss:$16 sps:$4 sm:$0xff]  }
 0x150   : > { %3637 = vmatprep.subr.bf16.mxu0 %v5608_v35  ;;  %3981 = vmatprep.subr.bf16.mxu1 %v5611_v36  ;;  %v5698_v35 = vld [vmem:[%s7644_s1 + $0xc44] ss:$16 sps:$4 sm:$0xff]   ;;  %v5701_v36 = vld [vmem:[%s7644_s1 + $0xc4c] ss:$16 sps:$4 sm:$0xff]  }
 0x153   : > { %3638 = vmatpush1.bf16.msra.mxu0 %v5606_v37  ;;  %3982 = vmatpush1.bf16.msra.mxu1 %v5609_v38  ;;  %v5696_v37 = vld [vmem:[%s7644_s1 + $0xc40] ss:$16 sps:$4 sm:$0xff]   ;;  %v5699_v38 = vld [vmem:[%s7644_s1 + $0xc48] ss:$16 sps:$4 sm:$0xff]  }
 0x154   : > { %3639 = vmatprep.subr.bf16.mxu0 %v5614_v39  ;;  %3983 = vmatprep.subr.bf16.mxu1 %v5617_v40  ;;  %v5704_v39 = vld [vmem:[%s7644_s1 + $0xc64] ss:$16 sps:$4 sm:$0xff]   ;;  %v5707_v40 = vld [vmem:[%s7644_s1 + $0xc6c] ss:$16 sps:$4 sm:$0xff]  }
 0x157   : > { %3640 = vmatpush1.bf16.msra.mxu0 %v5612_v41  ;;  %3984 = vmatpush1.bf16.msra.mxu1 %v5615_v42  ;;  %v5702_v41 = vld [vmem:[%s7644_s1 + $0xc60] ss:$16 sps:$4 sm:$0xff]   ;;  %v5705_v42 = vld [vmem:[%s7644_s1 + $0xc68] ss:$16 sps:$4 sm:$0xff]  }
 0x158   : > { %3641 = vmatprep.subr.bf16.mxu0 %v5620_v43  ;;  %3985 = vmatprep.subr.bf16.mxu1 %v5623_v44  ;;  %v5710_v43 = vld [vmem:[%s7644_s1 + $0xc84] ss:$16 sps:$4 sm:$0xff]   ;;  %v5713_v44 = vld [vmem:[%s7644_s1 + $0xc8c] ss:$16 sps:$4 sm:$0xff]  }
 0x15b   : > { %3642 = vmatpush1.bf16.msra.mxu0 %v5618_v45  ;;  %3986 = vmatpush1.bf16.msra.mxu1 %v5621_v46  ;;  %v5708_v45 = vld [vmem:[%s7644_s1 + $0xc80] ss:$16 sps:$4 sm:$0xff]   ;;  %v5711_v46 = vld [vmem:[%s7644_s1 + $0xc88] ss:$16 sps:$4 sm:$0xff]  }
 0x15c   : > { %3643 = vmatprep.subr.bf16.mxu0 %v5626_v47  ;;  %3987 = vmatprep.subr.bf16.mxu1 %v5629_v48  ;;  %v5716_v47 = vld [vmem:[%s7644_s1 + $0xca4] ss:$16 sps:$4 sm:$0xff]   ;;  %v5719_v48 = vld [vmem:[%s7644_s1 + $0xcac] ss:$16 sps:$4 sm:$0xff]  }
 0x15f   : > { %3644 = vmatpush1.bf16.msra.mxu0 %v5624_v49  ;;  %3988 = vmatpush1.bf16.msra.mxu1 %v5627_v50  ;;  %v5714_v49 = vld [vmem:[%s7644_s1 + $0xca0] ss:$16 sps:$4 sm:$0xff]   ;;  %v5717_v50 = vld [vmem:[%s7644_s1 + $0xca8] ss:$16 sps:$4 sm:$0xff]  }
 0x160   : > { %3645 = vmatprep.subr.bf16.mxu0 %v5632_v51  ;;  %3989 = vmatprep.subr.bf16.mxu1 %v5635_v52  ;;  %v5722_v51 = vld [vmem:[%s7644_s1 + $0xcc4] ss:$16 sps:$4 sm:$0xff]   ;;  %v5725_v52 = vld [vmem:[%s7644_s1 + $0xccc] ss:$16 sps:$4 sm:$0xff]  }
 0x163   : > { %3646 = vmatpush1.bf16.msra.mxu0 %v5630_v53  ;;  %3990 = vmatpush1.bf16.msra.mxu1 %v5633_v54  ;;  %v5720_v53 = vld [vmem:[%s7644_s1 + $0xcc0] ss:$16 sps:$4 sm:$0xff]   ;;  %v5723_v54 = vld [vmem:[%s7644_s1 + $0xcc8] ss:$16 sps:$4 sm:$0xff]  }
 0x164   : > { %3647 = vmatprep.subr.bf16.mxu0 %v5638_v55  ;;  %3991 = vmatprep.subr.bf16.mxu1 %v5641_v56  ;;  %v5728_v55 = vld [vmem:[%s7644_s1 + $0xce4] ss:$16 sps:$4 sm:$0xff]   ;;  %v5731_v56 = vld [vmem:[%s7644_s1 + $0xcec] ss:$16 sps:$4 sm:$0xff]  }
 0x167   : > { %3648 = vmatpush1.bf16.msra.mxu0 %v5636_v57  ;;  %3992 = vmatpush1.bf16.msra.mxu1 %v5639_v58  ;;  %v5726_v57 = vld [vmem:[%s7644_s1 + $0xce0] ss:$16 sps:$4 sm:$0xff]   ;;  %v5729_v58 = vld [vmem:[%s7644_s1 + $0xce8] ss:$16 sps:$4 sm:$0xff]  }
 0x168   : > { %3649 = vmatprep.subr.bf16.mxu0 %v5644_v59  ;;  %3993 = vmatprep.subr.bf16.mxu1 %v5647_v60  ;;  %v5734_v59 = vld [vmem:[%s7644_s1 + $0xd04] ss:$16 sps:$4 sm:$0xff]   ;;  %v5737_v60 = vld [vmem:[%s7644_s1 + $0xd0c] ss:$16 sps:$4 sm:$0xff]  }
 0x16b   : > { %3650 = vmatpush1.bf16.msra.mxu0 %v5642_v61  ;;  %3994 = vmatpush1.bf16.msra.mxu1 %v5645_v62  ;;  %v5732_v61 = vld [vmem:[%s7644_s1 + $0xd00] ss:$16 sps:$4 sm:$0xff]   ;;  %v5735_v62 = vld [vmem:[%s7644_s1 + $0xd08] ss:$16 sps:$4 sm:$0xff]  }
 0x16c   : > { %3651 = vmatprep.subr.bf16.mxu0 %v5650_v63  ;;  %3995 = vmatprep.subr.bf16.mxu1 %v5653_v0  ;;  %v5740_v63 = vld [vmem:[%s7644_s1 + $0xd24] ss:$16 sps:$4 sm:$0xff]   ;;  %v5743_v0 = vld [vmem:[%s7644_s1 + $0xd2c] ss:$16 sps:$4 sm:$0xff]  }
 0x16f   : > { %3652 = vmatpush1.bf16.msra.mxu0 %v5648_v1  ;;  %3996 = vmatpush1.bf16.msra.mxu1 %v5651_v2  ;;  %v5738_v1 = vld [vmem:[%s7644_s1 + $0xd20] ss:$16 sps:$4 sm:$0xff]   ;;  %v5741_v2 = vld [vmem:[%s7644_s1 + $0xd28] ss:$16 sps:$4 sm:$0xff]  }
 0x170   : > { %3653 = vmatprep.subr.bf16.mxu0 %v5656_v3  ;;  %3997 = vmatprep.subr.bf16.mxu1 %v5659_v4  ;;  %v5746_v3 = vld [vmem:[%s7644_s1 + $0xd44] ss:$16 sps:$4 sm:$0xff]   ;;  %v5749_v4 = vld [vmem:[%s7644_s1 + $0xd4c] ss:$16 sps:$4 sm:$0xff]  }
 0x173   : > { %3654 = vmatpush1.bf16.msra.mxu0 %v5654_v5  ;;  %3998 = vmatpush1.bf16.msra.mxu1 %v5657_v6  ;;  %v5744_v5 = vld [vmem:[%s7644_s1 + $0xd40] ss:$16 sps:$4 sm:$0xff]   ;;  %v5747_v6 = vld [vmem:[%s7644_s1 + $0xd48] ss:$16 sps:$4 sm:$0xff]  }
 0x174   : > { %3655 = vmatprep.subr.bf16.mxu0 %v5662_v7  ;;  %3999 = vmatprep.subr.bf16.mxu1 %v5665_v8  ;;  %v5752_v7 = vld [vmem:[%s7644_s1 + $0xd64] ss:$16 sps:$4 sm:$0xff]   ;;  %v5755_v8 = vld [vmem:[%s7644_s1 + $0xd6c] ss:$16 sps:$4 sm:$0xff]  }
 0x177   : > { %3656 = vmatpush1.bf16.msra.mxu0 %v5660_v9  ;;  %4000 = vmatpush1.bf16.msra.mxu1 %v5663_v10  ;;  %v5750_v9 = vld [vmem:[%s7644_s1 + $0xd60] ss:$16 sps:$4 sm:$0xff]   ;;  %v5753_v10 = vld [vmem:[%s7644_s1 + $0xd68] ss:$16 sps:$4 sm:$0xff]  }
 0x178   : > { %3657 = vmatprep.subr.bf16.mxu0 %v5668_v11  ;;  %4001 = vmatprep.subr.bf16.mxu1 %v5671_v12  ;;  %v5758_v11 = vld [vmem:[%s7644_s1 + $0xd84] ss:$16 sps:$4 sm:$0xff]   ;;  %v5761_v12 = vld [vmem:[%s7644_s1 + $0xd8c] ss:$16 sps:$4 sm:$0xff]  }
 0x17b   : > { %3658 = vmatpush1.bf16.msra.mxu0 %v5666_v13  ;;  %4002 = vmatpush1.bf16.msra.mxu1 %v5669_v16  ;;  %v5756_v13 = vld [vmem:[%s7644_s1 + $0xd80] ss:$16 sps:$4 sm:$0xff]   ;;  %v5759_v16 = vld [vmem:[%s7644_s1 + $0xd88] ss:$16 sps:$4 sm:$0xff]  }
 0x17c   : > { %3659 = vmatprep.subr.bf16.mxu0 %v5674_v17  ;;  %4003 = vmatprep.subr.bf16.mxu1 %v5677_v20  ;;  %v5764_v17 = vld [vmem:[%s7644_s1 + $0xda4] ss:$16 sps:$4 sm:$0xff]   ;;  %v5767_v20 = vld [vmem:[%s7644_s1 + $0xdac] ss:$16 sps:$4 sm:$0xff]  }
 0x17f   : > { %3660 = vmatpush1.bf16.msra.mxu0 %v5672_v22  ;;  %4004 = vmatpush1.bf16.msra.mxu1 %v5675_v15  ;;  %v5762_v22 = vld [vmem:[%s7644_s1 + $0xda0] ss:$16 sps:$4 sm:$0xff]   ;;  %v5765_v15 = vld [vmem:[%s7644_s1 + $0xda8] ss:$16 sps:$4 sm:$0xff]  }
 0x180   : > { %3661 = vmatprep.subr.bf16.mxu0 %v5680_v23  ;;  %4005 = vmatprep.subr.bf16.mxu1 %v5683_v24  ;;  %v5770_v23 = vld [vmem:[%s7644_s1 + $0xdc4] ss:$16 sps:$4 sm:$0xff]   ;;  %v5773_v24 = vld [vmem:[%s7644_s1 + $0xdcc] ss:$16 sps:$4 sm:$0xff]  }
 0x183   : > { %3662 = vmatpush1.bf16.msra.mxu0 %v5678_v25  ;;  %4006 = vmatpush1.bf16.msra.mxu1 %v5681_v26  ;;  %v5768_v25 = vld [vmem:[%s7644_s1 + $0xdc0] ss:$16 sps:$4 sm:$0xff]   ;;  %v5771_v26 = vld [vmem:[%s7644_s1 + $0xdc8] ss:$16 sps:$4 sm:$0xff]  }
 0x184   : > { %3674 = vmatprep.subr.bf16.mxu0 %v5686_v27  ;;  %4018 = vmatprep.subr.bf16.mxu1 %v5689_v28  ;;  %v5776_v27 = vld [vmem:[%s7644_s1 + $0xde4] ss:$16 sps:$4 sm:$0xff]   ;;  %v5779_v28 = vld [vmem:[%s7644_s1 + $0xdec] ss:$16 sps:$4 sm:$0xff]  }
 0x186   : > { %3664 = vmatmul.mubr.bf16.vlgmr.msra.gmra.mrb[0].mxu0 %v4457_v21  ;;  %4008 = vmatmul.mubr.bf16.vlgmr.msra.gmra.mrb[0].mxu1 %v4457_v21  ;;  %v5774_v21 = vld [vmem:[%s7644_s1 + $0xde0] ss:$16 sps:$4 sm:$0xff]  }
 0x187   : > { %3675 = vmatpush1.bf16.msra.mxu0 %v5684_v30  ;;  %4019 = vmatpush1.bf16.msra.mxu1 %v5687_v31  ;;  %v5777_v30 = vld [vmem:[%s7644_s1 + $0xde8] ss:$16 sps:$4 sm:$0xff]   ;;  %v5782_v31 = vld [vmem:[%s7644_s1 + $0xe04] ss:$16 sps:$4 sm:$0xff]  }
 0x188   : > { %3676 = vmatprep.subr.bf16.mxu0 %v5692_v18  ;;  %4020 = vmatprep.subr.bf16.mxu1 %v5695_v19  ;;  %v5785_v18 = vld [vmem:[%s7644_s1 + $0xe0c] ss:$16 sps:$4 sm:$0xff]   ;;  %v4459_v19 = vcombine.low %v7159_v14, %v7162_v29  ;;  %v5788_v14 = vld [vmem:[%s7644_s1 + $0xe24] ss:$16 sps:$4 sm:$0xff]  }
 0x189   : > { %3706 = vmatprep.mubr.bf16.mxu0 %v4460_v32  ;;  %4050 = vmatprep.mubr.bf16.mxu1 %v4460_v32  ;;  %v7361_v32 = vld [vmem:[%s6078_s17 + $0x38] sm:$0xff] }
 0x18a   : > { %v5791_v29 = vld [vmem:[%s7644_s1 + $0xe2c] ss:$16 sps:$4 sm:$0xff]  }
 0x18b   : > { %3677 = vmatpush1.bf16.msra.mxu0 %v5690_v33  ;;  %4021 = vmatpush1.bf16.msra.mxu1 %v5693_v34  ;;  %v7364_v33 = vld [vmem:[%s6078_s17 + $0x78] sm:$0xff]  ;;  %v5780_v34 = vld [vmem:[%s7644_s1 + $0xe00] ss:$16 sps:$4 sm:$0xff]  }
 0x18c   : > { %3678 = vmatprep.subr.bf16.mxu0 %v5698_v35  ;;  %4022 = vmatprep.subr.bf16.mxu1 %v5701_v36  ;;  %v5783_v35 = vld [vmem:[%s7644_s1 + $0xe08] ss:$16 sps:$4 sm:$0xff]   ;;  %v4462_v36 = vcombine.high %v7361_v32, %v7364_v33 }
 0x18f   : > { %3679 = vmatpush1.bf16.msra.mxu0 %v5696_v37  ;;  %4023 = vmatpush1.bf16.msra.mxu1 %v5699_v38  ;;  %v5786_v37 = vld [vmem:[%s7644_s1 + $0xe20] ss:$16 sps:$4 sm:$0xff]   ;;  %v5789_v38 = vld [vmem:[%s7644_s1 + $0xe28] ss:$16 sps:$4 sm:$0xff]  }
 0x190   : > { %3680 = vmatprep.subr.bf16.mxu0 %v5704_v39  ;;  %4024 = vmatprep.subr.bf16.mxu1 %v5707_v40  ;;  %v5794_v39 = vld [vmem:[%s7644_s1 + $0xe44] ss:$16 sps:$4 sm:$0xff]   ;;  %v5797_v40 = vld [vmem:[%s7644_s1 + $0xe4c] ss:$16 sps:$4 sm:$0xff]  }
 0x193   : > { %3681 = vmatpush1.bf16.msra.mxu0 %v5702_v41  ;;  %4025 = vmatpush1.bf16.msra.mxu1 %v5705_v42  ;;  %v5792_v41 = vld [vmem:[%s7644_s1 + $0xe40] ss:$16 sps:$4 sm:$0xff]   ;;  %v5795_v42 = vld [vmem:[%s7644_s1 + $0xe48] ss:$16 sps:$4 sm:$0xff]  }
 0x194   : > { %3682 = vmatprep.subr.bf16.mxu0 %v5710_v43  ;;  %4026 = vmatprep.subr.bf16.mxu1 %v5713_v44  ;;  %v5800_v43 = vld [vmem:[%s7644_s1 + $0xe64] ss:$16 sps:$4 sm:$0xff]   ;;  %v5803_v44 = vld [vmem:[%s7644_s1 + $0xe6c] ss:$16 sps:$4 sm:$0xff]  }
 0x197   : > { %3683 = vmatpush1.bf16.msra.mxu0 %v5708_v45  ;;  %4027 = vmatpush1.bf16.msra.mxu1 %v5711_v46  ;;  %v5798_v45 = vld [vmem:[%s7644_s1 + $0xe60] ss:$16 sps:$4 sm:$0xff]   ;;  %v5801_v46 = vld [vmem:[%s7644_s1 + $0xe68] ss:$16 sps:$4 sm:$0xff]  }
 0x198   : > { %3684 = vmatprep.subr.bf16.mxu0 %v5716_v47  ;;  %4028 = vmatprep.subr.bf16.mxu1 %v5719_v48  ;;  %v5806_v47 = vld [vmem:[%s7644_s1 + $0xe84] ss:$16 sps:$4 sm:$0xff]   ;;  %v5809_v48 = vld [vmem:[%s7644_s1 + $0xe8c] ss:$16 sps:$4 sm:$0xff]  }
 0x19b   : > { %3685 = vmatpush1.bf16.msra.mxu0 %v5714_v49  ;;  %4029 = vmatpush1.bf16.msra.mxu1 %v5717_v50  ;;  %v5804_v49 = vld [vmem:[%s7644_s1 + $0xe80] ss:$16 sps:$4 sm:$0xff]   ;;  %v5807_v50 = vld [vmem:[%s7644_s1 + $0xe88] ss:$16 sps:$4 sm:$0xff]  }
 0x19c   : > { %3686 = vmatprep.subr.bf16.mxu0 %v5722_v51  ;;  %4030 = vmatprep.subr.bf16.mxu1 %v5725_v52  ;;  %v5812_v51 = vld [vmem:[%s7644_s1 + $0xea4] ss:$16 sps:$4 sm:$0xff]   ;;  %v5815_v52 = vld [vmem:[%s7644_s1 + $0xeac] ss:$16 sps:$4 sm:$0xff]  }
 0x19f   : > { %3687 = vmatpush1.bf16.msra.mxu0 %v5720_v53  ;;  %4031 = vmatpush1.bf16.msra.mxu1 %v5723_v54  ;;  %v5810_v53 = vld [vmem:[%s7644_s1 + $0xea0] ss:$16 sps:$4 sm:$0xff]   ;;  %v5813_v54 = vld [vmem:[%s7644_s1 + $0xea8] ss:$16 sps:$4 sm:$0xff]  }
 0x1a0   : > { %3688 = vmatprep.subr.bf16.mxu0 %v5728_v55  ;;  %4032 = vmatprep.subr.bf16.mxu1 %v5731_v56  ;;  %v5818_v55 = vld [vmem:[%s7644_s1 + $0xec4] ss:$16 sps:$4 sm:$0xff]   ;;  %v5821_v56 = vld [vmem:[%s7644_s1 + $0xecc] ss:$16 sps:$4 sm:$0xff]  }
 0x1a3   : > { %3689 = vmatpush1.bf16.msra.mxu0 %v5726_v57  ;;  %4033 = vmatpush1.bf16.msra.mxu1 %v5729_v58  ;;  %v5816_v57 = vld [vmem:[%s7644_s1 + $0xec0] ss:$16 sps:$4 sm:$0xff]   ;;  %v5819_v58 = vld [vmem:[%s7644_s1 + $0xec8] ss:$16 sps:$4 sm:$0xff]  }
 0x1a4   : > { %3690 = vmatprep.subr.bf16.mxu0 %v5734_v59  ;;  %4034 = vmatprep.subr.bf16.mxu1 %v5737_v60  ;;  %v5824_v59 = vld [vmem:[%s7644_s1 + $0xee4] ss:$16 sps:$4 sm:$0xff]   ;;  %v5827_v60 = vld [vmem:[%s7644_s1 + $0xeec] ss:$16 sps:$4 sm:$0xff]  }
 0x1a7   : > { %3691 = vmatpush1.bf16.msra.mxu0 %v5732_v61  ;;  %4035 = vmatpush1.bf16.msra.mxu1 %v5735_v62  ;;  %v5822_v61 = vld [vmem:[%s7644_s1 + $0xee0] ss:$16 sps:$4 sm:$0xff]   ;;  %v5825_v62 = vld [vmem:[%s7644_s1 + $0xee8] ss:$16 sps:$4 sm:$0xff]  }
 0x1a8   : > { %3692 = vmatprep.subr.bf16.mxu0 %v5740_v63  ;;  %4036 = vmatprep.subr.bf16.mxu1 %v5743_v0  ;;  %v5830_v63 = vld [vmem:[%s7644_s1 + $0xf04] ss:$16 sps:$4 sm:$0xff]   ;;  %v5833_v0 = vld [vmem:[%s7644_s1 + $0xf0c] ss:$16 sps:$4 sm:$0xff]  }
 0x1ab   : > { %3693 = vmatpush1.bf16.msra.mxu0 %v5738_v1  ;;  %4037 = vmatpush1.bf16.msra.mxu1 %v5741_v2  ;;  %v5828_v1 = vld [vmem:[%s7644_s1 + $0xf00] ss:$16 sps:$4 sm:$0xff]   ;;  %v5831_v2 = vld [vmem:[%s7644_s1 + $0xf08] ss:$16 sps:$4 sm:$0xff]  }
 0x1ac   : > { %3694 = vmatprep.subr.bf16.mxu0 %v5746_v3  ;;  %4038 = vmatprep.subr.bf16.mxu1 %v5749_v4  ;;  %v5836_v3 = vld [vmem:[%s7644_s1 + $0xf24] ss:$16 sps:$4 sm:$0xff]   ;;  %v5839_v4 = vld [vmem:[%s7644_s1 + $0xf2c] ss:$16 sps:$4 sm:$0xff]  }
 0x1af   : > { %3695 = vmatpush1.bf16.msra.mxu0 %v5744_v5  ;;  %4039 = vmatpush1.bf16.msra.mxu1 %v5747_v6  ;;  %v5834_v5 = vld [vmem:[%s7644_s1 + $0xf20] ss:$16 sps:$4 sm:$0xff]   ;;  %v5837_v6 = vld [vmem:[%s7644_s1 + $0xf28] ss:$16 sps:$4 sm:$0xff]  }
 0x1b0   : > { %3696 = vmatprep.subr.bf16.mxu0 %v5752_v7  ;;  %4040 = vmatprep.subr.bf16.mxu1 %v5755_v8  ;;  %v5842_v7 = vld [vmem:[%s7644_s1 + $0xf44] ss:$16 sps:$4 sm:$0xff]   ;;  %v5845_v8 = vld [vmem:[%s7644_s1 + $0xf4c] ss:$16 sps:$4 sm:$0xff]  }
 0x1b3   : > { %3697 = vmatpush1.bf16.msra.mxu0 %v5750_v9  ;;  %4041 = vmatpush1.bf16.msra.mxu1 %v5753_v10  ;;  %v5840_v9 = vld [vmem:[%s7644_s1 + $0xf40] ss:$16 sps:$4 sm:$0xff]   ;;  %v5843_v10 = vld [vmem:[%s7644_s1 + $0xf48] ss:$16 sps:$4 sm:$0xff]  }
 0x1b4   : > { %3698 = vmatprep.subr.bf16.mxu0 %v5758_v11  ;;  %4042 = vmatprep.subr.bf16.mxu1 %v5761_v12  ;;  %v5848_v11 = vld [vmem:[%s7644_s1 + $0xf64] ss:$16 sps:$4 sm:$0xff]   ;;  %v5851_v12 = vld [vmem:[%s7644_s1 + $0xf6c] ss:$16 sps:$4 sm:$0xff]  }
 0x1b7   : > { %3699 = vmatpush1.bf16.msra.mxu0 %v5756_v13  ;;  %4043 = vmatpush1.bf16.msra.mxu1 %v5759_v16  ;;  %v5846_v13 = vld [vmem:[%s7644_s1 + $0xf60] ss:$16 sps:$4 sm:$0xff]   ;;  %v5849_v16 = vld [vmem:[%s7644_s1 + $0xf68] ss:$16 sps:$4 sm:$0xff]  }
 0x1b8   : > { %3700 = vmatprep.subr.bf16.mxu0 %v5764_v17  ;;  %4044 = vmatprep.subr.bf16.mxu1 %v5767_v20  ;;  %v5854_v17 = vld [vmem:[%s7644_s1 + $0xf84] ss:$16 sps:$4 sm:$0xff]   ;;  %v5857_v20 = vld [vmem:[%s7644_s1 + $0xf8c] ss:$16 sps:$4 sm:$0xff]  }
 0x1bb   : > { %3701 = vmatpush1.bf16.msra.mxu0 %v5762_v22  ;;  %4045 = vmatpush1.bf16.msra.mxu1 %v5765_v15  ;;  %v5852_v22 = vld [vmem:[%s7644_s1 + $0xf80] ss:$16 sps:$4 sm:$0xff]   ;;  %v5855_v15 = vld [vmem:[%s7644_s1 + $0xf88] ss:$16 sps:$4 sm:$0xff]  }
 0x1bc   : > { %3702 = vmatprep.subr.bf16.mxu0 %v5770_v23  ;;  %4046 = vmatprep.subr.bf16.mxu1 %v5773_v24  ;;  %v5860_v23 = vld [vmem:[%s7644_s1 + $0xfa4] ss:$16 sps:$4 sm:$0xff]   ;;  %v5863_v24 = vld [vmem:[%s7644_s1 + $0xfac] ss:$16 sps:$4 sm:$0xff]  }
 0x1bf   : > { %3703 = vmatpush1.bf16.msra.mxu0 %v5768_v25  ;;  %4047 = vmatpush1.bf16.msra.mxu1 %v5771_v26  ;;  %v5858_v25 = vld [vmem:[%s7644_s1 + $0xfa0] ss:$16 sps:$4 sm:$0xff]   ;;  %v5861_v26 = vld [vmem:[%s7644_s1 + $0xfa8] ss:$16 sps:$4 sm:$0xff]  }
 0x1c0   : > { %3704 = vmatprep.subr.bf16.mxu0 %v5776_v27  ;;  %4048 = vmatprep.subr.bf16.mxu1 %v5779_v28  ;;  %v5866_v27 = vld [vmem:[%s7644_s1 + $0xfc4] ss:$16 sps:$4 sm:$0xff]   ;;  %v5869_v28 = vld [vmem:[%s7644_s1 + $0xfcc] ss:$16 sps:$4 sm:$0xff]  }
 0x1c3   : > { %3705 = vmatpush1.bf16.msra.mxu0 %v5774_v21  ;;  %4049 = vmatpush1.bf16.msra.mxu1 %v5777_v30  ;;  %v5864_v21 = vld [vmem:[%s7644_s1 + $0xfc0] ss:$16 sps:$4 sm:$0xff]   ;;  %v5867_v30 = vld [vmem:[%s7644_s1 + $0xfc8] ss:$16 sps:$4 sm:$0xff]  }
 0x1c4   : > { %3717 = vmatprep.subr.bf16.mxu0 %v5782_v31  ;;  %4061 = vmatprep.subr.bf16.mxu1 %v5785_v18  ;;  %v5872_v31 = vld [vmem:[%s7644_s1 + $0xfe4] ss:$16 sps:$4 sm:$0xff]   ;;  %v5875_v18 = vld [vmem:[%s7644_s1 + $0xfec] ss:$16 sps:$4 sm:$0xff]  }
 0x1c6   : > { %3707 = vmatmul.mubr.bf16.vlgmr.msra.gmra.mrb[0].mxu0 %v4459_v19  ;;  %4051 = vmatmul.mubr.bf16.vlgmr.msra.gmra.mrb[0].mxu1 %v4459_v19  ;;  %v5870_v19 = vld [vmem:[%s7644_s1 + $0xfe0] ss:$16 sps:$4 sm:$0xff]  }
 0x1c7   : > { %3718 = vmatpush1.bf16.msra.mxu0 %v5780_v34  ;;  %4062 = vmatpush1.bf16.msra.mxu1 %v5783_v35  ;;  %v5873_v34 = vld [vmem:[%s7644_s1 + $0xfe8] ss:$16 sps:$4 sm:$0xff]   ;;  %v4461_v35 = vcombine.low %v7361_v32, %v7364_v33  ;;  %v5878_v32 = vld [vmem:[%s7646_s3 + $0x10] sm:$0xff]  }
 0x1c8   : > { %3719 = vmatprep.subr.bf16.mxu0 %v5788_v14  ;;  %4063 = vmatprep.subr.bf16.mxu1 %v5791_v29  ;;  %v5876_v14 = vld [vmem:[%s7646_s3] sm:$0xff]   ;;  %v5896_v29 = vmov 0.0   ;;  %v5879_v33 = vld [vmem:[%s7646_s3 + $0x18] sm:$0xff]  }
 0x1c9   : > { %3749 = vmatprep.mubr.bf16.mxu0 %v4462_v36  ;;  %4093 = vmatprep.mubr.bf16.mxu1 %v4462_v36  ;;  %v5877_v36 = vld [vmem:[%s7646_s3 + $0x8] sm:$0xff]  }
 0x1cb   : > { %3720 = vmatpush1.bf16.msra.mxu0 %v5786_v37  ;;  %4064 = vmatpush1.bf16.msra.mxu1 %v5789_v38  ;;  %v5880_v37 = vld [vmem:[%s7646_s3 + $0x20] sm:$0xff]   ;;  %v5881_v38 = vld [vmem:[%s7646_s3 + $0x28] sm:$0xff]  }
 0x1cc   : > { %3721 = vmatprep.subr.bf16.mxu0 %v5794_v39  ;;  %4065 = vmatprep.subr.bf16.mxu1 %v5797_v40  ;;  %v5882_v39 = vld [vmem:[%s7646_s3 + $0x30] sm:$0xff]   ;;  %v5883_v40 = vld [vmem:[%s7646_s3 + $0x38] sm:$0xff]  }
 0x1cf   : > { %3722 = vmatpush1.bf16.msra.mxu0 %v5792_v41  ;;  %4066 = vmatpush1.bf16.msra.mxu1 %v5795_v42  ;;  %v4284_v41 = vld [vmem:[%s7647_s4] sm:$0xf] }
 0x1d0   : > { %3723 = vmatprep.subr.bf16.mxu0 %v5800_v43  ;;  %4067 = vmatprep.subr.bf16.mxu1 %v5803_v44  ;;  %v4291_v42 = vsel %vm4289_vm1, %v4284_v41, 0  ;;  %v756_v43 = vlaneseq }
 0x1d2   : > { %v7583_v44 = vshrl.u32 %v756_v43, 7 }
 0x1d3   : > { %3724 = vmatpush1.bf16.msra.mxu0 %v5798_v45  ;;  %4068 = vmatpush1.bf16.msra.mxu1 %v5801_v46 }
 0x1d4   : > { %3725 = vmatprep.subr.bf16.mxu0 %v5806_v47  ;;  %4069 = vmatprep.subr.bf16.mxu1 %v5809_v48  ;;  %v758_v45 = vsub.s32 0, %v7583_v44  ;;  %v766_v46 = vsub.s32 2, %v7583_v44  ;;  %v754_v47 = vld [vmem:[%s7645_s2] sm:$0xf]  ;;  %v762_v48 = vsub.s32 1, %v7583_v44 }
 0x1d7   : > { %3726 = vmatpush1.bf16.msra.mxu0 %v5804_v49  ;;  %4070 = vmatpush1.bf16.msra.mxu1 %v5807_v50  ;;  %v770_v49 = vsub.s32 3, %v7583_v44  ;;  %v759_v50 = vrot.slane %v754_v47, %v758_v45 }
 0x1d8   : > { %3727 = vmatprep.subr.bf16.mxu0 %v5812_v51  ;;  %4071 = vmatprep.subr.bf16.mxu1 %v5815_v52  ;;  %v767_v51 = vrot.slane %v754_v47, %v766_v46  ;;  %v763_v52 = vrot.slane %v754_v47, %v762_v48 }
 0x1db   : > { %3728 = vmatpush1.bf16.msra.mxu0 %v5810_v53  ;;  %4072 = vmatpush1.bf16.msra.mxu1 %v5813_v54  ;;  %v771_v53 = vrot.slane %v754_v47, %v770_v49 }
 0x1dc   : > { %3729 = vmatprep.subr.bf16.mxu0 %v5818_v55  ;;  %4073 = vmatprep.subr.bf16.mxu1 %v5821_v56 }
 0x1df   : > { %3730 = vmatpush1.bf16.msra.mxu0 %v5816_v57  ;;  %4074 = vmatpush1.bf16.msra.mxu1 %v5819_v58 }
 0x1e0   : > { %3731 = vmatprep.subr.bf16.mxu0 %v5824_v59  ;;  %4075 = vmatprep.subr.bf16.mxu1 %v5827_v60 }
 0x1e3   : > { %3732 = vmatpush1.bf16.msra.mxu0 %v5822_v61  ;;  %4076 = vmatpush1.bf16.msra.mxu1 %v5825_v62 }
 0x1e4   : > { %3733 = vmatprep.subr.bf16.mxu0 %v5830_v63  ;;  %4077 = vmatprep.subr.bf16.mxu1 %v5833_v0 }
 0x1e7   : > { %3734 = vmatpush1.bf16.msra.mxu0 %v5828_v1  ;;  %4078 = vmatpush1.bf16.msra.mxu1 %v5831_v2 }
 0x1e8   : > { %3735 = vmatprep.subr.bf16.mxu0 %v5836_v3  ;;  %4079 = vmatprep.subr.bf16.mxu1 %v5839_v4 }
 0x1eb   : > { %3736 = vmatpush1.bf16.msra.mxu0 %v5834_v5  ;;  %4080 = vmatpush1.bf16.msra.mxu1 %v5837_v6 }
 0x1ec   : > { %3737 = vmatprep.subr.bf16.mxu0 %v5842_v7  ;;  %4081 = vmatprep.subr.bf16.mxu1 %v5845_v8 }
 0x1ef   : > { %3738 = vmatpush1.bf16.msra.mxu0 %v5840_v9  ;;  %4082 = vmatpush1.bf16.msra.mxu1 %v5843_v10 }
 0x1f0   : > { %3739 = vmatprep.subr.bf16.mxu0 %v5848_v11  ;;  %4083 = vmatprep.subr.bf16.mxu1 %v5851_v12 }
 0x1f3   : > { %3740 = vmatpush1.bf16.msra.mxu0 %v5846_v13  ;;  %4084 = vmatpush1.bf16.msra.mxu1 %v5849_v16 }
 0x1f4   : > { %3741 = vmatprep.subr.bf16.mxu0 %v5854_v17  ;;  %4085 = vmatprep.subr.bf16.mxu1 %v5857_v20 }
 0x1f7   : > { %3742 = vmatpush1.bf16.msra.mxu0 %v5852_v22  ;;  %4086 = vmatpush1.bf16.msra.mxu1 %v5855_v15 }
 0x1f8   : > { %3743 = vmatprep.subr.bf16.mxu0 %v5860_v23  ;;  %4087 = vmatprep.subr.bf16.mxu1 %v5863_v24 }
 0x1fb   : > { %3744 = vmatpush1.bf16.msra.mxu0 %v5858_v25  ;;  %4088 = vmatpush1.bf16.msra.mxu1 %v5861_v26 }
 0x1fc   : > { %3745 = vmatprep.subr.bf16.mxu0 %v5866_v27  ;;  %4089 = vmatprep.subr.bf16.mxu1 %v5869_v28 }
 0x1ff   : > { %3746 = vmatpush1.bf16.msra.mxu0 %v5864_v21  ;;  %4090 = vmatpush1.bf16.msra.mxu1 %v5867_v30 }
 0x200   : > { %3747 = vmatprep.subr.bf16.mxu0 %v5872_v31  ;;  %4091 = vmatprep.subr.bf16.mxu1 %v5875_v18 }
 0x203   : > { %3748 = vmatpush1.bf16.msra.mxu0 %v5870_v19  ;;  %4092 = vmatpush1.bf16.msra.mxu1 %v5873_v34 }
 0x204   : > { %5008 = vmatprep.subr.bf16.mxu0 %v5896_v29  ;;  %5028 = vmatprep.subr.bf16.mxu1 %v5896_v29 }
 0x206   : > { %3750 = vmatmul.mubr.bf16.vlgmr.msra.gmra.mrb[0].mxu0 %v4461_v35  ;;  %4094 = vmatmul.mubr.bf16.vlgmr.msra.gmra.mrb[0].mxu1 %v4461_v35 }
 0x207   : > { %5009 = vmatpush3.bf16.msra.mxu0 %v5876_v14  ;;  %5024 = vmatprep.mubr.msk.bf16.mxu0 %vm5897_vm0, %v5896_v29 }
 0x208   : > { %5010 = vmatprep.subr.bf16.mxu0 %v5896_v29  ;;  %5030 = vmatprep.mubr.msk.bf16.mxu1 %vm5897_vm0, %v5896_v29 }
 0x209   : > { %5029 = vmatpush3.bf16.msra.mxu1 %v4291_v42 }
 0x20b   : > { %5011 = vmatpush3.bf16.msra.mxu0 %v5877_v36 }
 0x20c   : > { %5012 = vmatprep.subr.bf16.mxu0 %v5896_v29 }
 0x20f   : > { %5013 = vmatpush3.bf16.msra.mxu0 %v5878_v32 }
 0x210   : > { %5014 = vmatprep.subr.bf16.mxu0 %v5896_v29 }
 0x213   : > { %5015 = vmatpush3.bf16.msra.mxu0 %v5879_v33 }
 0x214   : > { %5016 = vmatprep.subr.bf16.mxu0 %v5896_v29 }
 0x217   : > { %5017 = vmatpush3.bf16.msra.mxu0 %v5880_v37 }
 0x218   : > { %5018 = vmatprep.subr.bf16.mxu0 %v5896_v29 }
 0x21b   : > { %5019 = vmatpush3.bf16.msra.mxu0 %v5881_v38 }
 0x21c   : > { %5020 = vmatprep.subr.bf16.mxu0 %v5896_v29 }
 0x21f   : > { %5021 = vmatpush3.bf16.msra.mxu0 %v5882_v39 }
 0x220   : > { %5022 = vmatprep.subr.bf16.mxu0 %v5896_v29 }
 0x223   : > { %5023 = vmatpush3.bf16.msra.mxu0 %v5883_v40 }
 0x2d9   : > { %v3751_v54 = vpop.f32.mrb[0].mxu0  ;;  %v4095_v55 = vpop.f32.mrb[0].mxu1 }
 0x2da   : > { %v5034_v56 = vadd.f32 %v3751_v54, %v759_v50  ;;  %v5038_v57 = vadd.f32 %v4095_v55, %v767_v51  ;;  %v3753_v58 = vpop.f32.mrb[1].mxu0  ;;  %v4097_v59 = vpop.f32.mrb[1].mxu1 }
 0x2db   : > { %v5035_v60 = vadd.f32 %v3753_v58, %v763_v52  ;;  %v5039_v61 = vadd.f32 %v4097_v59, %v771_v53  ;;  %v3755_v62 = vpop.f32.mrb[2].mxu0  ;;  %v4099_v63 = vpop.f32.mrb[2].mxu1 }
 0x2dc   : > { %v5036_v0 = vadd.f32 %v3755_v62, %v759_v50  ;;  %v5040_v1 = vadd.f32 %v4099_v63, %v767_v51  ;;  %v3757_v2 = vpop.f32.mrb[3].mxu0  ;;  %v4101_v3 = vpop.f32.mrb[3].mxu1  ;;  %v7594_v6 = vmax.f32 %v5034_v56, 0.0  ;;  %v7596_v7 = vmax.f32 %v5038_v57, 0.0 }
 0x2dd   : > { %v5037_v4 = vadd.f32 %v3757_v2, %v763_v52  ;;  %v5041_v5 = vadd.f32 %v4101_v3, %v771_v53  ;;  %v7602_v10 = vmax.f32 %v5035_v60, 0.0  ;;  %v7604_v11 = vmax.f32 %v5039_v61, 0.0 }
 0x2de   : > { %v7598_v8 = vmax.f32 %v5036_v0, 0.0  ;;  %v7600_v9 = vmax.f32 %v5040_v1, 0.0 }
 0x2df   : > { %v7606_v12 = vmax.f32 %v5037_v4, 0.0  ;;  %v7608_v13 = vmax.f32 %v5041_v5, 0.0 }
 0x2e0   : > { %v4112_v16 = vadd.f32 %v7598_v8, %v7594_v6  ;;  %v4140_v17 = vmax.f32 %v7594_v6, %v7598_v8  ;;  %v4126_v20 = vadd.f32 %v7600_v9, %v7596_v7  ;;  %v4154_v22 = vmax.f32 %v7596_v7, %v7600_v9 }
 0x2e1   : > { %v4119_v15 = vadd.f32 %v7606_v12, %v7602_v10  ;;  %v4147_v23 = vmax.f32 %v7602_v10, %v7606_v12  ;;  %v4133_v24 = vadd.f32 %v7608_v13, %v7604_v11  ;;  %v4161_v25 = vmax.f32 %v7604_v11, %v7608_v13 }
 0x2e2   : > { %v4113_v26 = vrot.slane %v4112_v16, 4  ;;  %v4141_v27 = vrot.slane %v4140_v17, 4  ;;  %v4127_v28 = vrot.slane %v4126_v20, 4  ;;  %v4155_v21 = vrot.slane %v4154_v22, 4 }
 0x2e3   : > { %v4120_v30 = vrot.slane %v4119_v15, 4  ;;  %v4148_v31 = vrot.slane %v4147_v23, 4  ;;  %v4134_v18 = vrot.slane %v4133_v24, 4  ;;  %v4162_v19 = vrot.slane %v4161_v25, 4 }
 0x2e4   : > { %v4114_v34 = vadd.f32 %v4113_v26, %v4112_v16  ;;  %v4142_v35 = vmax.f32 %v4140_v17, %v4141_v27  ;;  %v4128_v14 = vadd.f32 %v4127_v28, %v4126_v20  ;;  %v4156_v29 = vmax.f32 %v4154_v22, %v4155_v21 }
 0x2e5   : > { %v4121_v36 = vadd.f32 %v4120_v30, %v4119_v15  ;;  %v4149_v32 = vmax.f32 %v4147_v23, %v4148_v31  ;;  %v4135_v33 = vadd.f32 %v4134_v18, %v4133_v24  ;;  %v4163_v37 = vmax.f32 %v4161_v25, %v4162_v19 }
 0x2e6   : > { %v4115_v38 = vrot.slane %v4114_v34, 2  ;;  %v4143_v39 = vrot.slane %v4142_v35, 2  ;;  %v4129_v40 = vrot.slane %v4128_v14, 2  ;;  %v4157_v41 = vrot.slane %v4156_v29, 2 }
 0x2e7   : > { %v4122_v42 = vrot.slane %v4121_v36, 2  ;;  %v4150_v43 = vrot.slane %v4149_v32, 2  ;;  %v4136_v46 = vrot.slane %v4135_v33, 2  ;;  %v4164_v47 = vrot.slane %v4163_v37, 2 }
 0x2e8   : > { %v4116_v48 = vadd.f32 %v4115_v38, %v4114_v34  ;;  %v4144_v49 = vmax.f32 %v4142_v35, %v4143_v39  ;;  %v4130_v50 = vadd.f32 %v4129_v40, %v4128_v14  ;;  %v4158_v51 = vmax.f32 %v4156_v29, %v4157_v41 }
 0x2e9   : > { %v4123_v52 = vadd.f32 %v4122_v42, %v4121_v36  ;;  %v4151_v53 = vmax.f32 %v4149_v32, %v4150_v43  ;;  %v4137_v54 = vadd.f32 %v4136_v46, %v4135_v33  ;;  %v4165_v57 = vmax.f32 %v4163_v37, %v4164_v47 }
 0x2ea   : > { %v4117_v55 = vrot.slane %v4116_v48, 1  ;;  %v4145_v56 = vrot.slane %v4144_v49, 1  ;;  %v4131_v58 = vrot.slane %v4130_v50, 1  ;;  %v4159_v59 = vrot.slane %v4158_v51, 1 }
 0x2eb   : > { %v4124_v60 = vrot.slane %v4123_v52, 1  ;;  %v4152_v61 = vrot.slane %v4151_v53, 1  ;;  %v4138_v2 = vrot.slane %v4137_v54, 1  ;;  %v4166_v3 = vrot.slane %v4165_v57, 1 }
 0x2ec   : > { %v4118_v62 = vadd.f32 %v4117_v55, %v4116_v48  ;;  %v4146_v63 = vmax.f32 %v4144_v49, %v4145_v56  ;;  %v4132_v4 = vadd.f32 %v4131_v58, %v4130_v50  ;;  %v4160_v5 = vmax.f32 %v4158_v51, %v4159_v59 }
 0x2ed   : > { %v4125_v0 = vadd.f32 %v4124_v60, %v4123_v52  ;;  %v4153_v1 = vmax.f32 %v4151_v53, %v4152_v61  ;;  %v4139_v20 = vadd.f32 %v4138_v2, %v4137_v54  ;;  %v4167_v23 = vmax.f32 %v4165_v57, %v4166_v3 }
 0x2ef   : > { %v4168_v16 = vadd.f32 %v4125_v0, %v4118_v62  ;;  %v4169_v17 = vmax.f32 %v4146_v63, %v4153_v1 }
 0x2f1   : > { %v4170_v22 = vadd.f32 %v4168_v16, %v4132_v4  ;;  %v4171_v15 = vmax.f32 %v4169_v17, %v4160_v5 }
 0x2f3   : > { %v4172_v24 = vadd.f32 %v4170_v22, %v4139_v20  ;;  %v4173_v25 = vmax.f32 %v4171_v15, %v4167_v23 }
 0x2f5   : > { %v4174_v26 = vmul.f32 0.015625, %v4172_v24 }
 0x2f7   : > { %v4176_v27 = vsel %vm4175_vm2, %v4174_v26, %v4173_v25 }
 0x2f8   : > { %v4177_v28 = vpack.c.bf16 %v4176_v27, %v4176_v27 }
 0x2fa   : > { %5025 = vmatmul.mubr.bf16.vlgmr.msra.gmra.mrb[4].mxu0 %v4177_v28 }
 0x3cd   : > { %v4276_v21 = vpop.f32.mrb[4].mxu0 }
 0x3ce   : > { %v4282_v30 = vmax.f32 %v4276_v21, 0.0  ;;  %v5026_v31 = vpop.f32.mrb[5].mxu0 }
 0x3cf   : > { %v4279_v18 = vpop.f32.mrb[6].mxu0 }
 0x3d0   : > { %v4283_v19 = vpack.c.bf16 %v4282_v30, %v4282_v30  ;;  %v5027_v34 = vpop.f32.mrb[7].mxu0 }
 0x3d2   : > { %5031 = vmatmul.mubr.msk.bf16.vlgmr.msra.gmra.mrb[4].mxu1 %vm4285_vm3, %v4283_v19 }
 0x4a5   : > { %v4327_v35 = vpop.f32.mrb[4].mxu1 }
 0x4a6   : > { %v4334_v14 = vrot.slane %v4327_v35, 1  ;;  %v5032_v29 = vpop.f32.mrb[5].mxu1 }
 0x4a7   : > { %v4330_v36 = vpop.f32.mrb[6].mxu1 }
 0x4a8   : > { %v4336_v32 = vadd.f32 %v4334_v14, %v4327_v35  ;;  %v5033_v33 = vpop.f32.mrb[7].mxu1 }
 0x4aa   : > { %v4984_v37 = vmul.f32 -1.442695, %v4336_v32 }
 0x4ac   : > { %5884 = vpow2.f32 %v4984_v37 }
 0x4b6   : > { %v5885_v38 = vpop.eup %5884 }
 0x4b7   : > { %v4340_v39 = vadd.f32 1.0, %v5885_v38 }
 0x4b9   : > { %5886 = vrcp.f32 %v4340_v39 }
 0x4c3   : > { %v5887_v40 = vpop.eup %5886 }
 0x4c4   : > { %v4346_v41 = vrot.slane %v5887_v40, %v758_v45 }
 0x4c6   : > { %v4347_v42 = vmul.f32 %v4346_v41, %v7594_v6  ;;  %v4348_v43 = vmul.f32 %v4346_v41, %v7602_v10  ;;  %v4349_v46 = vmul.f32 %v4346_v41, %v7596_v7  ;;  %v4350_v47 = vmul.f32 %v4346_v41, %v7604_v11 }
 0x4c7   : > { %v4351_v48 = vmul.f32 %v4346_v41, %v7598_v8  ;;  %v4352_v49 = vmul.f32 %v4346_v41, %v7606_v12  ;;  %v4353_v50 = vmul.f32 %v4346_v41, %v7600_v9  ;;  %v4354_v44 = vmul.f32 %v4346_v41, %v7608_v13 }
 0x4c8   : > { %v4993_v45 = vpack.c.bf16 %v4348_v43, %v4347_v42  ;;  %v4994_v6 = vpack.c.bf16 %v4350_v47, %v4349_v46 }
 0x4c9   : > { %v4995_v51 = vpack.c.bf16 %v4352_v49, %v4351_v48  ;;  %v4996_v10 = vpack.c.bf16 %v4354_v44, %v4353_v50 }
 0x4ca   : > { %4379 = vst [vmem:[%s224_s26] sm:$0xff] %v4993_v45  ;;  %4380 = vst [vmem:[%s224_s26 + $0x8] sm:$0xff] %v4994_v6 }
 0x4cb   : > { %4381 = vst [vmem:[%s224_s26 + $0x10] sm:$0xff] %v4995_v51  ;;  %4382 = vst [vmem:[%s224_s26 + $0x18] sm:$0xff] %v4996_v10 }
 0x4cc PF: > { %s15_s18 = sadd.s32 1, %s5894_s18  }
 0x4cd   : > { %p12_p4 = scmp.ge.s32.totalorder %s15_s18, 4  }
 0x4cf   :  { %14 = sbr.rel (!%p12_p4) target bundleno = 1 (0x1), region = 70 }

// kernel: astnet_decoder.6
= control target key start
LH: loop header
LB: loop body
LE: loop exit
PB: predicated region body
PF: predicated region fallthrough
CT: control target
= control target key end

     0   :  { %s2126_s24 = smov 0   ;;  %s2486_s0 = inlined_call_operand.vmem [shape: bf16[2,256,64], index: 0, kind: input, shape index: {}]   ;;  %s2487_s1 = inlined_call_operand.vmem [shape: bf16[2,256,64], index: 1, kind: input, shape index: {}]   ;;  %s2488_s2 = inlined_call_operand.vmem [shape: bf16[64,128], index: 2, kind: input, shape index: {}]   ;;  %s2489_s3 = inlined_call_operand.vmem [shape: bf16[64,128], index: 3, kind: input, shape index: {}]   ;;  %s2490_s4 = inlined_call_operand.vmem [shape: f32[1,128], index: 4, kind: input, shape index: {}]   ;;  %s2491_s5 = inlined_call_operand.vmem [shape: bf16[32,2], index: 5, kind: input, shape index: {}]   ;;  %s2492_s6 = inlined_call_operand.vmem [shape: bf16[2,32], index: 6, kind: input, shape index: {}]   ;;  %s2493_s7 = inlined_call_operand.vmem [shape: bf16[2,256,128], index: 7, kind: output, shape index: {}]  }
   0x1 LB: > { %s1582_s25 = sadd.s32 4294967295, %s2079_s24   ;;  %p1586_p0 = scmp.ge.s32.totalorder %s2079_s24, 1  ;;  %s2079_s24 = sphi %s2126_s24, %s17_s24  }
   0x2   : > { %p247_p1 = scmp.lt.s32.totalorder %s2079_s24, 3 }
   0x4   : > { %p248_p2 = pnand %p1586_p0, %p247_p1 }
   0x5   : > { %v2027_v0 = vld [vmem:[%s2489_s3] sm:$0xff] (!%p248_p2)   ;;  %p284_p3 = scmp.lt.s32.totalorder (!%p248_p2), %s1582_s25, 1  ;;  %v2028_v1 = vld [vmem:[%s2489_s3 + $0x8] sm:$0xff] (!%p248_p2)   ;;  %v2029_v3 = vld [vmem:[%s2489_s3 + $0x10] sm:$0xff] (!%p248_p2)   ;;  %vm484_vm0 = vcmask (!%p248_p2), 523264   ;;  %s2082_s10 = smov (!%p248_p2), 64  }
   0x6   : > { %251 = sbr.rel (%p248_p2) target bundleno = 1103 (0x44f), region = 48  ;;  %1880 = vmatprep.subr.bf16.mxu0 (!%p248_p2), %v2027_v0  ;;  %v2030_v2 = vld [vmem:[%s2488_s2] sm:$0xff] (!%p248_p2)   ;;  %v2032_v4 = vld [vmem:[%s2488_s2 + $0x8] sm:$0xff] (!%p248_p2)   ;;  %v2031_v6 = vld [vmem:[%s2489_s3 + $0x18] sm:$0xff] (!%p248_p2)   ;;  %s2083_s12 = smov (!%p248_p2), 96   ;;  %vm2084_vm1 = vmmov (!%p248_p2), 0  }
   0x7   : > { %1881 = vmatpush3.bf16.msra.mxu0 (!%p248_p2), %v2027_v0  ;;  %1974 = vmatprep.subr.bf16.mxu1 (!%p248_p2), %v2030_v2  ;;  %v2035_v7 = vld [vmem:[%s2488_s2 + $0x10] sm:$0xff] (!%p248_p2)   ;;  %v2036_v8 = vld [vmem:[%s2488_s2 + $0x18] sm:$0xff] (!%p248_p2)   ;;  %v2239_v45 = vld [vmem:[%s2490_s4] ss:$0 sm:$0xff] (!%p248_p2)  ;;  %s2085_s13 = smov (!%p248_p2), 32   ;;  %vm1182_vm2 = vcmask (!%p248_p2), 1040384  }
   0x8   : > { %1882 = vmatprep.subr.bf16.mxu0 (!%p248_p2), %v2028_v1  ;;  %1978 = vmatpush3.bf16.msra.mxu1 (!%p248_p2), %v2030_v2  ;;  %vm1201_vm3 = vcmask (!%p248_p2), 261120   ;;  %vm1248_vm4 = vcmask (!%p248_p2), 15360   ;;  %vm1317_vm5 = vcmask (!%p248_p2), 785408  }
   0x9   : > { %1975 = vmatprep.subr.bf16.mxu1 (!%p248_p2), %v2032_v4 }
   0xb   : > { %1883 = vmatpush3.bf16.msra.mxu0 (!%p248_p2), %v2028_v1 }
   0xc   : > { %1884 = vmatprep.subr.bf16.mxu0 (!%p248_p2), %v2029_v3  ;;  %1979 = vmatpush3.bf16.msra.mxu1 (!%p248_p2), %v2032_v4 }
   0xd   : > { %s2495_s25 = smov (!%p284_p3, %s1582_s25), 1  ;;  %1976 = vmatprep.subr.bf16.mxu1 %v2035_v7 }
   0xe   : > { %s2146_s11 = sshll.u32 %s2495_s25, 7 }
   0xf   : > { %s2155_s16 = scalar_lea.vmem %s2487_s1, %s2146_s11  ;;  %s2169_s23 = scalar_lea.vmem %s2486_s0, %s2146_s11  ;;  %1885 = vmatpush3.bf16.msra.mxu0 %v2029_v3 }
  0x10   : > { %v2033_v5 = vld [vmem:[%s2155_s16] sm:$0xff]   ;;  %v2038_v9 = vld [vmem:[%s2169_s23 + $0x10] sm:$0xff]   ;;  %1886 = vmatprep.subr.bf16.mxu0 %v2031_v6  ;;  %v2034_v10 = vld [vmem:[%s2155_s16 + $0x8] sm:$0xff]   ;;  %1980 = vmatpush3.bf16.msra.mxu1 %v2035_v7  ;;  %s2461_s18 = scalar_lea.vmem %s2493_s7, %s2146_s11 }
  0x11   : > { %1888 = vmatprep.mubr.msk.bf16.mxu0 %vm484_vm0, %v2033_v5  ;;  %1932 = vmatprep.mubr.msk.bf16.mxu1 %vm484_vm0, %v2038_v9  ;;  %v2037_v11 = vld [vmem:[%s2155_s16 + $0x10] sm:$0xff]   ;;  %v2040_v12 = vld [vmem:[%s2169_s23 + $0x18] sm:$0xff]   ;;  %v2042_v13 = vld [vmem:[%s2169_s23 + $0x20] sm:$0xff]  }
  0x12   : > { %1977 = vmatprep.subr.bf16.mxu1 %v2036_v8  ;;  %v2039_v14 = vld [vmem:[%s2155_s16 + $0x18] sm:$0xff]   ;;  %v2041_v15 = vld [vmem:[%s2155_s16 + $0x20] sm:$0xff]   ;;  %v2044_v16 = vld [vmem:[%s2169_s23 + $0x28] sm:$0xff]  }
  0x13   : > { %1887 = vmatpush3.bf16.msra.mxu0 %v2031_v6  ;;  %v2046_v17 = vld [vmem:[%s2169_s23 + $0x30] sm:$0xff]   ;;  %v2043_v18 = vld [vmem:[%s2155_s16 + $0x28] sm:$0xff]   ;;  %v2048_v20 = vld [vmem:[%s2169_s23 + $0x38] sm:$0xff]  }
  0x14   : > { %1920 = vmatprep.subr.bf16.mxu0 %v2030_v2  ;;  %1981 = vmatpush3.bf16.msra.mxu1 %v2036_v8  ;;  %v2045_v19 = vld [vmem:[%s2155_s16 + $0x30] sm:$0xff]   ;;  %v2050_v21 = vld [vmem:[%s2169_s23 + $0x40] sm:$0xff]   ;;  %v2047_v22 = vld [vmem:[%s2155_s16 + $0x38] sm:$0xff]  }
  0x15   : > { %v2049_v23 = vld [vmem:[%s2155_s16 + $0x40] sm:$0xff]   ;;  %v2052_v24 = vld [vmem:[%s2169_s23 + $0x48] sm:$0xff]   ;;  %v2054_v25 = vld [vmem:[%s2169_s23 + $0x50] sm:$0xff]  }
  0x16   : > { %1889 = vmatmul.mubr.msk.bf16.vlgmr.msra.gmra.mrb[0].mxu0 %vm484_vm0, %v2034_v10  ;;  %v2051_v26 = vld [vmem:[%s2155_s16 + $0x48] sm:$0xff]   ;;  %v2053_v27 = vld [vmem:[%s2155_s16 + $0x50] sm:$0xff]   ;;  %v2056_v28 = vld [vmem:[%s2169_s23 + $0x58] sm:$0xff]  }
  0x17   : > { %1921 = vmatpush3.bf16.msra.mxu0 %v2030_v2  ;;  %1892 = vmatprep.mubr.msk.bf16.mxu0 %vm484_vm0, %v2037_v11  ;;  %v2058_v29 = vld [vmem:[%s2169_s23 + $0x60] sm:$0xff]   ;;  %v2055_v30 = vld [vmem:[%s2155_s16 + $0x58] sm:$0xff]   ;;  %v2060_v32 = vld [vmem:[%s2169_s23 + $0x68] sm:$0xff]  }
  0x18   : > { %1922 = vmatprep.subr.bf16.mxu0 %v2032_v4  ;;  %1933 = vmatmul.mubr.msk.bf16.vlgmr.msra.gmra.mrb[0].mxu1 %vm484_vm0, %v2040_v12  ;;  %v2057_v31 = vld [vmem:[%s2155_s16 + $0x60] sm:$0xff]   ;;  %v2062_v33 = vld [vmem:[%s2169_s23 + $0x70] sm:$0xff]   ;;  %v2059_v34 = vld [vmem:[%s2155_s16 + $0x68] sm:$0xff]  }
  0x19   : > { %1936 = vmatprep.mubr.msk.bf16.mxu1 %vm484_vm0, %v2042_v13  ;;  %v2061_v35 = vld [vmem:[%s2155_s16 + $0x70] sm:$0xff]   ;;  %v2064_v36 = vld [vmem:[%s2169_s23 + $0x78] sm:$0xff]   ;;  %v2065_v38 = vld [vmem:[%s2169_s23] sm:$0xff]  }
  0x1a   : > { %v2063_v37 = vld [vmem:[%s2155_s16 + $0x78] sm:$0xff]   ;;  %v2066_v39 = vld [vmem:[%s2169_s23 + $0x8] sm:$0xff]  }
  0x1b   : > { %1923 = vmatpush3.bf16.msra.mxu0 %v2032_v4 }
  0x1c   : > { %1924 = vmatprep.subr.bf16.mxu0 %v2035_v7 }
  0x1e   : > { %1893 = vmatmul.mubr.msk.bf16.gmra.mrb[4].mxu0 %vm484_vm0, %v2039_v14 }
  0x1f   : > { %1896 = vmatprep.mubr.msk.bf16.mxu0 %vm484_vm0, %v2041_v15  ;;  %1925 = vmatpush3.bf16.msra.mxu0 %v2035_v7 }
  0x20   : > { %1926 = vmatprep.subr.bf16.mxu0 %v2036_v8  ;;  %1937 = vmatmul.mubr.msk.bf16.gmra.mrb[4].mxu1 %vm484_vm0, %v2044_v16 }
  0x21   : > { %1940 = vmatprep.mubr.msk.bf16.mxu1 %vm484_vm0, %v2046_v17 }
  0x23   : > { %1927 = vmatpush3.bf16.msra.mxu0 %v2036_v8 }
  0x26   : > { %1897 = vmatmul.mubr.msk.bf16.gmra.mrb[8].mxu0 %vm484_vm0, %v2043_v18 }
  0x27   : > { %1900 = vmatprep.mubr.msk.bf16.mxu0 %vm484_vm0, %v2045_v19 }
  0x28   : > { %1941 = vmatmul.mubr.msk.bf16.gmra.mrb[8].mxu1 %vm484_vm0, %v2048_v20 }
  0x29   : > { %1944 = vmatprep.mubr.msk.bf16.mxu1 %vm484_vm0, %v2050_v21 }
  0x2e   : > { %1901 = vmatmul.mubr.msk.bf16.gmra.mrb[12].mxu0 %vm484_vm0, %v2047_v22 }
  0x2f   : > { %1904 = vmatprep.mubr.msk.bf16.mxu0 %vm484_vm0, %v2049_v23  ;;  %v2081_v23 = vmov 0.0  }
  0x30   : > { %1945 = vmatmul.mubr.msk.bf16.gmra.mrb[12].mxu1 %vm484_vm0, %v2052_v24  ;;  %1960 = vmatprep.subr.bf16.mxu1 %v2081_v23 }
  0x31   : > { %1948 = vmatprep.mubr.msk.bf16.mxu1 %vm484_vm0, %v2054_v25 }
  0x36   : > { %1905 = vmatmul.mubr.msk.bf16.gmra.mrb[16].mxu0 %vm484_vm0, %v2051_v26 }
  0x37   : > { %1908 = vmatprep.mubr.msk.bf16.mxu0 %vm484_vm0, %v2053_v27 }
  0x38   : > { %1949 = vmatmul.mubr.msk.bf16.gmra.mrb[16].mxu1 %vm484_vm0, %v2056_v28 }
  0x39   : > { %1952 = vmatprep.mubr.msk.bf16.mxu1 %vm484_vm0, %v2058_v29 }
  0x3e   : > { %1909 = vmatmul.mubr.msk.bf16.gmra.mrb[20].mxu0 %vm484_vm0, %v2055_v30 }
  0x3f   : > { %1912 = vmatprep.mubr.msk.bf16.mxu0 %vm484_vm0, %v2057_v31 }
  0x40   : > { %1953 = vmatmul.mubr.msk.bf16.gmra.mrb[20].mxu1 %vm484_vm0, %v2060_v32 }
  0x41   : > { %1956 = vmatprep.mubr.msk.bf16.mxu1 %vm484_vm0, %v2062_v33 }
  0x46   : > { %1913 = vmatmul.mubr.msk.bf16.gmra.mrb[24].mxu0 %vm484_vm0, %v2059_v34 }
  0x47   : > { %1916 = vmatprep.mubr.msk.bf16.mxu0 %vm484_vm0, %v2061_v35 }
  0x48   : > { %1957 = vmatmul.mubr.msk.bf16.gmra.mrb[24].mxu1 %vm484_vm0, %v2064_v36 }
  0x49   : > { %1964 = vmatprep.mubr.msk.bf16.mxu1 %vm2084_vm1, %v2081_v23 }
  0x4e   : > { %1917 = vmatmul.mubr.msk.bf16.gmra.mrb[28].mxu0 %vm484_vm0, %v2063_v37 }
  0x4f   : > { %1928 = vmatprep.mubr.msk.bf16.mxu0 %vm484_vm0, %v2065_v38 }
  0x56   : > { %1929 = vmatmul.mubr.msk.bf16.vlgmr.msra.gmra.mrb[0].mxu0 %vm484_vm0, %v2066_v39 }
  0xeb   : > { %v1934_v40 = vpop.f32.mrb[0].mxu1 }
  0xec   : > { %v896_v41 = vpop.f32.mrb[1].mxu1 }
  0xed   : > { %v1935_v42 = vpop.f32.mrb[2].mxu1 }
  0xee   : > { %v899_v43 = vpop.f32.mrb[3].mxu1 }
  0xf1   : > { %v1894_v44 = vpop.f32.mrb[4].mxu0 }
  0xf2   : > { %v905_v46 = vadd.f32 %v1934_v40, %v1894_v44  ;;  %v583_v47 = vpop.f32.mrb[5].mxu0 }
  0xf3   : > { %v897_v48 = vadd.f32 %v896_v41, %v583_v47  ;;  %v1895_v49 = vpop.f32.mrb[6].mxu0  ;;  %v1938_v53 = vpop.f32.mrb[4].mxu1 }
  0xf4   : > { %v1020_v50 = vadd.f32 %v2239_v45, %v905_v46  ;;  %v908_v51 = vadd.f32 %v1935_v42, %v1895_v49  ;;  %v586_v52 = vpop.f32.mrb[7].mxu0  ;;  %v912_v56 = vpop.f32.mrb[5].mxu1 }
  0xf5   : > { %v1018_v54 = vadd.f32 %v2239_v45, %v897_v48  ;;  %v900_v55 = vadd.f32 %v899_v43, %v586_v52  ;;  %v1939_v59 = vpop.f32.mrb[6].mxu1 }
  0xf6   : > { %v2243_v57 = vmax.f32 %v1020_v50, 0.0  ;;  %v1021_v58 = vadd.f32 %v2239_v45, %v908_v51  ;;  %v915_v62 = vpop.f32.mrb[7].mxu1 }
  0xf7   : > { %v2246_v60 = vmax.f32 %v1018_v54, 0.0  ;;  %v1019_v61 = vadd.f32 %v2239_v45, %v900_v55 }
  0xf8   : > { %v2249_v63 = vmax.f32 %v1021_v58, 0.0 }
  0xf9   : > { %v1117_v0 = vmax.f32 %v2246_v60, %v2243_v57  ;;  %v1898_v1 = vpop.f32.mrb[8].mxu0  ;;  %v2254_v5 = vmax.f32 %v1019_v61, 0.0 }
  0xfa   : > { %v921_v2 = vadd.f32 %v1938_v53, %v1898_v1  ;;  %v599_v3 = vpop.f32.mrb[9].mxu0 }
  0xfb   : > { %v1121_v4 = vmax.f32 %v1117_v0, %v2249_v63  ;;  %v913_v6 = vadd.f32 %v912_v56, %v599_v3  ;;  %v1899_v7 = vpop.f32.mrb[10].mxu0  ;;  %v1942_v11 = vpop.f32.mrb[8].mxu1 }
  0xfc   : > { %v1024_v8 = vadd.f32 %v2239_v45, %v921_v2  ;;  %v924_v9 = vadd.f32 %v1939_v59, %v1899_v7  ;;  %v602_v10 = vpop.f32.mrb[11].mxu0  ;;  %v928_v15 = vpop.f32.mrb[9].mxu1 }
  0xfd   : > { %v1125_v12 = vmax.f32 %v1121_v4, %v2254_v5  ;;  %v1022_v13 = vadd.f32 %v2239_v45, %v913_v6  ;;  %v916_v14 = vadd.f32 %v915_v62, %v602_v10  ;;  %v1943_v18 = vpop.f32.mrb[10].mxu1 }
  0xfe   : > { %v2259_v16 = vmax.f32 %v1024_v8, 0.0  ;;  %v1025_v17 = vadd.f32 %v2239_v45, %v924_v9  ;;  %v931_v20 = vpop.f32.mrb[11].mxu1 }
  0xff   : > { %v2262_v19 = vmax.f32 %v1022_v13, 0.0  ;;  %v1023_v22 = vadd.f32 %v2239_v45, %v916_v14 }
 0x100   : > { %v1129_v21 = vmax.f32 %v1125_v12, %v2259_v16  ;;  %v2268_v26 = vmax.f32 %v1025_v17, 0.0 }
 0x101   : > { %v1902_v24 = vpop.f32.mrb[12].mxu0  ;;  %v2271_v32 = vmax.f32 %v1023_v22, 0.0 }
 0x102   : > { %v1133_v25 = vmax.f32 %v1129_v21, %v2262_v19  ;;  %v937_v27 = vadd.f32 %v1942_v11, %v1902_v24  ;;  %v615_v28 = vpop.f32.mrb[13].mxu0 }
 0x103   : > { %v929_v29 = vadd.f32 %v928_v15, %v615_v28  ;;  %v1903_v30 = vpop.f32.mrb[14].mxu0  ;;  %v1946_v36 = vpop.f32.mrb[12].mxu1 }
 0x104   : > { %v1137_v31 = vmax.f32 %v1133_v25, %v2268_v26  ;;  %v1028_v33 = vadd.f32 %v2239_v45, %v937_v27  ;;  %v940_v34 = vadd.f32 %v1943_v18, %v1903_v30  ;;  %v618_v35 = vpop.f32.mrb[15].mxu0  ;;  %v944_v39 = vpop.f32.mrb[13].mxu1 }
 0x105   : > { %v1026_v37 = vadd.f32 %v2239_v45, %v929_v29  ;;  %v932_v38 = vadd.f32 %v931_v20, %v618_v35  ;;  %v1947_v43 = vpop.f32.mrb[14].mxu1 }
 0x106   : > { %v1115_v40 = vmax.f32 %v2271_v32, %v1137_v31  ;;  %v2276_v41 = vmax.f32 %v1028_v33, 0.0  ;;  %v1029_v42 = vadd.f32 %v2239_v45, %v940_v34  ;;  %v947_v46 = vpop.f32.mrb[15].mxu1 }
 0x107   : > { %v2279_v44 = vmax.f32 %v1026_v37, 0.0  ;;  %v1027_v48 = vadd.f32 %v2239_v45, %v932_v38 }
 0x108   : > { %v1119_v47 = vmax.f32 %v1115_v40, %v2276_v41  ;;  %v2284_v51 = vmax.f32 %v1029_v42, 0.0 }
 0x109   : > { %v1906_v49 = vpop.f32.mrb[16].mxu0  ;;  %v2287_v58 = vmax.f32 %v1027_v48, 0.0 }
 0x10a   : > { %v1123_v50 = vmax.f32 %v1119_v47, %v2279_v44  ;;  %v953_v52 = vadd.f32 %v1946_v36, %v1906_v49  ;;  %v631_v53 = vpop.f32.mrb[17].mxu0 }
 0x10b   : > { %v945_v54 = vadd.f32 %v944_v39, %v631_v53  ;;  %v1907_v55 = vpop.f32.mrb[18].mxu0  ;;  %v1950_v0 = vpop.f32.mrb[16].mxu1 }
 0x10c   : > { %v1127_v56 = vmax.f32 %v1123_v50, %v2284_v51  ;;  %v1032_v59 = vadd.f32 %v2239_v45, %v953_v52  ;;  %v956_v61 = vadd.f32 %v1947_v43, %v1907_v55  ;;  %v634_v62 = vpop.f32.mrb[19].mxu0  ;;  %v960_v3 = vpop.f32.mrb[17].mxu1 }
 0x10d   : > { %v1030_v1 = vadd.f32 %v2239_v45, %v945_v54  ;;  %v948_v2 = vadd.f32 %v947_v46, %v634_v62  ;;  %v1951_v8 = vpop.f32.mrb[18].mxu1 }
 0x10e   : > { %v1131_v4 = vmax.f32 %v1127_v56, %v2287_v58  ;;  %v2292_v6 = vmax.f32 %v1032_v59, 0.0  ;;  %v1033_v7 = vadd.f32 %v2239_v45, %v956_v61  ;;  %v963_v10 = vpop.f32.mrb[19].mxu1 }
 0x10f   : > { %v2295_v9 = vmax.f32 %v1030_v1, 0.0  ;;  %v1031_v12 = vadd.f32 %v2239_v45, %v948_v2 }
 0x110   : > { %v1135_v11 = vmax.f32 %v1131_v4, %v2292_v6  ;;  %v2300_v15 = vmax.f32 %v1033_v7, 0.0 }
 0x111   : > { %v1910_v13 = vpop.f32.mrb[20].mxu0  ;;  %v2303_v24 = vmax.f32 %v1031_v12, 0.0 }
 0x112   : > { %v1118_v14 = vmax.f32 %v2295_v9, %v1135_v11  ;;  %v969_v17 = vadd.f32 %v1950_v0, %v1910_v13  ;;  %v647_v18 = vpop.f32.mrb[21].mxu0 }
 0x113   : > { %v961_v20 = vadd.f32 %v960_v3, %v647_v18  ;;  %v1911_v21 = vpop.f32.mrb[22].mxu0  ;;  %v1954_v29 = vpop.f32.mrb[20].mxu1 }
 0x114   : > { %v1122_v22 = vmax.f32 %v1118_v14, %v2300_v15  ;;  %v1036_v25 = vadd.f32 %v2239_v45, %v969_v17  ;;  %v972_v27 = vadd.f32 %v1951_v8, %v1911_v21  ;;  %v650_v28 = vpop.f32.mrb[23].mxu0  ;;  %v976_v33 = vpop.f32.mrb[21].mxu1 }
 0x115   : > { %v1034_v30 = vadd.f32 %v2239_v45, %v961_v20  ;;  %v964_v31 = vadd.f32 %v963_v10, %v650_v28  ;;  %v1955_v37 = vpop.f32.mrb[22].mxu1 }
 0x116   : > { %v1126_v34 = vmax.f32 %v1122_v22, %v2303_v24  ;;  %v2308_v35 = vmax.f32 %v1036_v25, 0.0  ;;  %v1037_v36 = vadd.f32 %v2239_v45, %v972_v27  ;;  %v979_v39 = vpop.f32.mrb[23].mxu1 }
 0x117   : > { %v2311_v38 = vmax.f32 %v1034_v30, 0.0  ;;  %v1035_v42 = vadd.f32 %v2239_v45, %v964_v31 }
 0x118   : > { %v1130_v40 = vmax.f32 %v1126_v34, %v2308_v35  ;;  %v2316_v47 = vmax.f32 %v1037_v36, 0.0 }
 0x119   : > { %v1914_v43 = vpop.f32.mrb[24].mxu0  ;;  %v2319_v54 = vmax.f32 %v1035_v42, 0.0 }
 0x11a   : > { %v1134_v46 = vmax.f32 %v1130_v40, %v2311_v38  ;;  %v985_v48 = vadd.f32 %v1954_v29, %v1914_v43  ;;  %v663_v49 = vpop.f32.mrb[25].mxu0 }
 0x11b   : > { %v977_v50 = vadd.f32 %v976_v33, %v663_v49  ;;  %v1915_v52 = vpop.f32.mrb[26].mxu0  ;;  %v1958_v61 = vpop.f32.mrb[24].mxu1 }
 0x11c   : > { %v1138_v53 = vmax.f32 %v1134_v46, %v2316_v47  ;;  %v1040_v55 = vadd.f32 %v2239_v45, %v985_v48  ;;  %v988_v56 = vadd.f32 %v1955_v37, %v1915_v52  ;;  %v666_v59 = vpop.f32.mrb[27].mxu0  ;;  %v992_v1 = vpop.f32.mrb[25].mxu1 }
 0x11d   : > { %v1038_v62 = vadd.f32 %v2239_v45, %v977_v50  ;;  %v980_v0 = vadd.f32 %v979_v39, %v666_v59  ;;  %v1959_v7 = vpop.f32.mrb[26].mxu1 }
 0x11e   : > { %v1116_v2 = vmax.f32 %v2319_v54, %v1138_v53  ;;  %v2324_v3 = vmax.f32 %v1040_v55, 0.0  ;;  %v1041_v4 = vadd.f32 %v2239_v45, %v988_v56  ;;  %v995_v10 = vpop.f32.mrb[27].mxu1 }
 0x11f   : > { %v2327_v8 = vmax.f32 %v1038_v62, 0.0  ;;  %v1039_v12 = vadd.f32 %v2239_v45, %v980_v0 }
 0x120   : > { %v1120_v11 = vmax.f32 %v1116_v2, %v2324_v3  ;;  %v2332_v17 = vmax.f32 %v1041_v4, 0.0 }
 0x121   : > { %v1918_v13 = vpop.f32.mrb[28].mxu0  ;;  %v2335_v27 = vmax.f32 %v1039_v12, 0.0 }
 0x122   : > { %v1124_v14 = vmax.f32 %v1120_v11, %v2327_v8  ;;  %v1001_v18 = vadd.f32 %v1958_v61, %v1918_v13  ;;  %v679_v20 = vpop.f32.mrb[29].mxu0 }
 0x123   : > { %v993_v21 = vadd.f32 %v992_v1, %v679_v20  ;;  %v1919_v22 = vpop.f32.mrb[30].mxu0 }
 0x124   : > { %v1128_v25 = vmax.f32 %v1124_v14, %v2332_v17  ;;  %v1044_v28 = vadd.f32 %v2239_v45, %v1001_v18  ;;  %v1004_v29 = vadd.f32 %v1959_v7, %v1919_v22  ;;  %v682_v30 = vpop.f32.mrb[31].mxu0 }
 0x125   : > { %v1042_v31 = vadd.f32 %v2239_v45, %v993_v21  ;;  %v996_v33 = vadd.f32 %v995_v10, %v682_v30  ;;  %v2067_v21 = vld [vmem:[%s2491_s5] sm:$0xff]  }
 0x126   : > { %v1132_v34 = vmax.f32 %v1128_v25, %v2335_v27  ;;  %v2340_v36 = vmax.f32 %v1044_v28, 0.0  ;;  %v1045_v37 = vadd.f32 %v2239_v45, %v1004_v29  ;;  %1961 = vmatpush3.bf16.msra.mxu1 %v2067_v21  ;;  %v2068_v28 = vld [vmem:[%s2491_s5 + $0x8] sm:$0xff]  }
 0x127   : > { %v2343_v39 = vmax.f32 %v1042_v31, 0.0  ;;  %v1043_v42 = vadd.f32 %v2239_v45, %v996_v33  ;;  %1962 = vmatprep.subr.bf16.mxu1 %v2081_v23 }
 0x128   : > { %v1136_v40 = vmax.f32 %v1132_v34, %v2340_v36  ;;  %v2348_v48 = vmax.f32 %v1045_v37, 0.0 }
 0x129   : > { %v1930_v43 = vpop.f32.mrb[0].mxu0  ;;  %v2353_v56 = vmax.f32 %v1043_v42, 0.0 }
 0x12a   : > { %v1139_v46 = vmax.f32 %v1136_v40, %v2343_v39  ;;  %v1016_v49 = vadd.f32 %v1930_v43, %v2239_v45  ;;  %v880_v50 = vpop.f32.mrb[1].mxu0  ;;  %1963 = vmatpush3.bf16.msra.mxu1 %v2068_v28 }
 0x12b   : > { %v1014_v52 = vadd.f32 %v2239_v45, %v880_v50  ;;  %v1931_v53 = vpop.f32.mrb[2].mxu0  ;;  %1968 = vmatprep.subr.bf16.mxu1 %v2081_v23 }
 0x12c   : > { %v1140_v55 = vmax.f32 %v2348_v48, %v1139_v46  ;;  %v883_v59 = vpop.f32.mrb[3].mxu0  ;;  %v2357_v0 = vmax.f32 %v1016_v49, 0.0  ;;  %v1017_v1 = vadd.f32 %v1931_v53, %v2239_v45 }
 0x12d   : > { %v1015_v61 = vadd.f32 %v2239_v45, %v883_v59  ;;  %v2360_v2 = vmax.f32 %v1014_v52, 0.0 }
 0x12e   : > { %v1141_v62 = vmax.f32 %v2353_v56, %v1140_v55  ;;  %v2368_v12 = vmax.f32 %v1017_v1, 0.0 }
 0x12f   : > { %v2362_v4 = vmax.f32 %v1015_v61, 0.0 }
 0x130   : > { %v1142_v7 = vmax.f32 %v2357_v0, %v1141_v62 }
 0x131   : > { %v1078_v10 = vadd.f32 %v2362_v4, %v2360_v2 }
 0x132   : > { %v1143_v11 = vmax.f32 %v2360_v2, %v1142_v7 }
 0x133   : > { %v1079_v13 = vadd.f32 %v1078_v10, %v2357_v0 }
 0x134   : > { %v1144_v14 = vmax.f32 %v2368_v12, %v1143_v11 }
 0x135   : > { %v1080_v18 = vadd.f32 %v1079_v13, %v2368_v12 }
 0x136   : > { %v1145_v45 = vmax.f32 %v2362_v4, %v1144_v14 }
 0x137   : > { %v1081_v20 = vadd.f32 %v1080_v18, %v2246_v60 }
 0x138   : > { %v1146_v22 = vrot.slane %v1145_v45, 4 }
 0x139   : > { %v1082_v25 = vadd.f32 %v1081_v20, %v2254_v5 }
 0x13a   : > { %v1147_v29 = vmax.f32 %v1145_v45, %v1146_v22 }
 0x13b   : > { %v1083_v30 = vadd.f32 %v1082_v25, %v2243_v57 }
 0x13c   : > { %v1148_v31 = vrot.slane %v1147_v29, 2 }
 0x13d   : > { %v1084_v33 = vadd.f32 %v1083_v30, %v2249_v63 }
 0x13e   : > { %v1149_v34 = vmax.f32 %v1147_v29, %v1148_v31 }
 0x13f   : > { %v1085_v37 = vadd.f32 %v1084_v33, %v2262_v19 }
 0x140   : > { %v1150_v40 = vrot.slane %v1149_v34, 1 }
 0x141   : > { %v1086_v42 = vadd.f32 %v1085_v37, %v2271_v32 }
 0x142   : > { %v1151_v43 = vmax.f32 %v1149_v34, %v1150_v40 }
 0x143   : > { %v1087_v46 = vadd.f32 %v1086_v42, %v2259_v16 }
 0x144   : > { %1166 = vrot.lane.b32.xlu1 %v1151_v43, %s2082_s10  ;;  %1158 = vrot.lane.b32.xlu0 %v1151_v43, %s2083_s12 }
 0x145   : > { %v1088_v49 = vadd.f32 %v1087_v46, %v2268_v26 }
 0x147   : > { %v1089_v50 = vadd.f32 %v1088_v49, %v2279_v44 }
 0x149   : > { %v1090_v52 = vadd.f32 %v1089_v50, %v2287_v58 }
 0x14b   : > { %v1091_v53 = vadd.f32 %v1090_v52, %v2276_v41 }
 0x14d   : > { %v1092_v55 = vadd.f32 %v1091_v53, %v2284_v51 }
 0x14f   : > { %v1093_v59 = vadd.f32 %v1092_v55, %v2295_v9 }
 0x151   : > { %v1094_v61 = vadd.f32 %v1093_v59, %v2303_v24 }
 0x153   : > { %v1095_v62 = vadd.f32 %v1094_v61, %v2292_v6 }
 0x155   : > { %v1096_v1 = vadd.f32 %v1095_v62, %v2300_v15 }
 0x157   : > { %v1097_v7 = vadd.f32 %v1096_v1, %v2311_v38 }
 0x159   : > { %v1098_v10 = vadd.f32 %v1097_v7, %v2319_v54 }
 0x15b   : > { %v1099_v11 = vadd.f32 %v1098_v10, %v2308_v35 }
 0x15d   : > { %v1100_v13 = vadd.f32 %v1099_v11, %v2316_v47  ;;  %v1247_v11 = vld [vmem:[%s2492_s6] sm:$0x1] }
 0x15f   : > { %v1101_v14 = vadd.f32 %v1100_v13, %v2327_v8 }
 0x161   : > { %v1102_v18 = vadd.f32 %v1101_v14, %v2335_v27 }
 0x163   : > { %v1103_v45 = vadd.f32 %v1102_v18, %v2324_v3 }
 0x165   : > { %v1104_v20 = vadd.f32 %v1103_v45, %v2332_v17 }
 0x167   : > { %v1105_v21 = vadd.f32 %v1104_v20, %v2343_v39 }
 0x169   : > { %v1106_v22 = vadd.f32 %v1105_v21, %v2353_v56 }
 0x16b   : > { %v1107_v25 = vadd.f32 %v1106_v22, %v2340_v36 }
 0x16d   : > { %v1108_v28 = vadd.f32 %v1107_v25, %v2348_v48 }
 0x16f   : > { %v1109_v29 = vrot.slane %v1108_v28, 4 }
 0x171   : > { %v1110_v30 = vadd.f32 %v1109_v29, %v1108_v28 }
 0x173   : > { %v1111_v31 = vrot.slane %v1110_v30, 2 }
 0x175   : > { %v1112_v33 = vadd.f32 %v1111_v31, %v1110_v30 }
 0x177   : > { %v1113_v34 = vrot.slane %v1112_v33, 1 }
 0x179   : > { %v1114_v37 = vadd.f32 %v1113_v34, %v1112_v33 }
 0x17b   : > { %1162 = vrot.lane.b32.xlu1 %v1114_v37, %s2082_s10  ;;  %1153 = vrot.lane.b32.xlu0 %v1114_v37, %s2083_s12 }
 0x17f   : > { %1174 = vrot.lane.b32.xlu1 %v1151_v43, %s2085_s13  ;;  %1170 = vrot.lane.b32.xlu0 %v1114_v37, %s2085_s13 }
 0x1b6   : > { %v1167_v40 = vpop.permute.xlu1 %1166  ;;  %v1159_v42 = vpop.permute.xlu0 %1158 }
 0x1b7   : > { %v1161_v46 = vmax.f32 %v1151_v43, %v1159_v42  ;;  %v1253_v43 = vsel %vm1182_vm2, %v1247_v11, 0 }
 0x1b9   : > { %v1169_v53 = vmax.f32 %v1161_v46, %v1167_v40  ;;  %v1319_v46 = vlaneseq }
 0x1ed   : > { %v1163_v49 = vpop.permute.xlu1 %1162  ;;  %v1154_v50 = vpop.permute.xlu0 %1153 }
 0x1ee   : > { %v1156_v52 = vadd.f32 %v1154_v50, %v1114_v37 }
 0x1f0   : > { %v1165_v55 = vadd.f32 %v1163_v49, %v1156_v52  ;;  %v1320_v49 = vshrl.u32 %v1319_v46, 7 }
 0x1f1   : > { %v1175_v59 = vpop.permute.xlu1 %1174  ;;  %v1171_v61 = vpop.permute.xlu0 %1170 }
 0x1f2   : > { %v1177_v62 = vmax.f32 %v1169_v53, %v1175_v59  ;;  %v1173_v1 = vadd.f32 %v1171_v61, %v1165_v55  ;;  %v1321_v55 = vsub.s32 0, %v1320_v49 }
 0x1f4   : > { %v1180_v7 = vrot.slane %v1177_v62, 7  ;;  %v1178_v10 = vmul.f32 0.0009765625, %v1173_v1 }
 0x1f6   : > { %v1183_v13 = vsel %vm1182_vm2, %v1178_v10, %v1180_v7 }
 0x1f7   : > { %v1184_v14 = vpack.c.bf16 %v1183_v13, %v1183_v13 }
 0x1f9   : > { %1965 = vmatmul.mubr.msk.bf16.vlgmr.msra.gmra.mrb[28].mxu1 %vm1201_vm3, %v1184_v14 }
 0x1fa   : > { %1969 = vmatpush3.bf16.msra.mxu1 %v1253_v43  ;;  %1970 = vmatprep.mubr.msk.bf16.mxu1 %vm2084_vm1, %v2081_v23 }
 0x2cc   : > { %v1239_v18 = vpop.f32.mrb[28].mxu1 }
 0x2cd   : > { %v1245_v45 = vmax.f32 %v1239_v18, 0.0  ;;  %v1966_v20 = vpop.f32.mrb[29].mxu1 }
 0x2ce   : > { %v1242_v21 = vpop.f32.mrb[30].mxu1 }
 0x2cf   : > { %v1246_v22 = vpack.c.bf16 %v1245_v45, %v1245_v45  ;;  %v1967_v25 = vpop.f32.mrb[31].mxu1 }
 0x2d1   : > { %1971 = vmatmul.mubr.msk.bf16.vlgmr.msra.gmra.mrb[32].mxu1 %vm1248_vm4, %v1246_v22 }
 0x3a4   : > { %v1289_v28 = vpop.f32.mrb[32].mxu1 }
 0x3a5   : > { %v1296_v29 = vrot.slane %v1289_v28, 1  ;;  %v1972_v30 = vpop.f32.mrb[33].mxu1 }
 0x3a6   : > { %v1292_v31 = vpop.f32.mrb[34].mxu1 }
 0x3a7   : > { %v1298_v33 = vadd.f32 %v1296_v29, %v1289_v28  ;;  %v1973_v34 = vpop.f32.mrb[35].mxu1 }
 0x3a9   : > { %v1670_v37 = vmul.f32 -1.442695, %v1298_v33 }
 0x3ab   : > { %2069 = vpow2.f32 %v1670_v37 }
 0x3b5   : > { %v2070_v40 = vpop.eup %2069 }
 0x3b6   : > { %v1302_v42 = vadd.f32 1.0, %v2070_v40 }
 0x3b8   : > { %2071 = vrcp.f32 %v1302_v42 }
 0x3c2   : > { %v2072_v23 = vpop.eup %2071 }
 0x3c3   : > { %1309 = vrot.lane.b32.xlu1 %v2072_v23, %s2082_s10  ;;  %1306 = vrot.lane.b32.xlu0 %v2072_v23, %s2085_s13 }
 0x3c7   : > { %1312 = vrot.lane.b32.xlu0 %v2072_v23, %s2083_s12 }
 0x435   : > { %v1307_v50 = vpop.permute.xlu0 %1306  ;;  %v1310_v52 = vpop.permute.xlu1 %1309 }
 0x436   : > { %v1315_v53 = vsel %vm1201_vm3, %v2072_v23, %v1307_v50 }
 0x437   : > { %v1316_v59 = vsel %vm484_vm0, %v1315_v53, %v1310_v52 }
 0x439   : > { %v1313_v61 = vpop.permute.xlu0 %1312 }
 0x43a   : > { %v1318_v62 = vsel %vm1317_vm5, %v1316_v59, %v1313_v61 }
 0x43b   : > { %v1322_v1 = vrot.slane %v1318_v62, %v1321_v55 }
 0x43d   : > { %v1323_v7 = vmul.f32 %v1322_v1, %v2360_v2  ;;  %v1324_v10 = vmul.f32 %v1322_v1, %v2362_v4  ;;  %v1325_v11 = vmul.f32 %v1322_v1, %v2357_v0  ;;  %v1326_v13 = vmul.f32 %v1322_v1, %v2368_v12 }
 0x43e   : > { %v1327_v14 = vmul.f32 %v1322_v1, %v2246_v60  ;;  %v1328_v43 = vmul.f32 %v1322_v1, %v2254_v5  ;;  %v1329_v18 = vmul.f32 %v1322_v1, %v2243_v57  ;;  %v1330_v45 = vmul.f32 %v1322_v1, %v2249_v63 }
 0x43f   : > { %v1331_v20 = vmul.f32 %v1322_v1, %v2262_v19  ;;  %v1332_v21 = vmul.f32 %v1322_v1, %v2271_v32  ;;  %v1333_v2 = vmul.f32 %v1322_v1, %v2259_v16  ;;  %v1334_v4 = vmul.f32 %v1322_v1, %v2268_v26 }
 0x440   : > { %v1335_v0 = vmul.f32 %v1322_v1, %v2279_v44  ;;  %v1336_v12 = vmul.f32 %v1322_v1, %v2287_v58  ;;  %v1337_v60 = vmul.f32 %v1322_v1, %v2276_v41  ;;  %v1338_v5 = vmul.f32 %v1322_v1, %v2284_v51 }
 0x441   : > { %v1339_v57 = vmul.f32 %v1322_v1, %v2295_v9  ;;  %v1340_v63 = vmul.f32 %v1322_v1, %v2303_v24  ;;  %v1341_v19 = vmul.f32 %v1322_v1, %v2292_v6  ;;  %v1342_v32 = vmul.f32 %v1322_v1, %v2300_v15 }
 0x442   : > { %v1343_v16 = vmul.f32 %v1322_v1, %v2311_v38  ;;  %v1344_v26 = vmul.f32 %v1322_v1, %v2319_v54  ;;  %v1345_v44 = vmul.f32 %v1322_v1, %v2308_v35  ;;  %v1346_v58 = vmul.f32 %v1322_v1, %v2316_v47 }
 0x443   : > { %v1347_v41 = vmul.f32 %v1322_v1, %v2327_v8  ;;  %v1348_v51 = vmul.f32 %v1322_v1, %v2335_v27  ;;  %v1349_v9 = vmul.f32 %v1322_v1, %v2324_v3  ;;  %v1350_v24 = vmul.f32 %v1322_v1, %v2332_v17 }
 0x444   : > { %v1351_v6 = vmul.f32 %v1322_v1, %v2343_v39  ;;  %v1352_v15 = vmul.f32 %v1322_v1, %v2353_v56  ;;  %v1353_v35 = vmul.f32 %v1322_v1, %v2340_v36  ;;  %v1354_v38 = vmul.f32 %v1322_v1, %v2348_v48 }
 0x445   : > { %v1743_v47 = vpack.c.bf16 %v1324_v10, %v1323_v7  ;;  %v1748_v54 = vpack.c.bf16 %v1326_v13, %v1325_v11  ;;  %v1753_v3 = vpack.c.bf16 %v1328_v43, %v1327_v14  ;;  %v1758_v8 = vpack.c.bf16 %v1330_v45, %v1329_v18 }
 0x446   : > { %v1763_v17 = vpack.c.bf16 %v1332_v21, %v1331_v20  ;;  %v1768_v27 = vpack.c.bf16 %v1334_v4, %v1333_v2  ;;  %v1773_v22 = vpack.c.bf16 %v1336_v12, %v1335_v0  ;;  %v1778_v25 = vpack.c.bf16 %v1338_v5, %v1337_v60 }
 0x447   : > { %1744 = vst [vmem:[%s2461_s18] sm:$0xff] %v1743_v47   ;;  %1820 = vst [vmem:[%s2461_s18 + $0x8] sm:$0xff] %v1748_v54   ;;  %v1783_v36 = vpack.c.bf16 %v1340_v63, %v1339_v57  ;;  %v1788_v39 = vpack.c.bf16 %v1342_v32, %v1341_v19  ;;  %v1793_v48 = vpack.c.bf16 %v1344_v26, %v1343_v16 }
 0x448   : > { %1821 = vst [vmem:[%s2461_s18 + $0x10] sm:$0xff] %v1753_v3   ;;  %1822 = vst [vmem:[%s2461_s18 + $0x18] sm:$0xff] %v1758_v8   ;;  %v1798_v56 = vpack.c.bf16 %v1346_v58, %v1345_v44  ;;  %v1803_v28 = vpack.c.bf16 %v1348_v51, %v1347_v41  ;;  %v1808_v29 = vpack.c.bf16 %v1350_v24, %v1349_v9 }
 0x449   : > { %1823 = vst [vmem:[%s2461_s18 + $0x20] sm:$0xff] %v1763_v17   ;;  %1824 = vst [vmem:[%s2461_s18 + $0x28] sm:$0xff] %v1768_v27   ;;  %v1813_v30 = vpack.c.bf16 %v1352_v15, %v1351_v6  ;;  %v1818_v31 = vpack.c.bf16 %v1354_v38, %v1353_v35 }
 0x44a   : > { %1825 = vst [vmem:[%s2461_s18 + $0x30] sm:$0xff] %v1773_v22   ;;  %1826 = vst [vmem:[%s2461_s18 + $0x38] sm:$0xff] %v1778_v25  }
 0x44b   : > { %1827 = vst [vmem:[%s2461_s18 + $0x40] sm:$0xff] %v1783_v36   ;;  %1828 = vst [vmem:[%s2461_s18 + $0x48] sm:$0xff] %v1788_v39  }
 0x44c   : > { %1829 = vst [vmem:[%s2461_s18 + $0x50] sm:$0xff] %v1793_v48   ;;  %1830 = vst [vmem:[%s2461_s18 + $0x58] sm:$0xff] %v1798_v56  }
 0x44d   : > { %1831 = vst [vmem:[%s2461_s18 + $0x60] sm:$0xff] %v1803_v28   ;;  %1832 = vst [vmem:[%s2461_s18 + $0x68] sm:$0xff] %v1808_v29  }
 0x44e   : > { %1833 = vst [vmem:[%s2461_s18 + $0x70] sm:$0xff] %v1813_v30   ;;  %1834 = vst [vmem:[%s2461_s18 + $0x78] sm:$0xff] %v1818_v31  }
 0x44f PF: > { %s17_s24 = sadd.s32 1, %s2079_s24  }
 0x450   : > { %p14_p4 = scmp.ge.s32.totalorder %s17_s24, 4  }
 0x452   :  { %16 = sbr.rel (!%p14_p4) target bundleno = 1 (0x1), region = 81 }

// kernel: astnet_decoder.7
= control target key start
LH: loop header
LB: loop body
LE: loop exit
PB: predicated region body
PF: predicated region fallthrough
CT: control target
= control target key end

     0   :  { %s2210_s24 = smov 0   ;;  %s3196_s0 = inlined_call_operand.vmem [shape: bf16[2,32,1280], index: 0, kind: input, shape index: {}]   ;;  %s3197_s1 = inlined_call_operand.vmem [shape: f32[1,1280], index: 1, kind: input, shape index: {}]   ;;  %s3198_s2 = inlined_call_operand.vmem [shape: bf16[16,32], index: 2, kind: input, shape index: {}]   ;;  %s3199_s3 = inlined_call_operand.vmem [shape: f32[16,1], index: 3, kind: input, shape index: {}]   ;;  %s3200_s4 = inlined_call_operand.vmem [shape: bf16[16,144], index: 4, kind: input, shape index: {}]   ;;  %s3201_s5 = inlined_call_operand.vmem [shape: f32[16,1], index: 5, kind: input, shape index: {}]   ;;  %s3202_s6 = inlined_call_operand.vmem [shape: bf16[3,144], index: 6, kind: input, shape index: {}]   ;;  %s3203_s7 = inlined_call_operand.vmem [shape: f32[2,3,1280], index: 7, kind: output, shape index: {}]  }
   0x1 LB: > { %s2026_s25 = sadd.s32 4294967295, %s2159_s24   ;;  %p2030_p0 = scmp.ge.s32.totalorder %s2159_s24, 1  ;;  %s2159_s24 = sphi %s2210_s24, %s17_s24  }
   0x2   : > { %p237_p1 = scmp.lt.s32.totalorder %s2159_s24, 3 }
   0x4   : > { %p238_p2 = pnand %p2030_p0, %p237_p1 }
   0x5   : > { %p269_p3 = scmp.lt.s32.totalorder (!%p238_p2), %s2026_s25, 1  ;;  %v2161_v0 = vmov (!%p238_p2), 0   ;;  %v304_v1 = vld [vmem:[%s3199_s3] sm:$0xff] (!%p238_p2)  ;;  %v305_v2 = vld [vmem:[%s3199_s3 + $0x8] sm:$0xff] (!%p238_p2)  ;;  %vm421_vm0 = vcmask (!%p238_p2), 261120   ;;  %v662_v24 = vlaneseq (!%p238_p2)  ;;  %s2162_s15 = smov (!%p238_p2), 34  }
   0x6   : > { %241 = sbr.rel (%p238_p2) target bundleno = 1173 (0x495), region = 48  ;;  %457 = vmatprep.mubr.bf16.mxu0 (!%p238_p2), %v2161_v0  ;;  %500 = vmatprep.mubr.bf16.mxu1 (!%p238_p2), %v2161_v0  ;;  %v2131_v11 = vld [vmem:[%s3198_s2] sm:$0xff] (!%p238_p2)   ;;  %s2163_s16 = smov (!%p238_p2), 35   ;;  %vm1120_vm1 = vcmask (!%p238_p2), 130048   ;;  %vm772_vm2 = vcmask (!%p238_p2), 285696   ;;  %vm816_vm4 = vcmask (!%p238_p2), 277504  }
   0x7   : > { %2117 = vset.pattern.permute.xlu0 (!%p238_p2), %v2161_v0  ;;  %2118 = vset.pattern.permute.xlu1 (!%p238_p2), %v2161_v0  ;;  %v2260_v25 = vshrl.u32 (!%p238_p2), %v662_v24, 7  ;;  %v300_v27 = vld [vmem:[%s3197_s1] sm:$0xff] (!%p238_p2)  ;;  %s2164_s17 = smov (!%p238_p2), 33   ;;  %s2165_s18 = smov (!%p238_p2), 127   ;;  %vm2543_vm3 = vmneg (!%p238_p2), %vm772_vm2  ;;  %vm859_vm6 = vcmask (!%p238_p2), 269312   ;;  %vm902_vm8 = vcmask (!%p238_p2), 7168  }
   0x8   : > { %308 = vperm.xlu0 (!%p238_p2), %2117, %v304_v1   ;;  %s2166_s21 = smov (!%p238_p2), 1   ;;  %s2167_s22 = smov (!%p238_p2), 95   ;;  %vm2557_vm5 = vmneg (!%p238_p2), %vm816_vm4  ;;  %vm945_vm10 = vcmask (!%p238_p2), 1039360   ;;  %vm988_vm11 = vcmask (!%p238_p2), 777216   ;;  %vm1031_vm12 = vcmask (!%p238_p2), 769024   ;;  %vm1074_vm13 = vcmask (!%p238_p2), 760832  }
   0x9   : > { %v688_v26 = vsub.s32 (!%p238_p2), 6, %v2260_v25  ;;  %v684_v28 = vsub.s32 (!%p238_p2), 5, %v2260_v25  ;;  %v692_v29 = vsub.s32 (!%p238_p2), 7, %v2260_v25  ;;  %v664_v34 = vsub.s32 (!%p238_p2), 0, %v2260_v25  ;;  %s2168_s23 = smov (!%p238_p2), 94   ;;  %s2169_s26 = smov (!%p238_p2), 93   ;;  %vm2569_vm7 = vmneg (!%p238_p2), %vm859_vm6 }
   0xa   : > { %v672_v35 = vsub.s32 (!%p238_p2), 2, %v2260_v25  ;;  %v668_v36 = vsub.s32 (!%p238_p2), 1, %v2260_v25  ;;  %v676_v37 = vsub.s32 (!%p238_p2), 3, %v2260_v25  ;;  %v680_v53 = vsub.s32 (!%p238_p2), 4, %v2260_v25  ;;  %vm2586_vm9 = vmneg (!%p238_p2), %vm902_vm8 }
   0xb   : > { %v2268_v30 = vrot.slane (!%p238_p2), %v300_v27, %v688_v26  ;;  %v2270_v31 = vrot.slane (!%p238_p2), %v300_v27, %v684_v28  ;;  %v2272_v32 = vrot.slane (!%p238_p2), %v300_v27, %v692_v29  ;;  %v2284_v40 = vrot.slane (!%p238_p2), %v300_v27, %v664_v34 }
   0xc   : > { %313 = vperm.xlu0 (!%p238_p2), %2117, %v305_v2   ;;  %v2288_v44 = vrot.slane (!%p238_p2), %v300_v27, %v672_v35  ;;  %v2292_v46 = vrot.slane (!%p238_p2), %v300_v27, %v668_v36  ;;  %v2296_v50 = vrot.slane (!%p238_p2), %v300_v27, %v676_v37 }
   0xd   : > { %s3213_s25 = smov (!%p269_p3, %s2026_s25), 1 }
   0xe   : > { %s2098_s28 = smul.u32 160, %s3213_s25 }
   0xf   : > { %s2099_s14 = smul.u32 40, %s3213_s25 }
  0x10   : > { %s2230_s10 = scalar_lea.vmem %s3196_s0, %s2098_s28 }
  0x11   : > { %v2119_v3 = vld [vmem:[%s2230_s10 + $0x4] ss:$40 sps:$4 sm:$0xff]   ;;  %v2123_v5 = vld [vmem:[%s2230_s10] ss:$40 sps:$4 sm:$0xff]   ;;  %v2125_v7 = vld [vmem:[%s2230_s10 + $0x54] ss:$40 sps:$4 sm:$0xff]  }
  0x12   : > { %v2121_v4 = vld [vmem:[%s2230_s10 + $0xc] ss:$40 sps:$4 sm:$0xff]   ;;  %425 = vmatprep.subr.bf16.mxu0 %v2119_v3  ;;  %v2124_v6 = vld [vmem:[%s2230_s10 + $0x8] ss:$40 sps:$4 sm:$0xff]   ;;  %v2127_v8 = vld [vmem:[%s2230_s10 + $0x5c] ss:$40 sps:$4 sm:$0xff]  }
  0x13   : > { %468 = vmatprep.subr.bf16.mxu1 %v2121_v4  ;;  %426 = vmatpush1.bf16.msra.mxu0 %v2123_v5  ;;  %v2129_v9 = vld [vmem:[%s2230_s10 + $0x50] ss:$40 sps:$4 sm:$0xff]   ;;  %v2134_v12 = vld [vmem:[%s2230_s10 + $0x14] ss:$40 sps:$4 sm:$0xff]   ;;  %v2140_v16 = vld [vmem:[%s2230_s10 + $0x64] ss:$40 sps:$4 sm:$0xff]   ;;  %v2303_v4 = vrot.slane %v300_v27, %v680_v53 }
  0x14   : > { %469 = vmatpush1.bf16.msra.mxu1 %v2124_v6  ;;  %427 = vmatprep.subr.bf16.mxu0 %v2125_v7  ;;  %v2130_v10 = vld [vmem:[%s2230_s10 + $0x58] ss:$40 sps:$4 sm:$0xff]   ;;  %v2137_v14 = vld [vmem:[%s2230_s10 + $0x1c] ss:$40 sps:$4 sm:$0xff]   ;;  %v2143_v17 = vld [vmem:[%s2230_s10 + $0x6c] ss:$40 sps:$4 sm:$0xff]  }
  0x15   : > { %470 = vmatprep.subr.bf16.mxu1 %v2127_v8  ;;  %v2132_v13 = vld [vmem:[%s2230_s10 + $0x10] ss:$40 sps:$4 sm:$0xff]   ;;  %v2138_v18 = vld [vmem:[%s2230_s10 + $0x60] ss:$40 sps:$4 sm:$0xff]   ;;  %v2146_v20 = vld [vmem:[%s2230_s10 + $0x24] ss:$40 sps:$4 sm:$0xff]  }
  0x16   : > { %v2135_v15 = vld [vmem:[%s2230_s10 + $0x18] ss:$40 sps:$4 sm:$0xff]   ;;  %v2141_v19 = vld [vmem:[%s2230_s10 + $0x68] ss:$40 sps:$4 sm:$0xff]   ;;  %v2149_v22 = vld [vmem:[%s2230_s10 + $0x74] ss:$40 sps:$4 sm:$0xff]  }
  0x17   : > { %428 = vmatpush1.bf16.msra.mxu0 %v2129_v9  ;;  %v2144_v21 = vld [vmem:[%s2230_s10 + $0x20] ss:$40 sps:$4 sm:$0xff]   ;;  %v2147_v23 = vld [vmem:[%s2230_s10 + $0x70] ss:$40 sps:$4 sm:$0xff]  }
  0x18   : > { %471 = vmatpush1.bf16.msra.mxu1 %v2130_v10  ;;  %511 = vmatprep.subr.bf16.mxu0 %v2134_v12 }
  0x19   : > { %554 = vmatprep.subr.bf16.mxu1 %v2137_v14 }
  0x1a   : > { %2054 = vmatmul.mubr.msk.bf16.vlgmr.msra.gmra.mrb[0].mxu0 %vm421_vm0, %v2131_v11 }
  0x1b   : > { %2055 = vmatmul.mubr.msk.bf16.vlgmr.msra.gmra.mrb[0].mxu1 %vm421_vm0, %v2131_v11  ;;  %512 = vmatpush1.bf16.msra.mxu0 %v2132_v13 }
  0x1c   : > { %555 = vmatpush1.bf16.msra.mxu1 %v2135_v15  ;;  %513 = vmatprep.subr.bf16.mxu0 %v2140_v16 }
  0x1d   : > { %556 = vmatprep.subr.bf16.mxu1 %v2143_v17  ;;  %543 = vmatprep.mubr.bf16.mxu0 %v2161_v0 }
  0x1e   : > { %586 = vmatprep.mubr.bf16.mxu1 %v2161_v0 }
  0x1f   : > { %514 = vmatpush1.bf16.msra.mxu0 %v2138_v18 }
  0x20   : > { %557 = vmatpush1.bf16.msra.mxu1 %v2141_v19  ;;  %597 = vmatprep.subr.bf16.mxu0 %v2146_v20 }
  0x22   : > { %2056 = vmatmul.mubr.msk.bf16.vlgmr.msra.gmra.mrb[4].mxu0 %vm421_vm0, %v2131_v11 }
  0x23   : > { %2057 = vmatmul.mubr.msk.bf16.vlgmr.msra.gmra.mrb[4].mxu1 %vm421_vm0, %v2131_v11  ;;  %598 = vmatpush1.bf16.msra.mxu0 %v2144_v21 }
  0x24   : > { %629 = vmatprep.mubr.bf16.mxu0 %v2161_v0  ;;  %599 = vmatprep.subr.bf16.mxu0 %v2149_v22 }
  0x27   : > { %600 = vmatpush1.bf16.msra.mxu0 %v2147_v23 }
  0x2a   : > { %2058 = vmatmul.mubr.msk.bf16.vlgmr.msra.gmra.mrb[8].mxu0 %vm421_vm0, %v2131_v11 }
  0x87   : > { %v2274_v33 = vpop.permute.xlu0 %308 }
  0x8b   : > { %v2280_v38 = vpop.permute.xlu0 %313 }
  0xed   : > { %v459_v39 = vpop.f32.mrb[0].mxu0 }
  0xee   : > { %v502_v41 = vpop.f32.mrb[0].mxu1  ;;  %v460_v42 = vadd.f32 %v459_v39, %v2274_v33  ;;  %v461_v45 = vpop.f32.mrb[1].mxu0 }
  0xef   : > { %v503_v43 = vadd.f32 %v502_v41, %v2274_v33  ;;  %v504_v47 = vpop.f32.mrb[1].mxu1  ;;  %v462_v48 = vadd.f32 %v461_v45, %v2274_v33  ;;  %v463_v51 = vpop.f32.mrb[2].mxu0 }
  0xf0   : > { %v505_v49 = vadd.f32 %v504_v47, %v2274_v33  ;;  %v506_v52 = vpop.f32.mrb[2].mxu1  ;;  %v640_v54 = vmax.f32 %v460_v42, 0.0  ;;  %v464_v56 = vadd.f32 %v463_v51, %v2280_v38  ;;  %v465_v58 = vpop.f32.mrb[3].mxu0 }
  0xf1   : > { %v642_v55 = vmax.f32 %v503_v43, 0.0  ;;  %v507_v57 = vadd.f32 %v506_v52, %v2280_v38  ;;  %v508_v59 = vpop.f32.mrb[3].mxu1  ;;  %v641_v60 = vmax.f32 %v462_v48, 0.0  ;;  %v466_v62 = vadd.f32 %v465_v58, %v2280_v38 }
  0xf2   : > { %v643_v61 = vmax.f32 %v505_v49, 0.0  ;;  %v509_v63 = vadd.f32 %v508_v59, %v2280_v38  ;;  %v650_v0 = vmax.f32 %v464_v56, 0.0  ;;  %v712_v5 = vmul.f32 %v2284_v40, %v640_v54 }
  0xf3   : > { %v652_v1 = vmax.f32 %v507_v57, 0.0  ;;  %v651_v2 = vmax.f32 %v466_v62, 0.0  ;;  %v714_v6 = vmul.f32 %v2288_v44, %v642_v55  ;;  %v713_v9 = vmul.f32 %v2292_v46, %v641_v60 }
  0xf4   : > { %v653_v3 = vmax.f32 %v509_v63, 0.0  ;;  %v722_v7 = vmul.f32 %v2284_v40, %v650_v0  ;;  %v715_v10 = vmul.f32 %v2296_v50, %v643_v61  ;;  %v301_v61 = vld [vmem:[%s3197_s1 + $0x8] sm:$0x3] }
  0xf5   : > { %v724_v8 = vmul.f32 %v2288_v44, %v652_v1  ;;  %v723_v11 = vmul.f32 %v2292_v46, %v651_v2  ;;  %v545_v13 = vpop.f32.mrb[4].mxu0 }
  0xf6   : > { %v725_v12 = vmul.f32 %v2296_v50, %v653_v3  ;;  %v588_v14 = vpop.f32.mrb[4].mxu1  ;;  %v2313_v15 = vpack.c.bf16 %v722_v7, %v712_v5  ;;  %v546_v17 = vadd.f32 %v545_v13, %v2274_v33  ;;  %v547_v19 = vpop.f32.mrb[5].mxu0 }
  0xf7   : > { %v2315_v16 = vpack.c.bf16 %v724_v8, %v714_v6  ;;  %v589_v18 = vadd.f32 %v588_v14, %v2274_v33  ;;  %v590_v20 = vpop.f32.mrb[5].mxu1  ;;  %v2319_v21 = vpack.c.bf16 %v723_v11, %v713_v9  ;;  %v548_v23 = vadd.f32 %v547_v19, %v2274_v33  ;;  %v549_v26 = vpop.f32.mrb[6].mxu0 }
  0xf8   : > { %v2321_v22 = vpack.c.bf16 %v725_v12, %v715_v10  ;;  %v591_v24 = vadd.f32 %v590_v20, %v2274_v33  ;;  %v592_v27 = vpop.f32.mrb[6].mxu1  ;;  %v644_v28 = vmax.f32 %v546_v17, 0.0  ;;  %v550_v35 = vadd.f32 %v549_v26, %v2280_v38  ;;  %v551_v39 = vpop.f32.mrb[7].mxu0  ;;  %796 = vrot.lane.b32.xlu0 %v2313_v15, %s2162_s15  ;;  %752 = vrot.lane.b32.xlu1 %v2313_v15, %s2163_s16  ;;  %v2423_v20 = vld [vmem:[%s3200_s4 + $0x4] ss:$8 sps:$4 sm:$0xff]  }
  0xf9   : > { %v646_v29 = vmax.f32 %v589_v18, 0.0  ;;  %v593_v37 = vadd.f32 %v592_v27, %v2280_v38  ;;  %v594_v41 = vpop.f32.mrb[7].mxu1  ;;  %v645_v42 = vmax.f32 %v548_v23, 0.0  ;;  %v552_v45 = vadd.f32 %v551_v39, %v2280_v38  ;;  %2069 = vmatprep.mubr.msk.bf16.mxu1 %vm1120_vm1, %v2423_v20  ;;  %2070 = vmatprep.mubr.msk.bf16.mxu0 %vm1120_vm1, %v2423_v20 }
  0xfa   : > { %v647_v43 = vmax.f32 %v591_v24, 0.0  ;;  %v595_v47 = vadd.f32 %v594_v41, %v2280_v38  ;;  %v654_v48 = vmax.f32 %v550_v35, 0.0  ;;  %v716_v51 = vmul.f32 %v2303_v4, %v644_v28 }
  0xfb   : > { %v656_v49 = vmax.f32 %v593_v37, 0.0  ;;  %v655_v52 = vmax.f32 %v552_v45, 0.0  ;;  %v718_v54 = vmul.f32 %v2268_v30, %v646_v29  ;;  %v717_v57 = vmul.f32 %v2270_v31, %v645_v42 }
  0xfc   : > { %v657_v53 = vmax.f32 %v595_v47, 0.0  ;;  %v726_v55 = vmul.f32 %v2303_v4, %v654_v48  ;;  %839 = vrot.lane.b32.xlu0 %v2313_v15, %s2164_s17  ;;  %929 = vrot.lane.b32.xlu1 %v2315_v16, %s2165_s18  ;;  %v719_v58 = vmul.f32 %v2272_v32, %v647_v43  ;;  %v2360_v9 = vrot.slane %v301_v61, %v664_v34 }
  0xfd   : > { %v728_v56 = vmul.f32 %v2268_v30, %v656_v49  ;;  %v727_v59 = vmul.f32 %v2270_v31, %v655_v52  ;;  %v631_v62 = vpop.f32.mrb[8].mxu0 }
  0xfe   : > { %v729_v60 = vmul.f32 %v2272_v32, %v657_v53  ;;  %v2348_v63 = vpack.c.bf16 %v726_v55, %v716_v51  ;;  %v632_v1 = vadd.f32 %v631_v62, %v2274_v33  ;;  %v633_v2 = vpop.f32.mrb[9].mxu0 }
  0xff   : > { %v2350_v0 = vpack.c.bf16 %v728_v56, %v718_v54  ;;  %v2353_v3 = vpack.c.bf16 %v727_v59, %v717_v57  ;;  %v634_v6 = vadd.f32 %v633_v2, %v2274_v33  ;;  %v635_v7 = vpop.f32.mrb[10].mxu0  ;;  %v2369_v33 = vrot.slane %v301_v61, %v668_v36  ;;  %v1099_v61 = vld [vmem:[%s3201_s5] sm:$0xff] }
 0x100   : > { %v2355_v5 = vpack.c.bf16 %v729_v60, %v719_v58  ;;  %v648_v8 = vmax.f32 %v632_v1, 0.0  ;;  %v636_v10 = vadd.f32 %v635_v7, %v2280_v38  ;;  %v637_v11 = vpop.f32.mrb[11].mxu0  ;;  %882 = vrot.lane.b32.xlu0 %v2313_v15, %s2166_s21  ;;  %800 = vrot.lane.b32.xlu1 %v2315_v16, %s2162_s15 }
 0x101   : > { %v649_v12 = vmax.f32 %v634_v6, 0.0  ;;  %v638_v13 = vadd.f32 %v637_v11, %v2280_v38 }
 0x102   : > { %v658_v14 = vmax.f32 %v636_v10, 0.0  ;;  %v720_v17 = vmul.f32 %v2360_v9, %v648_v8 }
 0x103   : > { %v659_v34 = vmax.f32 %v638_v13, 0.0  ;;  %v721_v19 = vmul.f32 %v2369_v33, %v649_v12  ;;  %v1100_v13 = vld [vmem:[%s3201_s5 + $0x8] sm:$0xff] }
 0x104   : > { %v730_v18 = vmul.f32 %v2360_v9, %v658_v14  ;;  %756 = vrot.lane.b32.xlu0 %v2315_v16, %s2163_s16  ;;  %968 = vrot.lane.b32.xlu1 %v2313_v15, %s2167_s22 }
 0x105   : > { %v731_v25 = vmul.f32 %v2369_v33, %v659_v34 }
 0x106   : > { %v2380_v36 = vpack.c.bf16 %v730_v18, %v720_v17 }
 0x107   : > { %v2382_v38 = vpack.c.bf16 %v731_v25, %v721_v19 }
 0x108   : > { %925 = vrot.lane.b32.xlu0 %v2313_v15, %s2165_s18  ;;  %1015 = vrot.lane.b32.xlu1 %v2315_v16, %s2168_s23 }
 0x10c   : > { %972 = vrot.lane.b32.xlu0 %v2315_v16, %s2167_s22  ;;  %886 = vrot.lane.b32.xlu1 %v2315_v16, %s2166_s21 }
 0x110   : > { %843 = vrot.lane.b32.xlu0 %v2315_v16, %s2164_s17  ;;  %1054 = vrot.lane.b32.xlu1 %v2313_v15, %s2169_s26 }
 0x114   : > { %1011 = vrot.lane.b32.xlu0 %v2313_v15, %s2168_s23  ;;  %754 = vrot.lane.b32.xlu1 %v2319_v21, %s2163_s16 }
 0x118   : > { %1058 = vrot.lane.b32.xlu0 %v2315_v16, %s2169_s26  ;;  %798 = vrot.lane.b32.xlu1 %v2319_v21, %s2162_s15 }
 0x11c   : > { %927 = vrot.lane.b32.xlu0 %v2319_v21, %s2165_s18  ;;  %841 = vrot.lane.b32.xlu1 %v2319_v21, %s2164_s17 }
 0x120   : > { %802 = vrot.lane.b32.xlu0 %v2321_v22, %s2162_s15  ;;  %884 = vrot.lane.b32.xlu1 %v2319_v21, %s2166_s21 }
 0x124   : > { %1013 = vrot.lane.b32.xlu0 %v2319_v21, %s2168_s23  ;;  %758 = vrot.lane.b32.xlu1 %v2321_v22, %s2163_s16 }
 0x128   : > { %888 = vrot.lane.b32.xlu0 %v2321_v22, %s2166_s21  ;;  %970 = vrot.lane.b32.xlu1 %v2319_v21, %s2167_s22 }
 0x12c   : > { %931 = vrot.lane.b32.xlu0 %v2321_v22, %s2165_s18  ;;  %845 = vrot.lane.b32.xlu1 %v2321_v22, %s2164_s17 }
 0x130   : > { %974 = vrot.lane.b32.xlu0 %v2321_v22, %s2167_s22  ;;  %1056 = vrot.lane.b32.xlu1 %v2319_v21, %s2169_s26 }
 0x134   : > { %1017 = vrot.lane.b32.xlu0 %v2321_v22, %s2168_s23  ;;  %933 = vrot.lane.b32.xlu1 %v2348_v63, %s2165_s18 }
 0x138   : > { %1060 = vrot.lane.b32.xlu0 %v2321_v22, %s2169_s26  ;;  %976 = vrot.lane.b32.xlu1 %v2348_v63, %s2167_s22 }
 0x13c   : > { %760 = vrot.lane.b32.xlu0 %v2348_v63, %s2163_s16  ;;  %1019 = vrot.lane.b32.xlu1 %v2348_v63, %s2168_s23 }
 0x140   : > { %804 = vrot.lane.b32.xlu0 %v2348_v63, %s2162_s15  ;;  %1062 = vrot.lane.b32.xlu1 %v2348_v63, %s2169_s26 }
 0x144   : > { %847 = vrot.lane.b32.xlu0 %v2348_v63, %s2164_s17  ;;  %937 = vrot.lane.b32.xlu1 %v2350_v0, %s2165_s18 }
 0x148   : > { %890 = vrot.lane.b32.xlu0 %v2348_v63, %s2166_s21  ;;  %980 = vrot.lane.b32.xlu1 %v2350_v0, %s2167_s22 }
 0x14c   : > { %764 = vrot.lane.b32.xlu0 %v2350_v0, %s2163_s16  ;;  %1023 = vrot.lane.b32.xlu1 %v2350_v0, %s2168_s23 }
 0x150   : > { %808 = vrot.lane.b32.xlu0 %v2350_v0, %s2162_s15  ;;  %1066 = vrot.lane.b32.xlu1 %v2350_v0, %s2169_s26 }
 0x154   : > { %851 = vrot.lane.b32.xlu0 %v2350_v0, %s2164_s17  ;;  %762 = vrot.lane.b32.xlu1 %v2353_v3, %s2163_s16 }
 0x158   : > { %894 = vrot.lane.b32.xlu0 %v2350_v0, %s2166_s21  ;;  %806 = vrot.lane.b32.xlu1 %v2353_v3, %s2162_s15 }
 0x15c   : > { %935 = vrot.lane.b32.xlu0 %v2353_v3, %s2165_s18  ;;  %849 = vrot.lane.b32.xlu1 %v2353_v3, %s2164_s17 }
 0x160   : > { %978 = vrot.lane.b32.xlu0 %v2353_v3, %s2167_s22  ;;  %892 = vrot.lane.b32.xlu1 %v2353_v3, %s2166_s21 }
 0x164   : > { %1021 = vrot.lane.b32.xlu0 %v2353_v3, %s2168_s23  ;;  %766 = vrot.lane.b32.xlu1 %v2355_v5, %s2163_s16 }
 0x168   : > { %1064 = vrot.lane.b32.xlu0 %v2353_v3, %s2169_s26  ;;  %810 = vrot.lane.b32.xlu1 %v2355_v5, %s2162_s15 }
 0x16a   : > { %v797_v23 = vpop.permute.xlu0 %796  ;;  %v753_v24 = vpop.permute.xlu1 %752 }
 0x16c   : > { %939 = vrot.lane.b32.xlu0 %v2355_v5, %s2165_s18  ;;  %853 = vrot.lane.b32.xlu1 %v2355_v5, %s2164_s17 }
 0x16e   : > { %v840_v26 = vpop.permute.xlu0 %839  ;;  %v2497_v27 = vpop.permute.xlu1 %929 }
 0x170   : > { %982 = vrot.lane.b32.xlu0 %v2355_v5, %s2167_s22  ;;  %896 = vrot.lane.b32.xlu1 %v2355_v5, %s2166_s21 }
 0x172   : > { %v883_v28 = vpop.permute.xlu0 %882  ;;  %v2503_v29 = vpop.permute.xlu1 %800 }
 0x174   : > { %768 = vrot.lane.b32.xlu0 %v2380_v36, %s2163_s16  ;;  %941 = vrot.lane.b32.xlu1 %v2380_v36, %s2165_s18 }
 0x176   : > { %v757_v35 = vpop.permute.xlu0 %756  ;;  %v2509_v37 = vpop.permute.xlu1 %968 }
 0x178   : > { %812 = vrot.lane.b32.xlu0 %v2380_v36, %s2162_s15  ;;  %984 = vrot.lane.b32.xlu1 %v2380_v36, %s2167_s22 }
 0x17a   : > { %v2515_v39 = vpop.permute.xlu0 %925  ;;  %v2517_v41 = vpop.permute.xlu1 %1015 }
 0x17c   : > { %855 = vrot.lane.b32.xlu0 %v2380_v36, %s2164_s17  ;;  %770 = vrot.lane.b32.xlu1 %v2382_v38, %s2163_s16 }
 0x17e   : > { %v2523_v42 = vpop.permute.xlu0 %972  ;;  %v2525_v43 = vpop.permute.xlu1 %886 }
 0x180   : > { %898 = vrot.lane.b32.xlu0 %v2380_v36, %s2166_s21  ;;  %814 = vrot.lane.b32.xlu1 %v2382_v38, %s2162_s15 }
 0x182   : > { %v2531_v45 = vpop.permute.xlu0 %843  ;;  %v2533_v47 = vpop.permute.xlu1 %1054 }
 0x184   : > { %1025 = vrot.lane.b32.xlu0 %v2355_v5, %s2168_s23  ;;  %857 = vrot.lane.b32.xlu1 %v2382_v38, %s2164_s17 }
 0x186   : > { %v2539_v48 = vpop.permute.xlu0 %1011  ;;  %v755_v49 = vpop.permute.xlu1 %754 }
 0x187   : > { %v773_v51 = vsel %vm772_vm2, %v753_v24, %v755_v49  ;;  %v774_v11 = vsel %vm772_vm2, %v755_v49, %v757_v35 }
 0x188   : > { %1068 = vrot.lane.b32.xlu0 %v2355_v5, %s2169_s26  ;;  %900 = vrot.lane.b32.xlu1 %v2382_v38, %s2166_s21 }
 0x189   : > { %1124 = vmatprep.subr.bf16.mxu1 %v773_v51 }
 0x18a   : > { %2062 = vmatpush1.bf16.msk.msra.mxu1 %vm2543_vm3, %v753_v24  ;;  %v2553_v53 = vpop.permute.xlu0 %1058  ;;  %v799_v54 = vpop.permute.xlu1 %798 }
 0x18b   : > { %v817_v55 = vsel %vm816_vm4, %v797_v23, %v799_v54  ;;  %v818_v17 = vsel %vm816_vm4, %v799_v54, %v2503_v29 }
 0x18c   : > { %943 = vrot.lane.b32.xlu0 %v2382_v38, %s2165_s18  ;;  %1027 = vrot.lane.b32.xlu1 %v2380_v36, %s2168_s23 }
 0x18d   : > { %1126 = vmatprep.subr.bf16.mxu1 %v817_v55 }
 0x18e   : > { %2064 = vmatpush1.bf16.msk.msra.mxu1 %vm2557_vm5, %v797_v23  ;;  %v928_v57 = vpop.permute.xlu0 %927  ;;  %v842_v58 = vpop.permute.xlu1 %841 }
 0x18f   : > { %v860_v59 = vsel %vm859_vm6, %v840_v26, %v842_v58  ;;  %v947_v14 = vsel %vm945_vm10, %v928_v57, %v2497_v27  ;;  %v946_v18 = vsel %vm945_vm10, %v2515_v39, %v928_v57  ;;  %v861_v24 = vsel %vm859_vm6, %v842_v58, %v2531_v45 }
 0x190   : > { %1029 = vrot.lane.b32.xlu0 %v2382_v38, %s2168_s23  ;;  %1070 = vrot.lane.b32.xlu1 %v2380_v36, %s2169_s26 }
 0x191   : > { %1128 = vmatprep.subr.bf16.mxu1 %v860_v59 }
 0x192   : > { %2066 = vmatpush1.bf16.msk.msra.mxu1 %vm2569_vm7, %v840_v26  ;;  %v2582_v62 = vpop.permute.xlu0 %802  ;;  %v885_v1 = vpop.permute.xlu1 %884 }
 0x193   : > { %v903_v2 = vsel %vm902_vm8, %v883_v28, %v885_v1  ;;  %v819_v12 = vsel %vm816_vm4, %v2503_v29, %v2582_v62 }
 0x194   : > { %1103 = vperm.xlu0 %2117, %v1099_v61   ;;  %986 = vrot.lane.b32.xlu1 %v2382_v38, %s2167_s22 }
 0x195   : > { %1130 = vmatprep.subr.bf16.mxu1 %v903_v2 }
 0x196   : > { %2068 = vmatpush1.bf16.msk.msra.mxu1 %vm2586_vm9, %v883_v28  ;;  %v1014_v7 = vpop.permute.xlu0 %1013  ;;  %v2594_v8 = vpop.permute.xlu1 %758 }
 0x197   : > { %1132 = vmatprep.subr.bf16.mxu1 %v2319_v21  ;;  %v775_v10 = vsel %vm772_vm2, %v757_v35, %v2594_v8  ;;  %v1033_v35 = vsel %vm1031_vm12, %v1014_v7, %v2517_v41 }
 0x198   : > { %1072 = vrot.lane.b32.xlu1 %v2382_v38, %s2169_s26  ;;  %1167 = vmatprep.subr.bf16.mxu0 %v775_v10 }
 0x199   : > { %1168 = vmatpush1.bf16.msra.mxu0 %v774_v11 }
 0x19a   : > { %1133 = vmatpush1.bf16.msra.mxu1 %v2313_v15  ;;  %v2609_v21 = vpop.permute.xlu0 %888  ;;  %1169 = vmatprep.subr.bf16.mxu0 %v819_v12  ;;  %v971_v34 = vpop.permute.xlu1 %970 }
 0x19b   : > { %1134 = vmatprep.subr.bf16.mxu1 %v947_v14  ;;  %v990_v15 = vsel %vm988_vm11, %v971_v34, %v2523_v42  ;;  %v989_v26 = vsel %vm988_vm11, %v2509_v37, %v971_v34  ;;  %v905_v28 = vsel %vm902_vm8, %v2525_v43, %v2609_v21  ;;  %v1032_v37 = vsel %vm1031_vm12, %v2539_v48, %v1014_v7  ;;  %v2650_v48 = vld [vmem:[%s3200_s4] ss:$8 sps:$4 sm:$0xff]  }
 0x19c   : > { %1108 = vperm.xlu1 %2118, %v1100_v13  }
 0x19d   : > { %1170 = vmatpush1.bf16.msra.mxu0 %v818_v17 }
 0x19e   : > { %1135 = vmatpush1.bf16.msra.mxu1 %v946_v18  ;;  %v932_v19 = vpop.permute.xlu0 %931  ;;  %v2619_v25 = vpop.permute.xlu1 %845 }
 0x19f   : > { %1136 = vmatprep.subr.bf16.mxu1 %v990_v15  ;;  %v862_v23 = vsel %vm859_vm6, %v2531_v45, %v2619_v25  ;;  %v904_v45 = vsel %vm902_vm8, %v885_v1, %v2525_v43  ;;  %v948_v58 = vsel %vm945_vm10, %v2497_v27, %v932_v19 }
 0x1a0   : > { %1171 = vmatprep.subr.bf16.mxu0 %v862_v23 }
 0x1a1   : > { %1172 = vmatpush1.bf16.msra.mxu0 %v861_v24 }
 0x1a2   : > { %1137 = vmatpush1.bf16.msra.mxu1 %v989_v26  ;;  %v975_v29 = vpop.permute.xlu0 %974  ;;  %1173 = vmatprep.subr.bf16.mxu0 %v905_v28  ;;  %v1057_v39 = vpop.permute.xlu1 %1056 }
 0x1a3   : > { %1138 = vmatprep.subr.bf16.mxu1 %v1033_v35  ;;  %v1076_v51 = vsel %vm1074_vm13, %v1057_v39, %v2553_v53  ;;  %v1075_v55 = vsel %vm1074_vm13, %v2533_v47, %v1057_v39  ;;  %v991_v61 = vsel %vm988_vm11, %v2523_v42, %v975_v29 }
 0x1a5   : > { %1174 = vmatpush1.bf16.msra.mxu0 %v904_v45 }
 0x1a6   : > { %1139 = vmatpush1.bf16.msra.mxu1 %v1032_v37  ;;  %v1018_v49 = vpop.permute.xlu0 %1017  ;;  %1175 = vmatprep.subr.bf16.mxu0 %v2321_v22  ;;  %v2640_v54 = vpop.permute.xlu1 %933 }
 0x1a7   : > { %1140 = vmatprep.subr.bf16.mxu1 %v1076_v51  ;;  %v949_v43 = vsel %vm945_vm10, %v932_v19, %v2640_v54  ;;  %v1034_v7 = vsel %vm1031_vm12, %v2517_v41, %v1018_v49 }
 0x1a9   : > { %1176 = vmatpush1.bf16.msra.mxu0 %v2315_v16 }
 0x1aa   : > { %1141 = vmatpush1.bf16.msra.mxu1 %v1075_v55  ;;  %v1061_v57 = vpop.permute.xlu0 %1060  ;;  %1177 = vmatprep.subr.bf16.mxu0 %v949_v43  ;;  %v2652_v22 = vpop.permute.xlu1 %976 }
 0x1ab   : > { %v992_v16 = vsel %vm988_vm11, %v975_v29, %v2652_v22  ;;  %v1077_v42 = vsel %vm1074_vm13, %v2553_v53, %v1061_v57 }
 0x1ad   : > { %1157 = vmatmul.mubr.bf16.vlgmr.msra.gmra.mrb[8].mxu1 %v2650_v48  ;;  %1178 = vmatpush1.bf16.msra.mxu0 %v948_v58 }
 0x1ae   : > { %v761_v47 = vpop.permute.xlu0 %760  ;;  %1179 = vmatprep.subr.bf16.mxu0 %v992_v16  ;;  %v2659_v59 = vpop.permute.xlu1 %1019  ;;  %2071 = vmatprep.mubr.msk.bf16.mxu1 %vm1120_vm1, %v2423_v20 }
 0x1af   : > { %v1035_v27 = vsel %vm1031_vm12, %v1018_v49, %v2659_v59  ;;  %v776_v53 = vsel %vm772_vm2, %v2594_v8, %v761_v47 }
 0x1b1   : > { %1180 = vmatpush1.bf16.msra.mxu0 %v991_v61 }
 0x1b2   : > { %v805_v1 = vpop.permute.xlu0 %804  ;;  %1181 = vmatprep.subr.bf16.mxu0 %v1035_v27  ;;  %v2667_v2 = vpop.permute.xlu1 %1062 }
 0x1b3   : > { %v1078_v10 = vsel %vm1074_vm13, %v1061_v57, %v2667_v2  ;;  %v820_v29 = vsel %vm816_vm4, %v2582_v62, %v805_v1 }
 0x1b5   : > { %1182 = vmatpush1.bf16.msra.mxu0 %v1034_v7 }
 0x1b6   : > { %v848_v11 = vpop.permute.xlu0 %847  ;;  %1183 = vmatprep.subr.bf16.mxu0 %v1078_v10  ;;  %v2673_v12 = vpop.permute.xlu1 %937 }
 0x1b7   : > { %v863_v37 = vsel %vm859_vm6, %v2619_v25, %v848_v11 }
 0x1b9   : > { %1184 = vmatpush1.bf16.msra.mxu0 %v1077_v42 }
 0x1ba   : > { %v891_v13 = vpop.permute.xlu0 %890  ;;  %v2677_v14 = vpop.permute.xlu1 %980 }
 0x1bb   : > { %v906_v55 = vsel %vm902_vm8, %v2609_v21, %v891_v13 }
 0x1bc   : > { %1200 = vmatmul.mubr.bf16.vlgmr.msra.gmra.mrb[12].mxu0 %v2650_v48 }
 0x1bd   : > { %2072 = vmatprep.mubr.msk.bf16.mxu0 %vm1120_vm1, %v2423_v20 }
 0x1be   : > { %v765_v41 = vpop.permute.xlu0 %764  ;;  %v2682_v34 = vpop.permute.xlu1 %1023 }
 0x1c2   : > { %v809_v17 = vpop.permute.xlu0 %808  ;;  %v2684_v18 = vpop.permute.xlu1 %1066 }
 0x1c6   : > { %v852_v19 = vpop.permute.xlu0 %851  ;;  %v763_v15 = vpop.permute.xlu1 %762 }
 0x1c7   : > { %v777_v23 = vsel %vm772_vm2, %v761_v47, %v763_v15  ;;  %v778_v58 = vsel %vm772_vm2, %v763_v15, %v765_v41 }
 0x1c8   : > { %1210 = vmatprep.subr.bf16.mxu1 %v777_v23 }
 0x1c9   : > { %1211 = vmatpush1.bf16.msra.mxu1 %v776_v53 }
 0x1ca   : > { %v895_v24 = vpop.permute.xlu0 %894  ;;  %v807_v26 = vpop.permute.xlu1 %806 }
 0x1cb   : > { %v821_v28 = vsel %vm816_vm4, %v805_v1, %v807_v26  ;;  %v822_v61 = vsel %vm816_vm4, %v807_v26, %v809_v17 }
 0x1cc   : > { %1212 = vmatprep.subr.bf16.mxu1 %v821_v28 }
 0x1cd   : > { %1213 = vmatpush1.bf16.msra.mxu1 %v820_v29 }
 0x1ce   : > { %v936_v35 = vpop.permute.xlu0 %935  ;;  %v850_v39 = vpop.permute.xlu1 %849 }
 0x1cf   : > { %v864_v45 = vsel %vm859_vm6, %v848_v11, %v850_v39  ;;  %v951_v25 = vsel %vm945_vm10, %v936_v35, %v2673_v12  ;;  %v865_v11 = vsel %vm859_vm6, %v850_v39, %v852_v19 }
 0x1d0   : > { %1214 = vmatprep.subr.bf16.mxu1 %v864_v45 }
 0x1d1   : > { %1215 = vmatpush1.bf16.msra.mxu1 %v863_v37 }
 0x1d2   : > { %v979_v8 = vpop.permute.xlu0 %978  ;;  %v893_v49 = vpop.permute.xlu1 %892 }
 0x1d3   : > { %v907_v51 = vsel %vm902_vm8, %v891_v13, %v893_v49  ;;  %v993_v10 = vsel %vm988_vm11, %v2652_v22, %v979_v8  ;;  %v908_v15 = vsel %vm902_vm8, %v893_v49, %v895_v24 }
 0x1d4   : > { %1216 = vmatprep.subr.bf16.mxu1 %v907_v51 }
 0x1d5   : > { %1217 = vmatpush1.bf16.msra.mxu1 %v906_v55 }
 0x1d6   : > { %v1022_v62 = vpop.permute.xlu0 %1021  ;;  %1218 = vmatprep.subr.bf16.mxu1 %v2353_v3  ;;  %v767_v43 = vpop.permute.xlu1 %766  ;;  %v950_v3 = vsel %vm945_vm10, %v2640_v54, %v936_v35 }
 0x1d7   : > { %v779_v57 = vsel %vm772_vm2, %v765_v41, %v767_v43  ;;  %v1037_v54 = vsel %vm1031_vm12, %v1022_v62, %v2682_v34 }
 0x1d8   : > { %1253 = vmatprep.subr.bf16.mxu0 %v779_v57 }
 0x1d9   : > { %1219 = vmatpush1.bf16.msra.mxu1 %v2348_v63  ;;  %1254 = vmatpush1.bf16.msra.mxu0 %v778_v58  ;;  %v994_v63 = vsel %vm988_vm11, %v979_v8, %v2677_v14 }
 0x1da   : > { %v1065_v16 = vpop.permute.xlu0 %1064  ;;  %1220 = vmatprep.subr.bf16.mxu1 %v951_v25  ;;  %v811_v47 = vpop.permute.xlu1 %810 }
 0x1db   : > { %v823_v21 = vsel %vm816_vm4, %v809_v17, %v811_v47  ;;  %v1036_v17 = vsel %vm1031_vm12, %v2659_v59, %v1022_v62  ;;  %v1080_v22 = vsel %vm1074_vm13, %v1065_v16, %v2684_v18  ;;  %v1079_v53 = vsel %vm1074_vm13, %v2667_v2, %v1065_v16 }
 0x1dc   : > { %1255 = vmatprep.subr.bf16.mxu0 %v823_v21 }
 0x1dd   : > { %1221 = vmatpush1.bf16.msra.mxu1 %v950_v3  ;;  %1256 = vmatpush1.bf16.msra.mxu0 %v822_v61 }
 0x1de   : > { %v940_v27 = vpop.permute.xlu0 %939  ;;  %1222 = vmatprep.subr.bf16.mxu1 %v994_v63  ;;  %v854_v1 = vpop.permute.xlu1 %853 }
 0x1df   : > { %v866_v7 = vsel %vm859_vm6, %v852_v19, %v854_v1  ;;  %v952_v28 = vsel %vm945_vm10, %v2673_v12, %v940_v27 }
 0x1e0   : > { %1257 = vmatprep.subr.bf16.mxu0 %v866_v7 }
 0x1e1   : > { %1223 = vmatpush1.bf16.msra.mxu1 %v993_v10  ;;  %1258 = vmatpush1.bf16.msra.mxu0 %v865_v11 }
 0x1e2   : > { %v983_v42 = vpop.permute.xlu0 %982  ;;  %1224 = vmatprep.subr.bf16.mxu1 %v1037_v54  ;;  %v897_v13 = vpop.permute.xlu1 %896 }
 0x1e3   : > { %v909_v41 = vsel %vm902_vm8, %v895_v24, %v897_v13  ;;  %v995_v39 = vsel %vm988_vm11, %v2677_v14, %v983_v42 }
 0x1e4   : > { %1259 = vmatprep.subr.bf16.mxu0 %v909_v41 }
 0x1e5   : > { %1225 = vmatpush1.bf16.msra.mxu1 %v1036_v17  ;;  %1260 = vmatpush1.bf16.msra.mxu0 %v908_v15 }
 0x1e6   : > { %v769_v19 = vpop.permute.xlu0 %768  ;;  %1226 = vmatprep.subr.bf16.mxu1 %v1080_v22  ;;  %1261 = vmatprep.subr.bf16.mxu0 %v2355_v5  ;;  %v942_v23 = vpop.permute.xlu1 %941 }
 0x1e7   : > { %v953_v59 = vsel %vm945_vm10, %v940_v27, %v942_v23  ;;  %v780_v35 = vsel %vm772_vm2, %v767_v43, %v769_v19 }
 0x1e9   : > { %1227 = vmatpush1.bf16.msra.mxu1 %v1079_v53  ;;  %1262 = vmatpush1.bf16.msra.mxu0 %v2350_v0 }
 0x1ea   : > { %v813_v26 = vpop.permute.xlu0 %812  ;;  %1263 = vmatprep.subr.bf16.mxu0 %v953_v59  ;;  %v985_v24 = vpop.permute.xlu1 %984 }
 0x1eb   : > { %v996_v5 = vsel %vm988_vm11, %v983_v42, %v985_v24  ;;  %v824_v8 = vsel %vm816_vm4, %v811_v47, %v813_v26 }
 0x1ec   : > { %1243 = vmatmul.mubr.bf16.vlgmr.msra.gmra.mrb[12].mxu1 %v2650_v48 }
 0x1ed   : > { %1264 = vmatpush1.bf16.msra.mxu0 %v952_v28  ;;  %2077 = vmatprep.mubr.msk.bf16.mxu1 %vm1120_vm1, %v2423_v20 }
 0x1ee   : > { %v856_v2 = vpop.permute.xlu0 %855  ;;  %1265 = vmatprep.subr.bf16.mxu0 %v996_v5  ;;  %v771_v29 = vpop.permute.xlu1 %770 }
 0x1ef   : > { %v781_v0 = vsel %vm772_vm2, %v769_v19, %v771_v29  ;;  %v867_v55 = vsel %vm859_vm6, %v854_v1, %v856_v2 }
 0x1f0   : > { %1296 = vmatprep.subr.bf16.mxu1 %v781_v0 }
 0x1f1   : > { %1266 = vmatpush1.bf16.msra.mxu0 %v995_v39  ;;  %1297 = vmatpush1.bf16.msra.mxu1 %v780_v35 }
 0x1f2   : > { %v899_v12 = vpop.permute.xlu0 %898  ;;  %v815_v45 = vpop.permute.xlu1 %814 }
 0x1f3   : > { %v825_v37 = vsel %vm816_vm4, %v813_v26, %v815_v45  ;;  %v910_v57 = vsel %vm902_vm8, %v897_v13, %v899_v12 }
 0x1f4   : > { %1298 = vmatprep.subr.bf16.mxu1 %v825_v37 }
 0x1f5   : > { %1299 = vmatpush1.bf16.msra.mxu1 %v824_v8 }
 0x1f6   : > { %v1026_v20 = vpop.permute.xlu0 %1025  ;;  %v858_v49 = vpop.permute.xlu1 %857 }
 0x1f7   : > { %v868_v51 = vsel %vm859_vm6, %v856_v2, %v858_v49  ;;  %v1038_v16 = vsel %vm1031_vm12, %v2682_v34, %v1026_v20 }
 0x1f8   : > { %1300 = vmatprep.subr.bf16.mxu1 %v868_v51 }
 0x1f9   : > { %1301 = vmatpush1.bf16.msra.mxu1 %v867_v55 }
 0x1fa   : > { %v901_v62 = vpop.permute.xlu1 %900  ;;  %v1069_v14 = vpop.permute.xlu0 %1068 }
 0x1fb   : > { %v911_v43 = vsel %vm902_vm8, %v899_v12, %v901_v62  ;;  %v1081_v61 = vsel %vm1074_vm13, %v2684_v18, %v1069_v14 }
 0x1fc   : > { %1302 = vmatprep.subr.bf16.mxu1 %v911_v43 }
 0x1fd   : > { %1303 = vmatpush1.bf16.msra.mxu1 %v910_v57 }
 0x1fe   : > { %1304 = vmatprep.subr.bf16.mxu1 %v2382_v38  ;;  %v1028_v58 = vpop.permute.xlu1 %1027  ;;  %v944_v47 = vpop.permute.xlu0 %943 }
 0x1ff   : > { %v1039_v25 = vsel %vm1031_vm12, %v1026_v20, %v1028_v58  ;;  %v954_v38 = vsel %vm945_vm10, %v942_v23, %v944_v47 }
 0x200   : > { %1267 = vmatprep.subr.bf16.mxu0 %v1039_v25 }
 0x201   : > { %1268 = vmatpush1.bf16.msra.mxu0 %v1038_v16  ;;  %1305 = vmatpush1.bf16.msra.mxu1 %v2380_v36 }
 0x202   : > { %2073 = vmatprep.subr.msk.bf16.mxu1 %vm945_vm10, %v944_v47  ;;  %v1071_v21 = vpop.permute.xlu1 %1070  ;;  %v1030_v36 = vpop.permute.xlu0 %1029 }
 0x203   : > { %v1082_v3 = vsel %vm1074_vm13, %v1069_v14, %v1071_v21  ;;  %v1040_v27 = vsel %vm1031_vm12, %v1028_v58, %v1030_v36 }
 0x204   : > { %1269 = vmatprep.subr.bf16.mxu0 %v1082_v3 }
 0x205   : > { %1270 = vmatpush1.bf16.msra.mxu0 %v1081_v61  ;;  %1307 = vmatpush1.bf16.msra.mxu1 %v954_v38 }
 0x206   : > { %v987_v63 = vpop.permute.xlu1 %986 }
 0x207   : > { %v997_v34 = vsel %vm988_vm11, %v985_v24, %v987_v63  ;;  %2074 = vmatprep.subr.msk.bf16.mxu1 %vm988_vm11, %v987_v63 }
 0x208   : > { %1286 = vmatmul.mubr.bf16.vlgmr.msra.gmra.mrb[16].mxu0 %v2650_v48 }
 0x209   : > { %1309 = vmatpush1.bf16.msra.mxu1 %v997_v34 }
 0x20a   : > { %2075 = vmatprep.subr.msk.bf16.mxu1 %vm1031_vm12, %v1030_v36  ;;  %v1073_v1 = vpop.permute.xlu1 %1072 }
 0x20b   : > { %v1083_v18 = vsel %vm1074_vm13, %v1071_v21, %v1073_v1 }
 0x20d   : > { %1311 = vmatpush1.bf16.msra.mxu1 %v1040_v27 }
 0x20e   : > { %2076 = vmatprep.subr.msk.bf16.mxu1 %vm1074_vm13, %v1073_v1 }
 0x211   : > { %1313 = vmatpush1.bf16.msra.mxu1 %v1083_v18 }
 0x213   : > { %v2761_v7 = vpop.permute.xlu0 %1103 }
 0x214   : > { %1329 = vmatmul.mubr.bf16.vlgmr.msra.gmra.mrb[16].mxu1 %v2650_v48 }
 0x21b   : > { %v2763_v11 = vpop.permute.xlu1 %1108 }
 0x280   : > { %v1158_v10 = vpop.f32.mrb[8].mxu1 }
 0x281   : > { %v1159_v54 = vadd.f32 %v1158_v10, %v2761_v7  ;;  %v1160_v42 = vpop.f32.mrb[9].mxu1 }
 0x282   : > { %v1161_v13 = vadd.f32 %v1160_v42, %v2761_v7  ;;  %v1162_v41 = vpop.f32.mrb[10].mxu1 }
 0x283   : > { %v1339_v17 = vmax.f32 %v1159_v54, 0.0  ;;  %v1163_v15 = vadd.f32 %v1162_v41, %v2763_v11  ;;  %v1164_v22 = vpop.f32.mrb[11].mxu1 }
 0x284   : > { %v1340_v19 = vmax.f32 %v1161_v13, 0.0  ;;  %v1165_v23 = vadd.f32 %v1164_v22, %v2763_v11 }
 0x285   : > { %v1349_v53 = vmax.f32 %v1163_v15, 0.0  ;;  %v1359_v59 = vmul.f32 %v1339_v17, %v2284_v40 }
 0x286   : > { %v1350_v48 = vmax.f32 %v1165_v23, 0.0  ;;  %v1360_v24 = vmul.f32 %v1340_v19, %v2292_v46 }
 0x287   : > { %v1369_v26 = vmul.f32 %v1349_v53, %v2284_v40 }
 0x288   : > { %v1370_v28 = vmul.f32 %v1350_v48, %v2292_v46 }
 0x289   : > { %v2773_v5 = vpack.c.bf16 %v1369_v26, %v1359_v59 }
 0x28a   : > { %v2775_v2 = vpack.c.bf16 %v1370_v28, %v1360_v24 }
 0x28b   : > { %1399 = vrot.lane.b32.xlu0 %v2773_v5, %s2163_s16 }
 0x28f   : > { %1440 = vrot.lane.b32.xlu0 %v2773_v5, %s2162_s15  ;;  %v1201_v29 = vpop.f32.mrb[12].mxu0 }
 0x290   : > { %v1202_v0 = vadd.f32 %v1201_v29, %v2761_v7  ;;  %v1203_v35 = vpop.f32.mrb[13].mxu0 }
 0x291   : > { %v1204_v40 = vadd.f32 %v1203_v35, %v2761_v7  ;;  %v1205_v39 = vpop.f32.mrb[14].mxu0 }
 0x292   : > { %v1341_v12 = vmax.f32 %v1202_v0, 0.0  ;;  %v1206_v46 = vadd.f32 %v1205_v39, %v2763_v11  ;;  %v1207_v45 = vpop.f32.mrb[15].mxu0 }
 0x293   : > { %v1342_v37 = vmax.f32 %v1204_v40, 0.0  ;;  %v1208_v8 = vadd.f32 %v1207_v45, %v2763_v11  ;;  %1481 = vrot.lane.b32.xlu0 %v2773_v5, %s2164_s17 }
 0x294   : > { %v1351_v20 = vmax.f32 %v1206_v46, 0.0  ;;  %v1361_v51 = vmul.f32 %v1341_v12, %v2288_v44 }
 0x295   : > { %v1352_v49 = vmax.f32 %v1208_v8, 0.0  ;;  %v1362_v62 = vmul.f32 %v1342_v37, %v2296_v50 }
 0x296   : > { %v1371_v55 = vmul.f32 %v1351_v20, %v2288_v44 }
 0x297   : > { %v1372_v14 = vmul.f32 %v1352_v49, %v2296_v50  ;;  %1522 = vrot.lane.b32.xlu0 %v2773_v5, %s2166_s21 }
 0x298   : > { %v2793_v43 = vpack.c.bf16 %v1371_v55, %v1361_v51 }
 0x299   : > { %v2795_v57 = vpack.c.bf16 %v1372_v14, %v1362_v62 }
 0x29a   : > { %1567 = vrot.lane.b32.xlu1 %v2793_v43, %s2165_s18 }
 0x29b   : > { %1563 = vrot.lane.b32.xlu0 %v2773_v5, %s2165_s18 }
 0x29e   : > { %1604 = vrot.lane.b32.xlu1 %v2773_v5, %s2167_s22 }
 0x29f   : > { %1608 = vrot.lane.b32.xlu0 %v2793_v43, %s2167_s22 }
 0x2a2   : > { %1649 = vrot.lane.b32.xlu1 %v2793_v43, %s2168_s23 }
 0x2a3   : > { %1645 = vrot.lane.b32.xlu0 %v2773_v5, %s2168_s23 }
 0x2a6   : > { %1686 = vrot.lane.b32.xlu1 %v2773_v5, %s2169_s26 }
 0x2a7   : > { %1690 = vrot.lane.b32.xlu0 %v2793_v43, %s2169_s26 }
 0x2aa   : > { %1401 = vrot.lane.b32.xlu1 %v2775_v2, %s2163_s16 }
 0x2ab   : > { %1403 = vrot.lane.b32.xlu0 %v2793_v43, %s2163_s16 }
 0x2ae   : > { %1442 = vrot.lane.b32.xlu1 %v2775_v2, %s2162_s15 }
 0x2af   : > { %1444 = vrot.lane.b32.xlu0 %v2793_v43, %s2162_s15 }
 0x2b2   : > { %1483 = vrot.lane.b32.xlu1 %v2775_v2, %s2164_s17 }
 0x2b3   : > { %1485 = vrot.lane.b32.xlu0 %v2793_v43, %s2164_s17 }
 0x2b6   : > { %1524 = vrot.lane.b32.xlu1 %v2775_v2, %s2166_s21 }
 0x2b7   : > { %1526 = vrot.lane.b32.xlu0 %v2793_v43, %s2166_s21 }
 0x2ba   : > { %1606 = vrot.lane.b32.xlu1 %v2775_v2, %s2167_s22 }
 0x2bb   : > { %1565 = vrot.lane.b32.xlu0 %v2775_v2, %s2165_s18 }
 0x2be   : > { %1688 = vrot.lane.b32.xlu1 %v2775_v2, %s2169_s26 }
 0x2bf   : > { %1647 = vrot.lane.b32.xlu0 %v2775_v2, %s2168_s23  ;;  %v1244_v44 = vpop.f32.mrb[12].mxu1 }
 0x2c0   : > { %v1245_v50 = vadd.f32 %v1244_v44, %v2761_v7  ;;  %v1246_v58 = vpop.f32.mrb[13].mxu1 }
 0x2c1   : > { %v1247_v25 = vadd.f32 %v1246_v58, %v2761_v7  ;;  %v1248_v16 = vpop.f32.mrb[14].mxu1 }
 0x2c2   : > { %v1343_v47 = vmax.f32 %v1245_v50, 0.0  ;;  %v1249_v21 = vadd.f32 %v1248_v16, %v2763_v11  ;;  %v1250_v3 = vpop.f32.mrb[15].mxu1  ;;  %1405 = vrot.lane.b32.xlu1 %v2795_v57, %s2163_s16 }
 0x2c3   : > { %v1344_v61 = vmax.f32 %v1247_v25, 0.0  ;;  %v1251_v38 = vadd.f32 %v1250_v3, %v2763_v11  ;;  %1569 = vrot.lane.b32.xlu0 %v2795_v57, %s2165_s18 }
 0x2c4   : > { %v1353_v63 = vmax.f32 %v1249_v21, 0.0  ;;  %v1363_v36 = vmul.f32 %v1343_v47, %v2303_v4 }
 0x2c5   : > { %v1354_v34 = vmax.f32 %v1251_v38, 0.0  ;;  %v1364_v1 = vmul.f32 %v1344_v61, %v2270_v31 }
 0x2c6   : > { %v1373_v27 = vmul.f32 %v1353_v63, %v2303_v4  ;;  %1446 = vrot.lane.b32.xlu1 %v2795_v57, %s2162_s15 }
 0x2c7   : > { %v1374_v18 = vmul.f32 %v1354_v34, %v2270_v31  ;;  %1610 = vrot.lane.b32.xlu0 %v2795_v57, %s2167_s22 }
 0x2c8   : > { %v2853_v10 = vpack.c.bf16 %v1373_v27, %v1363_v36 }
 0x2c9   : > { %v2855_v54 = vpack.c.bf16 %v1374_v18, %v1364_v1 }
 0x2ca   : > { %1487 = vrot.lane.b32.xlu1 %v2795_v57, %s2164_s17 }
 0x2cb   : > { %1651 = vrot.lane.b32.xlu0 %v2795_v57, %s2168_s23 }
 0x2ce   : > { %1528 = vrot.lane.b32.xlu1 %v2795_v57, %s2166_s21 }
 0x2cf   : > { %1692 = vrot.lane.b32.xlu0 %v2795_v57, %s2169_s26 }
 0x2d2   : > { %1571 = vrot.lane.b32.xlu1 %v2853_v10, %s2165_s18 }
 0x2d3   : > { %1407 = vrot.lane.b32.xlu0 %v2853_v10, %s2163_s16 }
 0x2d7   : > { %1448 = vrot.lane.b32.xlu0 %v2853_v10, %s2162_s15 }
 0x2db   : > { %1489 = vrot.lane.b32.xlu0 %v2853_v10, %s2164_s17  ;;  %v1287_v31 = vpop.f32.mrb[16].mxu0 }
 0x2dc   : > { %v1288_v4 = vadd.f32 %v1287_v31, %v2761_v7  ;;  %v1289_v42 = vpop.f32.mrb[17].mxu0 }
 0x2dd   : > { %v1290_v13 = vadd.f32 %v1289_v42, %v2761_v7  ;;  %v1291_v41 = vpop.f32.mrb[18].mxu0 }
 0x2de   : > { %v1345_v17 = vmax.f32 %v1288_v4, 0.0  ;;  %v1292_v15 = vadd.f32 %v1291_v41, %v2763_v11  ;;  %v1293_v22 = vpop.f32.mrb[19].mxu0 }
 0x2df   : > { %v1346_v19 = vmax.f32 %v1290_v13, 0.0  ;;  %v1294_v23 = vadd.f32 %v1293_v22, %v2763_v11  ;;  %1530 = vrot.lane.b32.xlu0 %v2853_v10, %s2166_s21 }
 0x2e0   : > { %v1355_v53 = vmax.f32 %v1292_v15, 0.0  ;;  %v1365_v59 = vmul.f32 %v1345_v17, %v2268_v30 }
 0x2e1   : > { %v1356_v48 = vmax.f32 %v1294_v23, 0.0  ;;  %v1366_v24 = vmul.f32 %v1346_v19, %v2272_v32 }
 0x2e2   : > { %v1375_v26 = vmul.f32 %v1355_v53, %v2268_v30 }
 0x2e3   : > { %v1376_v28 = vmul.f32 %v1356_v48, %v2272_v32 }
 0x2e4   : > { %v2883_v29 = vpack.c.bf16 %v1375_v26, %v1365_v59 }
 0x2e5   : > { %v2885_v0 = vpack.c.bf16 %v1376_v28, %v1366_v24 }
 0x2e6   : > { %1575 = vrot.lane.b32.xlu1 %v2883_v29, %s2165_s18  ;;  %1411 = vrot.lane.b32.xlu0 %v2883_v29, %s2163_s16 }
 0x2e7   : > { %v1330_v35 = vpop.f32.mrb[16].mxu1 }
 0x2e8   : > { %v1331_v40 = vadd.f32 %v1330_v35, %v2761_v7  ;;  %v1332_v39 = vpop.f32.mrb[17].mxu1 }
 0x2e9   : > { %v1333_v30 = vadd.f32 %v1332_v39, %v2761_v7  ;;  %v1334_v12 = vpop.f32.mrb[18].mxu1 }
 0x2ea   : > { %v1347_v46 = vmax.f32 %v1331_v40, 0.0  ;;  %v1335_v32 = vadd.f32 %v1334_v12, %v2763_v11  ;;  %v1336_v45 = vpop.f32.mrb[19].mxu1  ;;  %1612 = vrot.lane.b32.xlu1 %v2853_v10, %s2167_s22  ;;  %1452 = vrot.lane.b32.xlu0 %v2883_v29, %s2162_s15 }
 0x2eb   : > { %v1348_v37 = vmax.f32 %v1333_v30, 0.0  ;;  %v1337_v8 = vadd.f32 %v1336_v45, %v2763_v11  ;;  %v2912_v11 = vld.sshfl [vmem:[%s3202_s6] sm:$0x33 pattern:$0x76325410] }
 0x2ec   : > { %v1357_v20 = vmax.f32 %v1335_v32, 0.0  ;;  %v1367_v51 = vmul.f32 %v1347_v46, %v2360_v9 }
 0x2ed   : > { %v1358_v49 = vmax.f32 %v1337_v8, 0.0  ;;  %v1368_v55 = vmul.f32 %v1348_v37, %v2369_v33 }
 0x2ee   : > { %v1377_v7 = vmul.f32 %v1357_v20, %v2360_v9  ;;  %1616 = vrot.lane.b32.xlu1 %v2883_v29, %s2167_s22  ;;  %1493 = vrot.lane.b32.xlu0 %v2883_v29, %s2164_s17  ;;  %v2918_v9 = vcombine.high %v2912_v11, %v2912_v11 }
 0x2ef   : > { %v1378_v62 = vmul.f32 %v1358_v49, %v2369_v33 }
 0x2f0   : > { %v2907_v14 = vpack.c.bf16 %v1377_v7, %v1367_v51  ;;  %2087 = vmatprep.mubr.msk.bf16.mxu0 %vm1120_vm1, %v2918_v9  ;;  %2088 = vmatprep.mubr.msk.bf16.mxu1 %vm1120_vm1, %v2918_v9 }
 0x2f1   : > { %v2914_v44 = vpack.c.bf16 %v1378_v62, %v1368_v55 }
 0x2f2   : > { %1653 = vrot.lane.b32.xlu1 %v2853_v10, %s2168_s23  ;;  %1534 = vrot.lane.b32.xlu0 %v2883_v29, %s2166_s21 }
 0x2f6   : > { %1657 = vrot.lane.b32.xlu1 %v2883_v29, %s2168_s23  ;;  %1573 = vrot.lane.b32.xlu0 %v2855_v54, %s2165_s18 }
 0x2fa   : > { %1694 = vrot.lane.b32.xlu1 %v2853_v10, %s2169_s26  ;;  %1614 = vrot.lane.b32.xlu0 %v2855_v54, %s2167_s22 }
 0x2fd   : > { %v1400_v33 = vpop.permute.xlu0 %1399 }
 0x2fe   : > { %1409 = vrot.lane.b32.xlu1 %v2855_v54, %s2163_s16  ;;  %1655 = vrot.lane.b32.xlu0 %v2855_v54, %s2168_s23 }
 0x301   : > { %v1441_v50 = vpop.permute.xlu0 %1440 }
 0x302   : > { %1450 = vrot.lane.b32.xlu1 %v2855_v54, %s2162_s15  ;;  %1696 = vrot.lane.b32.xlu0 %v2855_v54, %s2169_s26 }
 0x305   : > { %v1482_v58 = vpop.permute.xlu0 %1481 }
 0x306   : > { %1491 = vrot.lane.b32.xlu1 %v2855_v54, %s2164_s17  ;;  %1577 = vrot.lane.b32.xlu0 %v2885_v0, %s2165_s18 }
 0x309   : > { %v1523_v25 = vpop.permute.xlu0 %1522 }
 0x30a   : > { %1532 = vrot.lane.b32.xlu1 %v2855_v54, %s2166_s21  ;;  %1415 = vrot.lane.b32.xlu0 %v2907_v14, %s2163_s16 }
 0x30c   : > { %v2952_v16 = vpop.permute.xlu1 %1567 }
 0x30d   : > { %v1564_v47 = vpop.permute.xlu0 %1563 }
 0x30e   : > { %1698 = vrot.lane.b32.xlu1 %v2883_v29, %s2169_s26  ;;  %1456 = vrot.lane.b32.xlu0 %v2907_v14, %s2162_s15 }
 0x310   : > { %v1605_v21 = vpop.permute.xlu1 %1604 }
 0x311   : > { %v2958_v3 = vpop.permute.xlu0 %1608 }
 0x312   : > { %1413 = vrot.lane.b32.xlu1 %v2885_v0, %s2163_s16  ;;  %1497 = vrot.lane.b32.xlu0 %v2907_v14, %s2164_s17 }
 0x314   : > { %v2964_v61 = vpop.permute.xlu1 %1649 }
 0x315   : > { %v2966_v38 = vpop.permute.xlu0 %1645 }
 0x316   : > { %1454 = vrot.lane.b32.xlu1 %v2885_v0, %s2162_s15  ;;  %1538 = vrot.lane.b32.xlu0 %v2907_v14, %s2166_s21 }
 0x318   : > { %v2972_v63 = vpop.permute.xlu1 %1686 }
 0x319   : > { %v2974_v34 = vpop.permute.xlu0 %1690 }
 0x31a   : > { %1495 = vrot.lane.b32.xlu1 %v2885_v0, %s2164_s17  ;;  %1620 = vrot.lane.b32.xlu0 %v2907_v14, %s2167_s22 }
 0x31c   : > { %v1402_v36 = vpop.permute.xlu1 %1401 }
 0x31d   : > { %v1404_v27 = vpop.permute.xlu0 %1403  ;;  %v1419_v1 = vsel %vm772_vm2, %v1400_v33, %v1402_v36 }
 0x31e   : > { %1536 = vrot.lane.b32.xlu1 %v2885_v0, %s2166_s21  ;;  %1581 = vrot.lane.b32.xlu0 %v2914_v44, %s2165_s18  ;;  %v1420_v59 = vsel %vm772_vm2, %v1402_v36, %v1404_v27 }
 0x31f   : > { %1741 = vmatprep.subr.bf16.mxu0 %v1419_v1 }
 0x320   : > { %2080 = vmatpush1.bf16.msk.msra.mxu0 %vm2543_vm3, %v1400_v33  ;;  %v1443_v18 = vpop.permute.xlu1 %1442 }
 0x321   : > { %v1445_v31 = vpop.permute.xlu0 %1444  ;;  %v1460_v4 = vsel %vm816_vm4, %v1441_v50, %v1443_v18 }
 0x322   : > { %1417 = vrot.lane.b32.xlu1 %v2914_v44, %s2163_s16  ;;  %1659 = vrot.lane.b32.xlu0 %v2885_v0, %s2168_s23  ;;  %v1461_v39 = vsel %vm816_vm4, %v1443_v18, %v1445_v31 }
 0x323   : > { %1743 = vmatprep.subr.bf16.mxu0 %v1460_v4 }
 0x324   : > { %2082 = vmatpush1.bf16.msk.msra.mxu0 %vm2557_vm5, %v1441_v50  ;;  %v1484_v42 = vpop.permute.xlu1 %1483 }
 0x325   : > { %v1486_v13 = vpop.permute.xlu0 %1485  ;;  %v1501_v41 = vsel %vm859_vm6, %v1482_v58, %v1484_v42 }
 0x326   : > { %1458 = vrot.lane.b32.xlu1 %v2914_v44, %s2162_s15  ;;  %1663 = vrot.lane.b32.xlu0 %v2914_v44, %s2168_s23  ;;  %v1502_v37 = vsel %vm859_vm6, %v1484_v42, %v1486_v13 }
 0x327   : > { %1745 = vmatprep.subr.bf16.mxu0 %v1501_v41 }
 0x328   : > { %2084 = vmatpush1.bf16.msk.msra.mxu0 %vm2569_vm7, %v1482_v58  ;;  %v1525_v52 = vpop.permute.xlu1 %1524 }
 0x329   : > { %v1527_v17 = vpop.permute.xlu0 %1526  ;;  %v1542_v15 = vsel %vm902_vm8, %v1523_v25, %v1525_v52 }
 0x32a   : > { %1499 = vrot.lane.b32.xlu1 %v2914_v44, %s2164_s17  ;;  %1702 = vrot.lane.b32.xlu0 %v2907_v14, %s2169_s26  ;;  %v1543_v7 = vsel %vm902_vm8, %v1525_v52, %v1527_v17  ;;  %s278_s17 = scalar_lea.vmem %s3203_s7, %s2099_s14 }
 0x32b   : > { %1747 = vmatprep.subr.bf16.mxu0 %v1542_v15 }
 0x32c   : > { %2086 = vmatpush1.bf16.msk.msra.mxu0 %vm2586_vm9, %v1523_v25  ;;  %v1607_v56 = vpop.permute.xlu1 %1606 }
 0x32d   : > { %1749 = vmatprep.subr.bf16.mxu0 %v2775_v2  ;;  %v1566_v22 = vpop.permute.xlu0 %1565  ;;  %v1625_v2 = vsel %vm988_vm11, %v1607_v56, %v2958_v3  ;;  %v1624_v26 = vsel %vm988_vm11, %v1605_v21, %v1607_v56 }
 0x32e   : > { %1540 = vrot.lane.b32.xlu1 %v2914_v44, %s2166_s21  ;;  %v1584_v19 = vsel %vm945_vm10, %v1566_v22, %v2952_v16  ;;  %v1583_v6 = vsel %vm945_vm10, %v1564_v47, %v1566_v22 }
 0x330   : > { %1750 = vmatpush1.bf16.msra.mxu0 %v2773_v5  ;;  %v1689_v60 = vpop.permute.xlu1 %1688 }
 0x331   : > { %1751 = vmatprep.subr.bf16.mxu0 %v1584_v19  ;;  %v1648_v23 = vpop.permute.xlu0 %1647  ;;  %v1707_v46 = vsel %vm1074_vm13, %v1689_v60, %v2974_v34  ;;  %v1706_v8 = vsel %vm1074_vm13, %v2972_v63, %v1689_v60 }
 0x332   : > { %1579 = vrot.lane.b32.xlu1 %v2907_v14, %s2165_s18  ;;  %v1666_v28 = vsel %vm1031_vm12, %v1648_v23, %v2964_v61  ;;  %v1665_v30 = vsel %vm1031_vm12, %v2966_v38, %v1648_v23 }
 0x334   : > { %1752 = vmatpush1.bf16.msra.mxu0 %v1583_v6  ;;  %v3017_v53 = vpop.permute.xlu1 %1405 }
 0x335   : > { %1753 = vmatprep.subr.bf16.mxu0 %v1625_v2  ;;  %v1570_v48 = vpop.permute.xlu0 %1569  ;;  %v1421_v5 = vsel %vm772_vm2, %v1404_v27, %v3017_v53 }
 0x336   : > { %1618 = vrot.lane.b32.xlu1 %v2885_v0, %s2167_s22  ;;  %1782 = vmatprep.subr.bf16.mxu1 %v1421_v5  ;;  %v1585_v58 = vsel %vm945_vm10, %v2952_v16, %v1570_v48 }
 0x337   : > { %1783 = vmatpush1.bf16.msra.mxu1 %v1420_v59 }
 0x338   : > { %1754 = vmatpush1.bf16.msra.mxu0 %v1624_v26  ;;  %v3027_v24 = vpop.permute.xlu1 %1446 }
 0x339   : > { %1755 = vmatprep.subr.bf16.mxu0 %v1666_v28  ;;  %v1611_v35 = vpop.permute.xlu0 %1610  ;;  %v1462_v40 = vsel %vm816_vm4, %v1445_v31, %v3027_v24 }
 0x33a   : > { %1661 = vrot.lane.b32.xlu1 %v2907_v14, %s2168_s23  ;;  %1784 = vmatprep.subr.bf16.mxu1 %v1462_v40  ;;  %v1626_v36 = vsel %vm988_vm11, %v2958_v3, %v1611_v35 }
 0x33b   : > { %1785 = vmatpush1.bf16.msra.mxu1 %v1461_v39 }
 0x33c   : > { %1756 = vmatpush1.bf16.msra.mxu0 %v1665_v30  ;;  %v3038_v12 = vpop.permute.xlu1 %1487 }
 0x33d   : > { %1757 = vmatprep.subr.bf16.mxu0 %v1707_v46  ;;  %v1652_v32 = vpop.permute.xlu0 %1651  ;;  %v1503_v45 = vsel %vm859_vm6, %v1486_v13, %v3038_v12 }
 0x33e   : > { %1622 = vrot.lane.b32.xlu1 %v2914_v44, %s2167_s22  ;;  %1786 = vmatprep.subr.bf16.mxu1 %v1503_v45  ;;  %v1667_v4 = vsel %vm1031_vm12, %v2964_v61, %v1652_v32 }
 0x33f   : > { %1787 = vmatpush1.bf16.msra.mxu1 %v1502_v37 }
 0x340   : > { %1758 = vmatpush1.bf16.msra.mxu0 %v1706_v8  ;;  %v3049_v20 = vpop.permute.xlu1 %1528 }
 0x341   : > { %v1693_v49 = vpop.permute.xlu0 %1692  ;;  %v1544_v51 = vsel %vm902_vm8, %v1527_v17, %v3049_v20 }
 0x342   : > { %1700 = vrot.lane.b32.xlu1 %v2885_v0, %s2169_s26  ;;  %1788 = vmatprep.subr.bf16.mxu1 %v1544_v51  ;;  %v1708_v17 = vsel %vm1074_vm13, %v2974_v34, %v1693_v49 }
 0x343   : > { %1789 = vmatpush1.bf16.msra.mxu1 %v1543_v7  ;;  %1774 = vmatmul.mubr.bf16.vlgmr.msra.gmra.mrb[20].mxu0 %v2912_v11 }
 0x344   : > { %v3057_v55 = vpop.permute.xlu1 %1571  ;;  %1790 = vmatprep.subr.bf16.mxu1 %v2795_v57  ;;  %2089 = vmatprep.mubr.msk.bf16.mxu0 %vm1120_vm1, %v2918_v9 }
 0x345   : > { %v1408_v62 = vpop.permute.xlu0 %1407  ;;  %v1586_v33 = vsel %vm945_vm10, %v1570_v48, %v3057_v55 }
 0x346   : > { %1704 = vrot.lane.b32.xlu1 %v2914_v44, %s2169_s26  ;;  %v1422_v61 = vsel %vm772_vm2, %v3017_v53, %v1408_v62 }
 0x347   : > { %1791 = vmatpush1.bf16.msra.mxu1 %v2793_v43 }
 0x348   : > { %1792 = vmatprep.subr.bf16.mxu1 %v1586_v33 }
 0x349   : > { %v1449_v50 = vpop.permute.xlu0 %1448 }
 0x34a   : > { %v1463_v34 = vsel %vm816_vm4, %v3027_v24, %v1449_v50 }
 0x34b   : > { %1793 = vmatpush1.bf16.msra.mxu1 %v1585_v58 }
 0x34d   : > { %v1490_v25 = vpop.permute.xlu0 %1489 }
 0x34e   : > { %v1504_v2 = vsel %vm859_vm6, %v3038_v12, %v1490_v25 }
 0x351   : > { %v1531_v57 = vpop.permute.xlu0 %1530 }
 0x352   : > { %v1545_v59 = vsel %vm902_vm8, %v3049_v20, %v1531_v57 }
 0x358   : > { %v3069_v47 = vpop.permute.xlu1 %1575  ;;  %v1412_v21 = vpop.permute.xlu0 %1411 }
 0x35c   : > { %v3071_v38 = vpop.permute.xlu1 %1612  ;;  %v3073_v63 = vpop.permute.xlu0 %1452 }
 0x35d   : > { %v1627_v43 = vsel %vm988_vm11, %v1611_v35, %v3071_v38 }
 0x35e   : > { %1794 = vmatprep.subr.bf16.mxu1 %v1627_v43 }
 0x35f   : > { %1795 = vmatpush1.bf16.msra.mxu1 %v1626_v36 }
 0x360   : > { %v3079_v27 = vpop.permute.xlu1 %1616  ;;  %v3081_v16 = vpop.permute.xlu0 %1493 }
 0x364   : > { %v3083_v1 = vpop.permute.xlu1 %1653  ;;  %v3085_v18 = vpop.permute.xlu0 %1534 }
 0x365   : > { %v1668_v31 = vsel %vm1031_vm12, %v1652_v32, %v3083_v1 }
 0x366   : > { %1796 = vmatprep.subr.bf16.mxu1 %v1668_v31 }
 0x367   : > { %1797 = vmatpush1.bf16.msra.mxu1 %v1667_v4 }
 0x368   : > { %v3091_v42 = vpop.permute.xlu1 %1657  ;;  %v1574_v3 = vpop.permute.xlu0 %1573 }
 0x369   : > { %v1588_v28 = vsel %vm945_vm10, %v1574_v3, %v3069_v47  ;;  %v1587_v30 = vsel %vm945_vm10, %v3057_v55, %v1574_v3 }
 0x36c   : > { %v3093_v13 = vpop.permute.xlu1 %1694  ;;  %v1615_v41 = vpop.permute.xlu0 %1614 }
 0x36d   : > { %v1709_v52 = vsel %vm1074_vm13, %v1693_v49, %v3093_v13  ;;  %v1628_v32 = vsel %vm988_vm11, %v3071_v38, %v1615_v41 }
 0x36e   : > { %1798 = vmatprep.subr.bf16.mxu1 %v1709_v52 }
 0x36f   : > { %1799 = vmatpush1.bf16.msra.mxu1 %v1708_v17 }
 0x370   : > { %v1410_v15 = vpop.permute.xlu1 %1409  ;;  %v1656_v22 = vpop.permute.xlu0 %1655 }
 0x371   : > { %v1423_v56 = vsel %vm772_vm2, %v1408_v62, %v1410_v15  ;;  %v1424_v12 = vsel %vm772_vm2, %v1410_v15, %v1412_v21  ;;  %v1670_v8 = vsel %vm1031_vm12, %v1656_v22, %v3091_v42  ;;  %v1669_v51 = vsel %vm1031_vm12, %v3083_v1, %v1656_v22 }
 0x372   : > { %1823 = vmatprep.subr.bf16.mxu0 %v1423_v56  ;;  %1815 = vmatmul.mubr.bf16.vlgmr.msra.gmra.mrb[20].mxu1 %v2912_v11 }
 0x373   : > { %1824 = vmatpush1.bf16.msra.mxu0 %v1422_v61  ;;  %2090 = vmatprep.mubr.msk.bf16.mxu1 %vm1120_vm1, %v2918_v9 }
 0x374   : > { %v1451_v60 = vpop.permute.xlu1 %1450  ;;  %v1697_v23 = vpop.permute.xlu0 %1696 }
 0x375   : > { %v1464_v19 = vsel %vm816_vm4, %v1449_v50, %v1451_v60  ;;  %v1465_v45 = vsel %vm816_vm4, %v1451_v60, %v3073_v63  ;;  %v1710_v58 = vsel %vm1074_vm13, %v3093_v13, %v1697_v23 }
 0x376   : > { %1825 = vmatprep.subr.bf16.mxu0 %v1464_v19 }
 0x377   : > { %1826 = vmatpush1.bf16.msra.mxu0 %v1463_v34 }
 0x378   : > { %v1492_v6 = vpop.permute.xlu1 %1491  ;;  %v3114_v26 = vpop.permute.xlu0 %1577 }
 0x379   : > { %v1505_v53 = vsel %vm859_vm6, %v1490_v25, %v1492_v6  ;;  %v1506_v7 = vsel %vm859_vm6, %v1492_v6, %v3081_v16  ;;  %v1589_v52 = vsel %vm945_vm10, %v3069_v47, %v3114_v26 }
 0x37a   : > { %1827 = vmatprep.subr.bf16.mxu0 %v1505_v53 }
 0x37b   : > { %1828 = vmatpush1.bf16.msra.mxu0 %v1504_v2 }
 0x37c   : > { %v1533_v48 = vpop.permute.xlu1 %1532  ;;  %v1416_v35 = vpop.permute.xlu0 %1415 }
 0x37d   : > { %v1546_v5 = vsel %vm902_vm8, %v1531_v57, %v1533_v48  ;;  %v1547_v25 = vsel %vm902_vm8, %v1533_v48, %v3085_v18 }
 0x37e   : > { %1829 = vmatprep.subr.bf16.mxu0 %v1546_v5 }
 0x37f   : > { %1830 = vmatpush1.bf16.msra.mxu0 %v1545_v59 }
 0x380   : > { %v3116_v24 = vpop.permute.xlu1 %1698  ;;  %1831 = vmatprep.subr.bf16.mxu0 %v2855_v54  ;;  %v1629_v54 = vsel %vm988_vm11, %v1615_v41, %v3079_v27  ;;  %v1457_v37 = vpop.permute.xlu0 %1456 }
 0x381   : > { %v1711_v55 = vsel %vm1074_vm13, %v1697_v23, %v3116_v24 }
 0x383   : > { %1832 = vmatpush1.bf16.msra.mxu0 %v2853_v10 }
 0x384   : > { %v1414_v40 = vpop.permute.xlu1 %1413  ;;  %1833 = vmatprep.subr.bf16.mxu0 %v1588_v28  ;;  %v1498_v62 = vpop.permute.xlu0 %1497 }
 0x385   : > { %v1425_v39 = vsel %vm772_vm2, %v1412_v21, %v1414_v40  ;;  %v1426_v38 = vsel %vm772_vm2, %v1414_v40, %v1416_v35 }
 0x386   : > { %1864 = vmatprep.subr.bf16.mxu1 %v1425_v39 }
 0x387   : > { %1834 = vmatpush1.bf16.msra.mxu0 %v1587_v30  ;;  %1865 = vmatpush1.bf16.msra.mxu1 %v1424_v12 }
 0x388   : > { %v1455_v10 = vpop.permute.xlu1 %1454  ;;  %1835 = vmatprep.subr.bf16.mxu0 %v1629_v54 }
 0x389   : > { %v1466_v46 = vsel %vm816_vm4, %v3073_v63, %v1455_v10  ;;  %v1539_v63 = vpop.permute.xlu0 %1538 }
 0x38a   : > { %1866 = vmatprep.subr.bf16.mxu1 %v1466_v46 }
 0x38b   : > { %1836 = vmatpush1.bf16.msra.mxu0 %v1628_v32  ;;  %1867 = vmatpush1.bf16.msra.mxu1 %v1465_v45 }
 0x38c   : > { %v1496_v20 = vpop.permute.xlu1 %1495  ;;  %1837 = vmatprep.subr.bf16.mxu0 %v1670_v8 }
 0x38d   : > { %v1507_v49 = vsel %vm859_vm6, %v3081_v16, %v1496_v20  ;;  %v1467_v16 = vsel %vm816_vm4, %v1455_v10, %v1457_v37  ;;  %v1508_v31 = vsel %vm859_vm6, %v1496_v20, %v1498_v62 }
 0x38e   : > { %1868 = vmatprep.subr.bf16.mxu1 %v1507_v49 }
 0x38f   : > { %1838 = vmatpush1.bf16.msra.mxu0 %v1669_v51  ;;  %1869 = vmatpush1.bf16.msra.mxu1 %v1506_v7 }
 0x390   : > { %v1537_v33 = vpop.permute.xlu1 %1536  ;;  %1839 = vmatprep.subr.bf16.mxu0 %v1711_v55 }
 0x391   : > { %v1548_v50 = vsel %vm902_vm8, %v3085_v18, %v1537_v33  ;;  %v1549_v3 = vsel %vm902_vm8, %v1537_v33, %v1539_v63 }
 0x392   : > { %1870 = vmatprep.subr.bf16.mxu1 %v1548_v50 }
 0x393   : > { %1840 = vmatpush1.bf16.msra.mxu0 %v1710_v58  ;;  %1871 = vmatpush1.bf16.msra.mxu1 %v1547_v25 }
 0x394   : > { %v1418_v57 = vpop.permute.xlu1 %1417  ;;  %1872 = vmatprep.subr.bf16.mxu1 %v2885_v0  ;;  %v1621_v0 = vpop.permute.xlu0 %1620 }
 0x395   : > { %v1427_v21 = vsel %vm772_vm2, %v1416_v35, %v1418_v57 }
 0x396   : > { %1905 = vmatprep.subr.bf16.mxu0 %v1427_v21  ;;  %1856 = vmatmul.mubr.bf16.vlgmr.msra.gmra.mrb[24].mxu0 %v2912_v11 }
 0x397   : > { %1873 = vmatpush1.bf16.msra.mxu1 %v2883_v29  ;;  %1906 = vmatpush1.bf16.msra.mxu0 %v1426_v38 }
 0x398   : > { %v1459_v43 = vpop.permute.xlu1 %1458  ;;  %2095 = vmatprep.mubr.msk.bf16.mxu0 %vm1120_vm1, %v2918_v9  ;;  %v1582_v9 = vpop.permute.xlu0 %1581 }
 0x399   : > { %v1468_v36 = vsel %vm816_vm4, %v1457_v37, %v1459_v43 }
 0x39a   : > { %1907 = vmatprep.subr.bf16.mxu0 %v1468_v36 }
 0x39b   : > { %1908 = vmatpush1.bf16.msra.mxu0 %v1467_v16 }
 0x39c   : > { %v1500_v1 = vpop.permute.xlu1 %1499  ;;  %v1660_v17 = vpop.permute.xlu0 %1659 }
 0x39d   : > { %v1509_v18 = vsel %vm859_vm6, %v1498_v62, %v1500_v1 }
 0x39e   : > { %1909 = vmatprep.subr.bf16.mxu0 %v1509_v18 }
 0x39f   : > { %1910 = vmatpush1.bf16.msra.mxu0 %v1508_v31 }
 0x3a0   : > { %v1541_v29 = vpop.permute.xlu1 %1540  ;;  %v1664_v60 = vpop.permute.xlu0 %1663 }
 0x3a1   : > { %v1550_v4 = vsel %vm902_vm8, %v1539_v63, %v1541_v29 }
 0x3a2   : > { %1911 = vmatprep.subr.bf16.mxu0 %v1550_v4 }
 0x3a3   : > { %1912 = vmatpush1.bf16.msra.mxu0 %v1549_v3 }
 0x3a4   : > { %v1580_v13 = vpop.permute.xlu1 %1579  ;;  %1913 = vmatprep.subr.bf16.mxu0 %v2914_v44 }
 0x3a5   : > { %v1590_v41 = vsel %vm945_vm10, %v3114_v26, %v1580_v13  ;;  %v1591_v61 = vsel %vm945_vm10, %v1580_v13, %v1582_v9 }
 0x3a6   : > { %1874 = vmatprep.subr.bf16.mxu1 %v1590_v41 }
 0x3a7   : > { %1875 = vmatpush1.bf16.msra.mxu1 %v1589_v52  ;;  %1914 = vmatpush1.bf16.msra.mxu0 %v2907_v14  ;;  %v1671_v14 = vsel %vm1031_vm12, %v3091_v42, %v1660_v17 }
 0x3a8   : > { %v1619_v15 = vpop.permute.xlu1 %1618  ;;  %2091 = vmatprep.subr.msk.bf16.mxu0 %vm945_vm10, %v1582_v9 }
 0x3a9   : > { %v1630_v56 = vsel %vm988_vm11, %v3079_v27, %v1619_v15  ;;  %v1631_v44 = vsel %vm988_vm11, %v1619_v15, %v1621_v0  ;;  %v1703_v27 = vpop.permute.xlu0 %1702 }
 0x3aa   : > { %1876 = vmatprep.subr.bf16.mxu1 %v1631_v44 }
 0x3ab   : > { %1877 = vmatpush1.bf16.msra.mxu1 %v1630_v56  ;;  %1916 = vmatpush1.bf16.msra.mxu0 %v1591_v61 }
 0x3ac   : > { %v1662_v22 = vpop.permute.xlu1 %1661 }
 0x3ad   : > { %v1672_v47 = vsel %vm1031_vm12, %v1660_v17, %v1662_v22  ;;  %v1673_v6 = vsel %vm1031_vm12, %v1662_v22, %v1664_v60 }
 0x3ae   : > { %1878 = vmatprep.subr.bf16.mxu1 %v1672_v47 }
 0x3af   : > { %1879 = vmatpush1.bf16.msra.mxu1 %v1671_v14 }
 0x3b0   : > { %v1623_v19 = vpop.permute.xlu1 %1622 }
 0x3b1   : > { %v1632_v34 = vsel %vm988_vm11, %v1621_v0, %v1623_v19  ;;  %2092 = vmatprep.subr.msk.bf16.mxu0 %vm988_vm11, %v1623_v19 }
 0x3b2   : > { %1918 = vmatpush1.bf16.msra.mxu0 %v1632_v34 }
 0x3b3   : > { %2093 = vmatprep.subr.msk.bf16.mxu0 %vm1031_vm12, %v1664_v60 }
 0x3b4   : > { %v1701_v23 = vpop.permute.xlu1 %1700 }
 0x3b5   : > { %v1712_v53 = vsel %vm1074_vm13, %v3116_v24, %v1701_v23  ;;  %v1713_v42 = vsel %vm1074_vm13, %v1701_v23, %v1703_v27 }
 0x3b6   : > { %1880 = vmatprep.subr.bf16.mxu1 %v1713_v42  ;;  %1920 = vmatpush1.bf16.msra.mxu0 %v1673_v6 }
 0x3b7   : > { %1881 = vmatpush1.bf16.msra.mxu1 %v1712_v53 }
 0x3b8   : > { %v1705_v2 = vpop.permute.xlu1 %1704 }
 0x3b9   : > { %v1714_v48 = vsel %vm1074_vm13, %v1703_v27, %v1705_v2  ;;  %2094 = vmatprep.subr.msk.bf16.mxu0 %vm1074_vm13, %v1705_v2 }
 0x3ba   : > { %1897 = vmatmul.mubr.bf16.vlgmr.msra.gmra.mrb[24].mxu1 %v2912_v11  ;;  %1922 = vmatpush1.bf16.msra.mxu0 %v1714_v48 }
 0x3bd   : > { %1938 = vmatmul.mubr.bf16.vlgmr.msra.gmra.mrb[28].mxu0 %v2912_v11 }
 0x416   : > { %v1775_v5 = vpop.f32.mrb[20].mxu0 }
 0x417   : > { %v1777_v59 = vpop.f32.mrb[21].mxu0 }
 0x418   : > { %v1956_v26 = vcombine.low %v1775_v5, %v1777_v59  ;;  %v1779_v24 = vpop.f32.mrb[22].mxu0 }
 0x419   : > { %v1780_v28 = vpop.f32.mrb[23].mxu0 }
 0x41a   : > { %1966 = vst [vmem:[%s278_s17] sm:$0x77] %v1956_v26 }
 0x445   : > { %v1816_v35 = vpop.f32.mrb[20].mxu1 }
 0x446   : > { %v1818_v40 = vpop.f32.mrb[21].mxu1 }
 0x447   : > { %v1957_v39 = vcombine.low %v1816_v35, %v1818_v40  ;;  %v1820_v30 = vpop.f32.mrb[22].mxu1 }
 0x448   : > { %v1821_v12 = vpop.f32.mrb[23].mxu1 }
 0x449   : > { %1967 = vst [vmem:[%s278_s17 + $0x8] sm:$0x77] %v1957_v39 }
 0x469   : > { %v1857_v54 = vpop.f32.mrb[24].mxu0 }
 0x46a   : > { %v1859_v10 = vpop.f32.mrb[25].mxu0 }
 0x46b   : > { %v1958_v11 = vcombine.low %v1857_v54, %v1859_v10  ;;  %v1861_v46 = vpop.f32.mrb[26].mxu0 }
 0x46c   : > { %v1862_v32 = vpop.f32.mrb[27].mxu0 }
 0x46d   : > { %1968 = vst [vmem:[%s278_s17 + $0x10] sm:$0x77] %v1958_v11 }
 0x48d   : > { %v1898_v45 = vpop.f32.mrb[24].mxu1 }
 0x48e   : > { %v1900_v37 = vpop.f32.mrb[25].mxu1 }
 0x48f   : > { %v1959_v8 = vcombine.low %v1898_v45, %v1900_v37  ;;  %v1902_v20 = vpop.f32.mrb[26].mxu1 }
 0x490   : > { %v1903_v49 = vpop.f32.mrb[27].mxu1  ;;  %v1939_v51 = vpop.f32.mrb[28].mxu0 }
 0x491   : > { %1969 = vst [vmem:[%s278_s17 + $0x18] sm:$0x77] %v1959_v8  ;;  %v1941_v7 = vpop.f32.mrb[29].mxu0 }
 0x492   : > { %v1960_v55 = vcombine.low %v1939_v51, %v1941_v7  ;;  %v1943_v62 = vpop.f32.mrb[30].mxu0 }
 0x493   : > { %v1944_v33 = vpop.f32.mrb[31].mxu0 }
 0x494   : > { %1970 = vst [vmem:[%s278_s17 + $0x20] sm:$0x77] %v1960_v55 }
 0x495 PF: > { %s17_s24 = sadd.s32 1, %s2159_s24  }
 0x496   : > { %p14_p4 = scmp.ge.s32.totalorder %s17_s24, 4  }
 0x498   :  { %16 = sbr.rel (!%p14_p4) target bundleno = 1 (0x1), region = 78 }

</bundles_post_ra>
